<compile_context>
chip_gen: v7x
topology: tpu7x:2x2x1
jax: 0.10.0
libtpu: 0.0.40
codegen_flags: <defaults>
</compile_context>

<pallas_src>
import numpy as np

import jax
import jax.numpy as jnp
from jax.experimental import pallas as pl
from jax.experimental.pallas import tpu as pltpu


# ---------------------------------------------------------------------------
# Static network description (Model_1):  (cout, cin, k, has_bn_relu)
# ---------------------------------------------------------------------------
_BLOCKS = [
    (8, 1, 3, True),     # convblock1
    (16, 8, 3, True),    # convblock2
    (32, 16, 3, True),   # convblock3
    # 2x2 max-pool here
    (8, 32, 1, True),    # convblock4 (fused with the pool)
    (16, 8, 3, True),    # convblock5
    (8, 16, 3, True),    # convblock6
    (10, 8, 7, False),   # convblock7 (no BN / no ReLU)
]

# Per-conv spatial widths for a 28x28 input (the final 7x7 conv implies 28x28).
_IN_W = [28, 26, 24, 11, 11, 9, 7]     # input width of each conv (idx 3 unused)
_OUT_W = [26, 24, 22, 11, 9, 7, 1]     # output width of each conv


# ---------------------------------------------------------------------------
# The single fused Pallas kernel (one image per grid step)
# ---------------------------------------------------------------------------
def _model1_fused_kernel(x_ref,
                         w1_ref, sb1_ref, w2_ref, sb2_ref, w3_ref, sb3_ref,
                         w4_ref, sb4_ref, w5_ref, sb5_ref, w6_ref, sb6_ref,
                         w7_ref,
                         o_ref,
                         a1_ref, a2_ref, a3_ref, a4_ref, a5_ref, a6_ref):
    f32 = jnp.float32

    def conv_rows(src_ref, w_ref, sb_ref, relu):
        # src_ref: (H, W*Cin);  w_ref: (kh, W*Cin, OW*Cout) banded matrices.
        kh = w_ref.shape[0]
        oh = src_ref.shape[0] - kh + 1
        acc = jnp.dot(src_ref[pl.ds(0, oh), :], w_ref[0],
                      preferred_element_type=f32)
        for i in range(1, kh):
            acc = acc + jnp.dot(src_ref[pl.ds(i, oh), :], w_ref[i],
                                preferred_element_type=f32)
        if sb_ref is not None:                        # fused BatchNorm (eval)
            acc = acc * sb_ref[0:1, :] + sb_ref[1:2, :]
        if relu:
            acc = jnp.maximum(acc, 0.0)
        return acc

    # convblock1..3   (Dropout = identity in eval mode)
    a1_ref[...] = conv_rows(x_ref, w1_ref, sb1_ref, True)    # (26, 26*8)
    a2_ref[...] = conv_rows(a1_ref, w2_ref, sb2_ref, True)   # (24, 24*16)
    a3_ref[...] = conv_rows(a2_ref, w3_ref, sb3_ref, True)   # (22, 22*32)

    # pool1 (2x2, stride 2) fused with convblock4 (1x1 conv):
    #   window max via 4 shifted VMEM loads, then the "every 2nd row/column"
    #   down-sampling is folded into the two matmuls below.
    mwin = jnp.maximum(a3_ref[pl.ds(0, 21), pl.ds(0, 672)],
                       a3_ref[pl.ds(1, 21), pl.ds(0, 672)])
    mwin = jnp.maximum(mwin, a3_ref[pl.ds(0, 21), pl.ds(32, 672)])
    mwin = jnp.maximum(mwin, a3_ref[pl.ds(1, 21), pl.ds(32, 672)])   # (21, 672)

    rr = jax.lax.broadcasted_iota(jnp.int32, (11, 21), 0)
    cc = jax.lax.broadcasted_iota(jnp.int32, (11, 21), 1)
    row_sel = (cc == 2 * rr).astype(f32)                             # (11, 21)

    pooled = jnp.dot(row_sel, mwin, preferred_element_type=f32)      # (11, 672)
    y4 = jnp.dot(pooled, w4_ref[...], preferred_element_type=f32)    # (11, 88)
    y4 = jnp.maximum(y4 * sb4_ref[0:1, :] + sb4_ref[1:2, :], 0.0)
    a4_ref[...] = y4

    # convblock5..7
    a5_ref[...] = conv_rows(a4_ref, w5_ref, sb5_ref, True)   # (9, 9*16)
    a6_ref[...] = conv_rows(a5_ref, w6_ref, sb6_ref, True)   # (7, 7*8)
    logits = conv_rows(a6_ref, w7_ref, None, False)          # (1, 10)

    # log_softmax (numerically stable), fused in the same kernel
    m = jnp.max(logits, axis=-1, keepdims=True)
    s = logits - m
    lse = jnp.log(jnp.sum(jnp.exp(s), axis=-1, keepdims=True))
    o_ref[...] = s - lse


def _const_index_map(ndim):
    return lambda i: (0,) * ndim


@jax.jit
def model_forward(x_nchw, fused_params):
    """Model_1.forward (eval mode).  x_nchw: (N, 1, 28, 28) float32."""
    n = x_nchw.shape[0]
    x2d = x_nchw[:, 0, :, :]                          # (N, 28, 28)

    in_specs = [pl.BlockSpec((None, 28, 28), lambda i: (i, 0, 0))]
    in_specs += [pl.BlockSpec(p.shape, _const_index_map(p.ndim))
                 for p in fused_params]

    scratch = [
        pltpu.VMEM((26, 26 * 8), jnp.float32),    # a1
        pltpu.VMEM((24, 24 * 16), jnp.float32),   # a2
        pltpu.VMEM((22, 22 * 32), jnp.float32),   # a3
        pltpu.VMEM((11, 11 * 8), jnp.float32),    # a4
        pltpu.VMEM((9, 9 * 16), jnp.float32),     # a5
        pltpu.VMEM((7, 7 * 8), jnp.float32),      # a6
    ]

    out = pl.pallas_call(
        _model1_fused_kernel,
        out_shape=jax.ShapeDtypeStruct((n, 1, 10), jnp.float32),
        grid=(n,),
        in_specs=in_specs,
        out_specs=pl.BlockSpec((None, 1, 10), lambda i: (i, 0, 0)),
        scratch_shapes=scratch,
        compiler_params=pltpu.CompilerParams(
            dimension_semantics=("parallel",),        # v7x: 2 TCs split batch
            vmem_limit_bytes=32 * 1024 * 1024,
        ),
    )(x2d, *fused_params)
    return out.reshape(n, 10)


# ---------------------------------------------------------------------------
# Parameter construction & one-time weight preprocessing
# ---------------------------------------------------------------------------
def make_raw_params(key):
    """Random Conv/BN parameters; BN folded to eval-mode scale/bias."""
    params = []
    for cout, cin, k, has_bn in _BLOCKS:
        key, k_w, k_g, k_b, k_m = jax.random.split(key, 5)
        w = jax.random.normal(k_w, (cout, cin, k, k), jnp.float32) * 0.1
        if has_bn:
            gamma = 1.0 + 0.1 * jax.random.normal(k_g, (cout,), jnp.float32)
            beta = 0.1 * jax.random.normal(k_b, (cout,), jnp.float32)
            mean = 0.1 * jax.random.normal(k_m, (cout,), jnp.float32)
            var = jnp.ones((cout,), jnp.float32)
            scale = gamma / jnp.sqrt(var + 1e-5)
            bias = beta - mean * scale
        else:
            scale, bias = None, None
        params.append((w, scale, bias))
    return params


def _banded_stack(w, w_in):
    """(cout,cin,kh,kw) -> (kh, w_in*cin, ow*cout) banded row-matmul weights."""
    cout, cin, kh, kw = w.shape
    ow = w_in - kw + 1
    wt = np.transpose(w, (2, 3, 1, 0))                # (kh, kw, cin, cout)
    m = np.zeros((kh, w_in, cin, ow, cout), np.float32)
    for i in range(kh):
        for j in range(kw):
            for x in range(ow):
                m[i, x + j, :, x, :] = wt[i, j]
    return m.reshape(kh, w_in * cin, ow * cout)


def _pool_conv4_matrix(w):
    """convblock4 (1x1, 32->8) weight fused with the pool's column
    down-sampling: shape (21*32, 11*8)."""
    cout, cin = w.shape[0], w.shape[1]
    wt = w[:, :, 0, 0].T                              # (cin, cout)
    m = np.zeros((21, cin, 11, cout), np.float32)
    for q in range(11):
        m[2 * q, :, q, :] = wt
    return m.reshape(21 * cin, 11 * cout)


def build_fused_params(raw_params):
    """Fold BN and build banded / pool-fused weight matrices (done once)."""
    out = []
    for idx, (w, scale, bias) in enumerate(raw_params):
        w_np = np.asarray(w, np.float32)
        if idx == 3:
            out.append(jnp.asarray(_pool_conv4_matrix(w_np)))
        else:
            out.append(jnp.asarray(_banded_stack(w_np, _IN_W[idx])))
        if scale is not None:
            sb = np.stack(
                [np.tile(np.asarray(scale, np.float32), _OUT_W[idx]),
                 np.tile(np.asarray(bias, np.float32), _OUT_W[idx])]
            ).astype(np.float32)
            out.append(jnp.asarray(sb))
    return tuple(out)


# ---------------------------------------------------------------------------
# Pure-JAX reference (for a correctness check only)
# ---------------------------------------------------------------------------
def reference_forward(x_nchw, raw_params):
    dn = ('NCHW', 'OIHW', 'NCHW')
    x = x_nchw
    for idx, (w, scale, bias) in enumerate(raw_params):
        x = jax.lax.conv_general_dilated(x, w, (1, 1), 'VALID',
                                         dimension_numbers=dn)
        if scale is not None:
            x = x * scale[None, :, None, None] + bias[None, :, None, None]
            x = jnp.maximum(x, 0.0)
        if idx == 2:   # pool1 after convblock3
            x = jax.lax.reduce_window(x, -jnp.inf, jax.lax.max,
                                      (1, 1, 2, 2), (1, 1, 2, 2), 'VALID')
    x = x.reshape(-1, 10)
    return jax.nn.log_softmax(x, axis=-1)


if __name__ == "__main__":
    key = jax.random.PRNGKey(0)
    k_x, k_p = jax.random.split(key)

    # MNIST-style input: the final 7x7 conv implies a 28x28 spatial input.
    x = jax.random.normal(k_x, (2, 1, 28, 28), jnp.float32)    # NCHW

    raw = make_raw_params(k_p)
    fused = build_fused_params(raw)

    out = jax.block_until_ready(model_forward(x, fused))
    assert out.shape == (2, 10), out.shape

    # Correctness vs. pure-JAX reference (loose tol: MXU default precision).
    ref = jax.block_until_ready(reference_forward(x, raw))
    np.testing.assert_allclose(np.asarray(out), np.asarray(ref),
                               rtol=5e-2, atol=5e-2)
    # log-softmax rows must sum (in prob space) to ~1
    assert bool(jnp.all(jnp.abs(jnp.sum(jnp.exp(out), axis=-1) - 1.0) < 1e-3))
    print("KERNEL_OK")
</pallas_src>

<mosaic_0001>
module attributes {stable_mosaic.version = 11 : i64} {
  func.func @_model1_fused_kernel(%arg0: i32, %arg1: memref<1x28x28xf32, #tpu.memory_space<vmem>>, %arg2: memref<3x28x208xf32, #tpu.memory_space<vmem>>, %arg3: memref<2x208xf32, #tpu.memory_space<vmem>>, %arg4: memref<3x208x384xf32, #tpu.memory_space<vmem>>, %arg5: memref<2x384xf32, #tpu.memory_space<vmem>>, %arg6: memref<3x384x704xf32, #tpu.memory_space<vmem>>, %arg7: memref<2x704xf32, #tpu.memory_space<vmem>>, %arg8: memref<672x88xf32, #tpu.memory_space<vmem>>, %arg9: memref<2x88xf32, #tpu.memory_space<vmem>>, %arg10: memref<3x88x144xf32, #tpu.memory_space<vmem>>, %arg11: memref<2x144xf32, #tpu.memory_space<vmem>>, %arg12: memref<3x144x56xf32, #tpu.memory_space<vmem>>, %arg13: memref<2x56xf32, #tpu.memory_space<vmem>>, %arg14: memref<7x56x10xf32, #tpu.memory_space<vmem>>, %arg15: memref<1x1x10xf32, #tpu.memory_space<vmem>>, %arg16: memref<26x208xf32, #tpu.memory_space<vmem>>, %arg17: memref<24x384xf32, #tpu.memory_space<vmem>>, %arg18: memref<22x704xf32, #tpu.memory_space<vmem>>, %arg19: memref<11x88xf32, #tpu.memory_space<vmem>>, %arg20: memref<9x144xf32, #tpu.memory_space<vmem>>, %arg21: memref<7x56xf32, #tpu.memory_space<vmem>>) attributes {dimension_semantics = [#tpu.dimension_semantics<parallel>], iteration_bounds = array<i64: 2>, scalar_prefetch = 0 : i64, scratch_operands = 6 : i64, tpu.core_type = #tpu.core_type<tc>, window_params = [{transform_indices = @transform_0, window_bounds = array<i64: 1, 28, 28>}, {pipeline_mode = #tpu.pipeline_mode<synchronous>, transform_indices = @transform_1, window_bounds = array<i64: 3, 28, 208>}, {pipeline_mode = #tpu.pipeline_mode<synchronous>, transform_indices = @transform_2, window_bounds = array<i64: 2, 208>}, {pipeline_mode = #tpu.pipeline_mode<synchronous>, transform_indices = @transform_3, window_bounds = array<i64: 3, 208, 384>}, {pipeline_mode = #tpu.pipeline_mode<synchronous>, transform_indices = @transform_4, window_bounds = array<i64: 2, 384>}, {pipeline_mode = #tpu.pipeline_mode<synchronous>, transform_indices = @transform_5, window_bounds = array<i64: 3, 384, 704>}, {pipeline_mode = #tpu.pipeline_mode<synchronous>, transform_indices = @transform_6, window_bounds = array<i64: 2, 704>}, {pipeline_mode = #tpu.pipeline_mode<synchronous>, transform_indices = @transform_7, window_bounds = array<i64: 672, 88>}, {pipeline_mode = #tpu.pipeline_mode<synchronous>, transform_indices = @transform_8, window_bounds = array<i64: 2, 88>}, {pipeline_mode = #tpu.pipeline_mode<synchronous>, transform_indices = @transform_9, window_bounds = array<i64: 3, 88, 144>}, {pipeline_mode = #tpu.pipeline_mode<synchronous>, transform_indices = @transform_10, window_bounds = array<i64: 2, 144>}, {pipeline_mode = #tpu.pipeline_mode<synchronous>, transform_indices = @transform_11, window_bounds = array<i64: 3, 144, 56>}, {pipeline_mode = #tpu.pipeline_mode<synchronous>, transform_indices = @transform_12, window_bounds = array<i64: 2, 56>}, {pipeline_mode = #tpu.pipeline_mode<synchronous>, transform_indices = @transform_13, window_bounds = array<i64: 7, 56, 10>}, {transform_indices = @transform_14, window_bounds = array<i64: 1, 1, 10>}]} {
    %c0 = arith.constant 0 : index
    %c0_0 = arith.constant 0 : index
    %c0_1 = arith.constant 0 : index
    %0 = vector.load %arg1[%c0, %c0_0, %c0_1] : memref<1x28x28xf32, #tpu.memory_space<vmem>>, vector<1x26x28xf32>
    %1 = vector.shape_cast %0 : vector<1x26x28xf32> to vector<26x28xf32>
    %c0_2 = arith.constant 0 : index
    %c0_3 = arith.constant 0 : index
    %c0_4 = arith.constant 0 : index
    %2 = vector.load %arg2[%c0_2, %c0_3, %c0_4] : memref<3x28x208xf32, #tpu.memory_space<vmem>>, vector<1x28x208xf32>
    %3 = vector.shape_cast %2 : vector<1x28x208xf32> to vector<28x208xf32>
    %cst = arith.constant dense<0.000000e+00> : vector<26x208xf32>
    %4 = tpu.matmul %1, %3, %cst {dimension_numbers = #tpu.dot_dimension_numbers<[1], [0], [0], [1], [0, 0, 1, 1], [], []>} : vector<26x28xf32>, vector<28x208xf32>, vector<26x208xf32> -> vector<26x208xf32>
    %c0_5 = arith.constant 0 : index
    %c1 = arith.constant 1 : index
    %c0_6 = arith.constant 0 : index
    %5 = vector.load %arg1[%c0_5, %c1, %c0_6] : memref<1x28x28xf32, #tpu.memory_space<vmem>>, vector<1x26x28xf32>
    %6 = vector.shape_cast %5 : vector<1x26x28xf32> to vector<26x28xf32>
    %c1_7 = arith.constant 1 : index
    %c0_8 = arith.constant 0 : index
    %c0_9 = arith.constant 0 : index
    %7 = vector.load %arg2[%c1_7, %c0_8, %c0_9] : memref<3x28x208xf32, #tpu.memory_space<vmem>>, vector<1x28x208xf32>
    %8 = vector.shape_cast %7 : vector<1x28x208xf32> to vector<28x208xf32>
    %cst_10 = arith.constant dense<0.000000e+00> : vector<26x208xf32>
    %9 = tpu.matmul %6, %8, %cst_10 {dimension_numbers = #tpu.dot_dimension_numbers<[1], [0], [0], [1], [0, 0, 1, 1], [], []>} : vector<26x28xf32>, vector<28x208xf32>, vector<26x208xf32> -> vector<26x208xf32>
    %10 = arith.addf %4, %9 : vector<26x208xf32>
    %c0_11 = arith.constant 0 : index
    %c2 = arith.constant 2 : index
    %c0_12 = arith.constant 0 : index
    %11 = vector.load %arg1[%c0_11, %c2, %c0_12] : memref<1x28x28xf32, #tpu.memory_space<vmem>>, vector<1x26x28xf32>
    %12 = vector.shape_cast %11 : vector<1x26x28xf32> to vector<26x28xf32>
    %c2_13 = arith.constant 2 : index
    %c0_14 = arith.constant 0 : index
    %c0_15 = arith.constant 0 : index
    %13 = vector.load %arg2[%c2_13, %c0_14, %c0_15] : memref<3x28x208xf32, #tpu.memory_space<vmem>>, vector<1x28x208xf32>
    %14 = vector.shape_cast %13 : vector<1x28x208xf32> to vector<28x208xf32>
    %cst_16 = arith.constant dense<0.000000e+00> : vector<26x208xf32>
    %15 = tpu.matmul %12, %14, %cst_16 {dimension_numbers = #tpu.dot_dimension_numbers<[1], [0], [0], [1], [0, 0, 1, 1], [], []>} : vector<26x28xf32>, vector<28x208xf32>, vector<26x208xf32> -> vector<26x208xf32>
    %16 = arith.addf %10, %15 : vector<26x208xf32>
    %c0_17 = arith.constant 0 : index
    %c0_18 = arith.constant 0 : index
    %17 = vector.load %arg3[%c0_17, %c0_18] : memref<2x208xf32, #tpu.memory_space<vmem>>, vector<1x208xf32>
    %18 = vector.broadcast %17 : vector<1x208xf32> to vector<26x208xf32>
    %19 = arith.mulf %16, %18 : vector<26x208xf32>
    %c1_19 = arith.constant 1 : index
    %c0_20 = arith.constant 0 : index
    %20 = vector.load %arg3[%c1_19, %c0_20] : memref<2x208xf32, #tpu.memory_space<vmem>>, vector<1x208xf32>
    %21 = vector.broadcast %20 : vector<1x208xf32> to vector<26x208xf32>
    %22 = arith.addf %19, %21 : vector<26x208xf32>
    %cst_21 = arith.constant 0.000000e+00 : f32
    %23 = vector.broadcast %cst_21 : f32 to vector<26x208xf32>
    %24 = arith.maximumf %22, %23 : vector<26x208xf32>
    %c0_22 = arith.constant 0 : index
    %c0_23 = arith.constant 0 : index
    %25 = vector.load %arg16[%c0_22, %c0_23] : memref<26x208xf32, #tpu.memory_space<vmem>>, vector<26x208xf32>
    tpu.vector_store %arg16[%c0_22, %c0_23], %24 {strides = array<i32>} : memref<26x208xf32, #tpu.memory_space<vmem>>, vector<26x208xf32>,
    %c0_24 = arith.constant 0 : index
    %c0_25 = arith.constant 0 : index
    %26 = vector.load %arg16[%c0_24, %c0_25] : memref<26x208xf32, #tpu.memory_space<vmem>>, vector<24x208xf32>
    %c0_26 = arith.constant 0 : index
    %c0_27 = arith.constant 0 : index
    %c0_28 = arith.constant 0 : index
    %27 = vector.load %arg4[%c0_26, %c0_27, %c0_28] : memref<3x208x384xf32, #tpu.memory_space<vmem>>, vector<1x208x384xf32>
    %28 = vector.shape_cast %27 : vector<1x208x384xf32> to vector<208x384xf32>
    %cst_29 = arith.constant dense<0.000000e+00> : vector<24x384xf32>
    %29 = tpu.matmul %26, %28, %cst_29 {dimension_numbers = #tpu.dot_dimension_numbers<[1], [0], [0], [1], [0, 0, 1, 1], [], []>} : vector<24x208xf32>, vector<208x384xf32>, vector<24x384xf32> -> vector<24x384xf32>
    %c1_30 = arith.constant 1 : index
    %c0_31 = arith.constant 0 : index
    %30 = vector.load %arg16[%c1_30, %c0_31] : memref<26x208xf32, #tpu.memory_space<vmem>>, vector<24x208xf32>
    %c1_32 = arith.constant 1 : index
    %c0_33 = arith.constant 0 : index
    %c0_34 = arith.constant 0 : index
    %31 = vector.load %arg4[%c1_32, %c0_33, %c0_34] : memref<3x208x384xf32, #tpu.memory_space<vmem>>, vector<1x208x384xf32>
    %32 = vector.shape_cast %31 : vector<1x208x384xf32> to vector<208x384xf32>
    %cst_35 = arith.constant dense<0.000000e+00> : vector<24x384xf32>
    %33 = tpu.matmul %30, %32, %cst_35 {dimension_numbers = #tpu.dot_dimension_numbers<[1], [0], [0], [1], [0, 0, 1, 1], [], []>} : vector<24x208xf32>, vector<208x384xf32>, vector<24x384xf32> -> vector<24x384xf32>
    %34 = arith.addf %29, %33 : vector<24x384xf32>
    %c2_36 = arith.constant 2 : index
    %c0_37 = arith.constant 0 : index
    %35 = vector.load %arg16[%c2_36, %c0_37] : memref<26x208xf32, #tpu.memory_space<vmem>>, vector<24x208xf32>
    %c2_38 = arith.constant 2 : index
    %c0_39 = arith.constant 0 : index
    %c0_40 = arith.constant 0 : index
    %36 = vector.load %arg4[%c2_38, %c0_39, %c0_40] : memref<3x208x384xf32, #tpu.memory_space<vmem>>, vector<1x208x384xf32>
    %37 = vector.shape_cast %36 : vector<1x208x384xf32> to vector<208x384xf32>
    %cst_41 = arith.constant dense<0.000000e+00> : vector<24x384xf32>
    %38 = tpu.matmul %35, %37, %cst_41 {dimension_numbers = #tpu.dot_dimension_numbers<[1], [0], [0], [1], [0, 0, 1, 1], [], []>} : vector<24x208xf32>, vector<208x384xf32>, vector<24x384xf32> -> vector<24x384xf32>
    %39 = arith.addf %34, %38 : vector<24x384xf32>
    %c0_42 = arith.constant 0 : index
    %c0_43 = arith.constant 0 : index
    %40 = vector.load %arg5[%c0_42, %c0_43] : memref<2x384xf32, #tpu.memory_space<vmem>>, vector<1x384xf32>
    %41 = vector.broadcast %40 : vector<1x384xf32> to vector<24x384xf32>
    %42 = arith.mulf %39, %41 : vector<24x384xf32>
    %c1_44 = arith.constant 1 : index
    %c0_45 = arith.constant 0 : index
    %43 = vector.load %arg5[%c1_44, %c0_45] : memref<2x384xf32, #tpu.memory_space<vmem>>, vector<1x384xf32>
    %44 = vector.broadcast %43 : vector<1x384xf32> to vector<24x384xf32>
    %45 = arith.addf %42, %44 : vector<24x384xf32>
    %cst_46 = arith.constant 0.000000e+00 : f32
    %46 = vector.broadcast %cst_46 : f32 to vector<24x384xf32>
    %47 = arith.maximumf %45, %46 : vector<24x384xf32>
    %c0_47 = arith.constant 0 : index
    %c0_48 = arith.constant 0 : index
    %48 = vector.load %arg17[%c0_47, %c0_48] : memref<24x384xf32, #tpu.memory_space<vmem>>, vector<24x384xf32>
    tpu.vector_store %arg17[%c0_47, %c0_48], %47 {strides = array<i32>} : memref<24x384xf32, #tpu.memory_space<vmem>>, vector<24x384xf32>,
    %c0_49 = arith.constant 0 : index
    %c0_50 = arith.constant 0 : index
    %49 = vector.load %arg17[%c0_49, %c0_50] : memref<24x384xf32, #tpu.memory_space<vmem>>, vector<22x384xf32>
    %c0_51 = arith.constant 0 : index
    %c0_52 = arith.constant 0 : index
    %c0_53 = arith.constant 0 : index
    %50 = vector.load %arg6[%c0_51, %c0_52, %c0_53] : memref<3x384x704xf32, #tpu.memory_space<vmem>>, vector<1x384x704xf32>
    %51 = vector.shape_cast %50 : vector<1x384x704xf32> to vector<384x704xf32>
    %cst_54 = arith.constant dense<0.000000e+00> : vector<22x704xf32>
    %52 = tpu.matmul %49, %51, %cst_54 {dimension_numbers = #tpu.dot_dimension_numbers<[1], [0], [0], [1], [0, 0, 1, 1], [], []>} : vector<22x384xf32>, vector<384x704xf32>, vector<22x704xf32> -> vector<22x704xf32>
    %c1_55 = arith.constant 1 : index
    %c0_56 = arith.constant 0 : index
    %53 = vector.load %arg17[%c1_55, %c0_56] : memref<24x384xf32, #tpu.memory_space<vmem>>, vector<22x384xf32>
    %c1_57 = arith.constant 1 : index
    %c0_58 = arith.constant 0 : index
    %c0_59 = arith.constant 0 : index
    %54 = vector.load %arg6[%c1_57, %c0_58, %c0_59] : memref<3x384x704xf32, #tpu.memory_space<vmem>>, vector<1x384x704xf32>
    %55 = vector.shape_cast %54 : vector<1x384x704xf32> to vector<384x704xf32>
    %cst_60 = arith.constant dense<0.000000e+00> : vector<22x704xf32>
    %56 = tpu.matmul %53, %55, %cst_60 {dimension_numbers = #tpu.dot_dimension_numbers<[1], [0], [0], [1], [0, 0, 1, 1], [], []>} : vector<22x384xf32>, vector<384x704xf32>, vector<22x704xf32> -> vector<22x704xf32>
    %57 = arith.addf %52, %56 : vector<22x704xf32>
    %c2_61 = arith.constant 2 : index
    %c0_62 = arith.constant 0 : index
    %58 = vector.load %arg17[%c2_61, %c0_62] : memref<24x384xf32, #tpu.memory_space<vmem>>, vector<22x384xf32>
    %c2_63 = arith.constant 2 : index
    %c0_64 = arith.constant 0 : index
    %c0_65 = arith.constant 0 : index
    %59 = vector.load %arg6[%c2_63, %c0_64, %c0_65] : memref<3x384x704xf32, #tpu.memory_space<vmem>>, vector<1x384x704xf32>
    %60 = vector.shape_cast %59 : vector<1x384x704xf32> to vector<384x704xf32>
    %cst_66 = arith.constant dense<0.000000e+00> : vector<22x704xf32>
    %61 = tpu.matmul %58, %60, %cst_66 {dimension_numbers = #tpu.dot_dimension_numbers<[1], [0], [0], [1], [0, 0, 1, 1], [], []>} : vector<22x384xf32>, vector<384x704xf32>, vector<22x704xf32> -> vector<22x704xf32>
    %62 = arith.addf %57, %61 : vector<22x704xf32>
    %c0_67 = arith.constant 0 : index
    %c0_68 = arith.constant 0 : index
    %63 = vector.load %arg7[%c0_67, %c0_68] : memref<2x704xf32, #tpu.memory_space<vmem>>, vector<1x704xf32>
    %64 = vector.broadcast %63 : vector<1x704xf32> to vector<22x704xf32>
    %65 = arith.mulf %62, %64 : vector<22x704xf32>
    %c1_69 = arith.constant 1 : index
    %c0_70 = arith.constant 0 : index
    %66 = vector.load %arg7[%c1_69, %c0_70] : memref<2x704xf32, #tpu.memory_space<vmem>>, vector<1x704xf32>
    %67 = vector.broadcast %66 : vector<1x704xf32> to vector<22x704xf32>
    %68 = arith.addf %65, %67 : vector<22x704xf32>
    %cst_71 = arith.constant 0.000000e+00 : f32
    %69 = vector.broadcast %cst_71 : f32 to vector<22x704xf32>
    %70 = arith.maximumf %68, %69 : vector<22x704xf32>
    %c0_72 = arith.constant 0 : index
    %c0_73 = arith.constant 0 : index
    %71 = vector.load %arg18[%c0_72, %c0_73] : memref<22x704xf32, #tpu.memory_space<vmem>>, vector<22x704xf32>
    tpu.vector_store %arg18[%c0_72, %c0_73], %70 {strides = array<i32>} : memref<22x704xf32, #tpu.memory_space<vmem>>, vector<22x704xf32>,
    %c0_74 = arith.constant 0 : index
    %c0_75 = arith.constant 0 : index
    %72 = vector.load %arg18[%c0_74, %c0_75] : memref<22x704xf32, #tpu.memory_space<vmem>>, vector<21x672xf32>
    %c1_76 = arith.constant 1 : index
    %c0_77 = arith.constant 0 : index
    %73 = vector.load %arg18[%c1_76, %c0_77] : memref<22x704xf32, #tpu.memory_space<vmem>>, vector<21x672xf32>
    %74 = arith.maximumf %72, %73 : vector<21x672xf32>
    %c0_78 = arith.constant 0 : index
    %c32 = arith.constant 32 : index
    %75 = vector.load %arg18[%c0_78, %c32] : memref<22x704xf32, #tpu.memory_space<vmem>>, vector<21x672xf32>
    %76 = arith.maximumf %74, %75 : vector<21x672xf32>
    %c1_79 = arith.constant 1 : index
    %c32_80 = arith.constant 32 : index
    %77 = vector.load %arg18[%c1_79, %c32_80] : memref<22x704xf32, #tpu.memory_space<vmem>>, vector<21x672xf32>
    %78 = arith.maximumf %76, %77 : vector<21x672xf32>
    %79 = tpu.iota {dimensions = array<i32: 0>} : vector<11x21xi32>
    %80 = tpu.iota {dimensions = array<i32: 1>} : vector<11x21xi32>
    %c2_i32 = arith.constant 2 : i32
    %81 = vector.broadcast %c2_i32 : i32 to vector<11x21xi32>
    %82 = arith.muli %81, %79 : vector<11x21xi32>
    %83 = arith.cmpi eq, %80, %82 : vector<11x21xi32>
    %84 = arith.extui %83 : vector<11x21xi1> to vector<11x21xi32>
    %85 = arith.sitofp %84 : vector<11x21xi32> to vector<11x21xf32>
    %cst_81 = arith.constant dense<0.000000e+00> : vector<11x672xf32>
    %86 = tpu.matmul %85, %78, %cst_81 {dimension_numbers = #tpu.dot_dimension_numbers<[1], [0], [0], [1], [0, 0, 1, 1], [], []>} : vector<11x21xf32>, vector<21x672xf32>, vector<11x672xf32> -> vector<11x672xf32>
    %c0_82 = arith.constant 0 : index
    %c0_83 = arith.constant 0 : index
    %87 = vector.load %arg8[%c0_82, %c0_83] : memref<672x88xf32, #tpu.memory_space<vmem>>, vector<672x88xf32>
    %cst_84 = arith.constant dense<0.000000e+00> : vector<11x88xf32>
    %88 = tpu.matmul %86, %87, %cst_84 {dimension_numbers = #tpu.dot_dimension_numbers<[1], [0], [0], [1], [0, 0, 1, 1], [], []>} : vector<11x672xf32>, vector<672x88xf32>, vector<11x88xf32> -> vector<11x88xf32>
    %c0_85 = arith.constant 0 : index
    %c0_86 = arith.constant 0 : index
    %89 = vector.load %arg9[%c0_85, %c0_86] : memref<2x88xf32, #tpu.memory_space<vmem>>, vector<1x88xf32>
    %90 = vector.broadcast %89 : vector<1x88xf32> to vector<11x88xf32>
    %91 = arith.mulf %88, %90 : vector<11x88xf32>
    %c1_87 = arith.constant 1 : index
    %c0_88 = arith.constant 0 : index
    %92 = vector.load %arg9[%c1_87, %c0_88] : memref<2x88xf32, #tpu.memory_space<vmem>>, vector<1x88xf32>
    %93 = vector.broadcast %92 : vector<1x88xf32> to vector<11x88xf32>
    %94 = arith.addf %91, %93 : vector<11x88xf32>
    %cst_89 = arith.constant 0.000000e+00 : f32
    %95 = vector.broadcast %cst_89 : f32 to vector<11x88xf32>
    %96 = arith.maximumf %94, %95 : vector<11x88xf32>
    %c0_90 = arith.constant 0 : index
    %c0_91 = arith.constant 0 : index
    %97 = vector.load %arg19[%c0_90, %c0_91] : memref<11x88xf32, #tpu.memory_space<vmem>>, vector<11x88xf32>
    tpu.vector_store %arg19[%c0_90, %c0_91], %96 {strides = array<i32>} : memref<11x88xf32, #tpu.memory_space<vmem>>, vector<11x88xf32>,
    %c0_92 = arith.constant 0 : index
    %c0_93 = arith.constant 0 : index
    %98 = vector.load %arg19[%c0_92, %c0_93] : memref<11x88xf32, #tpu.memory_space<vmem>>, vector<9x88xf32>
    %c0_94 = arith.constant 0 : index
    %c0_95 = arith.constant 0 : index
    %c0_96 = arith.constant 0 : index
    %99 = vector.load %arg10[%c0_94, %c0_95, %c0_96] : memref<3x88x144xf32, #tpu.memory_space<vmem>>, vector<1x88x144xf32>
    %100 = vector.shape_cast %99 : vector<1x88x144xf32> to vector<88x144xf32>
    %cst_97 = arith.constant dense<0.000000e+00> : vector<9x144xf32>
    %101 = tpu.matmul %98, %100, %cst_97 {dimension_numbers = #tpu.dot_dimension_numbers<[1], [0], [0], [1], [0, 0, 1, 1], [], []>} : vector<9x88xf32>, vector<88x144xf32>, vector<9x144xf32> -> vector<9x144xf32>
    %c1_98 = arith.constant 1 : index
    %c0_99 = arith.constant 0 : index
    %102 = vector.load %arg19[%c1_98, %c0_99] : memref<11x88xf32, #tpu.memory_space<vmem>>, vector<9x88xf32>
    %c1_100 = arith.constant 1 : index
    %c0_101 = arith.constant 0 : index
    %c0_102 = arith.constant 0 : index
    %103 = vector.load %arg10[%c1_100, %c0_101, %c0_102] : memref<3x88x144xf32, #tpu.memory_space<vmem>>, vector<1x88x144xf32>
    %104 = vector.shape_cast %103 : vector<1x88x144xf32> to vector<88x144xf32>
    %cst_103 = arith.constant dense<0.000000e+00> : vector<9x144xf32>
    %105 = tpu.matmul %102, %104, %cst_103 {dimension_numbers = #tpu.dot_dimension_numbers<[1], [0], [0], [1], [0, 0, 1, 1], [], []>} : vector<9x88xf32>, vector<88x144xf32>, vector<9x144xf32> -> vector<9x144xf32>
    %106 = arith.addf %101, %105 : vector<9x144xf32>
    %c2_104 = arith.constant 2 : index
    %c0_105 = arith.constant 0 : index
    %107 = vector.load %arg19[%c2_104, %c0_105] : memref<11x88xf32, #tpu.memory_space<vmem>>, vector<9x88xf32>
    %c2_106 = arith.constant 2 : index
    %c0_107 = arith.constant 0 : index
    %c0_108 = arith.constant 0 : index
    %108 = vector.load %arg10[%c2_106, %c0_107, %c0_108] : memref<3x88x144xf32, #tpu.memory_space<vmem>>, vector<1x88x144xf32>
    %109 = vector.shape_cast %108 : vector<1x88x144xf32> to vector<88x144xf32>
    %cst_109 = arith.constant dense<0.000000e+00> : vector<9x144xf32>
    %110 = tpu.matmul %107, %109, %cst_109 {dimension_numbers = #tpu.dot_dimension_numbers<[1], [0], [0], [1], [0, 0, 1, 1], [], []>} : vector<9x88xf32>, vector<88x144xf32>, vector<9x144xf32> -> vector<9x144xf32>
    %111 = arith.addf %106, %110 : vector<9x144xf32>
    %c0_110 = arith.constant 0 : index
    %c0_111 = arith.constant 0 : index
    %112 = vector.load %arg11[%c0_110, %c0_111] : memref<2x144xf32, #tpu.memory_space<vmem>>, vector<1x144xf32>
    %113 = vector.broadcast %112 : vector<1x144xf32> to vector<9x144xf32>
    %114 = arith.mulf %111, %113 : vector<9x144xf32>
    %c1_112 = arith.constant 1 : index
    %c0_113 = arith.constant 0 : index
    %115 = vector.load %arg11[%c1_112, %c0_113] : memref<2x144xf32, #tpu.memory_space<vmem>>, vector<1x144xf32>
    %116 = vector.broadcast %115 : vector<1x144xf32> to vector<9x144xf32>
    %117 = arith.addf %114, %116 : vector<9x144xf32>
    %cst_114 = arith.constant 0.000000e+00 : f32
    %118 = vector.broadcast %cst_114 : f32 to vector<9x144xf32>
    %119 = arith.maximumf %117, %118 : vector<9x144xf32>
    %c0_115 = arith.constant 0 : index
    %c0_116 = arith.constant 0 : index
    %120 = vector.load %arg20[%c0_115, %c0_116] : memref<9x144xf32, #tpu.memory_space<vmem>>, vector<9x144xf32>
    tpu.vector_store %arg20[%c0_115, %c0_116], %119 {strides = array<i32>} : memref<9x144xf32, #tpu.memory_space<vmem>>, vector<9x144xf32>,
    %c0_117 = arith.constant 0 : index
    %c0_118 = arith.constant 0 : index
    %121 = vector.load %arg20[%c0_117, %c0_118] : memref<9x144xf32, #tpu.memory_space<vmem>>, vector<7x144xf32>
    %c0_119 = arith.constant 0 : index
    %c0_120 = arith.constant 0 : index
    %c0_121 = arith.constant 0 : index
    %122 = vector.load %arg12[%c0_119, %c0_120, %c0_121] : memref<3x144x56xf32, #tpu.memory_space<vmem>>, vector<1x144x56xf32>
    %123 = vector.shape_cast %122 : vector<1x144x56xf32> to vector<144x56xf32>
    %cst_122 = arith.constant dense<0.000000e+00> : vector<7x56xf32>
    %124 = tpu.matmul %121, %123, %cst_122 {dimension_numbers = #tpu.dot_dimension_numbers<[1], [0], [0], [1], [0, 0, 1, 1], [], []>} : vector<7x144xf32>, vector<144x56xf32>, vector<7x56xf32> -> vector<7x56xf32>
    %c1_123 = arith.constant 1 : index
    %c0_124 = arith.constant 0 : index
    %125 = vector.load %arg20[%c1_123, %c0_124] : memref<9x144xf32, #tpu.memory_space<vmem>>, vector<7x144xf32>
    %c1_125 = arith.constant 1 : index
    %c0_126 = arith.constant 0 : index
    %c0_127 = arith.constant 0 : index
    %126 = vector.load %arg12[%c1_125, %c0_126, %c0_127] : memref<3x144x56xf32, #tpu.memory_space<vmem>>, vector<1x144x56xf32>
    %127 = vector.shape_cast %126 : vector<1x144x56xf32> to vector<144x56xf32>
    %cst_128 = arith.constant dense<0.000000e+00> : vector<7x56xf32>
    %128 = tpu.matmul %125, %127, %cst_128 {dimension_numbers = #tpu.dot_dimension_numbers<[1], [0], [0], [1], [0, 0, 1, 1], [], []>} : vector<7x144xf32>, vector<144x56xf32>, vector<7x56xf32> -> vector<7x56xf32>
    %129 = arith.addf %124, %128 : vector<7x56xf32>
    %c2_129 = arith.constant 2 : index
    %c0_130 = arith.constant 0 : index
    %130 = vector.load %arg20[%c2_129, %c0_130] : memref<9x144xf32, #tpu.memory_space<vmem>>, vector<7x144xf32>
    %c2_131 = arith.constant 2 : index
    %c0_132 = arith.constant 0 : index
    %c0_133 = arith.constant 0 : index
    %131 = vector.load %arg12[%c2_131, %c0_132, %c0_133] : memref<3x144x56xf32, #tpu.memory_space<vmem>>, vector<1x144x56xf32>
    %132 = vector.shape_cast %131 : vector<1x144x56xf32> to vector<144x56xf32>
    %cst_134 = arith.constant dense<0.000000e+00> : vector<7x56xf32>
    %133 = tpu.matmul %130, %132, %cst_134 {dimension_numbers = #tpu.dot_dimension_numbers<[1], [0], [0], [1], [0, 0, 1, 1], [], []>} : vector<7x144xf32>, vector<144x56xf32>, vector<7x56xf32> -> vector<7x56xf32>
    %134 = arith.addf %129, %133 : vector<7x56xf32>
    %c0_135 = arith.constant 0 : index
    %c0_136 = arith.constant 0 : index
    %135 = vector.load %arg13[%c0_135, %c0_136] : memref<2x56xf32, #tpu.memory_space<vmem>>, vector<1x56xf32>
    %136 = vector.broadcast %135 : vector<1x56xf32> to vector<7x56xf32>
    %137 = arith.mulf %134, %136 : vector<7x56xf32>
    %c1_137 = arith.constant 1 : index
    %c0_138 = arith.constant 0 : index
    %138 = vector.load %arg13[%c1_137, %c0_138] : memref<2x56xf32, #tpu.memory_space<vmem>>, vector<1x56xf32>
    %139 = vector.broadcast %138 : vector<1x56xf32> to vector<7x56xf32>
    %140 = arith.addf %137, %139 : vector<7x56xf32>
    %cst_139 = arith.constant 0.000000e+00 : f32
    %141 = vector.broadcast %cst_139 : f32 to vector<7x56xf32>
    %142 = arith.maximumf %140, %141 : vector<7x56xf32>
    %c0_140 = arith.constant 0 : index
    %c0_141 = arith.constant 0 : index
    %143 = vector.load %arg21[%c0_140, %c0_141] : memref<7x56xf32, #tpu.memory_space<vmem>>, vector<7x56xf32>
    tpu.vector_store %arg21[%c0_140, %c0_141], %142 {strides = array<i32>} : memref<7x56xf32, #tpu.memory_space<vmem>>, vector<7x56xf32>,
    %c0_142 = arith.constant 0 : index
    %c0_143 = arith.constant 0 : index
    %144 = vector.load %arg21[%c0_142, %c0_143] : memref<7x56xf32, #tpu.memory_space<vmem>>, vector<1x56xf32>
    %c0_144 = arith.constant 0 : index
    %c0_145 = arith.constant 0 : index
    %c0_146 = arith.constant 0 : index
    %145 = vector.load %arg14[%c0_144, %c0_145, %c0_146] : memref<7x56x10xf32, #tpu.memory_space<vmem>>, vector<1x56x10xf32>
    %146 = vector.shape_cast %145 : vector<1x56x10xf32> to vector<56x10xf32>
    %cst_147 = arith.constant dense<0.000000e+00> : vector<1x10xf32>
    %147 = tpu.matmul %144, %146, %cst_147 {dimension_numbers = #tpu.dot_dimension_numbers<[1], [0], [0], [1], [0, 0, 1, 1], [], []>} : vector<1x56xf32>, vector<56x10xf32>, vector<1x10xf32> -> vector<1x10xf32>
    %c1_148 = arith.constant 1 : index
    %c0_149 = arith.constant 0 : index
    %148 = vector.load %arg21[%c1_148, %c0_149] : memref<7x56xf32, #tpu.memory_space<vmem>>, vector<1x56xf32>
    %c1_150 = arith.constant 1 : index
    %c0_151 = arith.constant 0 : index
    %c0_152 = arith.constant 0 : index
    %149 = vector.load %arg14[%c1_150, %c0_151, %c0_152] : memref<7x56x10xf32, #tpu.memory_space<vmem>>, vector<1x56x10xf32>
    %150 = vector.shape_cast %149 : vector<1x56x10xf32> to vector<56x10xf32>
    %cst_153 = arith.constant dense<0.000000e+00> : vector<1x10xf32>
    %151 = tpu.matmul %148, %150, %cst_153 {dimension_numbers = #tpu.dot_dimension_numbers<[1], [0], [0], [1], [0, 0, 1, 1], [], []>} : vector<1x56xf32>, vector<56x10xf32>, vector<1x10xf32> -> vector<1x10xf32>
    %152 = arith.addf %147, %151 : vector<1x10xf32>
    %c2_154 = arith.constant 2 : index
    %c0_155 = arith.constant 0 : index
    %153 = vector.load %arg21[%c2_154, %c0_155] : memref<7x56xf32, #tpu.memory_space<vmem>>, vector<1x56xf32>
    %c2_156 = arith.constant 2 : index
    %c0_157 = arith.constant 0 : index
    %c0_158 = arith.constant 0 : index
    %154 = vector.load %arg14[%c2_156, %c0_157, %c0_158] : memref<7x56x10xf32, #tpu.memory_space<vmem>>, vector<1x56x10xf32>
    %155 = vector.shape_cast %154 : vector<1x56x10xf32> to vector<56x10xf32>
    %cst_159 = arith.constant dense<0.000000e+00> : vector<1x10xf32>
    %156 = tpu.matmul %153, %155, %cst_159 {dimension_numbers = #tpu.dot_dimension_numbers<[1], [0], [0], [1], [0, 0, 1, 1], [], []>} : vector<1x56xf32>, vector<56x10xf32>, vector<1x10xf32> -> vector<1x10xf32>
    %157 = arith.addf %152, %156 : vector<1x10xf32>
    %c3 = arith.constant 3 : index
    %c0_160 = arith.constant 0 : index
    %158 = vector.load %arg21[%c3, %c0_160] : memref<7x56xf32, #tpu.memory_space<vmem>>, vector<1x56xf32>
    %c3_161 = arith.constant 3 : index
    %c0_162 = arith.constant 0 : index
    %c0_163 = arith.constant 0 : index
    %159 = vector.load %arg14[%c3_161, %c0_162, %c0_163] : memref<7x56x10xf32, #tpu.memory_space<vmem>>, vector<1x56x10xf32>
    %160 = vector.shape_cast %159 : vector<1x56x10xf32> to vector<56x10xf32>
    %cst_164 = arith.constant dense<0.000000e+00> : vector<1x10xf32>
    %161 = tpu.matmul %158, %160, %cst_164 {dimension_numbers = #tpu.dot_dimension_numbers<[1], [0], [0], [1], [0, 0, 1, 1], [], []>} : vector<1x56xf32>, vector<56x10xf32>, vector<1x10xf32> -> vector<1x10xf32>
    %162 = arith.addf %157, %161 : vector<1x10xf32>
    %c4 = arith.constant 4 : index
    %c0_165 = arith.constant 0 : index
    %163 = vector.load %arg21[%c4, %c0_165] : memref<7x56xf32, #tpu.memory_space<vmem>>, vector<1x56xf32>
    %c4_166 = arith.constant 4 : index
    %c0_167 = arith.constant 0 : index
    %c0_168 = arith.constant 0 : index
    %164 = vector.load %arg14[%c4_166, %c0_167, %c0_168] : memref<7x56x10xf32, #tpu.memory_space<vmem>>, vector<1x56x10xf32>
    %165 = vector.shape_cast %164 : vector<1x56x10xf32> to vector<56x10xf32>
    %cst_169 = arith.constant dense<0.000000e+00> : vector<1x10xf32>
    %166 = tpu.matmul %163, %165, %cst_169 {dimension_numbers = #tpu.dot_dimension_numbers<[1], [0], [0], [1], [0, 0, 1, 1], [], []>} : vector<1x56xf32>, vector<56x10xf32>, vector<1x10xf32> -> vector<1x10xf32>
    %167 = arith.addf %162, %166 : vector<1x10xf32>
    %c5 = arith.constant 5 : index
    %c0_170 = arith.constant 0 : index
    %168 = vector.load %arg21[%c5, %c0_170] : memref<7x56xf32, #tpu.memory_space<vmem>>, vector<1x56xf32>
    %c5_171 = arith.constant 5 : index
    %c0_172 = arith.constant 0 : index
    %c0_173 = arith.constant 0 : index
    %169 = vector.load %arg14[%c5_171, %c0_172, %c0_173] : memref<7x56x10xf32, #tpu.memory_space<vmem>>, vector<1x56x10xf32>
    %170 = vector.shape_cast %169 : vector<1x56x10xf32> to vector<56x10xf32>
    %cst_174 = arith.constant dense<0.000000e+00> : vector<1x10xf32>
    %171 = tpu.matmul %168, %170, %cst_174 {dimension_numbers = #tpu.dot_dimension_numbers<[1], [0], [0], [1], [0, 0, 1, 1], [], []>} : vector<1x56xf32>, vector<56x10xf32>, vector<1x10xf32> -> vector<1x10xf32>
    %172 = arith.addf %167, %171 : vector<1x10xf32>
    %c6 = arith.constant 6 : index
    %c0_175 = arith.constant 0 : index
    %173 = vector.load %arg21[%c6, %c0_175] : memref<7x56xf32, #tpu.memory_space<vmem>>, vector<1x56xf32>
    %c6_176 = arith.constant 6 : index
    %c0_177 = arith.constant 0 : index
    %c0_178 = arith.constant 0 : index
    %174 = vector.load %arg14[%c6_176, %c0_177, %c0_178] : memref<7x56x10xf32, #tpu.memory_space<vmem>>, vector<1x56x10xf32>
    %175 = vector.shape_cast %174 : vector<1x56x10xf32> to vector<56x10xf32>
    %cst_179 = arith.constant dense<0.000000e+00> : vector<1x10xf32>
    %176 = tpu.matmul %173, %175, %cst_179 {dimension_numbers = #tpu.dot_dimension_numbers<[1], [0], [0], [1], [0, 0, 1, 1], [], []>} : vector<1x56xf32>, vector<56x10xf32>, vector<1x10xf32> -> vector<1x10xf32>
    %177 = arith.addf %172, %176 : vector<1x10xf32>
    %cst_180 = arith.constant dense<0xFF800000> : vector<1xf32>
    %178 = vector.multi_reduction <maximumf>, %177, %cst_180 [1] : vector<1x10xf32> to vector<1xf32>
    %179 = vector.shape_cast %178 : vector<1xf32> to vector<1x1xf32>
    %180 = vector.broadcast %179 : vector<1x1xf32> to vector<1x10xf32>
    %181 = arith.subf %177, %180 : vector<1x10xf32>
    %182 = math.exp %181 : vector<1x10xf32>
    %cst_181 = arith.constant dense<0.000000e+00> : vector<1xf32>
    %183 = vector.multi_reduction <add>, %182, %cst_181 [1] : vector<1x10xf32> to vector<1xf32>
    %184 = vector.shape_cast %183 : vector<1xf32> to vector<1x1xf32>
    %185 = math.log %184 : vector<1x1xf32>
    %186 = vector.broadcast %185 : vector<1x1xf32> to vector<1x10xf32>
    %187 = arith.subf %181, %186 : vector<1x10xf32>
    %c0_182 = arith.constant 0 : index
    %c0_183 = arith.constant 0 : index
    %c0_184 = arith.constant 0 : index
    %188 = vector.load %arg15[%c0_182, %c0_183, %c0_184] : memref<1x1x10xf32, #tpu.memory_space<vmem>>, vector<1x1x10xf32>
    %189 = vector.shape_cast %188 : vector<1x1x10xf32> to vector<1x10xf32>
    %190 = vector.shape_cast %187 : vector<1x10xf32> to vector<1x1x10xf32>
    tpu.vector_store %arg15[%c0_182, %c0_183, %c0_184], %190 {strides = array<i32>} : memref<1x1x10xf32, #tpu.memory_space<vmem>>, vector<1x1x10xf32>,
    return
  }
  func.func @transform_0(%arg0: i32) -> (i32, i32, i32) {
    %c0_i32 = arith.constant 0 : i32
    %c0_i32_0 = arith.constant 0 : i32
    %c0_i32_1 = arith.constant 0 : i32
    return %arg0, %c0_i32, %c0_i32_0 : i32, i32, i32
  }
  func.func @transform_1(%arg0: i32) -> (i32, i32, i32) {
    %c0_i32 = arith.constant 0 : i32
    %c0_i32_0 = arith.constant 0 : i32
    %c0_i32_1 = arith.constant 0 : i32
    %c0_i32_2 = arith.constant 0 : i32
    return %c0_i32, %c0_i32_0, %c0_i32_1 : i32, i32, i32
  }
  func.func @transform_2(%arg0: i32) -> (i32, i32) {
    %c0_i32 = arith.constant 0 : i32
    %c0_i32_0 = arith.constant 0 : i32
    %c0_i32_1 = arith.constant 0 : i32
    return %c0_i32, %c0_i32_0 : i32, i32
  }
  func.func @transform_3(%arg0: i32) -> (i32, i32, i32) {
    %c0_i32 = arith.constant 0 : i32
    %c0_i32_0 = arith.constant 0 : i32
    %c0_i32_1 = arith.constant 0 : i32
    %c0_i32_2 = arith.constant 0 : i32
    return %c0_i32, %c0_i32_0, %c0_i32_1 : i32, i32, i32
  }
  func.func @transform_4(%arg0: i32) -> (i32, i32) {
    %c0_i32 = arith.constant 0 : i32
    %c0_i32_0 = arith.constant 0 : i32
    %c0_i32_1 = arith.constant 0 : i32
    return %c0_i32, %c0_i32_0 : i32, i32
  }
  func.func @transform_5(%arg0: i32) -> (i32, i32, i32) {
    %c0_i32 = arith.constant 0 : i32
    %c0_i32_0 = arith.constant 0 : i32
    %c0_i32_1 = arith.constant 0 : i32
    %c0_i32_2 = arith.constant 0 : i32
    return %c0_i32, %c0_i32_0, %c0_i32_1 : i32, i32, i32
  }
  func.func @transform_6(%arg0: i32) -> (i32, i32) {
    %c0_i32 = arith.constant 0 : i32
    %c0_i32_0 = arith.constant 0 : i32
    %c0_i32_1 = arith.constant 0 : i32
    return %c0_i32, %c0_i32_0 : i32, i32
  }
  func.func @transform_7(%arg0: i32) -> (i32, i32) {
    %c0_i32 = arith.constant 0 : i32
    %c0_i32_0 = arith.constant 0 : i32
    %c0_i32_1 = arith.constant 0 : i32
    return %c0_i32, %c0_i32_0 : i32, i32
  }
  func.func @transform_8(%arg0: i32) -> (i32, i32) {
    %c0_i32 = arith.constant 0 : i32
    %c0_i32_0 = arith.constant 0 : i32
    %c0_i32_1 = arith.constant 0 : i32
    return %c0_i32, %c0_i32_0 : i32, i32
  }
  func.func @transform_9(%arg0: i32) -> (i32, i32, i32) {
    %c0_i32 = arith.constant 0 : i32
    %c0_i32_0 = arith.constant 0 : i32
    %c0_i32_1 = arith.constant 0 : i32
    %c0_i32_2 = arith.constant 0 : i32
    return %c0_i32, %c0_i32_0, %c0_i32_1 : i32, i32, i32
  }
  func.func @transform_10(%arg0: i32) -> (i32, i32) {
    %c0_i32 = arith.constant 0 : i32
    %c0_i32_0 = arith.constant 0 : i32
    %c0_i32_1 = arith.constant 0 : i32
    return %c0_i32, %c0_i32_0 : i32, i32
  }
  func.func @transform_11(%arg0: i32) -> (i32, i32, i32) {
    %c0_i32 = arith.constant 0 : i32
    %c0_i32_0 = arith.constant 0 : i32
    %c0_i32_1 = arith.constant 0 : i32
    %c0_i32_2 = arith.constant 0 : i32
    return %c0_i32, %c0_i32_0, %c0_i32_1 : i32, i32, i32
  }
  func.func @transform_12(%arg0: i32) -> (i32, i32) {
    %c0_i32 = arith.constant 0 : i32
    %c0_i32_0 = arith.constant 0 : i32
    %c0_i32_1 = arith.constant 0 : i32
    return %c0_i32, %c0_i32_0 : i32, i32
  }
  func.func @transform_13(%arg0: i32) -> (i32, i32, i32) {
    %c0_i32 = arith.constant 0 : i32
    %c0_i32_0 = arith.constant 0 : i32
    %c0_i32_1 = arith.constant 0 : i32
    %c0_i32_2 = arith.constant 0 : i32
    return %c0_i32, %c0_i32_0, %c0_i32_1 : i32, i32, i32
  }
  func.func @transform_14(%arg0: i32) -> (i32, i32, i32) {
    %c0_i32 = arith.constant 0 : i32
    %c0_i32_0 = arith.constant 0 : i32
    %c0_i32_1 = arith.constant 0 : i32
    return %arg0, %c0_i32, %c0_i32_0 : i32, i32, i32
  }
}

</mosaic_0001>

<bundles_post_ra>
// kernel: model_forward.1
= control target key start
LH: loop header
LB: loop body
LE: loop exit
PB: predicated region body
PF: predicated region fallthrough
CT: control target
= control target key end

     0   :  { %19 = vsyncpa [#allocation9], 0  ;;  %s14856_s0 = inlined_call_operand.vmem [shape: f32[2,28,28], index: 0, kind: input, shape index: {}]   ;;  %s14857_s1 = inlined_call_operand.vmem [shape: f32[3,28,208], index: 1, kind: input, shape index: {}]   ;;  %s14858_s2 = inlined_call_operand.vmem [shape: f32[2,208], index: 2, kind: input, shape index: {}]   ;;  %s14859_s3 = inlined_call_operand.vmem [shape: f32[3,208,384], index: 3, kind: input, shape index: {}]   ;;  %s14860_s4 = inlined_call_operand.vmem [shape: f32[2,384], index: 4, kind: input, shape index: {}]   ;;  %s14861_s5 = inlined_call_operand.vmem [shape: f32[3,384,704], index: 5, kind: input, shape index: {}]   ;;  %s14862_s6 = inlined_call_operand.vmem [shape: f32[2,704], index: 6, kind: input, shape index: {}]   ;;  %s14863_s7 = inlined_call_operand.vmem [shape: f32[672,88], index: 7, kind: input, shape index: {}]   ;;  %s14864_s8 = inlined_call_operand.vmem [shape: f32[2,88], index: 8, kind: input, shape index: {}]   ;;  %s14865_s9 = inlined_call_operand.vmem [shape: f32[3,88,144], index: 9, kind: input, shape index: {}]   ;;  %s14866_s10 = inlined_call_operand.vmem [shape: f32[2,144], index: 10, kind: input, shape index: {}]   ;;  %s14867_s11 = inlined_call_operand.vmem [shape: f32[3,144,56], index: 11, kind: input, shape index: {}]   ;;  %s14868_s12 = inlined_call_operand.vmem [shape: f32[2,56], index: 12, kind: input, shape index: {}]   ;;  %s14869_s13 = inlined_call_operand.vmem [shape: f32[7,56,10], index: 13, kind: input, shape index: {}]   ;;  %s14870_s14 = inlined_call_operand.hbm [shape: f32[2,1,10], index: 14, kind: output, shape index: {}]  }
   0x1   :  { %21 = vsyncpa [#allocation9 + $0x1], 0  ;;  %s9732_s29 = smov 0   ;;  %s9734_s30 = smov 0  }
   0x2   :  { %s9736_s15 = smov 0   ;;  %s9738_s16 = smov 0  }
   0x3 LB: > { %14885 = sst [smem:[#allocation11_spill]] %s9637_s29  ;;  %s9753_s17 = sadd.s32 4294967295, %s9649_s16   ;;  %s9649_s16 = sphi %s9738_s16, %s14913_s16   ;;  %s9645_s15 = sphi %s9736_s15, %s14915_s15   ;;  %s9641_s30 = sphi %s9734_s30, %s14917_s30   ;;  %s9637_s29 = sphi %s9732_s29, %s14916_s29  }
   0x4   : > { %14886 = sst [smem:[#allocation12_spill]] %s9645_s15  ;;  %s6631_s18 = sadd.s32 4294967294, %s9649_s16  }
   0x5   : > { %s9757_s19 = sadd.s32 1, %s9649_s16   ;;  %s333_s20 = sadd.s32 1, %s9645_s15 }
   0x6   : > { %14887 = sst [smem:[#allocation13_spill]] %s9757_s19  ;;  %s330_s21 = ssub.s32 %s9649_s16, %s9757_s19 }
   0x7   : > { %p343_p0 = scmp.ne.s32.totalorder %s9645_s15, %s9641_s30  ;;  %p331_p1 = scmp.eq.s32.totalorder %s330_s21, 0 }
   0x8   : > { %p344_p2 = scmp.eq.s32.totalorder %s9753_s17, 1  ;;  %p349_p3 = scmp.ne.s32.totalorder %s9641_s30, %s9637_s29 }
   0x9   : > { %p350_p4 = scmp.eq.s32.totalorder %s6631_s18, 1  ;;  %p6634_p7 = scmp.ge.s32.totalorder %s9649_s16, 1 }
   0xa   : > { %s9768_s22 = scalar_select %p331_p1, %s9645_s15, %s333_s20  }
   0xb   : > { %p9770_p5 = por %p344_p2, %p343_p0  ;;  %p9774_p6 = por %p350_p4, %p349_p3 }
   0xc   : > { %14888 = sst [smem:[#allocation14_spill]] %s9768_s22  ;;  %p415_p8 = scmp.lt.s32.totalorder %s9649_s16, 3 }
   0xd   : > { %s14890_s24 = scalar_select %p9774_p6, 1, 0 }
   0xe   : > { %p416_p9 = pnand %p6634_p7, %p415_p8 }
   0xf   : > { %14891 = sst [smem:[#allocation15_spill]] %s14890_s24 }
  0x10   : > { %419 = sbr.rel (%p416_p9) target bundleno = 3191 (0xc77), region = 76 }
  0x17   : > { %v6638_v0 = vld [vmem:[%s14857_s1 + $0x48] sm:$0xff]  ;;  %v6640_v1 = vld [vmem:[%s14857_s1 + $0x58] sm:$0xff]  ;;  %v6637_v2 = vld [vmem:[%s14857_s1 + $0x40] sm:$0xff]  ;;  %vm503_vm0 = vcmask 1043456   ;;  %v14878_v7 = vmov 0.0   ;;  %p460_p10 = scmp.lt.s32.totalorder %s9753_s17, 1 }
  0x18   : > { %v7838_v3 = vpack.c.bf16 %v6640_v1, %v6638_v0  ;;  %v6639_v4 = vld [vmem:[%s14857_s1 + $0x50] sm:$0xff]  ;;  %v6642_v5 = vld [vmem:[%s14857_s1 + $0x68] sm:$0xff]  ;;  %v6644_v6 = vld [vmem:[%s14857_s1 + $0x78] sm:$0xf]  ;;  %574 = vmatprep.mubr.f32.mxu0 %v14878_v7  ;;  %vm9652_vm1 = vmmov 1   ;;  %vm490_vm3 = vcmask 228352  }
  0x19   : > { %v7840_v8 = vpack.c.bf16 %v6639_v4, %v6637_v2  ;;  %v7842_v9 = vpack.c.bf16 %v6644_v6, %v6642_v5  ;;  %vm9800_vm2 = vmpackc.low %vm503_vm0, %vm9652_vm1  ;;  %v6641_v11 = vld [vmem:[%s14857_s1 + $0x60] sm:$0xff]  ;;  %v6643_v12 = vld [vmem:[%s14857_s1 + $0x70] sm:$0xf]  ;;  %s461_s28 = scalar_select %p460_p10, %s9753_s17, 1  ;;  %vm884_vm4 = vcmask 654336   ;;  %vm891_vm5 = vcmask 648192  }
  0x1a   : > { %7839 = vmatprep.subr.bf16.mxu0 %v7838_v3  ;;  %v470_v13 = vld [vmem:[%s14857_s1 + $0x8] sm:$0xff]  ;;  %v472_v14 = vld [vmem:[%s14857_s1 + $0x18] sm:$0xff]  ;;  %v7845_v15 = vpack.c.bf16 %v6643_v12, %v6641_v11  ;;  %v469_v17 = vld [vmem:[%s14857_s1] sm:$0xff]  ;;  %vm1068_vm6 = vcmask 1046528   ;;  %vm1512_vm7 = vcmask 1045504   ;;  %s9654_s22 = smov 96  }
  0x1b   : > { %7841 = vmatpush1.bf16.msra.mxu0 %v7840_v8  ;;  %s7586_s26 = sshll.u32 %s461_s28, 5  ;;  %v7848_v16 = vpack.c.bf16 %v472_v14, %v470_v13  ;;  %v471_v18 = vld [vmem:[%s14857_s1 + $0x10] sm:$0xff]  ;;  %v474_v19 = vld [vmem:[%s14857_s1 + $0x28] sm:$0xff]  ;;  %v476_v20 = vld [vmem:[%s14857_s1 + $0x38] sm:$0xf]  ;;  %vm4365_vm8 = vcmask 523264  }
  0x1c   : > { %7844 = vmatprep.subr.msk.bf16.mxu0 %vm9800_vm2, %v7842_v9  ;;  %s9828_s21 = scalar_lea.vmem %s14856_s0, %s7586_s26  ;;  %v7850_v22 = vpack.c.bf16 %v471_v18, %v469_v17  ;;  %v7852_v23 = vpack.c.bf16 %v476_v20, %v474_v19  ;;  %v473_v24 = vld [vmem:[%s14857_s1 + $0x20] sm:$0xff]  ;;  %v475_v25 = vld [vmem:[%s14857_s1 + $0x30] sm:$0xf]  ;;  %v6658_v26 = vld [vmem:[%s14857_s1 + $0x88] sm:$0xff]  ;;  %v14876_v20 = vmov 0.0|0.0   ;;  %vm4378_vm9 = vcmask 521216  }
  0x1d   : > { %v477_v21 = vld [vmem:[%s9828_s21 + $0x1] sm:$0xff]  ;;  %v6660_v27 = vld [vmem:[%s14857_s1 + $0x98] sm:$0xff]  ;;  %v478_v28 = vld [vmem:[%s9828_s21 + $0x9] sm:$0xff]  ;;  %v7855_v29 = vpack.c.bf16 %v475_v25, %v473_v24  ;;  %vm4542_vm10 = vcmask 785408   ;;  %vm4701_vm12 = vcmask 1044480   ;;  %vm4694_vm13 = vcmask 171008  }
  0x1e   : > { %v6673_v30 = vld [vmem:[%s14859_s3 + $0x278] sm:$0xff]  ;;  %v6676_v31 = vld [vmem:[%s14859_s3 + $0x290] sm:$0xff]  ;;  %v7858_v32 = vpack.c.bf16 %v6660_v27, %v6658_v26  ;;  %v6675_v35 = vld [vmem:[%s14859_s3 + $0x288] sm:$0xff]  ;;  %vm5035_vm15 = vcmask 261120   ;;  %vm5283_vm0 = vcmask 719872   ;;  %vm5285_vm1 = vcmask 714752  }
  0x1f   : > { %7847 = vmatpush1.bf16.msk.msra.mxu0 %vm9800_vm2, %v7845_v15  ;;  %v7868_v33 = vpack.c.bf16 %v6676_v31, %v6673_v30  ;;  %v6672_v34 = vld [vmem:[%s14859_s3 + $0x270] sm:$0xff]  ;;  %v6679_v37 = vld [vmem:[%s14859_s3 + $0x2a8] sm:$0xff]  ;;  %v6682_v38 = vld [vmem:[%s14859_s3 + $0x2c0] sm:$0xff]  ;;  %s458_s24 = sand.u32 1, %s9641_s30   ;;  %s7583_s27 = sshll.u32 %s9753_s17, 4 }
  0x20   : > { %7849 = vmatprep.subr.bf16.mxu0 %v7848_v16  ;;  %v7870_v36 = vpack.c.bf16 %v6675_v35, %v6672_v34  ;;  %v7872_v39 = vpack.c.bf16 %v6682_v38, %v6679_v37  ;;  %v6678_v40 = vld [vmem:[%s14859_s3 + $0x2a0] sm:$0xff]  ;;  %v6681_v41 = vld [vmem:[%s14859_s3 + $0x2b8] sm:$0xff]  ;;  %v6688_v44 = vld [vmem:[%s14859_s3 + $0x2f0] sm:$0xff]  ;;  %s459_s15 = scalar_lea.vmem [#allocation8], %s458_s24  ;;  %s14813_s20 = scalar_lea.hbm %s14870_s14, %s7583_s27 }
  0x21   : > { %7869 = vmatprep.subr.bf16.mxu1 %v7868_v33  ;;  %v479_v42 = vld [vmem:[%s9828_s21 + $0x11] sm:$0xff]  ;;  %v7874_v45 = vpack.c.bf16 %v6681_v41, %v6678_v40  ;;  %v6687_v48 = vld [vmem:[%s14859_s3 + $0x2e8] sm:$0xff]  ;;  %v6694_v50 = vld [vmem:[%s14859_s3 + $0x320] sm:$0xff]  ;;  %s6576_s19 = sshll.u32 %s459_s15, 4  ;;  %s6564_s25 = scalar_lea.sflag [#allocation9], %s458_s24  ;;  %s14815_s19 = int_to_ptr.vmem [resolvable:$true] %s6576_s19 }
  0x22   : > { %6647 = vmatmul.mubr.msk.f32.vlgmr.msra.gmra.mrb[0].mxu0 %vm490_vm3, %v477_v21  ;;  %v6685_v43 = vld [vmem:[%s14859_s3 + $0x2d8] sm:$0xff]  ;;  %7871 = vmatpush1.bf16.msra.mxu1 %v7870_v36  ;;  %v6684_v47 = vld [vmem:[%s14859_s3 + $0x2d0] sm:$0xff]  ;;  %v6691_v49 = vld [vmem:[%s14859_s3 + $0x308] sm:$0xff]  ;;  %s9587_s28 = scalar_lea.vmem %s14815_s19, 16  ;;  %s9656_s17 = smov [#allocation8]  }
  0x23   : > { %580 = vmatprep.mubr.f32.mxu0 %v14878_v7  ;;  %7851 = vmatpush1.bf16.msra.mxu0 %v7850_v22  ;;  %v7876_v46 = vpack.c.bf16 %v6688_v44, %v6685_v43  ;;  %v480_v51 = vld [vmem:[%s9828_s21 + $0x19] sm:$0x3]  ;;  %v6657_v52 = vld [vmem:[%s14857_s1 + $0x80] sm:$0xff]  ;;  %v6659_v53 = vld [vmem:[%s14857_s1 + $0x90] sm:$0xff]  ;;  %v7878_v55 = vpack.c.bf16 %v6687_v48, %v6684_v47  ;;  %v7880_v57 = vpack.c.bf16 %v6694_v50, %v6691_v49  ;;  %p9588_p11 = scmp.ne.s32.totalorder %s14815_s19, %s9587_s28  ;;  %s9591_s26 = sshll.u32 %s9656_s17, 4  ;;  %s9592_s26 = int_to_ptr.vmem [resolvable:$false] %s9591_s26 }
  0x24   : > { %7854 = vmatprep.subr.msk.bf16.mxu0 %vm9800_vm2, %v7852_v23  ;;  %7873 = vmatprep.subr.bf16.mxu1 %v7872_v39  ;;  %v6662_v54 = vld [vmem:[%s14857_s1 + $0xa8] sm:$0xff]  ;;  %v6664_v56 = vld [vmem:[%s14857_s1 + $0xb8] sm:$0xf]  ;;  %v6690_v58 = vld [vmem:[%s14859_s3 + $0x300] sm:$0xff]  ;;  %v7860_v63 = vpack.c.bf16 %v6659_v53, %v6657_v52  ;;  %p9594_p0 = scmp.lt.s32.totalorder %s14815_s19, %s9592_s26 }
  0x25   : > { %v6693_v59 = vld [vmem:[%s14859_s3 + $0x318] sm:$0xff]  ;;  %v6700_v61 = vld [vmem:[%s14859_s3 + $0x350] sm:$0xff]  ;;  %v465_v62 = vld [vmem:[%s9828_s21] sm:$0xff]  ;;  %v7862_v0 = vpack.c.bf16 %v6664_v56, %v6662_v54  ;;  %p9589_p12 = pnand %p9588_p11, %p9770_p5 }
  0x26   : > { %6648 = vmatmul.mubr.msk.f32.gmra.mrb[2].mxu0 %vm490_vm3, %v478_v28  ;;  %7875 = vmatpush1.bf16.msra.mxu1 %v7874_v45  ;;  %v6697_v60 = vld [vmem:[%s14859_s3 + $0x338] sm:$0xff]  ;;  %v6661_v1 = vld [vmem:[%s14857_s1 + $0xa0] sm:$0xff]  ;;  %v6663_v2 = vld [vmem:[%s14857_s1 + $0xb0] sm:$0xf]  ;;  %v7882_v3 = vpack.c.bf16 %v6693_v59, %v6690_v58 }
  0x27   : > { %586 = vmatprep.mubr.f32.mxu0 %v14878_v7  ;;  %7857 = vmatpush1.bf16.msk.msra.mxu0 %vm9800_vm2, %v7855_v29  ;;  %v7884_v4 = vpack.c.bf16 %v6700_v61, %v6697_v60  ;;  %v6696_v5 = vld [vmem:[%s14859_s3 + $0x330] sm:$0xff]  ;;  %v6699_v6 = vld [vmem:[%s14859_s3 + $0x348] sm:$0xff]  ;;  %v6706_v9 = vld [vmem:[%s14859_s3 + $0x380] sm:$0xff]  ;;  %v7865_v12 = vpack.c.bf16 %v6663_v2, %v6661_v1  ;;  %p9590_p13 = pneg %p9589_p12 }
  0x28   : > { %7859 = vmatprep.subr.bf16.mxu0 %v7858_v32  ;;  %7877 = vmatprep.subr.bf16.mxu1 %v7876_v46  ;;  %v6703_v8 = vld [vmem:[%s14859_s3 + $0x368] sm:$0xff]  ;;  %v7886_v13 = vpack.c.bf16 %v6699_v6, %v6696_v5  ;;  %v6702_v15 = vld [vmem:[%s14859_s3 + $0x360] sm:$0xff]  ;;  %v6705_v16 = vld [vmem:[%s14859_s3 + $0x378] sm:$0xff] }
  0x29   : > { %v466_v11 = vld [vmem:[%s9828_s21 + $0x8] sm:$0xff]  ;;  %v7888_v14 = vpack.c.bf16 %v6706_v9, %v6703_v8  ;;  %v6709_v17 = vld [vmem:[%s14859_s3 + $0x398] sm:$0xff]  ;;  %v6712_v18 = vld [vmem:[%s14859_s3 + $0x3b0] sm:$0xff]  ;;  %v7890_v21 = vpack.c.bf16 %v6705_v16, %v6702_v15 }
  0x2a   : > { %6649 = vmatmul.mubr.msk.f32.gmra.mrb[4].mxu0 %vm490_vm3, %v479_v42  ;;  %7879 = vmatpush1.bf16.msra.mxu1 %v7878_v55  ;;  %v467_v19 = vld [vmem:[%s9828_s21 + $0x10] sm:$0xff]  ;;  %v7892_v22 = vpack.c.bf16 %v6712_v18, %v6709_v17  ;;  %v6711_v24 = vld [vmem:[%s14859_s3 + $0x3a8] sm:$0xff]  ;;  %v6718_v25 = vld [vmem:[%s14859_s3 + $0x3e0] sm:$0xff] }
  0x2b   : > { %592 = vmatprep.mubr.f32.mxu0 %v14878_v7  ;;  %7881 = vmatprep.subr.bf16.mxu1 %v7880_v57  ;;  %v6708_v23 = vld [vmem:[%s14859_s3 + $0x390] sm:$0xff]  ;;  %v6715_v10 = vld [vmem:[%s14859_s3 + $0x3c8] sm:$0xff]  ;;  %v468_v26 = vld [vmem:[%s9828_s21 + $0x18] sm:$0x3] }
  0x2c   : > { %v6674_v27 = vld [vmem:[%s14859_s3 + $0x280] sm:$0xff]  ;;  %v6677_v28 = vld [vmem:[%s14859_s3 + $0x298] sm:$0xff]  ;;  %v7894_v29 = vpack.c.bf16 %v6711_v24, %v6708_v23  ;;  %v7896_v30 = vpack.c.bf16 %v6718_v25, %v6715_v10  ;;  %v6680_v33 = vld [vmem:[%s14859_s3 + $0x2b0] sm:$0xff] }
  0x2d   : > { %v706_v31 = vld [vmem:[%s9828_s21 + $0x2] sm:$0xff]  ;;  %v7921_v32 = vpack.c.bf16 %v6677_v28, %v6674_v27  ;;  %v707_v35 = vld [vmem:[%s9828_s21 + $0xa] sm:$0xff]  ;;  %v6689_v38 = vld [vmem:[%s14859_s3 + $0x2f8] sm:$0xff] }
  0x2e   : > { %6650 = vmatmul.mubr.msk.f32.gmra.mrb[6].mxu0 %vm490_vm3, %v480_v51  ;;  %7883 = vmatpush1.bf16.msra.mxu1 %v7882_v3  ;;  %v6683_v34 = vld [vmem:[%s14859_s3 + $0x2c8] sm:$0xff]  ;;  %v6686_v37 = vld [vmem:[%s14859_s3 + $0x2e0] sm:$0xff]  ;;  %v708_v39 = vld [vmem:[%s9828_s21 + $0x12] sm:$0xff] }
  0x2f   : > { %681 = vmatprep.mubr.f32.mxu0 %v14878_v7  ;;  %7885 = vmatprep.subr.bf16.mxu1 %v7884_v4  ;;  %v7924_v36 = vpack.c.bf16 %v6683_v34, %v6680_v33  ;;  %v7927_v40 = vpack.c.bf16 %v6689_v38, %v6686_v37  ;;  %v6692_v41 = vld [vmem:[%s14859_s3 + $0x310] sm:$0xff]  ;;  %v6695_v42 = vld [vmem:[%s14859_s3 + $0x328] sm:$0xff]  ;;  %v709_v43 = vld [vmem:[%s9828_s21 + $0x1a] sm:$0x3] }
  0x30   : > { %v7930_v44 = vpack.c.bf16 %v6695_v42, %v6692_v41  ;;  %v6698_v45 = vld [vmem:[%s14859_s3 + $0x340] sm:$0xff]  ;;  %v6701_v46 = vld [vmem:[%s14859_s3 + $0x358] sm:$0xff]  ;;  %v6704_v48 = vld [vmem:[%s14859_s3 + $0x370] sm:$0xff] }
  0x31   : > { %v7933_v47 = vpack.c.bf16 %v6701_v46, %v6698_v45  ;;  %v6707_v49 = vld [vmem:[%s14859_s3 + $0x388] sm:$0xff]  ;;  %v6710_v51 = vld [vmem:[%s14859_s3 + $0x3a0] sm:$0xff]  ;;  %v6713_v52 = vld [vmem:[%s14859_s3 + $0x3b8] sm:$0xff]  ;;  %v836_v46 = vlaneseq }
  0x32   : > { %6653 = vmatmul.mubr.msk.f32.vlgmr.msra.gmra.mrb[0].mxu0 %vm490_vm3, %v465_v62  ;;  %7887 = vmatpush1.bf16.msra.mxu1 %v7886_v13  ;;  %v7936_v50 = vpack.c.bf16 %v6707_v49, %v6704_v48  ;;  %v7939_v53 = vpack.c.bf16 %v6713_v52, %v6710_v51  ;;  %v6714_v54 = vld [vmem:[%s14859_s3 + $0x3c0] sm:$0xff]  ;;  %v6717_v55 = vld [vmem:[%s14859_s3 + $0x3d8] sm:$0xff]  ;;  %v6716_v56 = vld [vmem:[%s14859_s3 + $0x3d0] sm:$0xff] }
  0x33   : > { %687 = vmatprep.mubr.f32.mxu0 %v14878_v7  ;;  %7861 = vmatpush1.bf16.msra.mxu0 %v7860_v63  ;;  %v7898_v57 = vpack.c.bf16 %v6717_v55, %v6714_v54  ;;  %v6719_v58 = vld [vmem:[%s14859_s3 + $0x3e8] sm:$0xff]  ;;  %v6721_v60 = vld [vmem:[%s14859_s3 + $0x3f8] sm:$0xff]  ;;  %v6724_v61 = vld [vmem:[%s14859_s3 + $0x410] sm:$0xff] }
  0x34   : > { %7864 = vmatprep.subr.msk.bf16.mxu0 %vm9800_vm2, %v7862_v0  ;;  %7889 = vmatprep.subr.bf16.mxu1 %v7888_v14  ;;  %v7942_v59 = vpack.c.bf16 %v6719_v58, %v6716_v56  ;;  %v7900_v62 = vpack.c.bf16 %v6724_v61, %v6721_v60  ;;  %v6720_v63 = vld [vmem:[%s14859_s3 + $0x3f0] sm:$0xff]  ;;  %v6723_v0 = vld [vmem:[%s14859_s3 + $0x408] sm:$0xff]  ;;  %v6722_v1 = vld [vmem:[%s14859_s3 + $0x400] sm:$0xff] }
  0x35   : > { %v7902_v2 = vpack.c.bf16 %v6723_v0, %v6720_v63  ;;  %v6725_v3 = vld [vmem:[%s14859_s3 + $0x418] sm:$0xff]  ;;  %v6727_v5 = vld [vmem:[%s14859_s3 + $0x428] sm:$0xff]  ;;  %v6730_v6 = vld [vmem:[%s14859_s3 + $0x440] sm:$0xff] }
  0x36   : > { %6654 = vmatmul.mubr.msk.f32.gmra.mrb[2].mxu0 %vm490_vm3, %v466_v11  ;;  %7891 = vmatpush1.bf16.msra.mxu1 %v7890_v21  ;;  %v7945_v4 = vpack.c.bf16 %v6725_v3, %v6722_v1  ;;  %v7904_v8 = vpack.c.bf16 %v6730_v6, %v6727_v5  ;;  %v6726_v9 = vld [vmem:[%s14859_s3 + $0x420] sm:$0xff]  ;;  %v6729_v11 = vld [vmem:[%s14859_s3 + $0x438] sm:$0xff]  ;;  %v6731_v14 = vld [vmem:[%s14859_s3 + $0x448] sm:$0xff] }
  0x37   : > { %693 = vmatprep.mubr.f32.mxu0 %v14878_v7  ;;  %7867 = vmatpush1.bf16.msk.msra.mxu0 %vm9800_vm2, %v7865_v12  ;;  %v6728_v12 = vld [vmem:[%s14859_s3 + $0x430] sm:$0xff]  ;;  %v7906_v13 = vpack.c.bf16 %v6729_v11, %v6726_v9  ;;  %v6733_v16 = vld [vmem:[%s14859_s3 + $0x458] sm:$0xff]  ;;  %v6735_v21 = vld [vmem:[%s14859_s3 + $0x468] sm:$0xff]  ;;  %vm5652_vm2 = vcmask 130048  }
  0x38   : > { %7920 = vmatprep.subr.bf16.mxu0 %v14876_v20  ;;  %7893 = vmatprep.subr.bf16.mxu1 %v7892_v22  ;;  %v7948_v15 = vpack.c.bf16 %v6731_v14, %v6728_v12  ;;  %v6736_v17 = vld [vmem:[%s14859_s3 + $0x470] sm:$0xff]  ;;  %v6734_v22 = vld [vmem:[%s14859_s3 + $0x460] sm:$0xff]  ;;  %v6737_v24 = vld [vmem:[%s14859_s3 + $0x478] sm:$0xff] }
  0x39   : > { %v7908_v18 = vpack.c.bf16 %v6736_v17, %v6733_v16  ;;  %v7951_v10 = vpack.c.bf16 %v6737_v24, %v6734_v22  ;;  %v6739_v25 = vld [vmem:[%s14859_s3 + $0x488] sm:$0xff]  ;;  %v6738_v28 = vld [vmem:[%s14859_s3 + $0x480] sm:$0xff]  ;;  %v6745_v34 = vld [vmem:[%s14859_s3 + $0x4b8] sm:$0xff] }
  0x3a   : > { %6655 = vmatmul.mubr.msk.f32.gmra.mrb[4].mxu0 %vm490_vm3, %v467_v19  ;;  %7895 = vmatpush1.bf16.msra.mxu1 %v7894_v29  ;;  %v6732_v19 = vld [vmem:[%s14859_s3 + $0x450] sm:$0xff]  ;;  %v6741_v29 = vld [vmem:[%s14859_s3 + $0x498] sm:$0xff]  ;;  %v6747_v38 = vld [vmem:[%s14859_s3 + $0x4c8] sm:$0xff] }
  0x3b   : > { %699 = vmatprep.mubr.f32.mxu0 %v14878_v7  ;;  %7897 = vmatprep.subr.bf16.mxu1 %v7896_v30  ;;  %v7910_v23 = vpack.c.bf16 %v6735_v21, %v6732_v19  ;;  %v6740_v30 = vld [vmem:[%s14859_s3 + $0x490] sm:$0xff]  ;;  %v6749_v41 = vld [vmem:[%s14859_s3 + $0x4d8] sm:$0xff]  ;;  %v834_v49 = vld [vmem:[%s14858_s2] ss:$2 sm:$0x3] }
  0x3c   : > { %v6744_v37 = vld [vmem:[%s14859_s3 + $0x4b0] sm:$0xff]  ;;  %v6671_v51 = vld [vmem:[%s14858_s2 + $0x1] ss:$2 sm:$0x3] }
  0x3e   : > { %6656 = vmatmul.mubr.msk.f32.gmra.mrb[6].mxu0 %vm490_vm3, %v468_v26  ;;  %7899 = vmatpush1.bf16.msra.mxu1 %v7898_v57  ;;  %v6742_v26 = vld [vmem:[%s14859_s3 + $0x4a0] sm:$0xff] }
  0x3f   : > { %801 = vmatprep.mubr.f32.mxu0 %v14878_v7  ;;  %7901 = vmatprep.subr.bf16.mxu1 %v7900_v62  ;;  %v7912_v27 = vpack.c.bf16 %v6742_v26, %v6739_v25 }
  0x42   : > { %6667 = vmatmul.mubr.msk.f32.vlgmr.msra.gmra.mrb[0].mxu0 %vm490_vm3, %v706_v31  ;;  %7903 = vmatpush1.bf16.msra.mxu1 %v7902_v2  ;;  %v7914_v31 = vpack.c.bf16 %v6741_v29, %v6738_v28  ;;  %v902_v29 = vld [vmem:[%s14859_s3 + $0x18] sm:$0xff] }
  0x43   : > { %807 = vmatprep.mubr.f32.mxu0 %v14878_v7  ;;  %7922 = vmatpush1.bf16.msra.mxu0 %v7921_v32  ;;  %v6743_v32 = vld [vmem:[%s14859_s3 + $0x4a8] sm:$0xff] }
  0x44   : > { %7923 = vmatprep.subr.bf16.mxu0 %v14876_v20  ;;  %7905 = vmatprep.subr.bf16.mxu1 %v7904_v8  ;;  %v7954_v33 = vpack.c.bf16 %v6743_v32, %v6740_v30  ;;  %v901_v30 = vld [vmem:[%s14859_s3 + $0x10] sm:$0xff] }
  0x46   : > { %6668 = vmatmul.mubr.msk.f32.gmra.mrb[2].mxu0 %vm490_vm3, %v707_v35  ;;  %7907 = vmatpush1.bf16.msra.mxu1 %v7906_v13  ;;  %v6748_v35 = vld [vmem:[%s14859_s3 + $0x4d0] sm:$0xff] }
  0x47   : > { %813 = vmatprep.mubr.f32.mxu0 %v14878_v7  ;;  %7925 = vmatpush1.bf16.msra.mxu0 %v7924_v36  ;;  %v7916_v36 = vpack.c.bf16 %v6748_v35, %v6745_v34  ;;  %v906_v34 = vld [vmem:[%s14859_s3 + $0x38] sm:$0xff]  ;;  %v909_v35 = vld [vmem:[%s14859_s3 + $0x50] sm:$0xff] }
  0x48   : > { %7926 = vmatprep.subr.bf16.mxu0 %v14876_v20  ;;  %7909 = vmatprep.subr.bf16.mxu1 %v7908_v18 }
  0x4a   : > { %6669 = vmatmul.mubr.msk.f32.gmra.mrb[4].mxu0 %vm490_vm3, %v708_v39  ;;  %7911 = vmatpush1.bf16.msra.mxu1 %v7910_v23  ;;  %v6746_v39 = vld [vmem:[%s14859_s3 + $0x4c0] sm:$0xff] }
  0x4b   : > { %819 = vmatprep.mubr.f32.mxu0 %v14878_v7  ;;  %7928 = vmatpush1.bf16.msra.mxu0 %v7927_v40  ;;  %v7918_v40 = vpack.c.bf16 %v6747_v38, %v6744_v37  ;;  %v7957_v42 = vpack.c.bf16 %v6749_v41, %v6746_v39  ;;  %v905_v41 = vld [vmem:[%s14859_s3 + $0x30] sm:$0xff] }
  0x4c   : > { %7929 = vmatprep.subr.bf16.mxu0 %v14876_v20  ;;  %7913 = vmatprep.subr.bf16.mxu1 %v7912_v27  ;;  %v899_v27 = vld [vmem:[%s14859_s3] sm:$0xff] }
  0x4d   : > { %v7961_v39 = vpack.c.bf16 %v902_v29, %v899_v27  ;;  %v923_v27 = vld [vmem:[%s14859_s3 + $0xc0] sm:$0xff]  ;;  %v926_v29 = vld [vmem:[%s14859_s3 + $0xd8] sm:$0xff] }
  0x4e   : > { %6670 = vmatmul.mubr.msk.f32.gmra.mrb[6].mxu0 %vm490_vm3, %v709_v43  ;;  %7915 = vmatpush1.bf16.msra.mxu1 %v7914_v31  ;;  %v900_v43 = vld [vmem:[%s14859_s3 + $0x8] sm:$0xff]  ;;  %vm5655_vm3 = vcmask 122880  }
  0x4f   : > { %7931 = vmatpush1.bf16.msra.mxu0 %v7930_v44  ;;  %7917 = vmatprep.subr.bf16.mxu1 %v7916_v36  ;;  %v903_v44 = vld [vmem:[%s14859_s3 + $0x20] sm:$0xff]  ;;  %v904_v31 = vld [vmem:[%s14859_s3 + $0x28] sm:$0xff] }
  0x50   : > { %7932 = vmatprep.subr.bf16.mxu0 %v14876_v20  ;;  %v7959_v45 = vpack.c.bf16 %v903_v44, %v900_v43  ;;  %v7963_v43 = vpack.c.bf16 %v909_v35, %v906_v34  ;;  %v908_v44 = vld [vmem:[%s14859_s3 + $0x48] sm:$0xff]  ;;  %v933_v34 = vld [vmem:[%s14859_s3 + $0x110] sm:$0xff]  ;;  %v7977_v35 = vpack.c.bf16 %v926_v29, %v923_v27 }
  0x52   : > { %7919 = vmatpush1.bf16.msra.mxu1 %v7918_v40  ;;  %v8012_v40 = vpack.c.bf16 %v904_v31, %v901_v30  ;;  %v925_v30 = vld [vmem:[%s14859_s3 + $0xd0] sm:$0xff]  ;;  %v928_v31 = vld [vmem:[%s14859_s3 + $0xe8] sm:$0xff] }
  0x53   : > { %7934 = vmatpush1.bf16.msra.mxu0 %v7933_v47  ;;  %7960 = vmatprep.subr.bf16.mxu1 %v7959_v45  ;;  %v10166_v47 = vshrl.u32 %v836_v46, 7  ;;  %v907_v45 = vld [vmem:[%s14859_s3 + $0x40] sm:$0xff] }
  0x54   : > { %7935 = vmatprep.subr.bf16.mxu0 %v14876_v20 }
  0x55   : > { %v10169_v48 = vsub.s32 0, %v10166_v47 }
  0x57   : > { %7937 = vmatpush1.bf16.msra.mxu0 %v7936_v50  ;;  %v10175_v50 = vsub.s32 1, %v10166_v47  ;;  %v839_v52 = vrot.slane %v834_v49, %v10169_v48  ;;  %v860_v54 = vrot.slane %v6671_v51, %v10169_v48 }
  0x58   : > { %7938 = vmatprep.subr.bf16.mxu0 %v14876_v20 }
  0x59   : > { %14894 = vst [vmem:[#allocation16_spill] sm:$0xff] %v10175_v50  ;;  %v864_v56 = vrot.slane %v6671_v51, %v10175_v50 }
  0x5b   : > { %7940 = vmatpush1.bf16.msra.mxu0 %v7939_v53  ;;  %v843_v53 = vrot.slane %v834_v49, %v10175_v50  ;;  %v910_v49 = vld [vmem:[%s14859_s3 + $0x58] sm:$0xff] }
  0x5c   : > { %7941 = vmatprep.subr.bf16.mxu0 %v14876_v20 }
  0x5f   : > { %7943 = vmatpush1.bf16.msra.mxu0 %v7942_v59 }
  0x60   : > { %7944 = vmatprep.subr.bf16.mxu0 %v14876_v20 }
  0x63   : > { %7946 = vmatpush1.bf16.msra.mxu0 %v7945_v4 }
  0x64   : > { %7947 = vmatprep.subr.bf16.mxu0 %v14876_v20 }
  0x67   : > { %7949 = vmatpush1.bf16.msra.mxu0 %v7948_v15 }
  0x68   : > { %7950 = vmatprep.subr.bf16.mxu0 %v14876_v20 }
  0x6b   : > { %7952 = vmatpush1.bf16.msra.mxu0 %v7951_v10 }
  0x6c   : > { %7953 = vmatprep.subr.bf16.mxu0 %v14876_v20 }
  0x6f   : > { %7955 = vmatpush1.bf16.msra.mxu0 %v7954_v33 }
  0x70   : > { %7956 = vmatprep.subr.bf16.mxu0 %v14876_v20 }
  0x73   : > { %7958 = vmatpush1.bf16.msra.mxu0 %v7957_v42 }
  0x74   : > { %8011 = vmatprep.subr.bf16.mxu0 %v14876_v20 }
 0x115   : > { %v803_v55 = vpop.f32.mrb[0].mxu0 }
 0x116   : > { %v846_v57 = vmul.f32 %v839_v52, %v803_v55  ;;  %v805_v58 = vpop.f32.mrb[1].mxu0  ;;  %v915_v55 = vld [vmem:[%s14859_s3 + $0x80] sm:$0xff] }
 0x117   : > { %v847_v59 = vmul.f32 %v843_v53, %v805_v58  ;;  %v8015_v58 = vpack.c.bf16 %v910_v49, %v907_v45  ;;  %v935_v49 = vld [vmem:[%s14859_s3 + $0x120] sm:$0xff] }
 0x118   : > { %v867_v60 = vadd.f32 %v860_v54, %v846_v57  ;;  %v7965_v57 = vpack.c.bf16 %v908_v44, %v905_v41  ;;  %v934_v41 = vld [vmem:[%s14859_s3 + $0x118] sm:$0xff] }
 0x119   : > { %v868_v61 = vadd.f32 %v864_v56, %v847_v59  ;;  %v809_v62 = vpop.f32.mrb[2].mxu0  ;;  %v911_v59 = vld [vmem:[%s14859_s3 + $0x60] sm:$0xff] }
 0x11a   : > { %v10184_v63 = vmax.f32 %v867_v60, 0.0  ;;  %v848_v0 = vmul.f32 %v839_v52, %v809_v62  ;;  %v811_v1 = vpop.f32.mrb[3].mxu0  ;;  %v914_v60 = vld [vmem:[%s14859_s3 + $0x78] sm:$0xff] }
 0x11b   : > { %v876_v2 = vmax.f32 %v868_v61, 0.0  ;;  %v849_v3 = vmul.f32 %v843_v53, %v811_v1  ;;  %v913_v1 = vld [vmem:[%s14859_s3 + $0x70] sm:$0xff] }
 0x11c   : > { %883 = vst [vmem:[#allocation2] sm:$0xff] %v10184_v63  ;;  %v869_v4 = vadd.f32 %v860_v54, %v848_v0 }
 0x11d   : > { %885 = vst.msk [vmem:[#allocation2 + $0x8] sm:$0xff] %vm884_vm4, %v876_v2  ;;  %v870_v5 = vadd.f32 %v864_v56, %v849_v3  ;;  %v815_v6 = vpop.f32.mrb[4].mxu0  ;;  %v916_v2 = vld [vmem:[%s14859_s3 + $0x88] sm:$0xff] }
 0x11e   : > { %v10188_v8 = vmax.f32 %v869_v4, 0.0  ;;  %v850_v9 = vmul.f32 %v839_v52, %v815_v6  ;;  %v817_v11 = vpop.f32.mrb[5].mxu0 }
 0x11f   : > { %v878_v12 = vmax.f32 %v870_v5, 0.0  ;;  %v851_v13 = vmul.f32 %v843_v53, %v817_v11  ;;  %v921_v11 = vld [vmem:[%s14859_s3 + $0xb0] sm:$0xff] }
 0x120   : > { %v871_v14 = vadd.f32 %v860_v54, %v850_v9  ;;  %v1070_v38 = vrot.slane %v10188_v8, 1  ;;  %v918_v9 = vld [vmem:[%s14859_s3 + $0x98] sm:$0xff] }
 0x121   : > { %887 = vst.msk [vmem:[#allocation2 + $0x18] sm:$0xff] %vm884_vm4, %v878_v12  ;;  %v872_v15 = vadd.f32 %v864_v56, %v851_v13  ;;  %v821_v16 = vpop.f32.mrb[6].mxu0  ;;  %v7969_v12 = vpack.c.bf16 %v914_v60, %v911_v59  ;;  %v8018_v13 = vpack.c.bf16 %v916_v2, %v913_v1  ;;  %v941_v60 = vld [vmem:[%s14859_s3 + $0x150] sm:$0xff]  ;;  %v946_v1 = vld [vmem:[%s14859_s3 + $0x178] sm:$0xff]  ;;  %v948_v2 = vld [vmem:[%s14859_s3 + $0x188] sm:$0xff] }
 0x122   : > { %v10191_v17 = vmax.f32 %v871_v14, 0.0  ;;  %v852_v18 = vmul.f32 %v839_v52, %v821_v16  ;;  %v823_v19 = vpop.f32.mrb[7].mxu0  ;;  %v917_v14 = vld [vmem:[%s14859_s3 + $0x90] sm:$0xff]  ;;  %v920_v16 = vld [vmem:[%s14859_s3 + $0xa8] sm:$0xff] }
 0x123   : > { %v880_v21 = vmax.f32 %v872_v15, 0.0  ;;  %v853_v22 = vmul.f32 %v843_v53, %v823_v19  ;;  %v977_v10 = vld [vmem:[#allocation2] sm:$0xfe]  ;;  %v922_v19 = vld [vmem:[%s14859_s3 + $0xb8] sm:$0xff] }
 0x124   : > { %v873_v23 = vadd.f32 %v860_v54, %v852_v18  ;;  %v978_v26 = vld [vmem:[#allocation2 + $0x8] sm:$0xfe]  ;;  %v1069_v33 = vrot.slane %v977_v10, 1  ;;  %v1075_v53 = vrot.slane %v10191_v17, 1  ;;  %v912_v54 = vld [vmem:[%s14859_s3 + $0x68] sm:$0xff]  ;;  %v919_v18 = vld [vmem:[%s14859_s3 + $0xa0] sm:$0xff] }
 0x125   : > { %889 = vst.msk [vmem:[#allocation2 + $0x28] sm:$0xff] %vm884_vm4, %v880_v21  ;;  %v874_v24 = vadd.f32 %v864_v56, %v853_v22  ;;  %v1072_v36 = vrot.slane %v978_v26, 1  ;;  %v7967_v62 = vpack.c.bf16 %v915_v55, %v912_v54  ;;  %v7971_v22 = vpack.c.bf16 %v921_v11, %v918_v9  ;;  %v894_v10 = vld [vmem:[#allocation2 + $0x8] sm:$0xff]  ;;  %v940_v55 = vld [vmem:[%s14859_s3 + $0x148] sm:$0xff]  ;;  %v950_v11 = vld [vmem:[%s14859_s3 + $0x198] sm:$0xff] }
 0x126   : > { %v881_v25 = vmax.f32 %v873_v23, 0.0  ;;  %v1071_v51 = vsel %vm1068_vm6, %v1069_v33, %v1070_v38  ;;  %v1076_v3 = vsel %vm1068_vm6, %v1070_v38, %v1075_v53  ;;  %v924_v23 = vld [vmem:[%s14859_s3 + $0xc8] sm:$0xff]  ;;  %v8021_v26 = vpack.c.bf16 %v922_v19, %v919_v18  ;;  %v930_v33 = vld [vmem:[%s14859_s3 + $0xf8] sm:$0xff]  ;;  %v937_v54 = vld [vmem:[%s14859_s3 + $0x130] sm:$0xff] }
 0x127   : > { %v882_v28 = vmax.f32 %v874_v24, 0.0  ;;  %v927_v24 = vld [vmem:[%s14859_s3 + $0xe0] sm:$0xff]  ;;  %v7979_v38 = vpack.c.bf16 %v933_v34, %v930_v33  ;;  %v8030_v59 = vpack.c.bf16 %v940_v55, %v937_v54  ;;  %v953_v19 = vld [vmem:[%s14859_s3 + $0x1b0] sm:$0xff]  ;;  %v964_v33 = vld [vmem:[%s14859_s3 + $0x208] sm:$0xff] }
 0x128   : > { %890 = vst [vmem:[#allocation2 + $0x30] sm:$0x3] %v881_v25  ;;  %v10206_v32 = vld [vmem:[#allocation2 + $0x18] sm:$0xff]  ;;  %v7973_v25 = vpack.c.bf16 %v920_v16, %v917_v14  ;;  %v954_v14 = vld [vmem:[%s14859_s3 + $0x1b8] sm:$0xff]  ;;  %v973_v55 = vld [vmem:[%s14859_s3 + $0x250] sm:$0xff] }
 0x129   : > { %892 = vst.msk [vmem:[#allocation2 + $0x38] sm:$0x3] %vm891_vm5, %v882_v28  ;;  %v1073_v37 = vrot.slane %v10206_v32, 1  ;;  %v7975_v28 = vpack.c.bf16 %v927_v24, %v924_v23  ;;  %v955_v23 = vld [vmem:[%s14859_s3 + $0x1c0] sm:$0xff]  ;;  %v958_v24 = vld [vmem:[%s14859_s3 + $0x1d8] sm:$0xff]  ;;  %vm5968_vm5 = vcmask 456704  }
 0x12a   : > { %v8039_v27 = vpack.c.bf16 %v958_v24, %v955_v23  ;;  %v966_v34 = vld [vmem:[%s14859_s3 + $0x218] sm:$0xff]  ;;  %v1426_v23 = vld [vmem:[#allocation2 + $0x8] sm:$0xfc] }
 0x12b   : > { %v1074_v42 = vsel %vm1068_vm6, %v1072_v36, %v1073_v37  ;;  %v8024_v36 = vpack.c.bf16 %v928_v31, %v925_v30  ;;  %v962_v30 = vld [vmem:[%s14859_s3 + $0x1f8] sm:$0xff]  ;;  %v961_v31 = vld [vmem:[%s14859_s3 + $0x1f0] sm:$0xff] }
 0x12c   : > { %6750 = vmatprep.mubr.msk.f32.mxu1 %vm884_vm4, %v1074_v42  ;;  %6753 = vmatprep.mubr.msk.f32.mxu0 %vm884_vm4, %v1074_v42  ;;  %v10232_v52 = vld [vmem:[#allocation2 + $0x28] sm:$0xff]  ;;  %v936_v42 = vld [vmem:[%s14859_s3 + $0x128] sm:$0xff]  ;;  %v974_v54 = vld [vmem:[%s14859_s3 + $0x258] sm:$0xff] }
 0x12d   : > { %1157 = vmatmul.mubr.f32.vlgmr.msra.gmra.mrb[0].mxu1 %v1071_v51  ;;  %1240 = vmatmul.mubr.f32.vlgmr.msra.gmra.mrb[8].mxu0 %v1071_v51  ;;  %v1077_v56 = vrot.slane %v10232_v52, 1  ;;  %v6776_v24 = vld [vmem:[%s14859_s3 + $0x550] sm:$0xff] }
 0x12e   : > { %7962 = vmatpush1.bf16.msra.mxu1 %v7961_v39  ;;  %8013 = vmatpush1.bf16.msra.mxu0 %v8012_v40  ;;  %v932_v39 = vld [vmem:[%s14859_s3 + $0x108] sm:$0xff]  ;;  %v931_v40 = vld [vmem:[%s14859_s3 + $0x100] sm:$0xff] }
 0x12f   : > { %v1078_v61 = vsel %vm1068_vm6, %v1073_v37, %v1077_v56  ;;  %7964 = vmatprep.subr.bf16.mxu1 %v7963_v43  ;;  %8014 = vmatprep.subr.bf16.mxu0 %v14876_v20  ;;  %v979_v0 = vld [vmem:[#allocation2 + $0x30] sm:$0x1]  ;;  %v929_v37 = vld [vmem:[%s14859_s3 + $0xf0] sm:$0xff]  ;;  %v939_v43 = vld [vmem:[%s14859_s3 + $0x140] sm:$0xff]  ;;  %v8027_v45 = vpack.c.bf16 %v934_v41, %v931_v40 }
 0x130   : > { %6751 = vmatprep.mubr.msk.f32.mxu1 %vm884_vm4, %v1078_v61  ;;  %6754 = vmatprep.mubr.msk.f32.mxu0 %vm884_vm4, %v1078_v61  ;;  %v980_v4 = vld [vmem:[#allocation2 + $0x38] sm:$0x1]  ;;  %v1079_v5 = vrot.slane %v979_v0, 1  ;;  %v7981_v44 = vpack.c.bf16 %v932_v39, %v929_v37  ;;  %v7983_v51 = vpack.c.bf16 %v939_v43, %v936_v42  ;;  %v8042_v37 = vpack.c.bf16 %v964_v33, %v961_v31  ;;  %v968_v40 = vld [vmem:[%s14859_s3 + $0x228] sm:$0xff]  ;;  %v970_v42 = vld [vmem:[%s14859_s3 + $0x238] sm:$0xff] }
 0x131   : > { %1163 = vmatmul.mubr.f32.gmra.mrb[2].mxu1 %v1076_v3  ;;  %1245 = vmatmul.mubr.f32.gmra.mrb[10].mxu0 %v1076_v3  ;;  %v1081_v6 = vrot.slane %v980_v4, 1  ;;  %v943_v0 = vld [vmem:[%s14859_s3 + $0x160] sm:$0xff]  ;;  %v972_v43 = vld [vmem:[%s14859_s3 + $0x248] sm:$0xff]  ;;  %v6780_v31 = vld [vmem:[%s14859_s3 + $0x570] sm:$0xff] }
 0x132   : > { %7966 = vmatpush1.bf16.msra.mxu1 %v7965_v57  ;;  %8016 = vmatpush1.bf16.msra.mxu0 %v8015_v58  ;;  %v1080_v21 = vsel %vm1068_vm6, %v1075_v53, %v1079_v5  ;;  %v938_v53 = vld [vmem:[%s14859_s3 + $0x138] sm:$0xff]  ;;  %v945_v57 = vld [vmem:[%s14859_s3 + $0x170] sm:$0xff]  ;;  %v951_v3 = vld [vmem:[%s14859_s3 + $0x1a0] sm:$0xff]  ;;  %v8033_v5 = vpack.c.bf16 %v946_v1, %v943_v0 }
 0x133   : > { %v1082_v15 = vsel %vm1068_vm6, %v1077_v56, %v1081_v6  ;;  %7968 = vmatprep.subr.bf16.mxu1 %v7967_v62  ;;  %8017 = vmatprep.subr.bf16.mxu0 %v14876_v20  ;;  %v942_v56 = vld [vmem:[%s14859_s3 + $0x158] sm:$0xff]  ;;  %v7985_v58 = vpack.c.bf16 %v938_v53, %v935_v49  ;;  %v944_v62 = vld [vmem:[%s14859_s3 + $0x168] sm:$0xff]  ;;  %v947_v6 = vld [vmem:[%s14859_s3 + $0x180] sm:$0xff]  ;;  %v7991_v9 = vpack.c.bf16 %v951_v3, %v948_v2 }
 0x134   : > { %6752 = vmatprep.mubr.msk.f32.mxu1 %vm884_vm4, %v1082_v15  ;;  %6755 = vmatprep.mubr.msk.f32.mxu0 %vm884_vm4, %v1082_v15  ;;  %v7987_v61 = vpack.c.bf16 %v945_v57, %v942_v56  ;;  %v7989_v4 = vpack.c.bf16 %v944_v62, %v941_v60  ;;  %v957_v15 = vld [vmem:[%s14859_s3 + $0x1d0] sm:$0xff]  ;;  %v7993_v16 = vpack.c.bf16 %v950_v11, %v947_v6  ;;  %v967_v41 = vld [vmem:[%s14859_s3 + $0x220] sm:$0xff]  ;;  %v976_v56 = vld [vmem:[%s14859_s3 + $0x268] sm:$0xff] }
 0x135   : > { %1169 = vmatmul.mubr.f32.gmra.mrb[4].mxu1 %v1080_v21  ;;  %1250 = vmatmul.mubr.f32.gmra.mrb[12].mxu0 %v1080_v21  ;;  %v7995_v21 = vpack.c.bf16 %v957_v15, %v954_v14  ;;  %v8045_v49 = vpack.c.bf16 %v970_v42, %v967_v41  ;;  %v6763_v57 = vld [vmem:[%s14859_s3 + $0x4e8] sm:$0xff]  ;;  %v8048_v60 = vpack.c.bf16 %v976_v56, %v973_v55  ;;  %v6762_v62 = vld [vmem:[%s14859_s3 + $0x4e0] sm:$0xff]  ;;  %v6765_v0 = vld [vmem:[%s14859_s3 + $0x4f8] sm:$0xff] }
 0x136   : > { %7970 = vmatpush1.bf16.msra.mxu1 %v7969_v12  ;;  %8019 = vmatpush1.bf16.msra.mxu0 %v8018_v13  ;;  %v949_v12 = vld [vmem:[%s14859_s3 + $0x190] sm:$0xff]  ;;  %v952_v13 = vld [vmem:[%s14859_s3 + $0x1a8] sm:$0xff]  ;;  %v6769_v3 = vld [vmem:[%s14859_s3 + $0x518] sm:$0xff] }
 0x137   : > { %6756 = vmatprep.mubr.msk.f32.mxu1 %vm884_vm4, %v894_v10  ;;  %6759 = vmatprep.mubr.msk.f32.mxu0 %vm884_vm4, %v894_v10  ;;  %v8036_v18 = vpack.c.bf16 %v952_v13, %v949_v12  ;;  %v960_v10 = vld [vmem:[%s14859_s3 + $0x1e8] sm:$0xff]  ;;  %v6764_v1 = vld [vmem:[%s14859_s3 + $0x4f0] sm:$0xff]  ;;  %v6770_v13 = vld [vmem:[%s14859_s3 + $0x520] sm:$0xff] }
 0x138   : > { %7972 = vmatprep.subr.bf16.mxu1 %v7971_v22  ;;  %8020 = vmatprep.subr.bf16.mxu0 %v14876_v20  ;;  %v956_v22 = vld [vmem:[%s14859_s3 + $0x1c8] sm:$0xff]  ;;  %v6773_v14 = vld [vmem:[%s14859_s3 + $0x538] sm:$0xff]  ;;  %v6786_v42 = vld [vmem:[%s14859_s3 + $0x5a0] sm:$0xff] }
 0x139   : > { %v6767_v2 = vld [vmem:[%s14859_s3 + $0x508] sm:$0xff]  ;;  %v6792_v56 = vld [vmem:[%s14859_s3 + $0x5d0] sm:$0xff] }
 0x13a   : > { %7974 = vmatpush1.bf16.msra.mxu1 %v7973_v25  ;;  %8022 = vmatpush1.bf16.msra.mxu0 %v8021_v26  ;;  %v963_v25 = vld [vmem:[%s14859_s3 + $0x200] sm:$0xff]  ;;  %v7997_v26 = vpack.c.bf16 %v956_v22, %v953_v19  ;;  %v8103_v6 = vpack.c.bf16 %v6767_v2, %v6764_v1  ;;  %v6771_v12 = vld [vmem:[%s14859_s3 + $0x528] sm:$0xff]  ;;  %v8106_v19 = vpack.c.bf16 %v6773_v14, %v6770_v13  ;;  %v6804_v14 = vld [vmem:[%s14859_s3 + $0x630] sm:$0xff] }
 0x13b   : > { %7976 = vmatprep.subr.bf16.mxu1 %v7975_v28  ;;  %8023 = vmatprep.subr.bf16.mxu0 %v14876_v20  ;;  %v959_v28 = vld [vmem:[%s14859_s3 + $0x1e0] sm:$0xff]  ;;  %v7999_v29 = vpack.c.bf16 %v963_v25, %v960_v10  ;;  %v6775_v15 = vld [vmem:[%s14859_s3 + $0x548] sm:$0xff]  ;;  %v1517_v25 = vrot.slane %v10206_v32, 2 }
 0x13c   : > { %v6779_v10 = vld [vmem:[%s14859_s3 + $0x568] sm:$0xff]  ;;  %v6798_v2 = vld [vmem:[%s14859_s3 + $0x600] sm:$0xff] }
 0x13e   : > { %7978 = vmatpush1.bf16.msra.mxu1 %v7977_v35  ;;  %8025 = vmatpush1.bf16.msra.mxu0 %v8024_v36  ;;  %v969_v35 = vld [vmem:[%s14859_s3 + $0x230] sm:$0xff]  ;;  %v8001_v36 = vpack.c.bf16 %v962_v30, %v959_v28  ;;  %v8109_v30 = vpack.c.bf16 %v6779_v10, %v6776_v24  ;;  %v6810_v24 = vld [vmem:[%s14859_s3 + $0x660] sm:$0xff] }
 0x13f   : > { %7980 = vmatprep.subr.bf16.mxu1 %v7979_v38  ;;  %8026 = vmatprep.subr.bf16.mxu0 %v14876_v20  ;;  %v965_v38 = vld [vmem:[%s14859_s3 + $0x210] sm:$0xff]  ;;  %v8003_v39 = vpack.c.bf16 %v969_v35, %v966_v34  ;;  %v6783_v34 = vld [vmem:[%s14859_s3 + $0x588] sm:$0xff]  ;;  %v6782_v35 = vld [vmem:[%s14859_s3 + $0x580] sm:$0xff] }
 0x142   : > { %7982 = vmatpush1.bf16.msra.mxu1 %v7981_v44  ;;  %8028 = vmatpush1.bf16.msra.mxu0 %v8027_v45  ;;  %v975_v44 = vld [vmem:[%s14859_s3 + $0x260] sm:$0xff]  ;;  %v8005_v45 = vpack.c.bf16 %v968_v40, %v965_v38  ;;  %v6787_v38 = vld [vmem:[%s14859_s3 + $0x5a8] sm:$0xff]  ;;  %v8064_v40 = vpack.c.bf16 %v6783_v34, %v6780_v31  ;;  %v6816_v34 = vld [vmem:[%s14859_s3 + $0x690] sm:$0xff] }
 0x143   : > { %7984 = vmatprep.subr.bf16.mxu1 %v7983_v51  ;;  %8029 = vmatprep.subr.bf16.mxu0 %v14876_v20  ;;  %v971_v51 = vld [vmem:[%s14859_s3 + $0x240] sm:$0xff]  ;;  %v8007_v53 = vpack.c.bf16 %v975_v44, %v972_v43  ;;  %v6789_v44 = vld [vmem:[%s14859_s3 + $0x5b8] sm:$0xff] }
 0x146   : > { %7986 = vmatpush1.bf16.msra.mxu1 %v7985_v58  ;;  %8031 = vmatpush1.bf16.msra.mxu0 %v8030_v59  ;;  %v6766_v58 = vld [vmem:[%s14859_s3 + $0x500] sm:$0xff]  ;;  %v8009_v59 = vpack.c.bf16 %v974_v54, %v971_v51  ;;  %v6793_v51 = vld [vmem:[%s14859_s3 + $0x5d8] sm:$0xff]  ;;  %v8068_v54 = vpack.c.bf16 %v6789_v44, %v6786_v42 }
 0x147   : > { %7988 = vmatprep.subr.bf16.mxu1 %v7987_v61  ;;  %8032 = vmatprep.subr.bf16.mxu0 %v14876_v20  ;;  %v8050_v61 = vpack.c.bf16 %v6766_v58, %v6763_v57  ;;  %v6795_v58 = vld [vmem:[%s14859_s3 + $0x5e8] sm:$0xff] }
 0x14a   : > { %7990 = vmatpush1.bf16.msra.mxu1 %v7989_v4  ;;  %8034 = vmatpush1.bf16.msra.mxu0 %v8033_v5  ;;  %v6772_v4 = vld [vmem:[%s14859_s3 + $0x530] sm:$0xff]  ;;  %v8052_v5 = vpack.c.bf16 %v6765_v0, %v6762_v62  ;;  %v6802_v62 = vld [vmem:[%s14859_s3 + $0x620] sm:$0xff]  ;;  %v8072_v0 = vpack.c.bf16 %v6795_v58, %v6792_v56 }
 0x14b   : > { %7992 = vmatprep.subr.bf16.mxu1 %v7991_v9  ;;  %8035 = vmatprep.subr.bf16.mxu0 %v14876_v20  ;;  %v6768_v9 = vld [vmem:[%s14859_s3 + $0x510] sm:$0xff]  ;;  %v8054_v11 = vpack.c.bf16 %v6772_v4, %v6769_v3  ;;  %v6801_v4 = vld [vmem:[%s14859_s3 + $0x618] sm:$0xff] }
 0x14e   : > { %7994 = vmatpush1.bf16.msra.mxu1 %v7993_v16  ;;  %8037 = vmatpush1.bf16.msra.mxu0 %v8036_v18  ;;  %v6778_v16 = vld [vmem:[%s14859_s3 + $0x560] sm:$0xff]  ;;  %v8056_v18 = vpack.c.bf16 %v6771_v12, %v6768_v9  ;;  %v6805_v9 = vld [vmem:[%s14859_s3 + $0x638] sm:$0xff]  ;;  %v8076_v12 = vpack.c.bf16 %v6801_v4, %v6798_v2 }
 0x14f   : > { %7996 = vmatprep.subr.bf16.mxu1 %v7995_v21  ;;  %8038 = vmatprep.subr.bf16.mxu0 %v14876_v20  ;;  %v6777_v21 = vld [vmem:[%s14859_s3 + $0x558] sm:$0xff]  ;;  %v8058_v22 = vpack.c.bf16 %v6778_v16, %v6775_v15  ;;  %v6807_v16 = vld [vmem:[%s14859_s3 + $0x648] sm:$0xff] }
 0x150   : > { %v6837_v4 = vld [vmem:[%s14859_s3 + $0x738] sm:$0xff] }
 0x152   : > { %7998 = vmatpush1.bf16.msra.mxu1 %v7997_v26  ;;  %8040 = vmatpush1.bf16.msra.mxu0 %v8039_v27  ;;  %v6781_v26 = vld [vmem:[%s14859_s3 + $0x578] sm:$0xff]  ;;  %v6784_v27 = vld [vmem:[%s14859_s3 + $0x590] sm:$0xff] }
 0x153   : > { %8000 = vmatprep.subr.bf16.mxu1 %v7999_v29  ;;  %8041 = vmatprep.subr.bf16.mxu0 %v14876_v20  ;;  %v1516_v29 = vrot.slane %v1426_v23, 2  ;;  %v8062_v33 = vpack.c.bf16 %v6784_v27, %v6781_v26  ;;  %v6813_v26 = vld [vmem:[%s14859_s3 + $0x678] sm:$0xff]  ;;  %v6812_v27 = vld [vmem:[%s14859_s3 + $0x670] sm:$0xff] }
 0x154   : > { %v8084_v31 = vpack.c.bf16 %v6813_v26, %v6810_v24  ;;  %v6849_v24 = vld [vmem:[%s14861_s5 + $0x910] sm:$0xff]  ;;  %v6860_v26 = vld [vmem:[%s14861_s5 + $0x968] sm:$0xff] }
 0x156   : > { %8002 = vmatpush1.bf16.msra.mxu1 %v8001_v36  ;;  %8043 = vmatpush1.bf16.msra.mxu0 %v8042_v37  ;;  %v6785_v36 = vld [vmem:[%s14859_s3 + $0x598] sm:$0xff]  ;;  %v1518_v37 = vsel %vm1512_vm7, %v1516_v29, %v1517_v25 }
 0x157   : > { %8004 = vmatprep.subr.bf16.mxu1 %v8003_v39  ;;  %8044 = vmatprep.subr.bf16.mxu0 %v14876_v20  ;;  %v6790_v39 = vld [vmem:[%s14859_s3 + $0x5c0] sm:$0xff]  ;;  %v8112_v41 = vpack.c.bf16 %v6785_v36, %v6782_v35  ;;  %v6817_v29 = vld [vmem:[%s14859_s3 + $0x698] sm:$0xff]  ;;  %v6819_v36 = vld [vmem:[%s14859_s3 + $0x6a8] sm:$0xff] }
 0x158   : > { %v8066_v43 = vpack.c.bf16 %v6790_v39, %v6787_v38  ;;  %v6821_v38 = vld [vmem:[%s14859_s3 + $0x6b8] sm:$0xff]  ;;  %v6823_v39 = vld [vmem:[%s14859_s3 + $0x6c8] sm:$0xff] }
 0x15a   : > { %8006 = vmatpush1.bf16.msra.mxu1 %v8005_v45  ;;  %8046 = vmatpush1.bf16.msra.mxu0 %v8045_v49  ;;  %v6788_v45 = vld [vmem:[%s14859_s3 + $0x5b0] sm:$0xff]  ;;  %v6791_v49 = vld [vmem:[%s14859_s3 + $0x5c8] sm:$0xff] }
 0x15b   : > { %8008 = vmatprep.subr.bf16.mxu1 %v8007_v53  ;;  %8047 = vmatprep.subr.bf16.mxu0 %v14876_v20  ;;  %v6796_v53 = vld [vmem:[%s14859_s3 + $0x5f0] sm:$0xff]  ;;  %v8115_v55 = vpack.c.bf16 %v6791_v49, %v6788_v45  ;;  %v6825_v45 = vld [vmem:[%s14859_s3 + $0x6d8] sm:$0xff] }
 0x15c   : > { %v8070_v57 = vpack.c.bf16 %v6796_v53, %v6793_v51  ;;  %v6824_v49 = vld [vmem:[%s14859_s3 + $0x6d0] sm:$0xff]  ;;  %v6827_v51 = vld [vmem:[%s14859_s3 + $0x6e8] sm:$0xff]  ;;  %v6829_v53 = vld [vmem:[%s14859_s3 + $0x6f8] sm:$0xff] }
 0x15d   : > { %v8133_v56 = vpack.c.bf16 %v6827_v51, %v6824_v49  ;;  %v6874_v49 = vld [vmem:[%s14861_s5 + $0x9d8] sm:$0xff]  ;;  %v6880_v51 = vld [vmem:[%s14861_s5 + $0xa08] sm:$0xff] }
 0x15e   : > { %8010 = vmatpush1.bf16.msra.mxu1 %v8009_v59  ;;  %8049 = vmatpush1.bf16.msra.mxu0 %v8048_v60  ;;  %v6794_v59 = vld [vmem:[%s14859_s3 + $0x5e0] sm:$0xff]  ;;  %v6797_v60 = vld [vmem:[%s14859_s3 + $0x5f8] sm:$0xff] }
 0x15f   : > { %8051 = vmatprep.subr.bf16.mxu1 %v8050_v61  ;;  %8102 = vmatprep.subr.bf16.mxu0 %v14876_v20  ;;  %v6799_v61 = vld [vmem:[%s14859_s3 + $0x608] sm:$0xff]  ;;  %v8118_v1 = vpack.c.bf16 %v6797_v60, %v6794_v59  ;;  %v6830_v60 = vld [vmem:[%s14859_s3 + $0x700] sm:$0xff] }
 0x160   : > { %v8074_v3 = vpack.c.bf16 %v6802_v62, %v6799_v61  ;;  %v6831_v59 = vld [vmem:[%s14859_s3 + $0x708] sm:$0xff]  ;;  %v6833_v61 = vld [vmem:[%s14859_s3 + $0x718] sm:$0xff] }
 0x161   : > { %1327 = vmatmul.mubr.f32.vlgmr.msra.gmra.mrb[0].mxu1 %v10184_v63  ;;  %1410 = vmatmul.mubr.f32.vlgmr.msra.gmra.mrb[8].mxu0 %v10184_v63  ;;  %v6774_v63 = vld [vmem:[%s14859_s3 + $0x540] sm:$0xff]  ;;  %v6835_v62 = vld [vmem:[%s14859_s3 + $0x728] sm:$0xff]  ;;  %v8136_v2 = vpack.c.bf16 %v6833_v61, %v6830_v60 }
 0x162   : > { %6757 = vmatprep.mubr.msk.f32.mxu1 %vm884_vm4, %v10206_v32  ;;  %6760 = vmatprep.mubr.msk.f32.mxu0 %vm884_vm4, %v10206_v32  ;;  %v8060_v28 = vpack.c.bf16 %v6777_v21, %v6774_v63  ;;  %v6811_v63 = vld [vmem:[%s14859_s3 + $0x668] sm:$0xff]  ;;  %v6814_v21 = vld [vmem:[%s14859_s3 + $0x680] sm:$0xff] }
 0x163   : > { %8053 = vmatpush1.bf16.msra.mxu1 %v8052_v5  ;;  %8104 = vmatpush1.bf16.msra.mxu0 %v8103_v6  ;;  %v6800_v5 = vld [vmem:[%s14859_s3 + $0x610] sm:$0xff]  ;;  %v6803_v6 = vld [vmem:[%s14859_s3 + $0x628] sm:$0xff]  ;;  %v8082_v10 = vpack.c.bf16 %v6814_v21, %v6811_v63  ;;  %v6847_v21 = vld [vmem:[%s14861_s5 + $0x900] sm:$0xff] }
 0x164   : > { %8055 = vmatprep.subr.bf16.mxu1 %v8054_v11  ;;  %8105 = vmatprep.subr.bf16.mxu0 %v14876_v20  ;;  %v6808_v11 = vld [vmem:[%s14859_s3 + $0x650] sm:$0xff]  ;;  %v8121_v13 = vpack.c.bf16 %v6803_v6, %v6800_v5  ;;  %v6879_v60 = vld [vmem:[%s14861_s5 + $0xa00] sm:$0xff]  ;;  %v6884_v61 = vld [vmem:[%s14861_s5 + $0xa28] sm:$0xff] }
 0x165   : > { %1333 = vmatmul.mubr.f32.gmra.mrb[2].mxu1 %v10188_v8  ;;  %1415 = vmatmul.mubr.f32.gmra.mrb[10].mxu0 %v10188_v8  ;;  %v8078_v15 = vpack.c.bf16 %v6808_v11, %v6805_v9  ;;  %v6836_v6 = vld [vmem:[%s14859_s3 + $0x730] sm:$0xff]  ;;  %v6839_v9 = vld [vmem:[%s14859_s3 + $0x748] sm:$0xff] }
 0x166   : > { %6758 = vmatprep.mubr.msk.f32.mxu1 %vm884_vm4, %v10232_v52  ;;  %6761 = vmatprep.mubr.msk.f32.mxu0 %vm884_vm4, %v10232_v52  ;;  %v6848_v11 = vld [vmem:[%s14861_s5 + $0x908] sm:$0xff] }
 0x167   : > { %8057 = vmatpush1.bf16.msra.mxu1 %v8056_v18  ;;  %8107 = vmatpush1.bf16.msra.mxu0 %v8106_v19  ;;  %v6806_v18 = vld [vmem:[%s14859_s3 + $0x640] sm:$0xff]  ;;  %v6809_v19 = vld [vmem:[%s14859_s3 + $0x658] sm:$0xff] }
 0x168   : > { %8059 = vmatprep.subr.bf16.mxu1 %v8058_v22  ;;  %8108 = vmatprep.subr.bf16.mxu0 %v14876_v20  ;;  %v8080_v22 = vpack.c.bf16 %v6807_v16, %v6804_v14  ;;  %v8124_v23 = vpack.c.bf16 %v6809_v19, %v6806_v18  ;;  %v6856_v14 = vld [vmem:[%s14861_s5 + $0x948] sm:$0xff]  ;;  %v8139_v18 = vpack.c.bf16 %v6839_v9, %v6836_v6  ;;  %v6889_v6 = vld [vmem:[%s14861_s5 + $0xa50] sm:$0xff] }
 0x169   : > { %1339 = vmatmul.mubr.f32.gmra.mrb[4].mxu1 %v10191_v17  ;;  %1420 = vmatmul.mubr.f32.gmra.mrb[12].mxu0 %v10191_v17 }
 0x16a   : > { %6840 = vmatprep.mubr.msk.f32.mxu1 %vm884_vm4, %v1518_v37  ;;  %6843 = vmatprep.mubr.msk.f32.mxu0 %vm884_vm4, %v1518_v37  ;;  %v6818_v37 = vld [vmem:[%s14859_s3 + $0x6a0] sm:$0xff] }
 0x16b   : > { %8061 = vmatpush1.bf16.msra.mxu1 %v8060_v28  ;;  %8110 = vmatpush1.bf16.msra.mxu0 %v8109_v30  ;;  %v6815_v28 = vld [vmem:[%s14859_s3 + $0x688] sm:$0xff]  ;;  %v6820_v30 = vld [vmem:[%s14859_s3 + $0x6b0] sm:$0xff]  ;;  %v8130_v42 = vpack.c.bf16 %v6821_v38, %v6818_v37 }
 0x16c   : > { %8063 = vmatprep.subr.bf16.mxu1 %v8062_v33  ;;  %8111 = vmatprep.subr.bf16.mxu0 %v14876_v20  ;;  %v8127_v33 = vpack.c.bf16 %v6815_v28, %v6812_v27  ;;  %v8086_v35 = vpack.c.bf16 %v6820_v30, %v6817_v29  ;;  %v1521_v27 = vrot.slane %v10232_v52, 2  ;;  %v6866_v28 = vld [vmem:[%s14861_s5 + $0x998] sm:$0xff]  ;;  %v6868_v30 = vld [vmem:[%s14861_s5 + $0x9a8] sm:$0xff]  ;;  %v6861_v37 = vld [vmem:[%s14861_s5 + $0x970] sm:$0xff] }
 0x16d   : > { %v6862_v29 = vld [vmem:[%s14861_s5 + $0x978] sm:$0xff] }
 0x16f   : > { %8065 = vmatpush1.bf16.msra.mxu1 %v8064_v40  ;;  %8113 = vmatpush1.bf16.msra.mxu0 %v8112_v41  ;;  %v6826_v40 = vld [vmem:[%s14859_s3 + $0x6e0] sm:$0xff]  ;;  %v8088_v41 = vpack.c.bf16 %v6819_v36, %v6816_v34  ;;  %v6865_v36 = vld [vmem:[%s14861_s5 + $0x990] sm:$0xff] }
 0x170   : > { %8067 = vmatprep.subr.bf16.mxu1 %v8066_v43  ;;  %8114 = vmatprep.subr.bf16.mxu0 %v14876_v20  ;;  %v6822_v43 = vld [vmem:[%s14859_s3 + $0x6c0] sm:$0xff]  ;;  %v8090_v44 = vpack.c.bf16 %v6826_v40, %v6823_v39  ;;  %v8145_v39 = vpack.c.bf16 %v6866_v28, %v6860_v26  ;;  %v8241_v40 = vpack.c.bf16 %v6868_v30, %v6862_v29  ;;  %v6897_v26 = vld [vmem:[%s14861_s5 + $0xa90] sm:$0xff]  ;;  %v6908_v28 = vld [vmem:[%s14861_s5 + $0xae8] sm:$0xff] }
 0x171   : > { %v6914_v29 = vld [vmem:[%s14861_s5 + $0xb18] sm:$0xff] }
 0x172   : > { %v6910_v30 = vld [vmem:[%s14861_s5 + $0xaf8] sm:$0xff] }
 0x173   : > { %8069 = vmatpush1.bf16.msra.mxu1 %v8068_v54  ;;  %8116 = vmatpush1.bf16.msra.mxu0 %v8115_v55  ;;  %v6832_v54 = vld [vmem:[%s14859_s3 + $0x710] sm:$0xff]  ;;  %v8092_v55 = vpack.c.bf16 %v6825_v45, %v6822_v43  ;;  %v6878_v43 = vld [vmem:[%s14861_s5 + $0x9f8] sm:$0xff] }
 0x174   : > { %8071 = vmatprep.subr.bf16.mxu1 %v8070_v57  ;;  %8117 = vmatprep.subr.bf16.mxu0 %v14876_v20  ;;  %v6828_v57 = vld [vmem:[%s14859_s3 + $0x6f0] sm:$0xff]  ;;  %v8094_v58 = vpack.c.bf16 %v6832_v54, %v6829_v53  ;;  %v1427_v45 = vld [vmem:[#allocation2 + $0x30] sm:$0x3] }
 0x175   : > { %v6877_v54 = vld [vmem:[%s14861_s5 + $0x9f0] sm:$0xff] }
 0x177   : > { %8073 = vmatpush1.bf16.msra.mxu1 %v8072_v0  ;;  %8119 = vmatpush1.bf16.msra.mxu0 %v8118_v1  ;;  %v6838_v0 = vld [vmem:[%s14859_s3 + $0x740] sm:$0xff]  ;;  %v8096_v1 = vpack.c.bf16 %v6831_v59, %v6828_v57  ;;  %v6873_v59 = vld [vmem:[%s14861_s5 + $0x9d0] sm:$0xff] }
 0x178   : > { %8075 = vmatprep.subr.bf16.mxu1 %v8074_v3  ;;  %8120 = vmatprep.subr.bf16.mxu0 %v14876_v20  ;;  %v6834_v3 = vld [vmem:[%s14859_s3 + $0x720] sm:$0xff]  ;;  %v8098_v5 = vpack.c.bf16 %v6838_v0, %v6835_v62  ;;  %v6890_v0 = vld [vmem:[%s14861_s5 + $0xa58] sm:$0xff] }
 0x179   : > { %v8100_v16 = vpack.c.bf16 %v6837_v4, %v6834_v3  ;;  %v8247_v4 = vpack.c.bf16 %v6879_v60, %v6873_v59  ;;  %v6931_v59 = vld [vmem:[%s14861_s5 + $0xba0] sm:$0xff]  ;;  %v6937_v60 = vld [vmem:[%s14861_s5 + $0xbd0] sm:$0xff] }
 0x17b   : > { %8077 = vmatpush1.bf16.msra.mxu1 %v8076_v12  ;;  %8122 = vmatpush1.bf16.msra.mxu0 %v8121_v13  ;;  %v6854_v12 = vld [vmem:[%s14861_s5 + $0x938] sm:$0xff] }
 0x17c   : > { %8079 = vmatprep.subr.bf16.mxu1 %v8078_v15  ;;  %8123 = vmatprep.subr.bf16.mxu0 %v14876_v20  ;;  %v6850_v13 = vld [vmem:[%s14861_s5 + $0x918] sm:$0xff]  ;;  %v1425_v15 = vld [vmem:[#allocation2] sm:$0xfc]  ;;  %v8141_v19 = vpack.c.bf16 %v6854_v12, %v6848_v11  ;;  %v8153_v11 = vpack.c.bf16 %v6890_v0, %v6884_v61  ;;  %v6933_v0 = vld [vmem:[%s14861_s5 + $0xbb0] sm:$0xff] }
 0x17d   : > { %v8237_v63 = vpack.c.bf16 %v6856_v14, %v6850_v13  ;;  %v6885_v13 = vld [vmem:[%s14861_s5 + $0xa30] sm:$0xff]  ;;  %v6891_v14 = vld [vmem:[%s14861_s5 + $0xa60] sm:$0xff] }
 0x17f   : > { %8081 = vmatpush1.bf16.msra.mxu1 %v8080_v22  ;;  %8125 = vmatpush1.bf16.msra.mxu0 %v8124_v23  ;;  %v6853_v22 = vld [vmem:[%s14861_s5 + $0x930] sm:$0xff]  ;;  %v1513_v23 = vrot.slane %v1425_v15, 2  ;;  %v6896_v15 = vld [vmem:[%s14861_s5 + $0xa88] sm:$0xff] }
 0x180   : > { %8083 = vmatprep.subr.bf16.mxu1 %v8082_v10  ;;  %8126 = vmatprep.subr.bf16.mxu0 %v14876_v20  ;;  %v6855_v10 = vld [vmem:[%s14861_s5 + $0x940] sm:$0xff]  ;;  %v8143_v52 = vpack.c.bf16 %v6853_v22, %v6847_v21  ;;  %v8251_v21 = vpack.c.bf16 %v6891_v14, %v6885_v13 }
 0x181   : > { %v8239_v34 = vpack.c.bf16 %v6855_v10, %v6849_v24  ;;  %v6895_v22 = vld [vmem:[%s14861_s5 + $0xa80] sm:$0xff] }
 0x183   : > { %8085 = vmatpush1.bf16.msra.mxu1 %v8084_v31  ;;  %8128 = vmatpush1.bf16.msra.mxu0 %v8127_v33  ;;  %v1514_v31 = vrot.slane %v10188_v8, 2  ;;  %v1428_v33 = vld [vmem:[#allocation2 + $0x38] sm:$0x3]  ;;  %v1519_v8 = vrot.slane %v10191_v17, 2  ;;  %v1522_v17 = vsel %vm1512_vm7, %v1517_v25, %v1521_v27 }
 0x184   : > { %8087 = vmatprep.subr.bf16.mxu1 %v8086_v35  ;;  %8129 = vmatprep.subr.bf16.mxu0 %v14876_v20  ;;  %v6859_v35 = vld [vmem:[%s14861_s5 + $0x960] sm:$0xff] }
 0x185   : > { %v1515_v38 = vsel %vm1512_vm7, %v1513_v23, %v1514_v31  ;;  %v8147_v53 = vpack.c.bf16 %v6865_v36, %v6859_v35  ;;  %v6871_v25 = vld [vmem:[%s14861_s5 + $0x9c0] sm:$0xff]  ;;  %v6901_v23 = vld [vmem:[%s14861_s5 + $0xab0] sm:$0xff]  ;;  %v8161_v36 = vpack.c.bf16 %v6914_v29, %v6908_v28 }
 0x186   : > { %v8151_v3 = vpack.c.bf16 %v6877_v54, %v6871_v25  ;;  %v6913_v35 = vld [vmem:[%s14861_s5 + $0xb10] sm:$0xff]  ;;  %v6932_v25 = vld [vmem:[%s14861_s5 + $0xba8] sm:$0xff]  ;;  %v6938_v54 = vld [vmem:[%s14861_s5 + $0xbd8] sm:$0xff] }
 0x187   : > { %8089 = vmatpush1.bf16.msra.mxu1 %v8088_v41  ;;  %8131 = vmatpush1.bf16.msra.mxu0 %v8130_v42  ;;  %v6867_v41 = vld [vmem:[%s14861_s5 + $0x9a0] sm:$0xff]  ;;  %v6872_v42 = vld [vmem:[%s14861_s5 + $0x9c8] sm:$0xff]  ;;  %v8169_v61 = vpack.c.bf16 %v6938_v54, %v6932_v25  ;;  %v6957_v28 = vld [vmem:[%s14861_s5 + $0xc70] sm:$0xff] }
 0x188   : > { %8091 = vmatprep.subr.bf16.mxu1 %v8090_v44  ;;  %8132 = vmatprep.subr.bf16.mxu0 %v14876_v20  ;;  %v1525_v44 = vrot.slane %v1428_v33, 2  ;;  %v8243_v32 = vpack.c.bf16 %v6867_v41, %v6861_v37  ;;  %v8149_v57 = vpack.c.bf16 %v6878_v43, %v6872_v42  ;;  %v8159_v33 = vpack.c.bf16 %v6901_v23, %v6895_v22  ;;  %v6922_v41 = vld [vmem:[%s14861_s5 + $0xb58] sm:$0xff]  ;;  %v6928_v42 = vld [vmem:[%s14861_s5 + $0xb88] sm:$0xff]  ;;  %v6963_v29 = vld [vmem:[%s14861_s5 + $0xca0] sm:$0xff] }
 0x189   : > { %v6981_v54 = vld [vmem:[%s14861_s5 + $0xd30] sm:$0xff] }
 0x18a   : > { %v1526_v62 = vsel %vm1512_vm7, %v1521_v27, %v1525_v44  ;;  %v6903_v27 = vld [vmem:[%s14861_s5 + $0xac0] sm:$0xff] }
 0x18b   : > { %8093 = vmatpush1.bf16.msra.mxu1 %v8092_v55  ;;  %8134 = vmatpush1.bf16.msra.mxu0 %v8133_v56  ;;  %v1520_v55 = vsel %vm1512_vm7, %v1514_v31, %v1519_v8  ;;  %v1523_v56 = vrot.slane %v1427_v45, 2  ;;  %v6916_v31 = vld [vmem:[%s14861_s5 + $0xb28] sm:$0xff]  ;;  %v6919_v44 = vld [vmem:[%s14861_s5 + $0xb40] sm:$0xff]  ;;  %v6925_v45 = vld [vmem:[%s14861_s5 + $0xb70] sm:$0xff] }
 0x18c   : > { %8095 = vmatprep.subr.bf16.mxu1 %v8094_v58  ;;  %8135 = vmatprep.subr.bf16.mxu0 %v14876_v20  ;;  %v8245_v58 = vpack.c.bf16 %v6880_v51, %v6874_v49  ;;  %v8257_v37 = vpack.c.bf16 %v6916_v31, %v6910_v30  ;;  %v8261_v51 = vpack.c.bf16 %v6928_v42, %v6922_v41  ;;  %v6968_v30 = vld [vmem:[%s14861_s5 + $0xcc8] sm:$0xff]  ;;  %v6974_v31 = vld [vmem:[%s14861_s5 + $0xcf8] sm:$0xff]  ;;  %v6975_v41 = vld [vmem:[%s14861_s5 + $0xd00] sm:$0xff] }
 0x18d   : > { %v1524_v9 = vsel %vm1512_vm7, %v1519_v8, %v1523_v56  ;;  %v6915_v8 = vld [vmem:[%s14861_s5 + $0xb20] sm:$0xff]  ;;  %v6940_v56 = vld [vmem:[%s14861_s5 + $0xbe8] sm:$0xff] }
 0x18f   : > { %8097 = vmatpush1.bf16.msra.mxu1 %v8096_v1  ;;  %8137 = vmatpush1.bf16.msra.mxu0 %v8136_v2  ;;  %v6886_v1 = vld [vmem:[%s14861_s5 + $0xa38] sm:$0xff]  ;;  %v6892_v2 = vld [vmem:[%s14861_s5 + $0xa68] sm:$0xff] }
 0x190   : > { %8099 = vmatprep.subr.bf16.mxu1 %v8098_v5  ;;  %8138 = vmatprep.subr.bf16.mxu0 %v14876_v20  ;;  %v6883_v5 = vld [vmem:[%s14861_s5 + $0xa20] sm:$0xff]  ;;  %v8249_v12 = vpack.c.bf16 %v6892_v2, %v6886_v1  ;;  %v6944_v2 = vld [vmem:[%s14861_s5 + $0xc08] sm:$0xff] }
 0x191   : > { %v6939_v1 = vld [vmem:[%s14861_s5 + $0xbe0] sm:$0xff] }
 0x193   : > { %8101 = vmatpush1.bf16.msra.mxu1 %v8100_v16  ;;  %8140 = vmatpush1.bf16.msra.mxu0 %v8139_v18  ;;  %v6902_v16 = vld [vmem:[%s14861_s5 + $0xab8] sm:$0xff] }
 0x194   : > { %8142 = vmatprep.subr.bf16.mxu1 %v8141_v19  ;;  %8238 = vmatprep.subr.bf16.mxu0 %v8237_v63  ;;  %v6898_v18 = vld [vmem:[%s14861_s5 + $0xa98] sm:$0xff]  ;;  %v6904_v19 = vld [vmem:[%s14861_s5 + $0xac8] sm:$0xff]  ;;  %v8155_v63 = vpack.c.bf16 %v6889_v6, %v6883_v5  ;;  %v8157_v24 = vpack.c.bf16 %v6902_v16, %v6896_v15  ;;  %v8171_v6 = vpack.c.bf16 %v6937_v60, %v6931_v59  ;;  %v6945_v15 = vld [vmem:[%s14861_s5 + $0xc10] sm:$0xff] }
 0x195   : > { %v8253_v10 = vpack.c.bf16 %v6904_v19, %v6898_v18  ;;  %v6952_v5 = vld [vmem:[%s14861_s5 + $0xc48] sm:$0xff]  ;;  %v6951_v16 = vld [vmem:[%s14861_s5 + $0xc40] sm:$0xff]  ;;  %v6962_v19 = vld [vmem:[%s14861_s5 + $0xc98] sm:$0xff] }
 0x196   : > { %1601 = vmatmul.mubr.f32.vlgmr.msra.gmra.mrb[0].mxu1 %v1515_v38  ;;  %1684 = vmatmul.mubr.f32.vlgmr.msra.gmra.mrb[8].mxu0 %v1515_v38  ;;  %v6909_v38 = vld [vmem:[%s14861_s5 + $0xaf0] sm:$0xff]  ;;  %v6956_v18 = vld [vmem:[%s14861_s5 + $0xc68] sm:$0xff]  ;;  %v8271_v23 = vpack.c.bf16 %v6951_v16, %v6945_v15  ;;  %v6994_v60 = vld [vmem:[%s14861_s5 + $0xd98] sm:$0xff] }
 0x197   : > { %6841 = vmatprep.mubr.msk.f32.mxu1 %vm884_vm4, %v1522_v17  ;;  %6844 = vmatprep.mubr.msk.f32.mxu0 %vm884_vm4, %v1522_v17  ;;  %v8259_v17 = vpack.c.bf16 %v6915_v8, %v6909_v38  ;;  %v6967_v38 = vld [vmem:[%s14861_s5 + $0xcc0] sm:$0xff]  ;;  %v6973_v8 = vld [vmem:[%s14861_s5 + $0xcf0] sm:$0xff] }
 0x198   : > { %8144 = vmatpush1.bf16.msra.mxu1 %v8143_v52  ;;  %8240 = vmatpush1.bf16.msra.mxu0 %v8239_v34  ;;  %v8255_v52 = vpack.c.bf16 %v6903_v27, %v6897_v26  ;;  %v6907_v34 = vld [vmem:[%s14861_s5 + $0xae0] sm:$0xff]  ;;  %v8177_v26 = vpack.c.bf16 %v6962_v19, %v6956_v18  ;;  %v7009_v15 = vld [vmem:[%s14861_s5 + $0xe10] sm:$0xff] }
 0x199   : > { %8146 = vmatprep.subr.bf16.mxu1 %v8145_v39  ;;  %8242 = vmatprep.subr.bf16.mxu0 %v8241_v40  ;;  %v6920_v39 = vld [vmem:[%s14861_s5 + $0xb48] sm:$0xff]  ;;  %v6926_v40 = vld [vmem:[%s14861_s5 + $0xb78] sm:$0xff]  ;;  %v8163_v43 = vpack.c.bf16 %v6913_v35, %v6907_v34  ;;  %v8275_v35 = vpack.c.bf16 %v6963_v29, %v6957_v28  ;;  %v7005_v19 = vld [vmem:[%s14861_s5 + $0xdf0] sm:$0xff] }
 0x19a   : > { %1607 = vmatmul.mubr.f32.gmra.mrb[2].mxu1 %v1520_v55  ;;  %1689 = vmatmul.mubr.f32.gmra.mrb[10].mxu0 %v1520_v55  ;;  %v8165_v49 = vpack.c.bf16 %v6926_v40, %v6920_v39  ;;  %v6934_v55 = vld [vmem:[%s14861_s5 + $0xbb8] sm:$0xff]  ;;  %v6969_v39 = vld [vmem:[%s14861_s5 + $0xcd0] sm:$0xff]  ;;  %v8183_v40 = vpack.c.bf16 %v6973_v8, %v6967_v38  ;;  %v7036_v38 = vld [vmem:[%s14861_s5 + $0xee8] sm:$0xff] }
 0x19b   : > { %6842 = vmatprep.mubr.msk.f32.mxu1 %vm884_vm4, %v1526_v62  ;;  %6845 = vmatprep.mubr.msk.f32.mxu0 %vm884_vm4, %v1526_v62  ;;  %v8265_v62 = vpack.c.bf16 %v6940_v56, %v6934_v55  ;;  %v8279_v42 = vpack.c.bf16 %v6975_v41, %v6969_v39  ;;  %v6987_v55 = vld [vmem:[%s14861_s5 + $0xd60] sm:$0xff]  ;;  %v7021_v28 = vld [vmem:[%s14861_s5 + $0xe70] sm:$0xff]  ;;  %vm9655_vm4 = vmmov 0  }
 0x19c   : > { %8148 = vmatpush1.bf16.msra.mxu1 %v8147_v53  ;;  %8244 = vmatpush1.bf16.msra.mxu0 %v8243_v32  ;;  %v6921_v53 = vld [vmem:[%s14861_s5 + $0xb50] sm:$0xff]  ;;  %v6927_v32 = vld [vmem:[%s14861_s5 + $0xb80] sm:$0xff]  ;;  %v8283_v56 = vpack.c.bf16 %v6987_v55, %v6981_v54 }
 0x19d   : > { %8150 = vmatprep.subr.bf16.mxu1 %v8149_v57  ;;  %8246 = vmatprep.subr.bf16.mxu0 %v8245_v58  ;;  %v8167_v57 = vpack.c.bf16 %v6925_v45, %v6919_v44  ;;  %v8263_v58 = vpack.c.bf16 %v6927_v32, %v6921_v53  ;;  %v6982_v44 = vld [vmem:[%s14861_s5 + $0xd38] sm:$0xff]  ;;  %v6985_v53 = vld [vmem:[%s14861_s5 + $0xd50] sm:$0xff]  ;;  %v7027_v8 = vld [vmem:[%s14861_s5 + $0xea0] sm:$0xff] }
 0x19e   : > { %1613 = vmatmul.mubr.f32.gmra.mrb[4].mxu1 %v1524_v9  ;;  %1694 = vmatmul.mubr.f32.gmra.mrb[12].mxu0 %v1524_v9  ;;  %v8267_v9 = vpack.c.bf16 %v6939_v1, %v6933_v0  ;;  %v6997_v1 = vld [vmem:[%s14861_s5 + $0xdb0] sm:$0xff]  ;;  %v1708_v54 = vld [vmem:[%s14860_s4] ss:$2 sm:$0x7] }
 0x19f   : > { %v7033_v39 = vld [vmem:[%s14861_s5 + $0xed0] sm:$0xff]  ;;  %v6846_v55 = vld [vmem:[%s14860_s4 + $0x1] ss:$2 sm:$0x7] }
 0x1a0   : > { %8152 = vmatpush1.bf16.msra.mxu1 %v8151_v3  ;;  %8248 = vmatpush1.bf16.msra.mxu0 %v8247_v4  ;;  %v6950_v3 = vld [vmem:[%s14861_s5 + $0xc38] sm:$0xff]  ;;  %v8203_v41 = vpack.c.bf16 %v7033_v39, %v7027_v8  ;;  %v7039_v8 = vld [vmem:[%s14861_s5 + $0xf00] sm:$0xff] }
 0x1a1   : > { %8154 = vmatprep.subr.bf16.mxu1 %v8153_v11  ;;  %8250 = vmatprep.subr.bf16.mxu0 %v8249_v12  ;;  %v6946_v4 = vld [vmem:[%s14861_s5 + $0xc18] sm:$0xff]  ;;  %v6943_v11 = vld [vmem:[%s14861_s5 + $0xc00] sm:$0xff]  ;;  %v6949_v12 = vld [vmem:[%s14861_s5 + $0xc30] sm:$0xff]  ;;  %v8173_v13 = vpack.c.bf16 %v6950_v3, %v6944_v2 }
 0x1a2   : > { %v8269_v14 = vpack.c.bf16 %v6952_v5, %v6946_v4  ;;  %v8175_v22 = vpack.c.bf16 %v6949_v12, %v6943_v11  ;;  %v6993_v2 = vld [vmem:[%s14861_s5 + $0xd90] sm:$0xff]  ;;  %v6999_v3 = vld [vmem:[%s14861_s5 + $0xdc0] sm:$0xff]  ;;  %v7006_v11 = vld [vmem:[%s14861_s5 + $0xdf8] sm:$0xff] }
 0x1a3   : > { %v8287_v5 = vpack.c.bf16 %v6999_v3, %v6993_v2 }
 0x1a4   : > { %8156 = vmatpush1.bf16.msra.mxu1 %v8155_v63  ;;  %8252 = vmatpush1.bf16.msra.mxu0 %v8251_v21  ;;  %v6958_v63 = vld [vmem:[%s14861_s5 + $0xc78] sm:$0xff]  ;;  %v6964_v21 = vld [vmem:[%s14861_s5 + $0xca8] sm:$0xff] }
 0x1a5   : > { %8158 = vmatprep.subr.bf16.mxu1 %v8157_v24  ;;  %8254 = vmatprep.subr.bf16.mxu0 %v8253_v10  ;;  %v6955_v24 = vld [vmem:[%s14861_s5 + $0xc60] sm:$0xff]  ;;  %v6961_v10 = vld [vmem:[%s14861_s5 + $0xc90] sm:$0xff]  ;;  %v8273_v27 = vpack.c.bf16 %v6964_v21, %v6958_v63 }
 0x1a6   : > { %v8179_v34 = vpack.c.bf16 %v6961_v10, %v6955_v24  ;;  %v7011_v63 = vld [vmem:[%s14861_s5 + $0xe20] sm:$0xff]  ;;  %v7018_v24 = vld [vmem:[%s14861_s5 + $0xe58] sm:$0xff] }
 0x1a7   : > { %v8291_v21 = vpack.c.bf16 %v7011_v63, %v7005_v19 }
 0x1a8   : > { %8160 = vmatpush1.bf16.msra.mxu1 %v8159_v33  ;;  %8256 = vmatpush1.bf16.msra.mxu0 %v8255_v52  ;;  %v6970_v33 = vld [vmem:[%s14861_s5 + $0xcd8] sm:$0xff]  ;;  %v6976_v52 = vld [vmem:[%s14861_s5 + $0xd08] sm:$0xff] }
 0x1a9   : > { %8162 = vmatprep.subr.bf16.mxu1 %v8161_v36  ;;  %8258 = vmatprep.subr.bf16.mxu0 %v8257_v37  ;;  %v8181_v36 = vpack.c.bf16 %v6974_v31, %v6968_v30  ;;  %v8277_v37 = vpack.c.bf16 %v6976_v52, %v6970_v33  ;;  %v7017_v31 = vld [vmem:[%s14861_s5 + $0xe50] sm:$0xff]  ;;  %v7023_v33 = vld [vmem:[%s14861_s5 + $0xe80] sm:$0xff] }
 0x1aa   : > { %v8295_v52 = vpack.c.bf16 %v7023_v33, %v7017_v31 }
 0x1ac   : > { %8164 = vmatpush1.bf16.msra.mxu1 %v8163_v43  ;;  %8260 = vmatpush1.bf16.msra.mxu0 %v8259_v17  ;;  %v6980_v43 = vld [vmem:[%s14861_s5 + $0xd28] sm:$0xff]  ;;  %v6986_v17 = vld [vmem:[%s14861_s5 + $0xd58] sm:$0xff] }
 0x1ad   : > { %8166 = vmatprep.subr.bf16.mxu1 %v8165_v49  ;;  %8262 = vmatprep.subr.bf16.mxu0 %v8261_v51  ;;  %v8185_v45 = vpack.c.bf16 %v6986_v17, %v6980_v43  ;;  %v6988_v49 = vld [vmem:[%s14861_s5 + $0xd68] sm:$0xff]  ;;  %v6979_v51 = vld [vmem:[%s14861_s5 + $0xd20] sm:$0xff] }
 0x1ae   : > { %v8281_v32 = vpack.c.bf16 %v6988_v49, %v6982_v44  ;;  %v8187_v25 = vpack.c.bf16 %v6985_v53, %v6979_v51  ;;  %v7035_v43 = vld [vmem:[%s14861_s5 + $0xee0] sm:$0xff]  ;;  %v7040_v44 = vld [vmem:[%s14861_s5 + $0xf08] sm:$0xff]  ;;  %v7042_v49 = vld [vmem:[%s14861_s5 + $0xf18] sm:$0xff] }
 0x1af   : > { %v7048_v53 = vld [vmem:[%s14861_s5 + $0xf48] sm:$0xff] }
 0x1b0   : > { %8168 = vmatpush1.bf16.msra.mxu1 %v8167_v57  ;;  %8264 = vmatpush1.bf16.msra.mxu0 %v8263_v58  ;;  %v6992_v57 = vld [vmem:[%s14861_s5 + $0xd88] sm:$0xff]  ;;  %v6998_v58 = vld [vmem:[%s14861_s5 + $0xdb8] sm:$0xff] }
 0x1b1   : > { %8170 = vmatprep.subr.bf16.mxu1 %v8169_v61  ;;  %8266 = vmatprep.subr.bf16.mxu0 %v8265_v62  ;;  %v8189_v59 = vpack.c.bf16 %v6998_v58, %v6992_v57  ;;  %v7000_v61 = vld [vmem:[%s14861_s5 + $0xdc8] sm:$0xff]  ;;  %v6991_v62 = vld [vmem:[%s14861_s5 + $0xd80] sm:$0xff]  ;;  %v1717_v58 = vrot.slane %v1708_v54, %v10175_v50 }
 0x1b2   : > { %v8285_v0 = vpack.c.bf16 %v7000_v61, %v6994_v60  ;;  %v8191_v4 = vpack.c.bf16 %v6997_v1, %v6991_v62 }
 0x1b4   : > { %8172 = vmatpush1.bf16.msra.mxu1 %v8171_v6  ;;  %8268 = vmatpush1.bf16.msra.mxu0 %v8267_v9  ;;  %v7004_v6 = vld [vmem:[%s14861_s5 + $0xde8] sm:$0xff]  ;;  %v7010_v9 = vld [vmem:[%s14861_s5 + $0xe18] sm:$0xff] }
 0x1b5   : > { %8174 = vmatprep.subr.bf16.mxu1 %v8173_v13  ;;  %8270 = vmatprep.subr.bf16.mxu0 %v8269_v14  ;;  %v8193_v12 = vpack.c.bf16 %v7010_v9, %v7004_v6  ;;  %v7012_v13 = vld [vmem:[%s14861_s5 + $0xe28] sm:$0xff]  ;;  %v7003_v14 = vld [vmem:[%s14861_s5 + $0xde0] sm:$0xff] }
 0x1b6   : > { %v8289_v16 = vpack.c.bf16 %v7012_v13, %v7006_v11  ;;  %v8195_v18 = vpack.c.bf16 %v7009_v15, %v7003_v14 }
 0x1b8   : > { %8176 = vmatpush1.bf16.msra.mxu1 %v8175_v22  ;;  %8272 = vmatpush1.bf16.msra.mxu0 %v8271_v23  ;;  %v7016_v22 = vld [vmem:[%s14861_s5 + $0xe48] sm:$0xff]  ;;  %v7022_v23 = vld [vmem:[%s14861_s5 + $0xe78] sm:$0xff] }
 0x1b9   : > { %8178 = vmatprep.subr.bf16.mxu1 %v8177_v26  ;;  %8274 = vmatprep.subr.bf16.mxu0 %v8273_v27  ;;  %v8197_v10 = vpack.c.bf16 %v7022_v23, %v7016_v22  ;;  %v7024_v26 = vld [vmem:[%s14861_s5 + $0xe88] sm:$0xff]  ;;  %v7015_v27 = vld [vmem:[%s14861_s5 + $0xe40] sm:$0xff] }
 0x1ba   : > { %v8293_v29 = vpack.c.bf16 %v7024_v26, %v7018_v24  ;;  %v8199_v30 = vpack.c.bf16 %v7021_v28, %v7015_v27 }
 0x1bc   : > { %8180 = vmatpush1.bf16.msra.mxu1 %v8179_v34  ;;  %8276 = vmatpush1.bf16.msra.mxu0 %v8275_v35  ;;  %v7028_v34 = vld [vmem:[%s14861_s5 + $0xea8] sm:$0xff]  ;;  %v7034_v35 = vld [vmem:[%s14861_s5 + $0xed8] sm:$0xff] }
 0x1bd   : > { %8182 = vmatprep.subr.bf16.mxu1 %v8181_v36  ;;  %8278 = vmatprep.subr.bf16.mxu0 %v8277_v37  ;;  %v7030_v36 = vld [vmem:[%s14861_s5 + $0xeb8] sm:$0xff]  ;;  %v8201_v37 = vpack.c.bf16 %v7034_v35, %v7028_v34 }
 0x1c0   : > { %8184 = vmatpush1.bf16.msra.mxu1 %v8183_v40  ;;  %8280 = vmatpush1.bf16.msra.mxu0 %v8279_v42  ;;  %v8297_v40 = vpack.c.bf16 %v7036_v38, %v7030_v36  ;;  %v7029_v42 = vld [vmem:[%s14861_s5 + $0xeb0] sm:$0xff] }
 0x1c1   : > { %8186 = vmatprep.subr.bf16.mxu1 %v8185_v45  ;;  %8282 = vmatprep.subr.bf16.mxu0 %v8281_v32  ;;  %v8299_v17 = vpack.c.bf16 %v7035_v43, %v7029_v42  ;;  %v7046_v45 = vld [vmem:[%s14861_s5 + $0xf38] sm:$0xff]  ;;  %v8301_v32 = vpack.c.bf16 %v7048_v53, %v7042_v49  ;;  %v7041_v42 = vld [vmem:[%s14861_s5 + $0xf10] sm:$0xff]  ;;  %v7047_v43 = vld [vmem:[%s14861_s5 + $0xf40] sm:$0xff] }
 0x1c2   : > { %v8205_v51 = vpack.c.bf16 %v7046_v45, %v7040_v44  ;;  %v7052_v45 = vld [vmem:[%s14861_s5 + $0xf68] sm:$0xff]  ;;  %v7058_v49 = vld [vmem:[%s14861_s5 + $0xf98] sm:$0xff] }
 0x1c4   : > { %8188 = vmatpush1.bf16.msra.mxu1 %v8187_v25  ;;  %8284 = vmatpush1.bf16.msra.mxu0 %v8283_v56  ;;  %v11134_v25 = vsub.s32 2, %v10166_v47  ;;  %v1713_v56 = vrot.slane %v1708_v54, %v10169_v48 }
 0x1c5   : > { %8190 = vmatprep.subr.bf16.mxu1 %v8189_v59  ;;  %8286 = vmatprep.subr.bf16.mxu0 %v8285_v0  ;;  %v1740_v59 = vrot.slane %v6846_v55, %v10169_v48  ;;  %v1744_v0 = vrot.slane %v6846_v55, %v10175_v50 }
 0x1c6   : > { %v1721_v57 = vrot.slane %v1708_v54, %v11134_v25  ;;  %v1748_v60 = vrot.slane %v6846_v55, %v11134_v25  ;;  %v7060_v54 = vld [vmem:[%s14861_s5 + $0xfa8] sm:$0xff] }
 0x1c8   : > { %8192 = vmatpush1.bf16.msra.mxu1 %v8191_v4  ;;  %8288 = vmatpush1.bf16.msra.mxu0 %v8287_v5 }
 0x1c9   : > { %8194 = vmatprep.subr.bf16.mxu1 %v8193_v12  ;;  %8290 = vmatprep.subr.bf16.mxu0 %v8289_v16 }
 0x1cc   : > { %8196 = vmatpush1.bf16.msra.mxu1 %v8195_v18  ;;  %8292 = vmatpush1.bf16.msra.mxu0 %v8291_v21 }
 0x1cd   : > { %8198 = vmatprep.subr.bf16.mxu1 %v8197_v10  ;;  %8294 = vmatprep.subr.bf16.mxu0 %v8293_v29 }
 0x1d0   : > { %8200 = vmatpush1.bf16.msra.mxu1 %v8199_v30  ;;  %8296 = vmatpush1.bf16.msra.mxu0 %v8295_v52 }
 0x1d1   : > { %8202 = vmatprep.subr.bf16.mxu1 %v8201_v37  ;;  %8298 = vmatprep.subr.bf16.mxu0 %v8297_v40 }
 0x1d4   : > { %8204 = vmatpush1.bf16.msra.mxu1 %v8203_v41  ;;  %8300 = vmatpush1.bf16.msra.mxu0 %v8299_v17  ;;  %v7045_v41 = vld [vmem:[%s14861_s5 + $0xf30] sm:$0xff] }
 0x1d5   : > { %8206 = vmatprep.subr.bf16.mxu1 %v8205_v51  ;;  %8302 = vmatprep.subr.bf16.mxu0 %v8301_v32  ;;  %v7054_v32 = vld [vmem:[%s14861_s5 + $0xf78] sm:$0xff] }
 0x269   : > { %v1602_v61 = vpop.f32.mrb[0].mxu1  ;;  %v1685_v62 = vpop.f32.mrb[8].mxu0 }
 0x26a   : > { %v1725_v1 = vmul.f32 %v1713_v56, %v1602_v61  ;;  %v1727_v2 = vmul.f32 %v1721_v57, %v1685_v62  ;;  %v1604_v3 = vpop.f32.mrb[1].mxu1  ;;  %v1687_v4 = vpop.f32.mrb[9].mxu0  ;;  %v7057_v61 = vld [vmem:[%s14861_s5 + $0xf90] sm:$0xff] }
 0x26b   : > { %v1726_v5 = vmul.f32 %v1717_v58, %v1604_v3  ;;  %v7059_v3 = vld [vmem:[%s14861_s5 + $0xfa0] sm:$0xff]  ;;  %v7064_v4 = vld [vmem:[%s14861_s5 + $0xfc8] sm:$0xff] }
 0x26c   : > { %v1752_v6 = vadd.f32 %v1740_v59, %v1725_v1  ;;  %v1754_v9 = vadd.f32 %v1748_v60, %v1727_v2  ;;  %v8305_v1 = vpack.c.bf16 %v7060_v54, %v7054_v32  ;;  %v7053_v2 = vld [vmem:[%s14861_s5 + $0xf70] sm:$0xff]  ;;  %v7087_v32 = vld [vmem:[%s14861_s5 + $0x1080] sm:$0xff] }
 0x26d   : > { %v11148_v11 = vadd.f32 %v1744_v0, %v1726_v5  ;;  %v1608_v12 = vpop.f32.mrb[2].mxu1  ;;  %v1690_v13 = vpop.f32.mrb[10].mxu0  ;;  %v7093_v54 = vld [vmem:[%s14861_s5 + $0x10b0] sm:$0xff] }
 0x26e   : > { %v1761_v14 = vmax.f32 %v1752_v6, 0.0  ;;  %v1763_v15 = vmax.f32 %v1754_v9, 0.0  ;;  %v1728_v16 = vmul.f32 %v1713_v56, %v1608_v12  ;;  %v1730_v18 = vmul.f32 %v1721_v57, %v1690_v13  ;;  %v1610_v19 = vpop.f32.mrb[3].mxu1  ;;  %v1692_v63 = vpop.f32.mrb[11].mxu0  ;;  %v7070_v6 = vld [vmem:[%s14861_s5 + $0xff8] sm:$0xff]  ;;  %v7072_v12 = vld [vmem:[%s14861_s5 + $0x1008] sm:$0xff] }
 0x26f   : > { %v1762_v21 = vmax.f32 %v11148_v11, 0.0  ;;  %v1729_v22 = vmul.f32 %v1717_v58, %v1610_v19  ;;  %v7066_v9 = vld [vmem:[%s14861_s5 + $0xfd8] sm:$0xff]  ;;  %v7069_v63 = vld [vmem:[%s14861_s5 + $0xff0] sm:$0xff]  ;;  %v1844_v11 = vld [vmem:[%s14861_s5 + $0x1c0] sm:$0xff] }
 0x270   : > { %1770 = vst [vmem:[#allocation3] sm:$0xff] %v1761_v14  ;;  %1772 = vst [vmem:[#allocation3 + $0x10] sm:$0xff] %v1763_v15  ;;  %v1755_v23 = vadd.f32 %v1740_v59, %v1728_v16  ;;  %v11151_v24 = vadd.f32 %v1748_v60, %v1730_v18  ;;  %v8307_v14 = vpack.c.bf16 %v7059_v3, %v7053_v2  ;;  %v7063_v15 = vld [vmem:[%s14861_s5 + $0xfc0] sm:$0xff] }
 0x271   : > { %1771 = vst [vmem:[#allocation3 + $0x8] sm:$0xff] %v1762_v21  ;;  %v1756_v10 = vadd.f32 %v1744_v0, %v1729_v22  ;;  %v1614_v26 = vpop.f32.mrb[4].mxu1  ;;  %v1695_v27 = vpop.f32.mrb[12].mxu0  ;;  %v8213_v18 = vpack.c.bf16 %v7070_v6, %v7064_v4  ;;  %v8309_v19 = vpack.c.bf16 %v7072_v12, %v7066_v9  ;;  %v7065_v22 = vld [vmem:[%s14861_s5 + $0xfd0] sm:$0xff]  ;;  %v7099_v3 = vld [vmem:[%s14861_s5 + $0x10e0] sm:$0xff] }
 0x272   : > { %v11155_v28 = vmax.f32 %v1755_v23, 0.0  ;;  %v1766_v29 = vmax.f32 %v11151_v24, 0.0  ;;  %v1731_v30 = vmul.f32 %v1713_v56, %v1614_v26  ;;  %v1733_v31 = vmul.f32 %v1721_v57, %v1695_v27  ;;  %v1616_v33 = vpop.f32.mrb[5].mxu1  ;;  %v1697_v52 = vpop.f32.mrb[13].mxu0  ;;  %v7071_v26 = vld [vmem:[%s14861_s5 + $0x1000] sm:$0xff]  ;;  %v7076_v27 = vld [vmem:[%s14861_s5 + $0x1028] sm:$0xff] }
 0x273   : > { %v11158_v34 = vmax.f32 %v1756_v10, 0.0  ;;  %v1732_v35 = vmul.f32 %v1717_v58, %v1616_v33  ;;  %v8207_v58 = vpack.c.bf16 %v7045_v41, %v7039_v8  ;;  %v7078_v33 = vld [vmem:[%s14861_s5 + $0x1038] sm:$0xff]  ;;  %v7084_v52 = vld [vmem:[%s14861_s5 + $0x1068] sm:$0xff]  ;;  %v7081_v8 = vld [vmem:[%s14861_s5 + $0x1050] sm:$0xff] }
 0x274   : > { %1773 = vst [vmem:[#allocation3 + $0x18] sm:$0xff] %v11155_v28  ;;  %1775 = vst [vmem:[#allocation3 + $0x28] sm:$0xff] %v1766_v29  ;;  %v1758_v36 = vadd.f32 %v1740_v59, %v1731_v30  ;;  %v1760_v37 = vadd.f32 %v1748_v60, %v1733_v31  ;;  %v2381_v57 = vrot.slane %v11155_v28, 1  ;;  %v8303_v59 = vpack.c.bf16 %v7047_v43, %v7041_v42  ;;  %v7051_v60 = vld [vmem:[%s14861_s5 + $0xf60] sm:$0xff]  ;;  %v7082_v31 = vld [vmem:[%s14861_s5 + $0x1058] sm:$0xff] }
 0x275   : > { %1774 = vst [vmem:[#allocation3 + $0x20] sm:$0xff] %v11158_v34  ;;  %v1759_v38 = vadd.f32 %v1744_v0, %v1732_v35  ;;  %v2384_v56 = vrot.slane %v11158_v34, 1  ;;  %v8209_v0 = vpack.c.bf16 %v7058_v49, %v7052_v45  ;;  %v8211_v13 = vpack.c.bf16 %v7057_v61, %v7051_v60  ;;  %v7077_v42 = vld [vmem:[%s14861_s5 + $0x1030] sm:$0xff]  ;;  %v7083_v43 = vld [vmem:[%s14861_s5 + $0x1060] sm:$0xff]  ;;  %v7090_v45 = vld [vmem:[%s14861_s5 + $0x1098] sm:$0xff] }
 0x276   : > { %v1767_v39 = vmax.f32 %v1758_v36, 0.0  ;;  %v1769_v40 = vmax.f32 %v1760_v37, 0.0  ;;  %v8215_v36 = vpack.c.bf16 %v7069_v63, %v7063_v15  ;;  %v8311_v37 = vpack.c.bf16 %v7071_v26, %v7065_v22  ;;  %v7096_v49 = vld [vmem:[%s14861_s5 + $0x10c8] sm:$0xff]  ;;  %v7106_v60 = vld [vmem:[%s14861_s5 + $0x1118] sm:$0xff]  ;;  %v7105_v4 = vld [vmem:[%s14861_s5 + $0x1110] sm:$0xff] }
 0x277   : > { %v1768_v17 = vmax.f32 %v1759_v38, 0.0  ;;  %v2076_v44 = vld [vmem:[#allocation3] sm:$0xfe]  ;;  %v7075_v38 = vld [vmem:[%s14861_s5 + $0x1020] sm:$0xff]  ;;  %v8313_v41 = vpack.c.bf16 %v7084_v52, %v7078_v33  ;;  %v7102_v61 = vld [vmem:[%s14861_s5 + $0x10f8] sm:$0xff] }
 0x278   : > { %1776 = vst [vmem:[#allocation3 + $0x30] sm:$0xff] %v1767_v39  ;;  %1778 = vst [vmem:[#allocation3 + $0x40] sm:$0xff] %v1769_v40  ;;  %v2077_v51 = vld [vmem:[#allocation3 + $0x8] sm:$0xfe]  ;;  %v2380_v53 = vrot.slane %v2076_v44, 1  ;;  %v8217_v40 = vpack.c.bf16 %v7082_v31, %v7076_v27  ;;  %v7094_v44 = vld [vmem:[%s14861_s5 + $0x10b8] sm:$0xff] }
 0x279   : > { %1777 = vst [vmem:[#allocation3 + $0x38] sm:$0xff] %v1768_v17  ;;  %v2383_v55 = vrot.slane %v2077_v51, 1  ;;  %v7088_v17 = vld [vmem:[%s14861_s5 + $0x1088] sm:$0xff]  ;;  %v8219_v51 = vpack.c.bf16 %v7081_v8, %v7075_v38  ;;  %v7101_v12 = vld [vmem:[%s14861_s5 + $0x10f0] sm:$0xff]  ;;  %v7118_v15 = vld [vmem:[%s14861_s5 + $0x1178] sm:$0xff] }
 0x27a   : > { %v11211_v5 = vsel %vm1068_vm6, %v2380_v53, %v2381_v57  ;;  %v8315_v53 = vpack.c.bf16 %v7083_v43, %v7077_v42  ;;  %v7111_v22 = vld [vmem:[%s14861_s5 + $0x1140] sm:$0xff]  ;;  %v7113_v31 = vld [vmem:[%s14861_s5 + $0x1150] sm:$0xff]  ;;  %v7124_v52 = vld [vmem:[%s14861_s5 + $0x11a8] sm:$0xff] }
 0x27b   : > { %v11197_v62 = vsel %vm1068_vm6, %v2383_v55, %v2384_v56  ;;  %v8221_v55 = vpack.c.bf16 %v7094_v44, %v7088_v17  ;;  %v7119_v33 = vld [vmem:[%s14861_s5 + $0x1180] sm:$0xff]  ;;  %v7132_v38 = vld [vmem:[%s14861_s5 + $0x11e8] sm:$0xff]  ;;  %v7129_v42 = vld [vmem:[%s14861_s5 + $0x11d0] sm:$0xff] }
 0x27c   : > { %2468 = vmatprep.mubr.f32.mxu1 %v11197_v62  ;;  %2634 = vmatprep.mubr.f32.mxu0 %v11197_v62  ;;  %v7125_v44 = vld [vmem:[%s14861_s5 + $0x11b0] sm:$0xff]  ;;  %v1808_v24 = vld [vmem:[%s14861_s5 + $0xa0] sm:$0xff] }
 0x27d   : > { %2469 = vmatmul.mubr.f32.vlgmr.msra.gmra.mrb[6].mxu1 %v11211_v5  ;;  %2635 = vmatmul.mubr.f32.vlgmr.msra.gmra.mrb[14].mxu0 %v11211_v5 }
 0x27e   : > { %8208 = vmatpush1.bf16.msra.mxu1 %v8207_v58  ;;  %8304 = vmatpush1.bf16.msra.mxu0 %v8303_v59  ;;  %v7095_v58 = vld [vmem:[%s14861_s5 + $0x10c0] sm:$0xff]  ;;  %v7100_v59 = vld [vmem:[%s14861_s5 + $0x10e8] sm:$0xff] }
 0x27f   : > { %8210 = vmatprep.subr.bf16.mxu1 %v8209_v0  ;;  %8306 = vmatprep.subr.bf16.mxu0 %v8305_v1  ;;  %v2079_v16 = vld [vmem:[#allocation3 + $0x30] sm:$0x7f]  ;;  %v7108_v0 = vld [vmem:[%s14861_s5 + $0x1128] sm:$0xff]  ;;  %v8223_v1 = vpack.c.bf16 %v7093_v54, %v7087_v32  ;;  %v8225_v6 = vpack.c.bf16 %v7106_v60, %v7100_v59  ;;  %v6857_v60 = vld [vmem:[%s14861_s5 + $0x950] sm:$0xff] }
 0x280   : > { %v2080_v23 = vld [vmem:[#allocation3 + $0x38] sm:$0x7f]  ;;  %v11233_v10 = vrot.slane %v2079_v16, 1  ;;  %v8321_v9 = vpack.c.bf16 %v7108_v0, %v7102_v61  ;;  %v7114_v16 = vld [vmem:[%s14861_s5 + $0x1158] sm:$0xff]  ;;  %v1797_v32 = vld [vmem:[%s14861_s5 + $0x48] sm:$0xff] }
 0x281   : > { %v11241_v30 = vrot.slane %v2080_v23, 1  ;;  %v7117_v23 = vld [vmem:[%s14861_s5 + $0x1170] sm:$0xff]  ;;  %v2078_v54 = vld [vmem:[#allocation3 + $0x10] sm:$0xfe]  ;;  %v1796_v0 = vld [vmem:[%s14861_s5 + $0x40] sm:$0xff] }
 0x282   : > { %8212 = vmatpush1.bf16.msra.mxu1 %v8211_v13  ;;  %8308 = vmatpush1.bf16.msra.mxu0 %v8307_v14  ;;  %v11266_v39 = vsel %vm1068_vm6, %v2381_v57, %v11233_v10  ;;  %v7089_v57 = vld [vmem:[%s14861_s5 + $0x1090] sm:$0xff]  ;;  %v7107_v13 = vld [vmem:[%s14861_s5 + $0x1120] sm:$0xff]  ;;  %v7112_v14 = vld [vmem:[%s14861_s5 + $0x1148] sm:$0xff]  ;;  %v8231_v8 = vpack.c.bf16 %v7117_v23, %v7111_v22 }
 0x283   : > { %v11254_v35 = vsel %vm1068_vm6, %v2384_v56, %v11241_v30  ;;  %8214 = vmatprep.subr.bf16.mxu1 %v8213_v18  ;;  %8310 = vmatprep.subr.bf16.mxu0 %v8309_v19  ;;  %v8317_v56 = vpack.c.bf16 %v7096_v49, %v7090_v45  ;;  %v8319_v2 = vpack.c.bf16 %v7095_v58, %v7089_v57  ;;  %v7120_v18 = vld [vmem:[%s14861_s5 + $0x1188] sm:$0xff]  ;;  %v7131_v45 = vld [vmem:[%s14861_s5 + $0x11e0] sm:$0xff]  ;;  %v1790_v61 = vld [vmem:[%s14861_s5 + $0x10] sm:$0xff] }
 0x284   : > { %2474 = vmatprep.mubr.f32.mxu1 %v11254_v35  ;;  %2640 = vmatprep.mubr.f32.mxu0 %v11254_v35  ;;  %v8227_v19 = vpack.c.bf16 %v7105_v4, %v7099_v3  ;;  %v8323_v63 = vpack.c.bf16 %v7107_v13, %v7101_v12  ;;  %v8229_v26 = vpack.c.bf16 %v7118_v15, %v7112_v14  ;;  %v6852_v49 = vld [vmem:[%s14861_s5 + $0x928] sm:$0xff]  ;;  %v6851_v57 = vld [vmem:[%s14861_s5 + $0x920] sm:$0xff]  ;;  %v6870_v3 = vld [vmem:[%s14861_s5 + $0x9b8] sm:$0xff]  ;;  %v2387_v12 = vrot.slane %v1766_v29, 1 }
 0x285   : > { %2475 = vmatmul.mubr.f32.gmra.mrb[8].mxu1 %v11266_v39  ;;  %2641 = vmatmul.mubr.f32.gmra.mrb[16].mxu0 %v11266_v39  ;;  %v8325_v27 = vpack.c.bf16 %v7120_v18, %v7114_v16  ;;  %v2081_v4 = vld [vmem:[#allocation3 + $0x40] sm:$0x7f]  ;;  %v8335_v13 = vpack.c.bf16 %v6857_v60, %v6851_v57  ;;  %v8527_v14 = vpack.c.bf16 %v1796_v0, %v1790_v61  ;;  %v6863_v15 = vld [vmem:[%s14861_s5 + $0x980] sm:$0xff]  ;;  %v6869_v16 = vld [vmem:[%s14861_s5 + $0x9b0] sm:$0xff] }
 0x286   : > { %2480 = vmatprep.mubr.f32.mxu1 %v11241_v30  ;;  %2646 = vmatprep.mubr.f32.mxu0 %v11241_v30  ;;  %v1802_v18 = vld [vmem:[%s14861_s5 + $0x70] sm:$0xff]  ;;  %v6876_v23 = vld [vmem:[%s14861_s5 + $0x9e8] sm:$0xff]  ;;  %v1832_v57 = vld [vmem:[%s14861_s5 + $0x160] sm:$0xff] }
 0x287   : > { %8216 = vmatpush1.bf16.msra.mxu1 %v8215_v36  ;;  %8312 = vmatpush1.bf16.msra.mxu0 %v8311_v37  ;;  %v7130_v36 = vld [vmem:[%s14861_s5 + $0x11d8] sm:$0xff]  ;;  %v1845_v61 = vld [vmem:[%s14861_s5 + $0x1c8] sm:$0xff] }
 0x288   : > { %8218 = vmatprep.subr.bf16.mxu1 %v8217_v40  ;;  %8314 = vmatprep.subr.bf16.mxu0 %v8313_v41  ;;  %v7126_v37 = vld [vmem:[%s14861_s5 + $0x11b8] sm:$0xff]  ;;  %v8327_v40 = vpack.c.bf16 %v7119_v33, %v7113_v31  ;;  %v7123_v41 = vld [vmem:[%s14861_s5 + $0x11a0] sm:$0xff]  ;;  %v8233_v43 = vpack.c.bf16 %v7130_v36, %v7124_v52  ;;  %v1821_v31 = vld [vmem:[%s14861_s5 + $0x108] sm:$0xff]  ;;  %v8339_v33 = vpack.c.bf16 %v6869_v16, %v6863_v15 }
 0x289   : > { %2481 = vmatmul.mubr.f32.gmra.mrb[10].mxu1 %v11233_v10  ;;  %2647 = vmatmul.mubr.f32.gmra.mrb[18].mxu0 %v11233_v10  ;;  %v8329_v17 = vpack.c.bf16 %v7132_v38, %v7126_v37  ;;  %v8531_v52 = vpack.c.bf16 %v1808_v24, %v1802_v18  ;;  %v6875_v36 = vld [vmem:[%s14861_s5 + $0x9e0] sm:$0xff]  ;;  %v6881_v37 = vld [vmem:[%s14861_s5 + $0xa10] sm:$0xff]  ;;  %v1839_v60 = vld [vmem:[%s14861_s5 + $0x198] sm:$0xff] }
 0x28a   : > { %2551 = vmatprep.mubr.f32.mxu1 %v14878_v7  ;;  %2717 = vmatprep.mubr.f32.mxu0 %v14878_v7  ;;  %v6911_v18 = vld [vmem:[%s14861_s5 + $0xb00] sm:$0xff]  ;;  %v6917_v24 = vld [vmem:[%s14861_s5 + $0xb30] sm:$0xff] }
 0x28b   : > { %8220 = vmatpush1.bf16.msra.mxu1 %v8219_v51  ;;  %8316 = vmatpush1.bf16.msra.mxu0 %v8315_v53  ;;  %v6858_v51 = vld [vmem:[%s14861_s5 + $0x958] sm:$0xff] }
 0x28c   : > { %8222 = vmatprep.subr.bf16.mxu1 %v8221_v55  ;;  %8318 = vmatprep.subr.bf16.mxu0 %v8317_v56  ;;  %v1791_v53 = vld [vmem:[%s14861_s5 + $0x18] sm:$0xff]  ;;  %v8235_v55 = vpack.c.bf16 %v7129_v42, %v7123_v41  ;;  %v8331_v56 = vpack.c.bf16 %v7131_v45, %v7125_v44  ;;  %v8333_v58 = vpack.c.bf16 %v6858_v51, %v6852_v49  ;;  %v1814_v41 = vld [vmem:[%s14861_s5 + $0xd0] sm:$0xff]  ;;  %v1820_v42 = vld [vmem:[%s14861_s5 + $0x100] sm:$0xff] }
 0x28d   : > { %v8525_v59 = vpack.c.bf16 %v1797_v32, %v1791_v53  ;;  %v1827_v44 = vld [vmem:[%s14861_s5 + $0x138] sm:$0xff]  ;;  %v1833_v45 = vld [vmem:[%s14861_s5 + $0x168] sm:$0xff]  ;;  %v8343_v49 = vpack.c.bf16 %v6881_v37, %v6875_v36  ;;  %v8535_v51 = vpack.c.bf16 %v1820_v42, %v1814_v41  ;;  %v6887_v53 = vld [vmem:[%s14861_s5 + $0xa40] sm:$0xff] }
 0x28e   : > { %v6893_v32 = vld [vmem:[%s14861_s5 + $0xa70] sm:$0xff] }
 0x28f   : > { %8224 = vmatpush1.bf16.msra.mxu1 %v8223_v1  ;;  %8320 = vmatpush1.bf16.msra.mxu0 %v8319_v2  ;;  %v2386_v1 = vrot.slane %v2078_v54, 1  ;;  %v6864_v2 = vld [vmem:[%s14861_s5 + $0x988] sm:$0xff]  ;;  %v1826_v54 = vld [vmem:[%s14861_s5 + $0x130] sm:$0xff]  ;;  %v8347_v0 = vpack.c.bf16 %v6893_v32, %v6887_v53 }
 0x290   : > { %8226 = vmatprep.subr.bf16.mxu1 %v8225_v6  ;;  %8322 = vmatprep.subr.bf16.mxu0 %v8321_v9  ;;  %v1803_v6 = vld [vmem:[%s14861_s5 + $0x78] sm:$0xff]  ;;  %v1809_v9 = vld [vmem:[%s14861_s5 + $0xa8] sm:$0xff]  ;;  %v1862_v41 = vld [vmem:[%s14861_s5 + $0x250] sm:$0xff] }
 0x291   : > { %v11429_v29 = vsel %vm1068_vm6, %v2386_v1, %v2387_v12  ;;  %v8529_v22 = vpack.c.bf16 %v1809_v9, %v1803_v6  ;;  %v8539_v1 = vpack.c.bf16 %v1832_v57, %v1826_v54  ;;  %v1838_v6 = vld [vmem:[%s14861_s5 + $0x190] sm:$0xff]  ;;  %v6918_v9 = vld [vmem:[%s14861_s5 + $0xb38] sm:$0xff]  ;;  %v6935_v54 = vld [vmem:[%s14861_s5 + $0xbc0] sm:$0xff] }
 0x292   : > { %v8543_v15 = vpack.c.bf16 %v1844_v11, %v1838_v6  ;;  %v6953_v6 = vld [vmem:[%s14861_s5 + $0xc50] sm:$0xff] }
 0x293   : > { %8228 = vmatpush1.bf16.msra.mxu1 %v8227_v19  ;;  %8324 = vmatpush1.bf16.msra.mxu0 %v8323_v63  ;;  %v11431_v19 = vrot.slane %v2081_v4, 1  ;;  %v8337_v63 = vpack.c.bf16 %v6870_v3, %v6864_v2  ;;  %v6899_v3 = vld [vmem:[%s14861_s5 + $0xaa0] sm:$0xff]  ;;  %v6905_v4 = vld [vmem:[%s14861_s5 + $0xad0] sm:$0xff] }
 0x294   : > { %8230 = vmatprep.subr.bf16.mxu1 %v8229_v26  ;;  %8326 = vmatprep.subr.bf16.mxu0 %v8325_v27  ;;  %v6882_v26 = vld [vmem:[%s14861_s5 + $0xa18] sm:$0xff] }
 0x295   : > { %v1815_v27 = vld [vmem:[%s14861_s5 + $0xd8] sm:$0xff]  ;;  %v11457_v38 = vsel %vm1068_vm6, %v2387_v12, %v11431_v19 }
 0x296   : > { %v1851_v12 = vld [vmem:[%s14861_s5 + $0x1f8] sm:$0xff] }
 0x297   : > { %8232 = vmatpush1.bf16.msra.mxu1 %v8231_v8  ;;  %8328 = vmatpush1.bf16.msra.mxu0 %v8327_v40  ;;  %v8341_v8 = vpack.c.bf16 %v6882_v26, %v6876_v23  ;;  %v8533_v40 = vpack.c.bf16 %v1821_v31, %v1815_v27  ;;  %v1856_v23 = vld [vmem:[%s14861_s5 + $0x220] sm:$0xff]  ;;  %v6924_v26 = vld [vmem:[%s14861_s5 + $0xb68] sm:$0xff]  ;;  %v6930_v27 = vld [vmem:[%s14861_s5 + $0xb98] sm:$0xff] }
 0x298   : > { %8234 = vmatprep.subr.bf16.mxu1 %v8233_v43  ;;  %8330 = vmatprep.subr.bf16.mxu0 %v8329_v17  ;;  %v6888_v43 = vld [vmem:[%s14861_s5 + $0xa48] sm:$0xff]  ;;  %v6894_v17 = vld [vmem:[%s14861_s5 + $0xa78] sm:$0xff]  ;;  %v8357_v37 = vpack.c.bf16 %v6930_v27, %v6924_v26  ;;  %v1904_v26 = vld [vmem:[%s14861_s5 + $0x3a0] sm:$0xff] }
 0x299   : > { %v1863_v31 = vld [vmem:[%s14861_s5 + $0x258] sm:$0xff]  ;;  %v6972_v27 = vld [vmem:[%s14861_s5 + $0xce8] sm:$0xff] }
 0x29b   : > { %8236 = vmatpush1.bf16.msra.mxu1 %v8235_v55  ;;  %8332 = vmatpush1.bf16.msra.mxu0 %v8331_v56  ;;  %v8345_v55 = vpack.c.bf16 %v6894_v17, %v6888_v43  ;;  %v8537_v56 = vpack.c.bf16 %v1833_v45, %v1827_v44  ;;  %v1868_v43 = vld [vmem:[%s14861_s5 + $0x280] sm:$0xff]  ;;  %v6936_v17 = vld [vmem:[%s14861_s5 + $0xbc8] sm:$0xff]  ;;  %v6942_v44 = vld [vmem:[%s14861_s5 + $0xbf8] sm:$0xff] }
 0x29c   : > { %8334 = vmatprep.subr.bf16.mxu1 %v8333_v58  ;;  %8526 = vmatprep.subr.bf16.mxu0 %v8525_v59  ;;  %v6900_v58 = vld [vmem:[%s14861_s5 + $0xaa8] sm:$0xff]  ;;  %v6906_v59 = vld [vmem:[%s14861_s5 + $0xad8] sm:$0xff]  ;;  %v8551_v53 = vpack.c.bf16 %v1868_v43, %v1862_v41  ;;  %v8361_v32 = vpack.c.bf16 %v6942_v44, %v6936_v17  ;;  %v6977_v41 = vld [vmem:[%s14861_s5 + $0xd10] sm:$0xff] }
 0x29d   : > { %v8349_v2 = vpack.c.bf16 %v6906_v59, %v6900_v58  ;;  %v1875_v45 = vld [vmem:[%s14861_s5 + $0x2b8] sm:$0xff]  ;;  %v1880_v58 = vld [vmem:[%s14861_s5 + $0x2e0] sm:$0xff]  ;;  %v6948_v59 = vld [vmem:[%s14861_s5 + $0xc28] sm:$0xff] }
 0x29e   : > { %2552 = vmatmul.mubr.f32.vlgmr.msra.gmra.mrb[6].mxu1 %v11429_v29  ;;  %2718 = vmatmul.mubr.f32.vlgmr.msra.gmra.mrb[14].mxu0 %v11429_v29  ;;  %v1916_v17 = vld [vmem:[%s14861_s5 + $0x400] sm:$0xff]  ;;  %v6984_v44 = vld [vmem:[%s14861_s5 + $0xd48] sm:$0xff] }
 0x29f   : > { %8336 = vmatpush1.bf16.msra.mxu1 %v8335_v13  ;;  %8528 = vmatpush1.bf16.msra.mxu0 %v8527_v14  ;;  %v1857_v13 = vld [vmem:[%s14861_s5 + $0x228] sm:$0xff]  ;;  %v8351_v14 = vpack.c.bf16 %v6905_v4, %v6899_v3  ;;  %v6947_v4 = vld [vmem:[%s14861_s5 + $0xc20] sm:$0xff] }
 0x2a0   : > { %2557 = vmatprep.mubr.f32.mxu1 %v14878_v7  ;;  %2723 = vmatprep.mubr.f32.mxu0 %v14878_v7 }
 0x2a1   : > { %8338 = vmatprep.subr.bf16.mxu1 %v8337_v63  ;;  %8530 = vmatprep.subr.bf16.mxu0 %v8529_v22  ;;  %v1850_v63 = vld [vmem:[%s14861_s5 + $0x1f0] sm:$0xff]  ;;  %v8545_v22 = vpack.c.bf16 %v1857_v13, %v1851_v12  ;;  %v6966_v12 = vld [vmem:[%s14861_s5 + $0xcb8] sm:$0xff] }
 0x2a2   : > { %2558 = vmatmul.mubr.f32.gmra.mrb[8].mxu1 %v11457_v38  ;;  %2724 = vmatmul.mubr.f32.gmra.mrb[16].mxu0 %v11457_v38  ;;  %v8547_v36 = vpack.c.bf16 %v1856_v23, %v1850_v63  ;;  %v1899_v13 = vld [vmem:[%s14861_s5 + $0x378] sm:$0xff]  ;;  %v6965_v63 = vld [vmem:[%s14861_s5 + $0xcb0] sm:$0xff] }
 0x2a3   : > { %8340 = vmatpush1.bf16.msra.mxu1 %v8339_v33  ;;  %8532 = vmatpush1.bf16.msra.mxu0 %v8531_v52  ;;  %v1869_v33 = vld [vmem:[%s14861_s5 + $0x288] sm:$0xff]  ;;  %v8355_v52 = vpack.c.bf16 %v6917_v24, %v6911_v18  ;;  %v6959_v24 = vld [vmem:[%s14861_s5 + $0xc80] sm:$0xff] }
 0x2a4   : > { %2563 = vmatprep.mubr.f32.mxu1 %v14878_v7  ;;  %2729 = vmatprep.mubr.f32.mxu0 %v14878_v7  ;;  %v8549_v42 = vpack.c.bf16 %v1869_v33, %v1863_v31  ;;  %v6978_v31 = vld [vmem:[%s14861_s5 + $0xd18] sm:$0xff] }
 0x2a5   : > { %8342 = vmatprep.subr.bf16.mxu1 %v8341_v8  ;;  %8534 = vmatprep.subr.bf16.mxu0 %v8533_v40  ;;  %v6923_v8 = vld [vmem:[%s14861_s5 + $0xb60] sm:$0xff]  ;;  %v6929_v40 = vld [vmem:[%s14861_s5 + $0xb90] sm:$0xff]  ;;  %v1911_v33 = vld [vmem:[%s14861_s5 + $0x3d8] sm:$0xff] }
 0x2a6   : > { %2564 = vmatmul.mubr.f32.gmra.mrb[10].mxu1 %v11431_v19  ;;  %2730 = vmatmul.mubr.f32.gmra.mrb[18].mxu0 %v11431_v19 }
 0x2a7   : > { %8344 = vmatpush1.bf16.msra.mxu1 %v8343_v49  ;;  %2800 = vmatprep.mubr.f32.mxu1 %v11197_v62  ;;  %v8541_v62 = vpack.c.bf16 %v1845_v61, %v1839_v60  ;;  %v1881_v49 = vld [vmem:[%s14861_s5 + $0x2e8] sm:$0xff]  ;;  %v6954_v60 = vld [vmem:[%s14861_s5 + $0xc58] sm:$0xff] }
 0x2a8   : > { %8536 = vmatpush1.bf16.msra.mxu0 %v8535_v51  ;;  %3132 = vmatprep.mubr.f32.mxu0 %v1762_v21  ;;  %v6912_v21 = vld [vmem:[%s14861_s5 + $0xb08] sm:$0xff]  ;;  %v8359_v51 = vpack.c.bf16 %v6929_v40, %v6923_v8  ;;  %v8553_v57 = vpack.c.bf16 %v1881_v49, %v1875_v45  ;;  %v1887_v61 = vld [vmem:[%s14861_s5 + $0x318] sm:$0xff]  ;;  %v8365_v3 = vpack.c.bf16 %v6954_v60, %v6948_v59  ;;  %v6971_v40 = vld [vmem:[%s14861_s5 + $0xce0] sm:$0xff] }
 0x2a9   : > { %8346 = vmatprep.subr.bf16.mxu1 %v8345_v55  ;;  %8538 = vmatprep.subr.bf16.mxu0 %v8537_v56  ;;  %v8353_v16 = vpack.c.bf16 %v6918_v9, %v6912_v21  ;;  %v6941_v55 = vld [vmem:[%s14861_s5 + $0xbf0] sm:$0xff]  ;;  %v1892_v21 = vld [vmem:[%s14861_s5 + $0x340] sm:$0xff]  ;;  %v6960_v9 = vld [vmem:[%s14861_s5 + $0xc88] sm:$0xff]  ;;  %v8373_v8 = vpack.c.bf16 %v6978_v31, %v6972_v27 }
 0x2aa   : > { %v1874_v56 = vld [vmem:[%s14861_s5 + $0x2b0] sm:$0xff]  ;;  %v8369_v18 = vpack.c.bf16 %v6966_v12, %v6960_v9  ;;  %v6990_v45 = vld [vmem:[%s14861_s5 + $0xd78] sm:$0xff]  ;;  %v1928_v59 = vld [vmem:[%s14861_s5 + $0x460] sm:$0xff] }
 0x2ab   : > { %8348 = vmatpush1.bf16.msra.mxu1 %v8347_v0  ;;  %v1893_v0 = vld [vmem:[%s14861_s5 + $0x348] sm:$0xff]  ;;  %v1923_v49 = vld [vmem:[%s14861_s5 + $0x438] sm:$0xff]  ;;  %v1940_v9 = vld [vmem:[%s14861_s5 + $0x4c0] sm:$0xff] }
 0x2ac   : > { %8540 = vmatpush1.bf16.msra.mxu0 %v8539_v1  ;;  %8350 = vmatprep.subr.bf16.mxu1 %v8349_v2  ;;  %v8363_v1 = vpack.c.bf16 %v6941_v55, %v6935_v54  ;;  %v8555_v2 = vpack.c.bf16 %v1880_v58, %v1874_v56  ;;  %v8557_v11 = vpack.c.bf16 %v1893_v0, %v1887_v61  ;;  %v6983_v55 = vld [vmem:[%s14861_s5 + $0xd40] sm:$0xff]  ;;  %v6989_v56 = vld [vmem:[%s14861_s5 + $0xd70] sm:$0xff]  ;;  %v6996_v60 = vld [vmem:[%s14861_s5 + $0xda8] sm:$0xff] }
 0x2ad   : > { %8542 = vmatprep.subr.bf16.mxu0 %v8541_v62  ;;  %v1886_v62 = vld [vmem:[%s14861_s5 + $0x310] sm:$0xff]  ;;  %v8377_v54 = vpack.c.bf16 %v6990_v45, %v6984_v44  ;;  %v7002_v61 = vld [vmem:[%s14861_s5 + $0xdd8] sm:$0xff]  ;;  %v7008_v12 = vld [vmem:[%s14861_s5 + $0xe08] sm:$0xff] }
 0x2ae   : > { %v1935_v0 = vld [vmem:[%s14861_s5 + $0x498] sm:$0xff]  ;;  %v1952_v27 = vld [vmem:[%s14861_s5 + $0x520] sm:$0xff]  ;;  %v7020_v31 = vld [vmem:[%s14861_s5 + $0xe68] sm:$0xff] }
 0x2af   : > { %8352 = vmatpush1.bf16.msra.mxu1 %v8351_v14  ;;  %v1905_v14 = vld [vmem:[%s14861_s5 + $0x3a8] sm:$0xff]  ;;  %v1964_v44 = vld [vmem:[%s14861_s5 + $0x580] sm:$0xff] }
 0x2b0   : > { %8544 = vmatpush1.bf16.msra.mxu0 %v8543_v15  ;;  %8354 = vmatprep.subr.bf16.mxu1 %v8353_v16  ;;  %v8367_v15 = vpack.c.bf16 %v6953_v6, %v6947_v4  ;;  %v8559_v16 = vpack.c.bf16 %v1892_v21, %v1886_v62  ;;  %v8561_v23 = vpack.c.bf16 %v1905_v14, %v1899_v13  ;;  %v6995_v6 = vld [vmem:[%s14861_s5 + $0xda0] sm:$0xff]  ;;  %v7001_v62 = vld [vmem:[%s14861_s5 + $0xdd0] sm:$0xff]  ;;  %v7014_v13 = vld [vmem:[%s14861_s5 + $0xe38] sm:$0xff] }
 0x2b1   : > { %8546 = vmatprep.subr.bf16.mxu0 %v8545_v22  ;;  %v1898_v22 = vld [vmem:[%s14861_s5 + $0x370] sm:$0xff]  ;;  %v8381_v4 = vpack.c.bf16 %v7002_v61, %v6996_v60  ;;  %v1947_v14 = vld [vmem:[%s14861_s5 + $0x4f8] sm:$0xff]  ;;  %v7032_v45 = vld [vmem:[%s14861_s5 + $0xec8] sm:$0xff] }
 0x2b2   : > { %v1976_v60 = vld [vmem:[%s14861_s5 + $0x5e0] sm:$0xff]  ;;  %v7044_v61 = vld [vmem:[%s14861_s5 + $0xf28] sm:$0xff] }
 0x2b3   : > { %8356 = vmatpush1.bf16.msra.mxu1 %v8355_v52  ;;  %v1917_v52 = vld [vmem:[%s14861_s5 + $0x408] sm:$0xff] }
 0x2b4   : > { %8548 = vmatpush1.bf16.msra.mxu0 %v8547_v36  ;;  %8358 = vmatprep.subr.bf16.mxu1 %v8357_v37  ;;  %v8371_v36 = vpack.c.bf16 %v6965_v63, %v6959_v24  ;;  %v8563_v37 = vpack.c.bf16 %v1904_v26, %v1898_v22  ;;  %v8565_v43 = vpack.c.bf16 %v1917_v52, %v1911_v33  ;;  %v7007_v63 = vld [vmem:[%s14861_s5 + $0xe00] sm:$0xff]  ;;  %v7013_v22 = vld [vmem:[%s14861_s5 + $0xe30] sm:$0xff]  ;;  %v7026_v33 = vld [vmem:[%s14861_s5 + $0xe98] sm:$0xff] }
 0x2b5   : > { %8550 = vmatprep.subr.bf16.mxu0 %v8549_v42  ;;  %v1910_v42 = vld [vmem:[%s14861_s5 + $0x3d0] sm:$0xff]  ;;  %v8385_v24 = vpack.c.bf16 %v7014_v13, %v7008_v12  ;;  %v1959_v52 = vld [vmem:[%s14861_s5 + $0x558] sm:$0xff]  ;;  %v1988_v12 = vld [vmem:[%s14861_s5 + $0x640] sm:$0xff] }
 0x2b6   : > { %v7056_v13 = vld [vmem:[%s14861_s5 + $0xf88] sm:$0xff] }
 0x2b7   : > { %8360 = vmatpush1.bf16.msra.mxu1 %v8359_v51  ;;  %v1929_v51 = vld [vmem:[%s14861_s5 + $0x468] sm:$0xff] }
 0x2b8   : > { %8552 = vmatpush1.bf16.msra.mxu0 %v8551_v53  ;;  %8362 = vmatprep.subr.bf16.mxu1 %v8361_v32  ;;  %v8375_v53 = vpack.c.bf16 %v6977_v41, %v6971_v40  ;;  %v8567_v32 = vpack.c.bf16 %v1916_v17, %v1910_v42  ;;  %v8569_v58 = vpack.c.bf16 %v1929_v51, %v1923_v49  ;;  %v7019_v41 = vld [vmem:[%s14861_s5 + $0xe60] sm:$0xff]  ;;  %v7025_v42 = vld [vmem:[%s14861_s5 + $0xe90] sm:$0xff]  ;;  %v7038_v49 = vld [vmem:[%s14861_s5 + $0xef8] sm:$0xff] }
 0x2b9   : > { %8554 = vmatprep.subr.bf16.mxu0 %v8553_v57  ;;  %v1922_v57 = vld [vmem:[%s14861_s5 + $0x430] sm:$0xff]  ;;  %v8389_v40 = vpack.c.bf16 %v7026_v33, %v7020_v31  ;;  %v1971_v51 = vld [vmem:[%s14861_s5 + $0x5b8] sm:$0xff]  ;;  %v11835_v31 = vld [vmem:[#allocation3] sm:$0xff] }
 0x2bb   : > { %8364 = vmatpush1.bf16.msra.mxu1 %v8363_v1  ;;  %v1941_v1 = vld [vmem:[%s14861_s5 + $0x4c8] sm:$0xff] }
 0x2bc   : > { %8556 = vmatpush1.bf16.msra.mxu0 %v8555_v2  ;;  %8366 = vmatprep.subr.bf16.mxu1 %v8365_v3  ;;  %v8379_v2 = vpack.c.bf16 %v6989_v56, %v6983_v55  ;;  %v8571_v3 = vpack.c.bf16 %v1928_v59, %v1922_v57  ;;  %v8573_v21 = vpack.c.bf16 %v1941_v1, %v1935_v0  ;;  %v7031_v56 = vld [vmem:[%s14861_s5 + $0xec0] sm:$0xff]  ;;  %v7037_v57 = vld [vmem:[%s14861_s5 + $0xef0] sm:$0xff]  ;;  %v7050_v0 = vld [vmem:[%s14861_s5 + $0xf58] sm:$0xff] }
 0x2bd   : > { %8558 = vmatprep.subr.bf16.mxu0 %v8557_v11  ;;  %v1934_v11 = vld [vmem:[%s14861_s5 + $0x490] sm:$0xff]  ;;  %v8393_v55 = vpack.c.bf16 %v7038_v49, %v7032_v45  ;;  %v1983_v1 = vld [vmem:[%s14861_s5 + $0x618] sm:$0xff]  ;;  %v11873_v49 = vld [vmem:[#allocation3 + $0x38] sm:$0x3f] }
 0x2be   : > { %v7086_v45 = vld [vmem:[%s14861_s5 + $0x1078] sm:$0xff] }
 0x2bf   : > { %8368 = vmatpush1.bf16.msra.mxu1 %v8367_v15  ;;  %v1953_v15 = vld [vmem:[%s14861_s5 + $0x528] sm:$0xff] }
 0x2c0   : > { %8560 = vmatpush1.bf16.msra.mxu0 %v8559_v16  ;;  %8370 = vmatprep.subr.bf16.mxu1 %v8369_v18  ;;  %v8383_v16 = vpack.c.bf16 %v7001_v62, %v6995_v6  ;;  %v8575_v18 = vpack.c.bf16 %v1940_v9, %v1934_v11  ;;  %v8577_v26 = vpack.c.bf16 %v1953_v15, %v1947_v14  ;;  %v7043_v11 = vld [vmem:[%s14861_s5 + $0xf20] sm:$0xff]  ;;  %v1982_v9 = vld [vmem:[%s14861_s5 + $0x610] sm:$0xff]  ;;  %v7062_v14 = vld [vmem:[%s14861_s5 + $0xfb8] sm:$0xff] }
 0x2c1   : > { %8562 = vmatprep.subr.bf16.mxu0 %v8561_v23  ;;  %v1946_v23 = vld [vmem:[%s14861_s5 + $0x4f0] sm:$0xff]  ;;  %v8397_v6 = vpack.c.bf16 %v7050_v0, %v7044_v61  ;;  %v1995_v15 = vld [vmem:[%s14861_s5 + $0x678] sm:$0xff] }
 0x2c2   : > { %v2031_v61 = vld [vmem:[%s14861_s5 + $0x798] sm:$0xff] }
 0x2c3   : > { %8372 = vmatpush1.bf16.msra.mxu1 %v8371_v36  ;;  %v1965_v36 = vld [vmem:[%s14861_s5 + $0x588] sm:$0xff] }
 0x2c4   : > { %8564 = vmatpush1.bf16.msra.mxu0 %v8563_v37  ;;  %8374 = vmatprep.subr.bf16.mxu1 %v8373_v8  ;;  %v8387_v37 = vpack.c.bf16 %v7013_v22, %v7007_v63  ;;  %v8579_v8 = vpack.c.bf16 %v1952_v27, %v1946_v23  ;;  %v8581_v17 = vpack.c.bf16 %v1965_v36, %v1959_v52  ;;  %v7061_v23 = vld [vmem:[%s14861_s5 + $0xfb0] sm:$0xff]  ;;  %v2000_v27 = vld [vmem:[%s14861_s5 + $0x6a0] sm:$0xff]  ;;  %v7068_v52 = vld [vmem:[%s14861_s5 + $0xfe8] sm:$0xff] }
 0x2c5   : > { %8566 = vmatprep.subr.bf16.mxu0 %v8565_v43  ;;  %v1958_v43 = vld [vmem:[%s14861_s5 + $0x550] sm:$0xff]  ;;  %v8591_v63 = vpack.c.bf16 %v1988_v12, %v1982_v9  ;;  %v8401_v22 = vpack.c.bf16 %v7062_v14, %v7056_v13  ;;  %v7074_v36 = vld [vmem:[%s14861_s5 + $0x1018] sm:$0xff]  ;;  %v2049_v13 = vld [vmem:[%s14861_s5 + $0x828] sm:$0xff] }
 0x2c6   : > { %v7110_v9 = vld [vmem:[%s14861_s5 + $0x1138] sm:$0xff] }
 0x2c7   : > { %8376 = vmatpush1.bf16.msra.mxu1 %v8375_v53  ;;  %v1977_v53 = vld [vmem:[%s14861_s5 + $0x5e8] sm:$0xff]  ;;  %v2043_v12 = vld [vmem:[%s14861_s5 + $0x7f8] sm:$0xff] }
 0x2c8   : > { %8568 = vmatpush1.bf16.msra.mxu0 %v8567_v32  ;;  %8378 = vmatprep.subr.bf16.mxu1 %v8377_v54  ;;  %v8391_v32 = vpack.c.bf16 %v7025_v42, %v7019_v41  ;;  %v8583_v54 = vpack.c.bf16 %v1964_v44, %v1958_v43  ;;  %v8585_v59 = vpack.c.bf16 %v1977_v53, %v1971_v51  ;;  %v7073_v42 = vld [vmem:[%s14861_s5 + $0x1010] sm:$0xff]  ;;  %v7080_v44 = vld [vmem:[%s14861_s5 + $0x1048] sm:$0xff] }
 0x2c9   : > { %8570 = vmatprep.subr.bf16.mxu0 %v8569_v58  ;;  %v1970_v58 = vld [vmem:[%s14861_s5 + $0x5b0] sm:$0xff]  ;;  %v8405_v41 = vpack.c.bf16 %v7074_v36, %v7068_v52  ;;  %v2025_v51 = vld [vmem:[%s14861_s5 + $0x768] sm:$0xff] }
 0x2ca   : > { %v2006_v43 = vld [vmem:[%s14861_s5 + $0x6d0] sm:$0xff]  ;;  %v2061_v52 = vld [vmem:[%s14861_s5 + $0x888] sm:$0xff] }
 0x2cb   : > { %8380 = vmatpush1.bf16.msra.mxu1 %v8379_v2  ;;  %v1989_v2 = vld [vmem:[%s14861_s5 + $0x648] sm:$0xff] }
 0x2cc   : > { %8572 = vmatpush1.bf16.msra.mxu0 %v8571_v3  ;;  %8382 = vmatprep.subr.bf16.mxu1 %v8381_v4  ;;  %v8395_v3 = vpack.c.bf16 %v7037_v57, %v7031_v56  ;;  %v8587_v4 = vpack.c.bf16 %v1976_v60, %v1970_v58  ;;  %v8589_v62 = vpack.c.bf16 %v1989_v2, %v1983_v1  ;;  %v2024_v56 = vld [vmem:[%s14861_s5 + $0x760] sm:$0xff]  ;;  %v11895_v57 = vld [vmem:[#allocation3 + $0x30] sm:$0x3f] }
 0x2cd   : > { %8574 = vmatprep.subr.bf16.mxu0 %v8573_v21  ;;  %v7049_v21 = vld [vmem:[%s14861_s5 + $0xf50] sm:$0xff]  ;;  %v7098_v60 = vld [vmem:[%s14861_s5 + $0x10d8] sm:$0xff] }
 0x2cf   : > { %8384 = vmatpush1.bf16.msra.mxu1 %v8383_v16  ;;  %v2001_v16 = vld [vmem:[%s14861_s5 + $0x6a8] sm:$0xff] }
 0x2d0   : > { %8576 = vmatpush1.bf16.msra.mxu0 %v8575_v18  ;;  %8386 = vmatprep.subr.bf16.mxu1 %v8385_v24  ;;  %v8399_v18 = vpack.c.bf16 %v7049_v21, %v7043_v11  ;;  %v7055_v24 = vld [vmem:[%s14861_s5 + $0xf80] sm:$0xff]  ;;  %v8593_v33 = vpack.c.bf16 %v2001_v16, %v1995_v15  ;;  %v7104_v21 = vld [vmem:[%s14861_s5 + $0x1108] sm:$0xff] }
 0x2d1   : > { %8578 = vmatprep.subr.bf16.mxu0 %v8577_v26  ;;  %v1994_v26 = vld [vmem:[%s14861_s5 + $0x670] sm:$0xff]  ;;  %v2036_v11 = vld [vmem:[%s14861_s5 + $0x7c0] sm:$0xff]  ;;  %v8417_v16 = vpack.c.bf16 %v7110_v9, %v7104_v21  ;;  %v7150_v21 = vld [vmem:[%s14861_s5 + $0x1278] sm:$0xff] }
 0x2d2   : > { %v7156_v9 = vld [vmem:[%s14861_s5 + $0x12a8] sm:$0xff] }
 0x2d3   : > { %8388 = vmatpush1.bf16.msra.mxu1 %v8387_v37  ;;  %v2007_v37 = vld [vmem:[%s14861_s5 + $0x6d8] sm:$0xff] }
 0x2d4   : > { %8580 = vmatpush1.bf16.msra.mxu0 %v8579_v8  ;;  %8390 = vmatprep.subr.bf16.mxu1 %v8389_v40  ;;  %v8403_v8 = vpack.c.bf16 %v7061_v23, %v7055_v24  ;;  %v8595_v40 = vpack.c.bf16 %v2000_v27, %v1994_v26  ;;  %v7109_v24 = vld [vmem:[%s14861_s5 + $0x1130] sm:$0xff]  ;;  %v2048_v23 = vld [vmem:[%s14861_s5 + $0x820] sm:$0xff]  ;;  %v7116_v26 = vld [vmem:[%s14861_s5 + $0x1168] sm:$0xff] }
 0x2d5   : > { %8582 = vmatprep.subr.bf16.mxu0 %v8581_v17  ;;  %v2012_v17 = vld [vmem:[%s14861_s5 + $0x700] sm:$0xff]  ;;  %v7122_v27 = vld [vmem:[%s14861_s5 + $0x1198] sm:$0xff] }
 0x2d7   : > { %8392 = vmatpush1.bf16.msra.mxu1 %v8391_v32  ;;  %v8409_v32 = vpack.c.bf16 %v7086_v45, %v7080_v44  ;;  %v2073_v44 = vld [vmem:[%s14861_s5 + $0x8e8] sm:$0xff] }
 0x2d8   : > { %8584 = vmatpush1.bf16.msra.mxu0 %v8583_v54  ;;  %8394 = vmatprep.subr.bf16.mxu1 %v8393_v55  ;;  %v7085_v54 = vld [vmem:[%s14861_s5 + $0x1070] sm:$0xff] }
 0x2d9   : > { %8586 = vmatprep.subr.bf16.mxu0 %v8585_v59  ;;  %v2018_v55 = vld [vmem:[%s14861_s5 + $0x730] sm:$0xff]  ;;  %v7092_v59 = vld [vmem:[%s14861_s5 + $0x10a8] sm:$0xff] }
 0x2da   : > { %v8603_v1 = vpack.c.bf16 %v2024_v56, %v2018_v55  ;;  %v8413_v2 = vpack.c.bf16 %v7098_v60, %v7092_v59  ;;  %v1789_v55 = vld [vmem:[%s14861_s5 + $0x8] sm:$0xff]  ;;  %v1795_v56 = vld [vmem:[%s14861_s5 + $0x38] sm:$0xff] }
 0x2db   : > { %8396 = vmatpush1.bf16.msra.mxu1 %v8395_v3  ;;  %v7091_v3 = vld [vmem:[%s14861_s5 + $0x10a0] sm:$0xff]  ;;  %v7144_v59 = vld [vmem:[%s14861_s5 + $0x1248] sm:$0xff] }
 0x2dc   : > { %8588 = vmatpush1.bf16.msra.mxu0 %v8587_v4  ;;  %8398 = vmatprep.subr.bf16.mxu1 %v8397_v6  ;;  %v7097_v4 = vld [vmem:[%s14861_s5 + $0x10d0] sm:$0xff] }
 0x2dd   : > { %8590 = vmatprep.subr.bf16.mxu0 %v8589_v62  ;;  %v2030_v6 = vld [vmem:[%s14861_s5 + $0x790] sm:$0xff]  ;;  %v8415_v14 = vpack.c.bf16 %v7097_v4, %v7091_v3  ;;  %v7143_v4 = vld [vmem:[%s14861_s5 + $0x1240] sm:$0xff] }
 0x2de   : > { %2801 = vmatmul.mubr.f32.vlgmr.msra.gmra.mrb[12].mxu1 %v11211_v5  ;;  %v2013_v5 = vld [vmem:[%s14861_s5 + $0x708] sm:$0xff]  ;;  %v8607_v15 = vpack.c.bf16 %v2036_v11, %v2030_v6  ;;  %v7137_v3 = vld [vmem:[%s14861_s5 + $0x1210] sm:$0xff] }
 0x2df   : > { %3133 = vmatmul.mubr.f32.vlgmr.msra.gmra.mrb[14].mxu0 %v11835_v31  ;;  %2806 = vmatprep.mubr.f32.mxu1 %v11254_v35  ;;  %v7067_v35 = vld [vmem:[%s14861_s5 + $0xfe0] sm:$0xff]  ;;  %v1801_v6 = vld [vmem:[%s14861_s5 + $0x68] sm:$0xff] }
 0x2e0   : > { %8400 = vmatpush1.bf16.msra.mxu1 %v8399_v18  ;;  %3138 = vmatprep.mubr.f32.mxu0 %v11158_v34  ;;  %v8597_v34 = vpack.c.bf16 %v2013_v5, %v2007_v37  ;;  %v8407_v53 = vpack.c.bf16 %v7073_v42, %v7067_v35  ;;  %v7103_v18 = vld [vmem:[%s14861_s5 + $0x1100] sm:$0xff]  ;;  %v8421_v5 = vpack.c.bf16 %v7122_v27, %v7116_v26  ;;  %v7162_v27 = vld [vmem:[%s14861_s5 + $0x12d8] sm:$0xff] }
 0x2e1   : > { %8592 = vmatpush1.bf16.msra.mxu0 %v8591_v63  ;;  %8402 = vmatprep.subr.bf16.mxu1 %v8401_v22  ;;  %v2042_v63 = vld [vmem:[%s14861_s5 + $0x7f0] sm:$0xff]  ;;  %v8609_v22 = vpack.c.bf16 %v2049_v13, %v2043_v12  ;;  %v8419_v36 = vpack.c.bf16 %v7109_v24, %v7103_v18  ;;  %v2060_v42 = vld [vmem:[%s14861_s5 + $0x880] sm:$0xff]  ;;  %v8815_v12 = vpack.c.bf16 %v7143_v4, %v7137_v3  ;;  %v12045_v24 = vld [vmem:[#allocation3 + $0x10] sm:$0xff] }
 0x2e2   : > { %2807 = vmatmul.mubr.f32.gmra.mrb[14].mxu1 %v11266_v39  ;;  %8594 = vmatprep.subr.bf16.mxu0 %v8593_v33  ;;  %v2019_v39 = vld [vmem:[%s14861_s5 + $0x738] sm:$0xff]  ;;  %v8611_v37 = vpack.c.bf16 %v2048_v23, %v2042_v63  ;;  %v1800_v13 = vld [vmem:[%s14861_s5 + $0x60] sm:$0xff]  ;;  %v8817_v63 = vpack.c.bf16 %v7156_v9, %v7150_v21  ;;  %v1842_v4 = vld [vmem:[%s14861_s5 + $0x1b0] sm:$0xff] }
 0x2e3   : > { %3139 = vmatmul.mubr.f32.gmra.mrb[16].mxu0 %v11155_v28  ;;  %2812 = vmatprep.mubr.f32.mxu1 %v11241_v30  ;;  %v7079_v28 = vld [vmem:[%s14861_s5 + $0x1040] sm:$0xff]  ;;  %v8599_v30 = vpack.c.bf16 %v2012_v17, %v2006_v43  ;;  %v8601_v58 = vpack.c.bf16 %v2025_v51, %v2019_v39  ;;  %v2055_v33 = vld [vmem:[%s14861_s5 + $0x858] sm:$0xff]  ;;  %v7128_v43 = vld [vmem:[%s14861_s5 + $0x11c8] sm:$0xff] }
 0x2e4   : > { %8404 = vmatpush1.bf16.msra.mxu1 %v8403_v8  ;;  %3144 = vmatprep.mubr.f32.mxu0 %v11873_v49  ;;  %v8411_v0 = vpack.c.bf16 %v7085_v54, %v7079_v28  ;;  %v7115_v8 = vld [vmem:[%s14861_s5 + $0x1160] sm:$0xff]  ;;  %v8613_v35 = vpack.c.bf16 %v2061_v52, %v2055_v33  ;;  %v2067_v17 = vld [vmem:[%s14861_s5 + $0x8b8] sm:$0xff]  ;;  %v7133_v28 = vld [vmem:[%s14861_s5 + $0x11f0] sm:$0xff] }
 0x2e5   : > { %8596 = vmatpush1.bf16.msra.mxu0 %v8595_v40  ;;  %8406 = vmatprep.subr.bf16.mxu1 %v8405_v41  ;;  %v7121_v40 = vld [vmem:[%s14861_s5 + $0x1190] sm:$0xff]  ;;  %v2072_v54 = vld [vmem:[%s14861_s5 + $0x8e0] sm:$0xff]  ;;  %v1819_v23 = vld [vmem:[%s14861_s5 + $0xf8] sm:$0xff] }
 0x2e6   : > { %2813 = vmatmul.mubr.f32.gmra.mrb[16].mxu1 %v11233_v10  ;;  %8598 = vmatprep.subr.bf16.mxu0 %v8597_v34  ;;  %v2037_v10 = vld [vmem:[%s14861_s5 + $0x7c8] sm:$0xff]  ;;  %v2054_v41 = vld [vmem:[%s14861_s5 + $0x850] sm:$0xff]  ;;  %v7134_v34 = vld [vmem:[%s14861_s5 + $0x11f8] sm:$0xff]  ;;  %v8423_v45 = vpack.c.bf16 %v7121_v40, %v7115_v8 }
 0x2e7   : > { %3145 = vmatmul.mubr.f32.gmra.mrb[18].mxu0 %v11895_v57  ;;  %2883 = vmatprep.mubr.f32.mxu1 %v14878_v7  ;;  %v8605_v62 = vpack.c.bf16 %v2037_v10, %v2031_v61  ;;  %v8615_v39 = vpack.c.bf16 %v2060_v42, %v2054_v41  ;;  %v8425_v51 = vpack.c.bf16 %v7134_v34, %v7128_v43  ;;  %v7155_v18 = vld [vmem:[%s14861_s5 + $0x12a0] sm:$0xff]  ;;  %v3401_v40 = vld [vmem:[#allocation3 + $0x8] sm:$0xfc]  ;;  %v1831_v42 = vld [vmem:[%s14861_s5 + $0x158] sm:$0xff] }
 0x2e8   : > { %8408 = vmatpush1.bf16.msra.mxu1 %v8407_v53  ;;  %3215 = vmatprep.mubr.f32.mxu0 %v14878_v7  ;;  %v7127_v53 = vld [vmem:[%s14861_s5 + $0x11c0] sm:$0xff]  ;;  %v8429_v10 = vpack.c.bf16 %v1795_v56, %v1789_v55  ;;  %v12081_v43 = vld [vmem:[#allocation3 + $0x28] sm:$0xff]  ;;  %v12111_v55 = vld [vmem:[#allocation3 + $0x40] sm:$0x3f] }
 0x2e9   : > { %8600 = vmatpush1.bf16.msra.mxu0 %v8599_v30  ;;  %8410 = vmatprep.subr.bf16.mxu1 %v8409_v32  ;;  %v2066_v30 = vld [vmem:[%s14861_s5 + $0x8b0] sm:$0xff]  ;;  %v8617_v32 = vpack.c.bf16 %v2073_v44, %v2067_v17  ;;  %v8427_v60 = vpack.c.bf16 %v7133_v28, %v7127_v53  ;;  %v1812_v52 = vld [vmem:[%s14861_s5 + $0xc0] sm:$0xff]  ;;  %v7180_v17 = vld [vmem:[%s14861_s5 + $0x1368] sm:$0xff] }
 0x2ea   : > { %8602 = vmatprep.subr.bf16.mxu0 %v8601_v58  ;;  %v7138_v58 = vld [vmem:[%s14861_s5 + $0x1218] sm:$0xff]  ;;  %v8619_v61 = vpack.c.bf16 %v2072_v54, %v2066_v30  ;;  %v7167_v8 = vld [vmem:[%s14861_s5 + $0x1300] sm:$0xff]  ;;  %v7173_v53 = vld [vmem:[%s14861_s5 + $0x1330] sm:$0xff] }
 0x2eb   : > { %v7179_v30 = vld [vmem:[%s14861_s5 + $0x1360] sm:$0xff]  ;;  %v1843_v54 = vld [vmem:[%s14861_s5 + $0x1b8] sm:$0xff]  ;;  %v12113_v56 = vld [vmem:[#allocation3 + $0x20] sm:$0xff] }
 0x2ec   : > { %8412 = vmatpush1.bf16.msra.mxu1 %v8411_v0  ;;  %v1788_v0 = vld [vmem:[%s14861_s5] sm:$0xff]  ;;  %v1849_v21 = vld [vmem:[%s14861_s5 + $0x1e8] sm:$0xff]  ;;  %v1855_v9 = vld [vmem:[%s14861_s5 + $0x218] sm:$0xff] }
 0x2ed   : > { %8604 = vmatpush1.bf16.msra.mxu0 %v8603_v1  ;;  %8414 = vmatprep.subr.bf16.mxu1 %v8413_v2  ;;  %v1794_v1 = vld [vmem:[%s14861_s5 + $0x30] sm:$0xff]  ;;  %v8813_v2 = vpack.c.bf16 %v7144_v59, %v7138_v58  ;;  %v3705_v58 = vrot.slane %v12113_v56, 2  ;;  %v1836_v3 = vld [vmem:[%s14861_s5 + $0x180] sm:$0xff] }
 0x2ee   : > { %8606 = vmatprep.subr.bf16.mxu0 %v8605_v62  ;;  %v1807_v62 = vld [vmem:[%s14861_s5 + $0x98] sm:$0xff]  ;;  %v8431_v11 = vpack.c.bf16 %v1794_v1, %v1788_v0  ;;  %v8827_v1 = vpack.c.bf16 %v7179_v30, %v7173_v53  ;;  %v1872_v53 = vld [vmem:[%s14861_s5 + $0x2a0] sm:$0xff]  ;;  %v7221_v30 = vld [vmem:[%s14861_s5 + $0x14b0] sm:$0xff] }
 0x2f0   : > { %8416 = vmatpush1.bf16.msra.mxu1 %v8415_v14  ;;  %v1806_v14 = vld [vmem:[%s14861_s5 + $0x90] sm:$0xff] }
 0x2f1   : > { %8608 = vmatpush1.bf16.msra.mxu0 %v8607_v15  ;;  %8418 = vmatprep.subr.bf16.mxu1 %v8417_v16  ;;  %v8433_v15 = vpack.c.bf16 %v1807_v62, %v1801_v6  ;;  %v7149_v16 = vld [vmem:[%s14861_s5 + $0x1270] sm:$0xff]  ;;  %v8435_v26 = vpack.c.bf16 %v1806_v14, %v1800_v13  ;;  %v7204_v13 = vld [vmem:[%s14861_s5 + $0x1428] sm:$0xff]  ;;  %v8447_v14 = vpack.c.bf16 %v1842_v4, %v1836_v3  ;;  %v1884_v4 = vld [vmem:[%s14861_s5 + $0x300] sm:$0xff] }
 0x2f2   : > { %8610 = vmatprep.subr.bf16.mxu0 %v8609_v22  ;;  %v1813_v22 = vld [vmem:[%s14861_s5 + $0xc8] sm:$0xff]  ;;  %v8819_v33 = vpack.c.bf16 %v7155_v18, %v7149_v16  ;;  %v7185_v6 = vld [vmem:[%s14861_s5 + $0x1390] sm:$0xff]  ;;  %v8449_v16 = vpack.c.bf16 %v1855_v9, %v1849_v21  ;;  %v1848_v18 = vld [vmem:[%s14861_s5 + $0x1e0] sm:$0xff] }
 0x2f3   : > { %v7239_v21 = vld [vmem:[%s14861_s5 + $0x1540] sm:$0xff]  ;;  %v1897_v9 = vld [vmem:[%s14861_s5 + $0x368] sm:$0xff] }
 0x2f4   : > { %8420 = vmatpush1.bf16.msra.mxu1 %v8419_v36  ;;  %v1818_v36 = vld [vmem:[%s14861_s5 + $0xf0] sm:$0xff] }
 0x2f5   : > { %8612 = vmatpush1.bf16.msra.mxu0 %v8611_v37  ;;  %8422 = vmatprep.subr.bf16.mxu1 %v8421_v5  ;;  %v8437_v37 = vpack.c.bf16 %v1819_v23, %v1813_v22  ;;  %v7161_v5 = vld [vmem:[%s14861_s5 + $0x12d0] sm:$0xff]  ;;  %v8439_v34 = vpack.c.bf16 %v1818_v36, %v1812_v52  ;;  %v7216_v52 = vld [vmem:[%s14861_s5 + $0x1488] sm:$0xff] }
 0x2f6   : > { %8614 = vmatprep.subr.bf16.mxu0 %v8613_v35  ;;  %v1825_v35 = vld [vmem:[%s14861_s5 + $0x128] sm:$0xff]  ;;  %v8823_v44 = vpack.c.bf16 %v7167_v8, %v7161_v5  ;;  %v7197_v22 = vld [vmem:[%s14861_s5 + $0x13f0] sm:$0xff]  ;;  %v1860_v8 = vld [vmem:[%s14861_s5 + $0x240] sm:$0xff] }
 0x2f7   : > { %v8441_v28 = vpack.c.bf16 %v1831_v42, %v1825_v35  ;;  %v7215_v42 = vld [vmem:[%s14861_s5 + $0x1480] sm:$0xff] }
 0x2f8   : > { %8424 = vmatpush1.bf16.msra.mxu1 %v8423_v45  ;;  %v3704_v45 = vrot.slane %v3401_v40, 2  ;;  %v1866_v40 = vld [vmem:[%s14861_s5 + $0x270] sm:$0xff] }
 0x2f9   : > { %8616 = vmatpush1.bf16.msra.mxu0 %v8615_v39  ;;  %8426 = vmatprep.subr.bf16.mxu1 %v8425_v51  ;;  %v1824_v39 = vld [vmem:[%s14861_s5 + $0x120] sm:$0xff]  ;;  %v1830_v51 = vld [vmem:[%s14861_s5 + $0x150] sm:$0xff] }
 0x2fa   : > { %8618 = vmatprep.subr.bf16.mxu0 %v8617_v32  ;;  %v1837_v32 = vld [vmem:[%s14861_s5 + $0x188] sm:$0xff]  ;;  %v12129_v0 = vsel %vm1512_vm7, %v3704_v45, %v3705_v58  ;;  %v8455_v45 = vpack.c.bf16 %v1866_v40, %v1860_v8  ;;  %v1908_v40 = vld [vmem:[%s14861_s5 + $0x3c0] sm:$0xff] }
 0x2fc   : > { %8428 = vmatpush1.bf16.msra.mxu1 %v8427_v60  ;;  %v7186_v60 = vld [vmem:[%s14861_s5 + $0x1398] sm:$0xff] }
 0x2fd   : > { %8620 = vmatpush1.bf16.msra.mxu0 %v8619_v61  ;;  %8430 = vmatprep.subr.bf16.mxu1 %v8429_v10  ;;  %v7192_v61 = vld [vmem:[%s14861_s5 + $0x13c8] sm:$0xff]  ;;  %v12123_v10 = vld [vmem:[#allocation3 + $0x8] sm:$0xff] }
 0x2fe   : > { %8814 = vmatprep.subr.bf16.mxu0 %v8813_v2  ;;  %v8445_v2 = vpack.c.bf16 %v1843_v54, %v1837_v32  ;;  %v8829_v62 = vpack.c.bf16 %v7192_v61, %v7186_v60  ;;  %v7227_v54 = vld [vmem:[%s14861_s5 + $0x14e0] sm:$0xff]  ;;  %v1891_v60 = vld [vmem:[%s14861_s5 + $0x338] sm:$0xff] }
 0x2ff   : > { %2884 = vmatmul.mubr.f32.vlgmr.msra.gmra.mrb[12].mxu1 %v11429_v29  ;;  %v7168_v29 = vld [vmem:[%s14861_s5 + $0x1308] sm:$0xff]  ;;  %v7234_v61 = vld [vmem:[%s14861_s5 + $0x1518] sm:$0xff] }
 0x300   : > { %3216 = vmatmul.mubr.f32.vlgmr.msra.gmra.mrb[14].mxu0 %v12045_v24  ;;  %8432 = vmatpush1.bf16.msra.mxu1 %v8431_v11  ;;  %v8821_v41 = vpack.c.bf16 %v7168_v29, %v7162_v27  ;;  %v7191_v11 = vld [vmem:[%s14861_s5 + $0x13c0] sm:$0xff]  ;;  %v1861_v27 = vld [vmem:[%s14861_s5 + $0x248] sm:$0xff]  ;;  %v1867_v29 = vld [vmem:[%s14861_s5 + $0x278] sm:$0xff] }
 0x301   : > { %8816 = vmatpush1.bf16.msra.mxu0 %v8815_v12  ;;  %2889 = vmatprep.mubr.f32.mxu1 %v14878_v7  ;;  %v7198_v12 = vld [vmem:[%s14861_s5 + $0x13f8] sm:$0xff]  ;;  %v8453_v5 = vpack.c.bf16 %v1867_v29, %v1861_v27  ;;  %v7251_v27 = vld [vmem:[%s14861_s5 + $0x15a0] sm:$0xff]  ;;  %v1909_v29 = vld [vmem:[%s14861_s5 + $0x3c8] sm:$0xff] }
 0x302   : > { %3221 = vmatprep.mubr.f32.mxu0 %v14878_v7  ;;  %8434 = vmatprep.subr.bf16.mxu1 %v8433_v15  ;;  %v8831_v15 = vpack.c.bf16 %v7191_v11, %v7185_v6  ;;  %v8833_v23 = vpack.c.bf16 %v7204_v13, %v7198_v12  ;;  %v1890_v6 = vld [vmem:[%s14861_s5 + $0x330] sm:$0xff]  ;;  %v1903_v12 = vld [vmem:[%s14861_s5 + $0x398] sm:$0xff] }
 0x303   : > { %2890 = vmatmul.mubr.f32.gmra.mrb[14].mxu1 %v11457_v38  ;;  %8818 = vmatprep.subr.bf16.mxu0 %v8817_v63  ;;  %v7174_v38 = vld [vmem:[%s14861_s5 + $0x1338] sm:$0xff]  ;;  %v1854_v63 = vld [vmem:[%s14861_s5 + $0x210] sm:$0xff] }
 0x304   : > { %3222 = vmatmul.mubr.f32.gmra.mrb[16].mxu0 %v12081_v43  ;;  %8436 = vmatpush1.bf16.msra.mxu1 %v8435_v26  ;;  %v8825_v59 = vpack.c.bf16 %v7180_v17, %v7174_v38  ;;  %v7203_v26 = vld [vmem:[%s14861_s5 + $0x1420] sm:$0xff]  ;;  %v8451_v36 = vpack.c.bf16 %v1854_v63, %v1848_v18  ;;  %v1879_v38 = vld [vmem:[%s14861_s5 + $0x2d8] sm:$0xff]  ;;  %v8465_v18 = vpack.c.bf16 %v1903_v12, %v1897_v9  ;;  %v1945_v12 = vld [vmem:[%s14861_s5 + $0x4e8] sm:$0xff] }
 0x305   : > { %8820 = vmatpush1.bf16.msra.mxu0 %v8819_v33  ;;  %2895 = vmatprep.mubr.f32.mxu1 %v14878_v7  ;;  %v7210_v33 = vld [vmem:[%s14861_s5 + $0x1458] sm:$0xff]  ;;  %v1896_v63 = vld [vmem:[%s14861_s5 + $0x360] sm:$0xff] }
 0x306   : > { %3227 = vmatprep.mubr.f32.mxu0 %v14878_v7  ;;  %8438 = vmatprep.subr.bf16.mxu1 %v8437_v37  ;;  %v8835_v37 = vpack.c.bf16 %v7203_v26, %v7197_v22  ;;  %v8837_v35 = vpack.c.bf16 %v7216_v52, %v7210_v33  ;;  %v7222_v17 = vld [vmem:[%s14861_s5 + $0x14b8] sm:$0xff]  ;;  %v1902_v22 = vld [vmem:[%s14861_s5 + $0x390] sm:$0xff]  ;;  %v7287_v9 = vld [vmem:[%s14861_s5 + $0x16c0] sm:$0xff] }
 0x307   : > { %2896 = vmatmul.mubr.f32.gmra.mrb[16].mxu1 %v11431_v19  ;;  %8822 = vmatprep.subr.bf16.mxu0 %v8821_v41  ;;  %v8443_v19 = vpack.c.bf16 %v1830_v51, %v1824_v39  ;;  %v7209_v41 = vld [vmem:[%s14861_s5 + $0x1450] sm:$0xff]  ;;  %v7246_v13 = vld [vmem:[%s14861_s5 + $0x1578] sm:$0xff] }
 0x308   : > { %3228 = vmatmul.mubr.f32.gmra.mrb[18].mxu0 %v12111_v55  ;;  %8440 = vmatpush1.bf16.msra.mxu1 %v8439_v34  ;;  %v1873_v34 = vld [vmem:[%s14861_s5 + $0x2a8] sm:$0xff]  ;;  %v8839_v39 = vpack.c.bf16 %v7215_v42, %v7209_v41  ;;  %v1915_v33 = vld [vmem:[%s14861_s5 + $0x3f8] sm:$0xff]  ;;  %v1914_v41 = vld [vmem:[%s14861_s5 + $0x3f0] sm:$0xff] }
 0x309   : > { %2966 = vmatprep.mubr.f32.mxu1 %v12123_v10  ;;  %8824 = vmatpush1.bf16.msra.mxu0 %v8823_v44  ;;  %v7228_v44 = vld [vmem:[%s14861_s5 + $0x14e8] sm:$0xff]  ;;  %v8457_v51 = vpack.c.bf16 %v1879_v38, %v1873_v34  ;;  %v7258_v52 = vld [vmem:[%s14861_s5 + $0x15d8] sm:$0xff]  ;;  %v8469_v8 = vpack.c.bf16 %v1915_v33, %v1909_v29  ;;  %v7263_v34 = vld [vmem:[%s14861_s5 + $0x1600] sm:$0xff] }
 0x30a   : > { %3955 = vmatprep.mubr.f32.mxu0 %v12129_v0  ;;  %8442 = vmatprep.subr.bf16.mxu1 %v8441_v28  ;;  %v1878_v28 = vld [vmem:[%s14861_s5 + $0x2d0] sm:$0xff]  ;;  %v8841_v32 = vpack.c.bf16 %v7228_v44, %v7222_v17  ;;  %v1921_v38 = vld [vmem:[%s14861_s5 + $0x428] sm:$0xff]  ;;  %v1927_v17 = vld [vmem:[%s14861_s5 + $0x458] sm:$0xff] }
 0x30b   : > { %8826 = vmatprep.subr.bf16.mxu0 %v8825_v59  ;;  %v1885_v59 = vld [vmem:[%s14861_s5 + $0x308] sm:$0xff]  ;;  %v7270_v44 = vld [vmem:[%s14861_s5 + $0x1638] sm:$0xff]  ;;  %v7299_v29 = vld [vmem:[%s14861_s5 + $0x1720] sm:$0xff] }
 0x30c   : > { %8444 = vmatpush1.bf16.msra.mxu1 %v8443_v19  ;;  %v7240_v19 = vld [vmem:[%s14861_s5 + $0x1548] sm:$0xff]  ;;  %v8461_v3 = vpack.c.bf16 %v1891_v60, %v1885_v59  ;;  %v7275_v59 = vld [vmem:[%s14861_s5 + $0x1660] sm:$0xff] }
 0x30d   : > { %8828 = vmatpush1.bf16.msra.mxu0 %v8827_v1  ;;  %8446 = vmatprep.subr.bf16.mxu1 %v8445_v2  ;;  %v8459_v1 = vpack.c.bf16 %v1878_v28, %v1872_v53  ;;  %v8843_v2 = vpack.c.bf16 %v7227_v54, %v7221_v30  ;;  %v8845_v11 = vpack.c.bf16 %v7240_v19, %v7234_v61  ;;  %v1920_v28 = vld [vmem:[%s14861_s5 + $0x420] sm:$0xff]  ;;  %v1926_v30 = vld [vmem:[%s14861_s5 + $0x450] sm:$0xff]  ;;  %v1933_v60 = vld [vmem:[%s14861_s5 + $0x488] sm:$0xff] }
 0x30e   : > { %8830 = vmatprep.subr.bf16.mxu0 %v8829_v62  ;;  %v7233_v62 = vld [vmem:[%s14861_s5 + $0x1510] sm:$0xff]  ;;  %v8473_v53 = vpack.c.bf16 %v1927_v17, %v1921_v38  ;;  %v1939_v61 = vld [vmem:[%s14861_s5 + $0x4b8] sm:$0xff]  ;;  %v1957_v33 = vld [vmem:[%s14861_s5 + $0x548] sm:$0xff] }
 0x30f   : > { %v7282_v19 = vld [vmem:[%s14861_s5 + $0x1698] sm:$0xff]  ;;  %v7311_v38 = vld [vmem:[%s14861_s5 + $0x1780] sm:$0xff]  ;;  %v1969_v17 = vld [vmem:[%s14861_s5 + $0x5a8] sm:$0xff] }
 0x310   : > { %8448 = vmatpush1.bf16.msra.mxu1 %v8447_v14  ;;  %v7252_v14 = vld [vmem:[%s14861_s5 + $0x15a8] sm:$0xff] }
 0x311   : > { %8832 = vmatpush1.bf16.msra.mxu0 %v8831_v15  ;;  %8450 = vmatprep.subr.bf16.mxu1 %v8449_v16  ;;  %v8463_v15 = vpack.c.bf16 %v1890_v6, %v1884_v4  ;;  %v8847_v16 = vpack.c.bf16 %v7239_v21, %v7233_v62  ;;  %v8849_v26 = vpack.c.bf16 %v7252_v14, %v7246_v13  ;;  %v1932_v6 = vld [vmem:[%s14861_s5 + $0x480] sm:$0xff]  ;;  %v1938_v62 = vld [vmem:[%s14861_s5 + $0x4b0] sm:$0xff]  ;;  %v1951_v13 = vld [vmem:[%s14861_s5 + $0x518] sm:$0xff] }
 0x312   : > { %8834 = vmatprep.subr.bf16.mxu0 %v8833_v23  ;;  %v7245_v23 = vld [vmem:[%s14861_s5 + $0x1570] sm:$0xff]  ;;  %v8477_v4 = vpack.c.bf16 %v1939_v61, %v1933_v60  ;;  %v7294_v14 = vld [vmem:[%s14861_s5 + $0x16f8] sm:$0xff]  ;;  %v7323_v60 = vld [vmem:[%s14861_s5 + $0x17e0] sm:$0xff] }
 0x313   : > { %v1981_v61 = vld [vmem:[%s14861_s5 + $0x608] sm:$0xff] }
 0x314   : > { %8452 = vmatpush1.bf16.msra.mxu1 %v8451_v36  ;;  %v7264_v36 = vld [vmem:[%s14861_s5 + $0x1608] sm:$0xff] }
 0x315   : > { %8836 = vmatpush1.bf16.msra.mxu0 %v8835_v37  ;;  %8454 = vmatprep.subr.bf16.mxu1 %v8453_v5  ;;  %v8467_v37 = vpack.c.bf16 %v1902_v22, %v1896_v63  ;;  %v8851_v5 = vpack.c.bf16 %v7251_v27, %v7245_v23  ;;  %v8853_v42 = vpack.c.bf16 %v7264_v36, %v7258_v52  ;;  %v1944_v22 = vld [vmem:[%s14861_s5 + $0x4e0] sm:$0xff]  ;;  %v1950_v23 = vld [vmem:[%s14861_s5 + $0x510] sm:$0xff]  ;;  %v1963_v52 = vld [vmem:[%s14861_s5 + $0x578] sm:$0xff] }
 0x316   : > { %8838 = vmatprep.subr.bf16.mxu0 %v8837_v35  ;;  %v7257_v35 = vld [vmem:[%s14861_s5 + $0x15d0] sm:$0xff]  ;;  %v8481_v63 = vpack.c.bf16 %v1951_v13, %v1945_v12  ;;  %v7306_v36 = vld [vmem:[%s14861_s5 + $0x1758] sm:$0xff] }
 0x317   : > { %v1986_v12 = vld [vmem:[%s14861_s5 + $0x630] sm:$0xff] }
 0x318   : > { %8456 = vmatpush1.bf16.msra.mxu1 %v8455_v45  ;;  %v7276_v45 = vld [vmem:[%s14861_s5 + $0x1668] sm:$0xff]  ;;  %v7329_v13 = vld [vmem:[%s14861_s5 + $0x1810] sm:$0xff] }
 0x319   : > { %8840 = vmatpush1.bf16.msra.mxu0 %v8839_v39  ;;  %8458 = vmatprep.subr.bf16.mxu1 %v8457_v51  ;;  %v8471_v39 = vpack.c.bf16 %v1914_v41, %v1908_v40  ;;  %v8855_v51 = vpack.c.bf16 %v7263_v34, %v7257_v35  ;;  %v8857_v54 = vpack.c.bf16 %v7276_v45, %v7270_v44  ;;  %v1956_v41 = vld [vmem:[%s14861_s5 + $0x540] sm:$0xff]  ;;  %v1962_v35 = vld [vmem:[%s14861_s5 + $0x570] sm:$0xff]  ;;  %v1975_v44 = vld [vmem:[%s14861_s5 + $0x5d8] sm:$0xff] }
 0x31a   : > { %8842 = vmatprep.subr.bf16.mxu0 %v8841_v32  ;;  %v7269_v32 = vld [vmem:[%s14861_s5 + $0x1630] sm:$0xff]  ;;  %v8485_v40 = vpack.c.bf16 %v1963_v52, %v1957_v33  ;;  %v7318_v45 = vld [vmem:[%s14861_s5 + $0x17b8] sm:$0xff] }
 0x31c   : > { %8460 = vmatpush1.bf16.msra.mxu1 %v8459_v1  ;;  %v7288_v1 = vld [vmem:[%s14861_s5 + $0x16c8] sm:$0xff] }
 0x31d   : > { %8844 = vmatpush1.bf16.msra.mxu0 %v8843_v2  ;;  %8462 = vmatprep.subr.bf16.mxu1 %v8461_v3  ;;  %v8475_v2 = vpack.c.bf16 %v1926_v30, %v1920_v28  ;;  %v8859_v3 = vpack.c.bf16 %v7275_v59, %v7269_v32  ;;  %v8861_v21 = vpack.c.bf16 %v7288_v1, %v7282_v19  ;;  %v1968_v30 = vld [vmem:[%s14861_s5 + $0x5a0] sm:$0xff]  ;;  %v1974_v32 = vld [vmem:[%s14861_s5 + $0x5d0] sm:$0xff]  ;;  %v1987_v19 = vld [vmem:[%s14861_s5 + $0x638] sm:$0xff] }
 0x31e   : > { %8846 = vmatprep.subr.bf16.mxu0 %v8845_v11  ;;  %v7281_v11 = vld [vmem:[%s14861_s5 + $0x1690] sm:$0xff]  ;;  %v8489_v28 = vpack.c.bf16 %v1975_v44, %v1969_v17  ;;  %v7330_v1 = vld [vmem:[%s14861_s5 + $0x1818] sm:$0xff]  ;;  %v7360_v44 = vld [vmem:[%s14861_s5 + $0x1908] sm:$0xff] }
 0x31f   : > { %v7354_v17 = vld [vmem:[%s14861_s5 + $0x18d8] sm:$0xff] }
 0x320   : > { %8464 = vmatpush1.bf16.msra.mxu1 %v8463_v15  ;;  %v7300_v15 = vld [vmem:[%s14861_s5 + $0x1728] sm:$0xff] }
 0x321   : > { %8848 = vmatpush1.bf16.msra.mxu0 %v8847_v16  ;;  %8466 = vmatprep.subr.bf16.mxu1 %v8465_v18  ;;  %v8479_v16 = vpack.c.bf16 %v1938_v62, %v1932_v6  ;;  %v8863_v18 = vpack.c.bf16 %v7287_v9, %v7281_v11  ;;  %v8865_v27 = vpack.c.bf16 %v7300_v15, %v7294_v14  ;;  %v3404_v11 = vld [vmem:[#allocation3 + $0x38] sm:$0xff] }
 0x322   : > { %8850 = vmatprep.subr.bf16.mxu0 %v8849_v26  ;;  %v7293_v26 = vld [vmem:[%s14861_s5 + $0x16f0] sm:$0xff]  ;;  %v8493_v62 = vpack.c.bf16 %v1987_v19, %v1981_v61  ;;  %v1980_v9 = vld [vmem:[%s14861_s5 + $0x600] sm:$0xff]  ;;  %v7372_v61 = vld [vmem:[%s14861_s5 + $0x1968] sm:$0xff] }
 0x323   : > { %v7335_v15 = vld [vmem:[%s14861_s5 + $0x1840] sm:$0xff]  ;;  %v8495_v33 = vpack.c.bf16 %v1986_v12, %v1980_v9  ;;  %v7384_v9 = vld [vmem:[%s14861_s5 + $0x19c8] sm:$0xff] }
 0x324   : > { %8468 = vmatpush1.bf16.msra.mxu1 %v8467_v37  ;;  %v7312_v37 = vld [vmem:[%s14861_s5 + $0x1788] sm:$0xff]  ;;  %v8879_v52 = vpack.c.bf16 %v7335_v15, %v7329_v13  ;;  %v2028_v15 = vld [vmem:[%s14861_s5 + $0x780] sm:$0xff] }
 0x325   : > { %8852 = vmatpush1.bf16.msra.mxu0 %v8851_v5  ;;  %8470 = vmatprep.subr.bf16.mxu1 %v8469_v8  ;;  %v8483_v5 = vpack.c.bf16 %v1950_v23, %v1944_v22  ;;  %v8867_v8 = vpack.c.bf16 %v7299_v29, %v7293_v26  ;;  %v8869_v34 = vpack.c.bf16 %v7312_v37, %v7306_v36  ;;  %v3403_v22 = vld [vmem:[#allocation3 + $0x30] sm:$0xff]  ;;  %v7348_v26 = vld [vmem:[%s14861_s5 + $0x18a8] sm:$0xff]  ;;  %v1992_v37 = vld [vmem:[%s14861_s5 + $0x660] sm:$0xff] }
 0x326   : > { %8854 = vmatprep.subr.bf16.mxu0 %v8853_v42  ;;  %v7305_v42 = vld [vmem:[%s14861_s5 + $0x1750] sm:$0xff]  ;;  %v7342_v23 = vld [vmem:[%s14861_s5 + $0x1878] sm:$0xff] }
 0x328   : > { %8472 = vmatpush1.bf16.msra.mxu1 %v8471_v39  ;;  %v7324_v39 = vld [vmem:[%s14861_s5 + $0x17e8] sm:$0xff] }
 0x329   : > { %8856 = vmatpush1.bf16.msra.mxu0 %v8855_v51  ;;  %8474 = vmatprep.subr.bf16.mxu1 %v8473_v53  ;;  %v8487_v51 = vpack.c.bf16 %v1962_v35, %v1956_v41  ;;  %v8871_v53 = vpack.c.bf16 %v7311_v38, %v7305_v42  ;;  %v8873_v59 = vpack.c.bf16 %v7324_v39, %v7318_v45  ;;  %v12462_v41 = vrot.slane %v3403_v22, 2  ;;  %v7347_v42 = vld [vmem:[%s14861_s5 + $0x18a0] sm:$0xff]  ;;  %v2011_v38 = vld [vmem:[%s14861_s5 + $0x6f8] sm:$0xff] }
 0x32a   : > { %8858 = vmatprep.subr.bf16.mxu0 %v8857_v54  ;;  %v7317_v54 = vld [vmem:[%s14861_s5 + $0x17b0] sm:$0xff]  ;;  %v8881_v35 = vpack.c.bf16 %v7348_v26, %v7342_v23  ;;  %v7383_v23 = vld [vmem:[%s14861_s5 + $0x19c0] sm:$0xff]  ;;  %v2041_v26 = vld [vmem:[%s14861_s5 + $0x7e8] sm:$0xff] }
 0x32b   : > { %v8875_v6 = vpack.c.bf16 %v7323_v60, %v7317_v54  ;;  %v2017_v54 = vld [vmem:[%s14861_s5 + $0x728] sm:$0xff]  ;;  %v7366_v60 = vld [vmem:[%s14861_s5 + $0x1938] sm:$0xff] }
 0x32c   : > { %8476 = vmatpush1.bf16.msra.mxu1 %v8475_v2  ;;  %v7336_v2 = vld [vmem:[%s14861_s5 + $0x1848] sm:$0xff] }
 0x32d   : > { %8860 = vmatpush1.bf16.msra.mxu0 %v8859_v3  ;;  %8478 = vmatprep.subr.bf16.mxu1 %v8477_v4  ;;  %v8491_v3 = vpack.c.bf16 %v1974_v32, %v1968_v30  ;;  %v3400_v4 = vld [vmem:[#allocation3] sm:$0xfc]  ;;  %v8885_v30 = vpack.c.bf16 %v7360_v44, %v7354_v17  ;;  %v7359_v32 = vld [vmem:[%s14861_s5 + $0x1900] sm:$0xff]  ;;  %v2059_v44 = vld [vmem:[%s14861_s5 + $0x878] sm:$0xff] }
 0x32e   : > { %8862 = vmatprep.subr.bf16.mxu0 %v8861_v21  ;;  %v8877_v21 = vpack.c.bf16 %v7336_v2, %v7330_v1  ;;  %v3701_v14 = vrot.slane %v3400_v4, 2  ;;  %v7365_v4 = vld [vmem:[%s14861_s5 + $0x1930] sm:$0xff]  ;;  %v2053_v17 = vld [vmem:[%s14861_s5 + $0x848] sm:$0xff] }
 0x330   : > { %8480 = vmatpush1.bf16.msra.mxu1 %v8479_v16  ;;  %v1993_v16 = vld [vmem:[%s14861_s5 + $0x668] sm:$0xff] }
 0x331   : > { %8864 = vmatpush1.bf16.msra.mxu0 %v8863_v18  ;;  %8482 = vmatprep.subr.bf16.mxu1 %v8481_v63  ;;  %v1999_v18 = vld [vmem:[%s14861_s5 + $0x698] sm:$0xff]  ;;  %v12438_v63 = vrot.slane %v3404_v11, 2  ;;  %v2029_v11 = vld [vmem:[%s14861_s5 + $0x788] sm:$0xff] }
 0x332   : > { %8866 = vmatprep.subr.bf16.mxu0 %v8865_v27  ;;  %v12446_v27 = vld [vmem:[#allocation3 + $0x18] sm:$0xff]  ;;  %v8497_v36 = vpack.c.bf16 %v1999_v18, %v1993_v16  ;;  %v2034_v16 = vld [vmem:[%s14861_s5 + $0x7b0] sm:$0xff] }
 0x333   : > { %v3702_v29 = vrot.slane %v12446_v27, 2  ;;  %v7377_v18 = vld [vmem:[%s14861_s5 + $0x1990] sm:$0xff] }
 0x334   : > { %8484 = vmatpush1.bf16.msra.mxu1 %v8483_v5  ;;  %v1998_v5 = vld [vmem:[%s14861_s5 + $0x690] sm:$0xff] }
 0x335   : > { %8868 = vmatpush1.bf16.msra.mxu0 %v8867_v8  ;;  %8486 = vmatprep.subr.bf16.mxu1 %v8485_v40  ;;  %v7341_v8 = vld [vmem:[%s14861_s5 + $0x1870] sm:$0xff]  ;;  %v12460_v40 = vsel %vm1512_vm7, %v3701_v14, %v3702_v29  ;;  %v8499_v45 = vpack.c.bf16 %v1998_v5, %v1992_v37  ;;  %v8895_v37 = vpack.c.bf16 %v7383_v23, %v7377_v18  ;;  %v1805_v23 = vld [vmem:[%s14861_s5 + $0x88] sm:$0xff] }
 0x336   : > { %8870 = vmatprep.subr.bf16.mxu0 %v8869_v34  ;;  %v2005_v34 = vld [vmem:[%s14861_s5 + $0x6c8] sm:$0xff]  ;;  %v8883_v39 = vpack.c.bf16 %v7347_v42, %v7341_v8  ;;  %v2040_v8 = vld [vmem:[%s14861_s5 + $0x7e0] sm:$0xff]  ;;  %v7389_v42 = vld [vmem:[%s14861_s5 + $0x19f0] sm:$0xff] }
 0x337   : > { %v1798_v18 = vld [vmem:[%s14861_s5 + $0x50] sm:$0xff] }
 0x338   : > { %8488 = vmatpush1.bf16.msra.mxu1 %v8487_v51  ;;  %v8501_v51 = vpack.c.bf16 %v2011_v38, %v2005_v34  ;;  %v7395_v38 = vld [vmem:[%s14861_s5 + $0x1a20] sm:$0xff] }
 0x339   : > { %8872 = vmatpush1.bf16.msra.mxu0 %v8871_v53  ;;  %8490 = vmatprep.subr.bf16.mxu1 %v8489_v28  ;;  %v7353_v53 = vld [vmem:[%s14861_s5 + $0x18d0] sm:$0xff]  ;;  %v12500_v28 = vsel %vm1512_vm7, %v3702_v29, %v12462_v41  ;;  %v2047_v29 = vld [vmem:[%s14861_s5 + $0x818] sm:$0xff] }
 0x33a   : > { %8874 = vmatprep.subr.bf16.mxu0 %v8873_v59  ;;  %v2023_v59 = vld [vmem:[%s14861_s5 + $0x758] sm:$0xff]  ;;  %v8887_v1 = vpack.c.bf16 %v7359_v32, %v7353_v53  ;;  %v8513_v5 = vpack.c.bf16 %v2047_v29, %v2041_v26  ;;  %v2052_v53 = vld [vmem:[%s14861_s5 + $0x840] sm:$0xff]  ;;  %v7401_v32 = vld [vmem:[%s14861_s5 + $0x1a50] sm:$0xff] }
 0x33b   : > { %v8505_v2 = vpack.c.bf16 %v2023_v59, %v2017_v54  ;;  %v7407_v59 = vld [vmem:[%s14861_s5 + $0x1a80] sm:$0xff]  ;;  %v1811_v26 = vld [vmem:[%s14861_s5 + $0xb8] sm:$0xff] }
 0x33c   : > { %8492 = vmatpush1.bf16.msra.mxu1 %v8491_v3  ;;  %v2022_v3 = vld [vmem:[%s14861_s5 + $0x750] sm:$0xff] }
 0x33d   : > { %8876 = vmatpush1.bf16.msra.mxu0 %v8875_v6  ;;  %8494 = vmatprep.subr.bf16.mxu1 %v8493_v62  ;;  %v8889_v6 = vpack.c.bf16 %v7372_v61, %v7366_v60  ;;  %v7371_v62 = vld [vmem:[%s14861_s5 + $0x1960] sm:$0xff]  ;;  %v2065_v60 = vld [vmem:[%s14861_s5 + $0x8a8] sm:$0xff]  ;;  %v2071_v61 = vld [vmem:[%s14861_s5 + $0x8d8] sm:$0xff] }
 0x33e   : > { %8878 = vmatprep.subr.bf16.mxu0 %v8877_v21  ;;  %v2035_v21 = vld [vmem:[%s14861_s5 + $0x7b8] sm:$0xff]  ;;  %v8891_v13 = vpack.c.bf16 %v7371_v62, %v7365_v4  ;;  %v2064_v4 = vld [vmem:[%s14861_s5 + $0x8a0] sm:$0xff]  ;;  %v7413_v62 = vld [vmem:[%s14861_s5 + $0x1ab0] sm:$0xff] }
 0x33f   : > { %2967 = vmatmul.mubr.f32.vlgmr.msra.gmra.mrb[6].mxu1 %v11835_v31  ;;  %v12479_v31 = vsel %vm1512_vm7, %v3705_v58, %v12438_v63  ;;  %v2010_v58 = vld [vmem:[%s14861_s5 + $0x6f0] sm:$0xff]  ;;  %v8509_v14 = vpack.c.bf16 %v2035_v21, %v2029_v11  ;;  %v7419_v21 = vld [vmem:[%s14861_s5 + $0x1ae0] sm:$0xff] }
 0x340   : > { %3956 = vmatmul.mubr.f32.vlgmr.msra.gmra.mrb[14].mxu0 %v12460_v40  ;;  %2972 = vmatprep.mubr.f32.mxu1 %v12113_v56  ;;  %v2004_v56 = vld [vmem:[%s14861_s5 + $0x6c0] sm:$0xff] }
 0x341   : > { %8496 = vmatpush1.bf16.msra.mxu1 %v8495_v33  ;;  %3961 = vmatprep.mubr.f32.mxu0 %v12479_v31  ;;  %v8503_v19 = vpack.c.bf16 %v2010_v58, %v2004_v56  ;;  %v7390_v33 = vld [vmem:[%s14861_s5 + $0x19f8] sm:$0xff]  ;;  %v8899_v56 = vpack.c.bf16 %v7395_v38, %v7389_v42  ;;  %v8517_v58 = vpack.c.bf16 %v2059_v44, %v2053_v17  ;;  %v1817_v42 = vld [vmem:[%s14861_s5 + $0xe8] sm:$0xff]  ;;  %v1822_v17 = vld [vmem:[%s14861_s5 + $0x110] sm:$0xff] }
 0x342   : > { %8880 = vmatpush1.bf16.msra.mxu0 %v8879_v52  ;;  %8498 = vmatprep.subr.bf16.mxu1 %v8497_v36  ;;  %v7396_v52 = vld [vmem:[%s14861_s5 + $0x1a28] sm:$0xff]  ;;  %v8511_v36 = vpack.c.bf16 %v2034_v16, %v2028_v15  ;;  %v1792_v16 = vld [vmem:[%s14861_s5 + $0x20] sm:$0xff] }
 0x343   : > { %2973 = vmatmul.mubr.f32.gmra.mrb[8].mxu1 %v12446_v27  ;;  %8882 = vmatprep.subr.bf16.mxu0 %v8881_v35  ;;  %v2046_v35 = vld [vmem:[%s14861_s5 + $0x810] sm:$0xff]  ;;  %v8897_v34 = vpack.c.bf16 %v7396_v52, %v7390_v33  ;;  %v8623_v29 = vpack.c.bf16 %v1798_v18, %v1792_v16  ;;  %v3405_v33 = vld [vmem:[#allocation3 + $0x40] sm:$0xff]  ;;  %v3708_v52 = vrot.slane %v12081_v43, 2  ;;  %v1895_v18 = vld [vmem:[%s14861_s5 + $0x358] sm:$0xff] }
 0x344   : > { %3962 = vmatmul.mubr.f32.gmra.mrb[16].mxu0 %v12500_v28  ;;  %2978 = vmatprep.mubr.f32.mxu1 %v11873_v49  ;;  %v2016_v49 = vld [vmem:[%s14861_s5 + $0x720] sm:$0xff]  ;;  %v1889_v16 = vld [vmem:[%s14861_s5 + $0x328] sm:$0xff] }
 0x345   : > { %8500 = vmatpush1.bf16.msra.mxu1 %v8499_v45  ;;  %3967 = vmatprep.mubr.f32.mxu0 %v12438_v63  ;;  %v8507_v12 = vpack.c.bf16 %v2022_v3, %v2016_v49  ;;  %v7402_v45 = vld [vmem:[%s14861_s5 + $0x1a58] sm:$0xff]  ;;  %v8903_v49 = vpack.c.bf16 %v7407_v59, %v7401_v32  ;;  %v8521_v3 = vpack.c.bf16 %v2071_v61, %v2065_v60  ;;  %v1840_v60 = vld [vmem:[%s14861_s5 + $0x1a0] sm:$0xff]  ;;  %v1846_v61 = vld [vmem:[%s14861_s5 + $0x1d0] sm:$0xff] }
 0x346   : > { %8884 = vmatpush1.bf16.msra.mxu0 %v8883_v39  ;;  %8502 = vmatprep.subr.bf16.mxu1 %v8501_v51  ;;  %v7408_v39 = vld [vmem:[%s14861_s5 + $0x1a88] sm:$0xff]  ;;  %v8515_v51 = vpack.c.bf16 %v2046_v35, %v2040_v8  ;;  %v12661_v35 = vrot.slane %v3405_v33, 2  ;;  %v1847_v32 = vld [vmem:[%s14861_s5 + $0x1d8] sm:$0xff] }
 0x347   : > { %2979 = vmatmul.mubr.f32.gmra.mrb[10].mxu1 %v11895_v57  ;;  %8886 = vmatprep.subr.bf16.mxu0 %v8885_v30  ;;  %v7378_v57 = vld [vmem:[%s14861_s5 + $0x1998] sm:$0xff]  ;;  %v2058_v30 = vld [vmem:[%s14861_s5 + $0x870] sm:$0xff]  ;;  %v8901_v54 = vpack.c.bf16 %v7408_v39, %v7402_v45  ;;  %v1829_v45 = vld [vmem:[%s14861_s5 + $0x148] sm:$0xff] }
 0x348   : > { %3968 = vmatmul.mubr.f32.gmra.mrb[18].mxu0 %v12462_v41  ;;  %3049 = vmatprep.mubr.f32.mxu1 %v14878_v7  ;;  %v8893_v22 = vpack.c.bf16 %v7384_v9, %v7378_v57  ;;  %v1793_v57 = vld [vmem:[%s14861_s5 + $0x28] sm:$0xff]  ;;  %v1799_v9 = vld [vmem:[%s14861_s5 + $0x58] sm:$0xff] }
 0x349   : > { %8504 = vmatpush1.bf16.msra.mxu1 %v8503_v19  ;;  %4038 = vmatprep.mubr.f32.mxu0 %v14878_v7  ;;  %v7414_v19 = vld [vmem:[%s14861_s5 + $0x1ab8] sm:$0xff]  ;;  %v8621_v15 = vpack.c.bf16 %v1799_v9, %v1793_v57  ;;  %v1877_v57 = vld [vmem:[%s14861_s5 + $0x2c8] sm:$0xff] }
 0x34a   : > { %8888 = vmatpush1.bf16.msra.mxu0 %v8887_v1  ;;  %8506 = vmatprep.subr.bf16.mxu1 %v8505_v2  ;;  %v7420_v1 = vld [vmem:[%s14861_s5 + $0x1ae8] sm:$0xff]  ;;  %v8519_v2 = vpack.c.bf16 %v2058_v30, %v2052_v53  ;;  %v1835_v39 = vld [vmem:[%s14861_s5 + $0x178] sm:$0xff]  ;;  %v1828_v53 = vld [vmem:[%s14861_s5 + $0x140] sm:$0xff] }
 0x34b   : > { %8890 = vmatprep.subr.bf16.mxu0 %v8889_v6  ;;  %v2070_v6 = vld [vmem:[%s14861_s5 + $0x8d0] sm:$0xff]  ;;  %v8905_v11 = vpack.c.bf16 %v7420_v1, %v7414_v19  ;;  %v1841_v30 = vld [vmem:[%s14861_s5 + $0x1a8] sm:$0xff]  ;;  %v1859_v19 = vld [vmem:[%s14861_s5 + $0x238] sm:$0xff] }
 0x34c   : > { %v8637_v59 = vpack.c.bf16 %v1847_v32, %v1841_v30  ;;  %v1883_v9 = vld [vmem:[%s14861_s5 + $0x2f8] sm:$0xff]  ;;  %v1901_v33 = vld [vmem:[%s14861_s5 + $0x388] sm:$0xff]  ;;  %v1930_v30 = vld [vmem:[%s14861_s5 + $0x470] sm:$0xff] }
 0x34d   : > { %8508 = vmatpush1.bf16.msra.mxu1 %v8507_v12  ;;  %v8523_v12 = vpack.c.bf16 %v2070_v6, %v2064_v4  ;;  %v1871_v4 = vld [vmem:[%s14861_s5 + $0x298] sm:$0xff]  ;;  %v1937_v32 = vld [vmem:[%s14861_s5 + $0x4a8] sm:$0xff] }
 0x34e   : > { %8892 = vmatpush1.bf16.msra.mxu0 %v8891_v13  ;;  %8510 = vmatprep.subr.bf16.mxu1 %v8509_v14  ;;  %v3402_v13 = vld [vmem:[#allocation3 + $0x10] sm:$0xfc]  ;;  %v8907_v14 = vpack.c.bf16 %v7419_v21, %v7413_v62  ;;  %v1870_v21 = vld [vmem:[%s14861_s5 + $0x290] sm:$0xff] }
 0x34f   : > { %8894 = vmatprep.subr.bf16.mxu0 %v8893_v22  ;;  %v3707_v22 = vrot.slane %v3402_v13, 2  ;;  %v8649_v13 = vpack.c.bf16 %v1883_v9, %v1877_v57  ;;  %v1966_v57 = vld [vmem:[%s14861_s5 + $0x590] sm:$0xff]  ;;  %v1973_v9 = vld [vmem:[%s14861_s5 + $0x5c8] sm:$0xff] }
 0x351   : > { %8512 = vmatpush1.bf16.msra.mxu1 %v8511_v36  ;;  %v1804_v36 = vld [vmem:[%s14861_s5 + $0x80] sm:$0xff]  ;;  %v12659_v8 = vsel %vm1512_vm7, %v3707_v22, %v3708_v52 }
 0x352   : > { %8896 = vmatpush1.bf16.msra.mxu0 %v8895_v37  ;;  %8514 = vmatprep.subr.bf16.mxu1 %v8513_v5  ;;  %v1810_v37 = vld [vmem:[%s14861_s5 + $0xb0] sm:$0xff]  ;;  %v8625_v5 = vpack.c.bf16 %v1811_v26, %v1805_v23  ;;  %v8653_v23 = vpack.c.bf16 %v1895_v18, %v1889_v16  ;;  %v1888_v26 = vld [vmem:[%s14861_s5 + $0x320] sm:$0xff]  ;;  %v1985_v18 = vld [vmem:[%s14861_s5 + $0x628] sm:$0xff] }
 0x353   : > { %8898 = vmatprep.subr.bf16.mxu0 %v8897_v34  ;;  %v1823_v34 = vld [vmem:[%s14861_s5 + $0x118] sm:$0xff]  ;;  %v8627_v38 = vpack.c.bf16 %v1810_v37, %v1804_v36  ;;  %v1978_v16 = vld [vmem:[%s14861_s5 + $0x5f0] sm:$0xff] }
 0x354   : > { %v8629_v44 = vpack.c.bf16 %v1823_v34, %v1817_v42  ;;  %v1906_v42 = vld [vmem:[%s14861_s5 + $0x3b0] sm:$0xff]  ;;  %v1913_v34 = vld [vmem:[%s14861_s5 + $0x3e8] sm:$0xff] }
 0x355   : > { %8516 = vmatpush1.bf16.msra.mxu1 %v8515_v51  ;;  %v12687_v51 = vsel %vm1512_vm7, %v3708_v52, %v12661_v35  ;;  %v1907_v52 = vld [vmem:[%s14861_s5 + $0x3b8] sm:$0xff] }
 0x356   : > { %8900 = vmatpush1.bf16.msra.mxu0 %v8899_v56  ;;  %8518 = vmatprep.subr.bf16.mxu1 %v8517_v58  ;;  %v8633_v58 = vpack.c.bf16 %v1835_v39, %v1829_v45  ;;  %v8657_v37 = vpack.c.bf16 %v1907_v52, %v1901_v33  ;;  %v1918_v45 = vld [vmem:[%s14861_s5 + $0x410] sm:$0xff]  ;;  %v1925_v39 = vld [vmem:[%s14861_s5 + $0x448] sm:$0xff] }
 0x357   : > { %8902 = vmatprep.subr.bf16.mxu0 %v8901_v54  ;;  %v1990_v33 = vld [vmem:[%s14861_s5 + $0x650] sm:$0xff]  ;;  %v1997_v52 = vld [vmem:[%s14861_s5 + $0x688] sm:$0xff] }
 0x359   : > { %8520 = vmatpush1.bf16.msra.mxu1 %v8519_v2  ;;  %v1852_v2 = vld [vmem:[%s14861_s5 + $0x200] sm:$0xff] }
 0x35a   : > { %8904 = vmatpush1.bf16.msra.mxu0 %v8903_v49  ;;  %8522 = vmatprep.subr.bf16.mxu1 %v8521_v3  ;;  %v1858_v49 = vld [vmem:[%s14861_s5 + $0x230] sm:$0xff]  ;;  %v1865_v3 = vld [vmem:[%s14861_s5 + $0x268] sm:$0xff] }
 0x35b   : > { %8906 = vmatprep.subr.bf16.mxu0 %v8905_v11  ;;  %v8643_v6 = vpack.c.bf16 %v1858_v49, %v1852_v2  ;;  %v8645_v62 = vpack.c.bf16 %v1871_v4, %v1865_v3  ;;  %v1864_v11 = vld [vmem:[%s14861_s5 + $0x260] sm:$0xff]  ;;  %v1954_v3 = vld [vmem:[%s14861_s5 + $0x530] sm:$0xff]  ;;  %v1961_v4 = vld [vmem:[%s14861_s5 + $0x568] sm:$0xff] }
 0x35c   : > { %v1948_v49 = vld [vmem:[%s14861_s5 + $0x500] sm:$0xff] }
 0x35d   : > { %8524 = vmatpush1.bf16.msra.mxu1 %v8523_v12  ;;  %v8647_v12 = vpack.c.bf16 %v1870_v21, %v1864_v11  ;;  %v1960_v21 = vld [vmem:[%s14861_s5 + $0x560] sm:$0xff] }
 0x35e   : > { %8908 = vmatpush1.bf16.msra.mxu0 %v8907_v14  ;;  %8622 = vmatprep.subr.bf16.mxu1 %v8621_v15  ;;  %v1876_v14 = vld [vmem:[%s14861_s5 + $0x2c0] sm:$0xff]  ;;  %v1882_v15 = vld [vmem:[%s14861_s5 + $0x2f0] sm:$0xff] }
 0x35f   : > { %v8651_v22 = vpack.c.bf16 %v1882_v15, %v1876_v14  ;;  %v1972_v15 = vld [vmem:[%s14861_s5 + $0x5c0] sm:$0xff] }
 0x360   : > { %3050 = vmatmul.mubr.f32.vlgmr.msra.gmra.mrb[6].mxu1 %v12045_v24  ;;  %v1816_v24 = vld [vmem:[%s14861_s5 + $0xe0] sm:$0xff] }
 0x361   : > { %4039 = vmatmul.mubr.f32.vlgmr.msra.gmra.mrb[14].mxu0 %v12659_v8  ;;  %8624 = vmatpush1.bf16.msra.mxu1 %v8623_v29  ;;  %v8631_v56 = vpack.c.bf16 %v1822_v17, %v1816_v24  ;;  %v1894_v29 = vld [vmem:[%s14861_s5 + $0x350] sm:$0xff] }
 0x362   : > { %3055 = vmatprep.mubr.f32.mxu1 %v14878_v7  ;;  %4044 = vmatprep.mubr.f32.mxu0 %v14878_v7  ;;  %v8655_v36 = vpack.c.bf16 %v1894_v29, %v1888_v26  ;;  %v1984_v29 = vld [vmem:[%s14861_s5 + $0x620] sm:$0xff] }
 0x363   : > { %8626 = vmatprep.subr.bf16.mxu1 %v8625_v5  ;;  %v1900_v5 = vld [vmem:[%s14861_s5 + $0x380] sm:$0xff] }
 0x364   : > { %3056 = vmatmul.mubr.f32.gmra.mrb[8].mxu1 %v12081_v43  ;;  %v1834_v43 = vld [vmem:[%s14861_s5 + $0x170] sm:$0xff]  ;;  %v8659_v24 = vpack.c.bf16 %v1906_v42, %v1900_v5  ;;  %v1996_v42 = vld [vmem:[%s14861_s5 + $0x680] sm:$0xff] }
 0x365   : > { %4045 = vmatmul.mubr.f32.gmra.mrb[16].mxu0 %v12687_v51  ;;  %8628 = vmatpush1.bf16.msra.mxu1 %v8627_v38  ;;  %v8635_v54 = vpack.c.bf16 %v1834_v43, %v1828_v53  ;;  %v1919_v38 = vld [vmem:[%s14861_s5 + $0x418] sm:$0xff]  ;;  %v1924_v43 = vld [vmem:[%s14861_s5 + $0x440] sm:$0xff] }
 0x366   : > { %3061 = vmatprep.mubr.f32.mxu1 %v14878_v7  ;;  %4050 = vmatprep.mubr.f32.mxu0 %v14878_v7  ;;  %v8661_v17 = vpack.c.bf16 %v1919_v38, %v1913_v34  ;;  %v2002_v34 = vld [vmem:[%s14861_s5 + $0x6b0] sm:$0xff]  ;;  %v2009_v38 = vld [vmem:[%s14861_s5 + $0x6e8] sm:$0xff] }
 0x367   : > { %8630 = vmatprep.subr.bf16.mxu1 %v8629_v44  ;;  %v1912_v44 = vld [vmem:[%s14861_s5 + $0x3e0] sm:$0xff] }
 0x368   : > { %3062 = vmatmul.mubr.f32.gmra.mrb[10].mxu1 %v12111_v55  ;;  %v1853_v55 = vld [vmem:[%s14861_s5 + $0x208] sm:$0xff] }
 0x369   : > { %4051 = vmatmul.mubr.f32.gmra.mrb[18].mxu0 %v12661_v35  ;;  %8632 = vmatpush1.bf16.msra.mxu1 %v8631_v56  ;;  %v8641_v1 = vpack.c.bf16 %v1859_v19, %v1853_v55  ;;  %v1931_v56 = vld [vmem:[%s14861_s5 + $0x478] sm:$0xff]  ;;  %v1942_v55 = vld [vmem:[%s14861_s5 + $0x4d0] sm:$0xff]  ;;  %v1949_v19 = vld [vmem:[%s14861_s5 + $0x508] sm:$0xff] }
 0x36a   : > { %3298 = vmatprep.mubr.f32.mxu1 %v12123_v10  ;;  %8634 = vmatprep.subr.bf16.mxu1 %v8633_v58  ;;  %v8639_v10 = vpack.c.bf16 %v1846_v61, %v1840_v60  ;;  %v8663_v58 = vpack.c.bf16 %v1918_v45, %v1912_v44  ;;  %v8665_v53 = vpack.c.bf16 %v1931_v56, %v1925_v39  ;;  %v1936_v61 = vld [vmem:[%s14861_s5 + $0x4a0] sm:$0xff]  ;;  %v9581_v44 = vld [vmem:[#allocation3 + $0x20] sm:$0xff] }
 0x36b   : > { %4784 = vmatprep.mubr.f32.mxu0 %v14878_v7  ;;  %v8691_v45 = vpack.c.bf16 %v2002_v34, %v1996_v42  ;;  %v2008_v56 = vld [vmem:[%s14861_s5 + $0x6e0] sm:$0xff]  ;;  %v7148_v42 = vld [vmem:[%s14861_s5 + $0x1268] sm:$0xff]  ;;  %v7154_v34 = vld [vmem:[%s14861_s5 + $0x1298] sm:$0xff] }
 0x36d   : > { %8636 = vmatpush1.bf16.msra.mxu1 %v8635_v54  ;;  %v1943_v54 = vld [vmem:[%s14861_s5 + $0x4d8] sm:$0xff] }
 0x36e   : > { %8638 = vmatprep.subr.bf16.mxu1 %v8637_v59  ;;  %v8667_v59 = vpack.c.bf16 %v1930_v30, %v1924_v43  ;;  %v8669_v60 = vpack.c.bf16 %v1943_v54, %v1937_v32  ;;  %v2027_v43 = vld [vmem:[%s14861_s5 + $0x778] sm:$0xff]  ;;  %v9582_v30 = vld [vmem:[#allocation3 + $0x38] sm:$0x3f] }
 0x371   : > { %8640 = vmatpush1.bf16.msra.mxu1 %v8639_v10  ;;  %v1955_v10 = vld [vmem:[%s14861_s5 + $0x538] sm:$0xff] }
 0x372   : > { %8642 = vmatprep.subr.bf16.mxu1 %v8641_v1  ;;  %v8671_v1 = vpack.c.bf16 %v1942_v55, %v1936_v61  ;;  %v8673_v2 = vpack.c.bf16 %v1955_v10, %v1949_v19  ;;  %v2033_v61 = vld [vmem:[%s14861_s5 + $0x7a8] sm:$0xff]  ;;  %v9583_v55 = vld [vmem:[#allocation3 + $0x30] sm:$0x3f] }
 0x375   : > { %8644 = vmatpush1.bf16.msra.mxu1 %v8643_v6  ;;  %v1967_v6 = vld [vmem:[%s14861_s5 + $0x598] sm:$0xff] }
 0x376   : > { %8646 = vmatprep.subr.bf16.mxu1 %v8645_v62  ;;  %v8675_v62 = vpack.c.bf16 %v1954_v3, %v1948_v49  ;;  %v8677_v11 = vpack.c.bf16 %v1967_v6, %v1961_v4  ;;  %v2045_v49 = vld [vmem:[%s14861_s5 + $0x808] sm:$0xff]  ;;  %v2051_v3 = vld [vmem:[%s14861_s5 + $0x838] sm:$0xff] }
 0x377   : > { %v8705_v6 = vpack.c.bf16 %v2051_v3, %v2045_v49  ;;  %v7183_v3 = vld [vmem:[%s14861_s5 + $0x1380] sm:$0xff] }
 0x379   : > { %8648 = vmatpush1.bf16.msra.mxu1 %v8647_v12  ;;  %v1979_v12 = vld [vmem:[%s14861_s5 + $0x5f8] sm:$0xff] }
 0x37a   : > { %8650 = vmatprep.subr.bf16.mxu1 %v8649_v13  ;;  %v8679_v13 = vpack.c.bf16 %v1966_v57, %v1960_v21  ;;  %v8681_v14 = vpack.c.bf16 %v1979_v12, %v1973_v9  ;;  %v2057_v21 = vld [vmem:[%s14861_s5 + $0x868] sm:$0xff]  ;;  %v2063_v57 = vld [vmem:[%s14861_s5 + $0x898] sm:$0xff] }
 0x37b   : > { %v8709_v12 = vpack.c.bf16 %v2063_v57, %v2057_v21  ;;  %v7195_v57 = vld [vmem:[%s14861_s5 + $0x13e0] sm:$0xff] }
 0x37d   : > { %8652 = vmatpush1.bf16.msra.mxu1 %v8651_v22  ;;  %v1991_v22 = vld [vmem:[%s14861_s5 + $0x658] sm:$0xff] }
 0x37e   : > { %8654 = vmatprep.subr.bf16.mxu1 %v8653_v23  ;;  %v8683_v23 = vpack.c.bf16 %v1978_v16, %v1972_v15  ;;  %v8685_v26 = vpack.c.bf16 %v1991_v22, %v1985_v18  ;;  %v2069_v15 = vld [vmem:[%s14861_s5 + $0x8c8] sm:$0xff]  ;;  %v2075_v16 = vld [vmem:[%s14861_s5 + $0x8f8] sm:$0xff] }
 0x37f   : > { %v8713_v22 = vpack.c.bf16 %v2075_v16, %v2069_v15  ;;  %v7207_v16 = vld [vmem:[%s14861_s5 + $0x1440] sm:$0xff] }
 0x381   : > { %8656 = vmatpush1.bf16.msra.mxu1 %v8655_v36  ;;  %v2003_v36 = vld [vmem:[%s14861_s5 + $0x6b8] sm:$0xff] }
 0x382   : > { %8658 = vmatprep.subr.bf16.mxu1 %v8657_v37  ;;  %v8687_v37 = vpack.c.bf16 %v1990_v33, %v1984_v29  ;;  %v8689_v5 = vpack.c.bf16 %v2003_v36, %v1997_v52  ;;  %v7136_v29 = vld [vmem:[%s14861_s5 + $0x1208] sm:$0xff]  ;;  %v7142_v33 = vld [vmem:[%s14861_s5 + $0x1238] sm:$0xff] }
 0x383   : > { %v8717_v36 = vpack.c.bf16 %v7142_v33, %v7136_v29  ;;  %v7219_v33 = vld [vmem:[%s14861_s5 + $0x14a0] sm:$0xff] }
 0x385   : > { %8660 = vmatpush1.bf16.msra.mxu1 %v8659_v24  ;;  %v2015_v24 = vld [vmem:[%s14861_s5 + $0x718] sm:$0xff] }
 0x386   : > { %8662 = vmatprep.subr.bf16.mxu1 %v8661_v17  ;;  %v9580_v17 = vld [vmem:[#allocation3] sm:$0xff]  ;;  %v8693_v39 = vpack.c.bf16 %v2015_v24, %v2009_v38  ;;  %v8721_v24 = vpack.c.bf16 %v7154_v34, %v7148_v42  ;;  %v7231_v34 = vld [vmem:[%s14861_s5 + $0x1500] sm:$0xff] }
 0x389   : > { %8664 = vmatpush1.bf16.msra.mxu1 %v8663_v58  ;;  %v2014_v58 = vld [vmem:[%s14861_s5 + $0x710] sm:$0xff] }
 0x38a   : > { %8666 = vmatprep.subr.bf16.mxu1 %v8665_v53  ;;  %v2021_v53 = vld [vmem:[%s14861_s5 + $0x748] sm:$0xff]  ;;  %v8695_v32 = vpack.c.bf16 %v2014_v58, %v2008_v56  ;;  %v9584_v56 = vld [vmem:[#allocation3 + $0x10] sm:$0xff] }
 0x38b   : > { %v8697_v54 = vpack.c.bf16 %v2027_v43, %v2021_v53  ;;  %v7159_v43 = vld [vmem:[%s14861_s5 + $0x12c0] sm:$0xff] }
 0x38d   : > { %8668 = vmatpush1.bf16.msra.mxu1 %v8667_v59  ;;  %v2020_v59 = vld [vmem:[%s14861_s5 + $0x740] sm:$0xff] }
 0x38e   : > { %8670 = vmatprep.subr.bf16.mxu1 %v8669_v60  ;;  %v2026_v60 = vld [vmem:[%s14861_s5 + $0x770] sm:$0xff] }
 0x38f   : > { %v8699_v19 = vpack.c.bf16 %v2026_v60, %v2020_v59  ;;  %v9585_v59 = vld [vmem:[#allocation3 + $0x28] sm:$0xff] }
 0x391   : > { %8672 = vmatpush1.bf16.msra.mxu1 %v8671_v1  ;;  %v2032_v1 = vld [vmem:[%s14861_s5 + $0x7a0] sm:$0xff] }
 0x392   : > { %8674 = vmatprep.subr.bf16.mxu1 %v8673_v2  ;;  %v2038_v2 = vld [vmem:[%s14861_s5 + $0x7d0] sm:$0xff] }
 0x393   : > { %v8703_v4 = vpack.c.bf16 %v2038_v2, %v2032_v1  ;;  %v9586_v1 = vld [vmem:[#allocation3 + $0x40] sm:$0x3f] }
 0x395   : > { %8676 = vmatpush1.bf16.msra.mxu1 %v8675_v62  ;;  %v2044_v62 = vld [vmem:[%s14861_s5 + $0x800] sm:$0xff] }
 0x396   : > { %8678 = vmatprep.subr.bf16.mxu1 %v8677_v11  ;;  %v2050_v11 = vld [vmem:[%s14861_s5 + $0x830] sm:$0xff] }
 0x397   : > { %v8707_v9 = vpack.c.bf16 %v2050_v11, %v2044_v62  ;;  %v7202_v62 = vld [vmem:[%s14861_s5 + $0x1418] sm:$0xff] }
 0x399   : > { %8680 = vmatpush1.bf16.msra.mxu1 %v8679_v13  ;;  %v2056_v13 = vld [vmem:[%s14861_s5 + $0x860] sm:$0xff] }
 0x39a   : > { %8682 = vmatprep.subr.bf16.mxu1 %v8681_v14  ;;  %v2062_v14 = vld [vmem:[%s14861_s5 + $0x890] sm:$0xff] }
 0x39b   : > { %v8711_v18 = vpack.c.bf16 %v2062_v14, %v2056_v13  ;;  %v7214_v13 = vld [vmem:[%s14861_s5 + $0x1478] sm:$0xff] }
 0x39d   : > { %8684 = vmatpush1.bf16.msra.mxu1 %v8683_v23  ;;  %v2068_v23 = vld [vmem:[%s14861_s5 + $0x8c0] sm:$0xff] }
 0x39e   : > { %8686 = vmatprep.subr.bf16.mxu1 %v8685_v26  ;;  %v2074_v26 = vld [vmem:[%s14861_s5 + $0x8f0] sm:$0xff] }
 0x39f   : > { %v8715_v52 = vpack.c.bf16 %v2074_v26, %v2068_v23  ;;  %v7226_v23 = vld [vmem:[%s14861_s5 + $0x14d8] sm:$0xff] }
 0x3a0   : > { %3299 = vmatmul.mubr.f32.vlgmr.msra.gmra.mrb[12].mxu1 %v9580_v17  ;;  %v7147_v17 = vld [vmem:[%s14861_s5 + $0x1260] sm:$0xff] }
 0x3a1   : > { %3304 = vmatprep.mubr.f32.mxu1 %v9581_v44  ;;  %8688 = vmatpush1.bf16.msra.mxu1 %v8687_v37  ;;  %v7135_v37 = vld [vmem:[%s14861_s5 + $0x1200] sm:$0xff]  ;;  %v7153_v44 = vld [vmem:[%s14861_s5 + $0x1290] sm:$0xff] }
 0x3a2   : > { %8690 = vmatprep.subr.bf16.mxu1 %v8689_v5  ;;  %v7141_v5 = vld [vmem:[%s14861_s5 + $0x1230] sm:$0xff]  ;;  %v8723_v58 = vpack.c.bf16 %v7153_v44, %v7147_v17  ;;  %v7250_v17 = vld [vmem:[%s14861_s5 + $0x1598] sm:$0xff] }
 0x3a3   : > { %v8719_v38 = vpack.c.bf16 %v7141_v5, %v7135_v37  ;;  %v7238_v37 = vld [vmem:[%s14861_s5 + $0x1538] sm:$0xff] }
 0x3a4   : > { %3305 = vmatmul.mubr.f32.gmra.mrb[14].mxu1 %v12446_v27  ;;  %v2039_v27 = vld [vmem:[%s14861_s5 + $0x7d8] sm:$0xff] }
 0x3a5   : > { %3310 = vmatprep.mubr.f32.mxu1 %v9582_v30  ;;  %8692 = vmatpush1.bf16.msra.mxu1 %v8691_v45  ;;  %v8701_v10 = vpack.c.bf16 %v2039_v27, %v2033_v61  ;;  %v7160_v45 = vld [vmem:[%s14861_s5 + $0x12c8] sm:$0xff]  ;;  %v7165_v30 = vld [vmem:[%s14861_s5 + $0x12f0] sm:$0xff]  ;;  %v7171_v27 = vld [vmem:[%s14861_s5 + $0x1320] sm:$0xff] }
 0x3a6   : > { %8694 = vmatprep.subr.bf16.mxu1 %v8693_v39  ;;  %v7166_v39 = vld [vmem:[%s14861_s5 + $0x12f8] sm:$0xff]  ;;  %v8727_v60 = vpack.c.bf16 %v7165_v30, %v7159_v43 }
 0x3a7   : > { %v8725_v53 = vpack.c.bf16 %v7166_v39, %v7160_v45  ;;  %v7243_v39 = vld [vmem:[%s14861_s5 + $0x1560] sm:$0xff] }
 0x3a8   : > { %3311 = vmatmul.mubr.f32.gmra.mrb[16].mxu1 %v9583_v55  ;;  %v7177_v55 = vld [vmem:[%s14861_s5 + $0x1350] sm:$0xff] }
 0x3a9   : > { %8696 = vmatpush1.bf16.msra.mxu1 %v8695_v32  ;;  %3381 = vmatprep.mubr.f32.mxu1 %v14878_v7  ;;  %v7172_v32 = vld [vmem:[%s14861_s5 + $0x1328] sm:$0xff]  ;;  %v8731_v2 = vpack.c.bf16 %v7177_v55, %v7171_v27  ;;  %v7267_v55 = vld [vmem:[%s14861_s5 + $0x1620] sm:$0xff] }
 0x3aa   : > { %8698 = vmatprep.subr.bf16.mxu1 %v8697_v54  ;;  %v7178_v54 = vld [vmem:[%s14861_s5 + $0x1358] sm:$0xff] }
 0x3ab   : > { %v8729_v61 = vpack.c.bf16 %v7178_v54, %v7172_v32  ;;  %v7255_v32 = vld [vmem:[%s14861_s5 + $0x15c0] sm:$0xff]  ;;  %v7261_v54 = vld [vmem:[%s14861_s5 + $0x15f0] sm:$0xff] }
 0x3ad   : > { %8700 = vmatpush1.bf16.msra.mxu1 %v8699_v19  ;;  %v7184_v19 = vld [vmem:[%s14861_s5 + $0x1388] sm:$0xff] }
 0x3ae   : > { %8702 = vmatprep.subr.bf16.mxu1 %v8701_v10  ;;  %v7190_v10 = vld [vmem:[%s14861_s5 + $0x13b8] sm:$0xff] }
 0x3af   : > { %v8733_v49 = vpack.c.bf16 %v7190_v10, %v7184_v19  ;;  %v7273_v19 = vld [vmem:[%s14861_s5 + $0x1650] sm:$0xff]  ;;  %v7280_v10 = vld [vmem:[%s14861_s5 + $0x1688] sm:$0xff] }
 0x3b1   : > { %8704 = vmatpush1.bf16.msra.mxu1 %v8703_v4  ;;  %v7189_v4 = vld [vmem:[%s14861_s5 + $0x13b0] sm:$0xff] }
 0x3b2   : > { %8706 = vmatprep.subr.bf16.mxu1 %v8705_v6  ;;  %v7196_v6 = vld [vmem:[%s14861_s5 + $0x13e8] sm:$0xff]  ;;  %v8735_v11 = vpack.c.bf16 %v7189_v4, %v7183_v3  ;;  %v7279_v3 = vld [vmem:[%s14861_s5 + $0x1680] sm:$0xff]  ;;  %v7285_v4 = vld [vmem:[%s14861_s5 + $0x16b0] sm:$0xff] }
 0x3b3   : > { %v8737_v21 = vpack.c.bf16 %v7202_v62, %v7196_v6  ;;  %v7292_v6 = vld [vmem:[%s14861_s5 + $0x16e8] sm:$0xff]  ;;  %v7298_v62 = vld [vmem:[%s14861_s5 + $0x1718] sm:$0xff] }
 0x3b5   : > { %8708 = vmatpush1.bf16.msra.mxu1 %v8707_v9  ;;  %v7201_v9 = vld [vmem:[%s14861_s5 + $0x1410] sm:$0xff] }
 0x3b6   : > { %8710 = vmatprep.subr.bf16.mxu1 %v8709_v12  ;;  %v7208_v12 = vld [vmem:[%s14861_s5 + $0x1448] sm:$0xff]  ;;  %v8739_v14 = vpack.c.bf16 %v7201_v9, %v7195_v57  ;;  %v7291_v57 = vld [vmem:[%s14861_s5 + $0x16e0] sm:$0xff]  ;;  %v7297_v9 = vld [vmem:[%s14861_s5 + $0x1710] sm:$0xff] }
 0x3b7   : > { %v8741_v15 = vpack.c.bf16 %v7214_v13, %v7208_v12  ;;  %v7304_v12 = vld [vmem:[%s14861_s5 + $0x1748] sm:$0xff]  ;;  %v7310_v13 = vld [vmem:[%s14861_s5 + $0x1778] sm:$0xff] }
 0x3b9   : > { %8712 = vmatpush1.bf16.msra.mxu1 %v8711_v18  ;;  %v7213_v18 = vld [vmem:[%s14861_s5 + $0x1470] sm:$0xff] }
 0x3ba   : > { %8714 = vmatprep.subr.bf16.mxu1 %v8713_v22  ;;  %v7220_v22 = vld [vmem:[%s14861_s5 + $0x14a8] sm:$0xff]  ;;  %v8743_v26 = vpack.c.bf16 %v7213_v18, %v7207_v16  ;;  %v7303_v16 = vld [vmem:[%s14861_s5 + $0x1740] sm:$0xff]  ;;  %v7309_v18 = vld [vmem:[%s14861_s5 + $0x1770] sm:$0xff] }
 0x3bb   : > { %v8745_v29 = vpack.c.bf16 %v7226_v23, %v7220_v22  ;;  %v7316_v22 = vld [vmem:[%s14861_s5 + $0x17a8] sm:$0xff]  ;;  %v7322_v23 = vld [vmem:[%s14861_s5 + $0x17d8] sm:$0xff] }
 0x3bd   : > { %8716 = vmatpush1.bf16.msra.mxu1 %v8715_v52  ;;  %v7225_v52 = vld [vmem:[%s14861_s5 + $0x14d0] sm:$0xff] }
 0x3be   : > { %8718 = vmatprep.subr.bf16.mxu1 %v8717_v36  ;;  %v7232_v36 = vld [vmem:[%s14861_s5 + $0x1508] sm:$0xff]  ;;  %v8747_v5 = vpack.c.bf16 %v7225_v52, %v7219_v33  ;;  %v7315_v33 = vld [vmem:[%s14861_s5 + $0x17a0] sm:$0xff]  ;;  %v7321_v52 = vld [vmem:[%s14861_s5 + $0x17d0] sm:$0xff] }
 0x3bf   : > { %v8749_v42 = vpack.c.bf16 %v7238_v37, %v7232_v36  ;;  %v7328_v36 = vld [vmem:[%s14861_s5 + $0x1808] sm:$0xff]  ;;  %v7334_v37 = vld [vmem:[%s14861_s5 + $0x1838] sm:$0xff] }
 0x3c0   : > { %3382 = vmatmul.mubr.f32.vlgmr.msra.gmra.mrb[12].mxu1 %v9584_v56  ;;  %v7249_v56 = vld [vmem:[%s14861_s5 + $0x1590] sm:$0xff] }
 0x3c1   : > { %8720 = vmatpush1.bf16.msra.mxu1 %v8719_v38  ;;  %3387 = vmatprep.mubr.f32.mxu1 %v14878_v7  ;;  %v7237_v38 = vld [vmem:[%s14861_s5 + $0x1530] sm:$0xff]  ;;  %v8755_v43 = vpack.c.bf16 %v7249_v56, %v7243_v39  ;;  %v7339_v39 = vld [vmem:[%s14861_s5 + $0x1860] sm:$0xff] }
 0x3c2   : > { %8722 = vmatprep.subr.bf16.mxu1 %v8721_v24  ;;  %v7244_v24 = vld [vmem:[%s14861_s5 + $0x1568] sm:$0xff]  ;;  %v8751_v44 = vpack.c.bf16 %v7237_v38, %v7231_v34  ;;  %v7327_v34 = vld [vmem:[%s14861_s5 + $0x1800] sm:$0xff]  ;;  %v7333_v38 = vld [vmem:[%s14861_s5 + $0x1830] sm:$0xff] }
 0x3c3   : > { %v8753_v45 = vpack.c.bf16 %v7250_v17, %v7244_v24  ;;  %v7340_v24 = vld [vmem:[%s14861_s5 + $0x1868] sm:$0xff]  ;;  %v7346_v17 = vld [vmem:[%s14861_s5 + $0x1898] sm:$0xff]  ;;  %v7345_v56 = vld [vmem:[%s14861_s5 + $0x1890] sm:$0xff] }
 0x3c4   : > { %3388 = vmatmul.mubr.f32.gmra.mrb[14].mxu1 %v9585_v59  ;;  %v7268_v59 = vld [vmem:[%s14861_s5 + $0x1628] sm:$0xff] }
 0x3c5   : > { %8724 = vmatpush1.bf16.msra.mxu1 %v8723_v58  ;;  %3393 = vmatprep.mubr.f32.mxu1 %v14878_v7  ;;  %v7256_v58 = vld [vmem:[%s14861_s5 + $0x15c8] sm:$0xff] }
 0x3c6   : > { %8726 = vmatprep.subr.bf16.mxu1 %v8725_v53  ;;  %v7262_v53 = vld [vmem:[%s14861_s5 + $0x15f8] sm:$0xff] }
 0x3c7   : > { %v8757_v30 = vpack.c.bf16 %v7262_v53, %v7256_v58  ;;  %v7352_v58 = vld [vmem:[%s14861_s5 + $0x18c8] sm:$0xff]  ;;  %v7358_v53 = vld [vmem:[%s14861_s5 + $0x18f8] sm:$0xff] }
 0x3c8   : > { %3394 = vmatmul.mubr.f32.gmra.mrb[16].mxu1 %v9586_v1  ;;  %v7286_v1 = vld [vmem:[%s14861_s5 + $0x16b8] sm:$0xff] }
 0x3c9   : > { %8728 = vmatpush1.bf16.msra.mxu1 %v8727_v60  ;;  %3789 = vmatprep.mubr.f32.mxu1 %v12129_v0  ;;  %v7274_v60 = vld [vmem:[%s14861_s5 + $0x1658] sm:$0xff] }
 0x3ca   : > { %8730 = vmatprep.subr.bf16.mxu1 %v8729_v61  ;;  %v8759_v61 = vpack.c.bf16 %v7261_v54, %v7255_v32  ;;  %v8761_v27 = vpack.c.bf16 %v7274_v60, %v7268_v59  ;;  %v7351_v32 = vld [vmem:[%s14861_s5 + $0x18c0] sm:$0xff]  ;;  %v7357_v54 = vld [vmem:[%s14861_s5 + $0x18f0] sm:$0xff]  ;;  %v7364_v59 = vld [vmem:[%s14861_s5 + $0x1928] sm:$0xff] }
 0x3cb   : > { %v7370_v60 = vld [vmem:[%s14861_s5 + $0x1958] sm:$0xff] }
 0x3cd   : > { %8732 = vmatpush1.bf16.msra.mxu1 %v8731_v2  ;;  %v8763_v2 = vpack.c.bf16 %v7273_v19, %v7267_v55  ;;  %v7363_v55 = vld [vmem:[%s14861_s5 + $0x1920] sm:$0xff]  ;;  %v7369_v19 = vld [vmem:[%s14861_s5 + $0x1950] sm:$0xff] }
 0x3ce   : > { %8734 = vmatprep.subr.bf16.mxu1 %v8733_v49  ;;  %v8765_v49 = vpack.c.bf16 %v7286_v1, %v7280_v10  ;;  %v7376_v10 = vld [vmem:[%s14861_s5 + $0x1988] sm:$0xff]  ;;  %v7382_v1 = vld [vmem:[%s14861_s5 + $0x19b8] sm:$0xff] }
 0x3d1   : > { %8736 = vmatpush1.bf16.msra.mxu1 %v8735_v11  ;;  %v8767_v11 = vpack.c.bf16 %v7285_v4, %v7279_v3  ;;  %v7375_v3 = vld [vmem:[%s14861_s5 + $0x1980] sm:$0xff]  ;;  %v7381_v4 = vld [vmem:[%s14861_s5 + $0x19b0] sm:$0xff] }
 0x3d2   : > { %8738 = vmatprep.subr.bf16.mxu1 %v8737_v21  ;;  %v8769_v21 = vpack.c.bf16 %v7298_v62, %v7292_v6  ;;  %v7388_v6 = vld [vmem:[%s14861_s5 + $0x19e8] sm:$0xff]  ;;  %v7394_v62 = vld [vmem:[%s14861_s5 + $0x1a18] sm:$0xff] }
 0x3d5   : > { %8740 = vmatpush1.bf16.msra.mxu1 %v8739_v14  ;;  %v8771_v14 = vpack.c.bf16 %v7297_v9, %v7291_v57  ;;  %v7387_v57 = vld [vmem:[%s14861_s5 + $0x19e0] sm:$0xff]  ;;  %v7393_v9 = vld [vmem:[%s14861_s5 + $0x1a10] sm:$0xff] }
 0x3d6   : > { %8742 = vmatprep.subr.bf16.mxu1 %v8741_v15  ;;  %v8773_v15 = vpack.c.bf16 %v7310_v13, %v7304_v12  ;;  %v7400_v12 = vld [vmem:[%s14861_s5 + $0x1a48] sm:$0xff]  ;;  %v7406_v13 = vld [vmem:[%s14861_s5 + $0x1a78] sm:$0xff] }
 0x3d9   : > { %8744 = vmatpush1.bf16.msra.mxu1 %v8743_v26  ;;  %v8775_v26 = vpack.c.bf16 %v7309_v18, %v7303_v16  ;;  %v7399_v16 = vld [vmem:[%s14861_s5 + $0x1a40] sm:$0xff]  ;;  %v7405_v18 = vld [vmem:[%s14861_s5 + $0x1a70] sm:$0xff] }
 0x3da   : > { %8746 = vmatprep.subr.bf16.mxu1 %v8745_v29  ;;  %v8777_v29 = vpack.c.bf16 %v7322_v23, %v7316_v22  ;;  %v7412_v22 = vld [vmem:[%s14861_s5 + $0x1aa8] sm:$0xff]  ;;  %v7418_v23 = vld [vmem:[%s14861_s5 + $0x1ad8] sm:$0xff] }
 0x3dd   : > { %8748 = vmatpush1.bf16.msra.mxu1 %v8747_v5  ;;  %v8779_v5 = vpack.c.bf16 %v7321_v52, %v7315_v33  ;;  %v7411_v33 = vld [vmem:[%s14861_s5 + $0x1aa0] sm:$0xff]  ;;  %v7417_v52 = vld [vmem:[%s14861_s5 + $0x1ad0] sm:$0xff] }
 0x3de   : > { %8750 = vmatprep.subr.bf16.mxu1 %v8749_v42  ;;  %v8781_v42 = vpack.c.bf16 %v7334_v37, %v7328_v36  ;;  %v7140_v36 = vld [vmem:[%s14861_s5 + $0x1228] sm:$0xff]  ;;  %v7146_v37 = vld [vmem:[%s14861_s5 + $0x1258] sm:$0xff] }
 0x3e1   : > { %8752 = vmatpush1.bf16.msra.mxu1 %v8751_v44  ;;  %v8783_v44 = vpack.c.bf16 %v7333_v38, %v7327_v34  ;;  %v7139_v34 = vld [vmem:[%s14861_s5 + $0x1220] sm:$0xff]  ;;  %v7145_v38 = vld [vmem:[%s14861_s5 + $0x1250] sm:$0xff] }
 0x3e2   : > { %8754 = vmatprep.subr.bf16.mxu1 %v8753_v45  ;;  %v8785_v45 = vpack.c.bf16 %v7346_v17, %v7340_v24  ;;  %v7152_v24 = vld [vmem:[%s14861_s5 + $0x1288] sm:$0xff]  ;;  %v7158_v17 = vld [vmem:[%s14861_s5 + $0x12b8] sm:$0xff] }
 0x3e5   : > { %8756 = vmatpush1.bf16.msra.mxu1 %v8755_v43  ;;  %v8787_v43 = vpack.c.bf16 %v7345_v56, %v7339_v39  ;;  %v7151_v39 = vld [vmem:[%s14861_s5 + $0x1280] sm:$0xff]  ;;  %v7157_v56 = vld [vmem:[%s14861_s5 + $0x12b0] sm:$0xff] }
 0x3e6   : > { %8758 = vmatprep.subr.bf16.mxu1 %v8757_v30  ;;  %v8789_v30 = vpack.c.bf16 %v7358_v53, %v7352_v58  ;;  %v7164_v58 = vld [vmem:[%s14861_s5 + $0x12e8] sm:$0xff]  ;;  %v7170_v53 = vld [vmem:[%s14861_s5 + $0x1318] sm:$0xff] }
 0x3e9   : > { %8760 = vmatpush1.bf16.msra.mxu1 %v8759_v61  ;;  %v8791_v61 = vpack.c.bf16 %v7357_v54, %v7351_v32  ;;  %v7163_v32 = vld [vmem:[%s14861_s5 + $0x12e0] sm:$0xff]  ;;  %v7169_v54 = vld [vmem:[%s14861_s5 + $0x1310] sm:$0xff] }
 0x3ea   : > { %8762 = vmatprep.subr.bf16.mxu1 %v8761_v27  ;;  %v8793_v27 = vpack.c.bf16 %v7370_v60, %v7364_v59  ;;  %v7176_v59 = vld [vmem:[%s14861_s5 + $0x1348] sm:$0xff]  ;;  %v7182_v60 = vld [vmem:[%s14861_s5 + $0x1378] sm:$0xff] }
 0x3ed   : > { %8764 = vmatpush1.bf16.msra.mxu1 %v8763_v2  ;;  %v8795_v2 = vpack.c.bf16 %v7369_v19, %v7363_v55  ;;  %v7175_v55 = vld [vmem:[%s14861_s5 + $0x1340] sm:$0xff]  ;;  %v7181_v19 = vld [vmem:[%s14861_s5 + $0x1370] sm:$0xff] }
 0x3ee   : > { %8766 = vmatprep.subr.bf16.mxu1 %v8765_v49  ;;  %v8797_v49 = vpack.c.bf16 %v7382_v1, %v7376_v10  ;;  %v7188_v10 = vld [vmem:[%s14861_s5 + $0x13a8] sm:$0xff]  ;;  %v7194_v1 = vld [vmem:[%s14861_s5 + $0x13d8] sm:$0xff] }
 0x3f1   : > { %8768 = vmatpush1.bf16.msra.mxu1 %v8767_v11  ;;  %v8799_v11 = vpack.c.bf16 %v7381_v4, %v7375_v3  ;;  %v7187_v3 = vld [vmem:[%s14861_s5 + $0x13a0] sm:$0xff]  ;;  %v7193_v4 = vld [vmem:[%s14861_s5 + $0x13d0] sm:$0xff] }
 0x3f2   : > { %8770 = vmatprep.subr.bf16.mxu1 %v8769_v21  ;;  %v8801_v21 = vpack.c.bf16 %v7394_v62, %v7388_v6  ;;  %v7200_v6 = vld [vmem:[%s14861_s5 + $0x1408] sm:$0xff]  ;;  %v7206_v62 = vld [vmem:[%s14861_s5 + $0x1438] sm:$0xff] }
 0x3f5   : > { %8772 = vmatpush1.bf16.msra.mxu1 %v8771_v14  ;;  %v8803_v14 = vpack.c.bf16 %v7393_v9, %v7387_v57  ;;  %v8929_v57 = vpack.c.bf16 %v7206_v62, %v7200_v6  ;;  %v7199_v9 = vld [vmem:[%s14861_s5 + $0x1400] sm:$0xff] }
 0x3f6   : > { %8774 = vmatprep.subr.bf16.mxu1 %v8773_v15  ;;  %v8805_v15 = vpack.c.bf16 %v7406_v13, %v7400_v12  ;;  %v7205_v12 = vld [vmem:[%s14861_s5 + $0x1430] sm:$0xff]  ;;  %v7212_v13 = vld [vmem:[%s14861_s5 + $0x1468] sm:$0xff] }
 0x3f9   : > { %8776 = vmatpush1.bf16.msra.mxu1 %v8775_v26  ;;  %v8807_v26 = vpack.c.bf16 %v7405_v18, %v7399_v16  ;;  %v8931_v18 = vpack.c.bf16 %v7205_v12, %v7199_v9  ;;  %v7247_v9 = vld [vmem:[%s14861_s5 + $0x1580] sm:$0xff]  ;;  %v7253_v12 = vld [vmem:[%s14861_s5 + $0x15b0] sm:$0xff] }
 0x3fa   : > { %8778 = vmatprep.subr.bf16.mxu1 %v8777_v29  ;;  %v8809_v29 = vpack.c.bf16 %v7418_v23, %v7412_v22 }
 0x3fd   : > { %8780 = vmatpush1.bf16.msra.mxu1 %v8779_v5  ;;  %v8811_v5 = vpack.c.bf16 %v7417_v52, %v7411_v33  ;;  %v7224_v52 = vld [vmem:[%s14861_s5 + $0x14c8] sm:$0xff] }
 0x3fe   : > { %8782 = vmatprep.subr.bf16.mxu1 %v8781_v42  ;;  %v8909_v42 = vpack.c.bf16 %v7146_v37, %v7140_v36  ;;  %v7230_v36 = vld [vmem:[%s14861_s5 + $0x14f8] sm:$0xff] }
 0x400   : > { %3790 = vmatmul.mubr.f32.vlgmr.msra.gmra.mrb[6].mxu1 %v12460_v40 }
 0x401   : > { %3795 = vmatprep.mubr.f32.mxu1 %v12479_v31  ;;  %8784 = vmatpush1.bf16.msra.mxu1 %v8783_v44  ;;  %v8911_v44 = vpack.c.bf16 %v7145_v38, %v7139_v34 }
 0x402   : > { %8786 = vmatprep.subr.bf16.mxu1 %v8785_v45  ;;  %v8913_v45 = vpack.c.bf16 %v7158_v17, %v7152_v24  ;;  %v8937_v17 = vpack.c.bf16 %v7230_v36, %v7224_v52  ;;  %v7259_v52 = vld [vmem:[%s14861_s5 + $0x15e0] sm:$0xff]  ;;  %v7272_v36 = vld [vmem:[%s14861_s5 + $0x1648] sm:$0xff] }
 0x404   : > { %3796 = vmatmul.mubr.f32.gmra.mrb[8].mxu1 %v12500_v28 }
 0x405   : > { %3801 = vmatprep.mubr.f32.mxu1 %v12438_v63  ;;  %8788 = vmatpush1.bf16.msra.mxu1 %v8787_v43  ;;  %v8915_v43 = vpack.c.bf16 %v7157_v56, %v7151_v39  ;;  %v7236_v39 = vld [vmem:[%s14861_s5 + $0x1528] sm:$0xff]  ;;  %v7242_v56 = vld [vmem:[%s14861_s5 + $0x1558] sm:$0xff] }
 0x406   : > { %8790 = vmatprep.subr.bf16.mxu1 %v8789_v30  ;;  %v8917_v30 = vpack.c.bf16 %v7170_v53, %v7164_v58 }
 0x408   : > { %3802 = vmatmul.mubr.f32.gmra.mrb[10].mxu1 %v12462_v41 }
 0x409   : > { %8792 = vmatpush1.bf16.msra.mxu1 %v8791_v61  ;;  %3872 = vmatprep.mubr.f32.mxu1 %v14878_v7  ;;  %v8919_v61 = vpack.c.bf16 %v7169_v54, %v7163_v32 }
 0x40a   : > { %8794 = vmatprep.subr.bf16.mxu1 %v8793_v27  ;;  %v8921_v27 = vpack.c.bf16 %v7182_v60, %v7176_v59 }
 0x40d   : > { %8796 = vmatpush1.bf16.msra.mxu1 %v8795_v2  ;;  %v8923_v2 = vpack.c.bf16 %v7181_v19, %v7175_v55  ;;  %v7241_v55 = vld [vmem:[%s14861_s5 + $0x1550] sm:$0xff] }
 0x40e   : > { %8798 = vmatprep.subr.bf16.mxu1 %v8797_v49  ;;  %v8925_v49 = vpack.c.bf16 %v7194_v1, %v7188_v10  ;;  %v7248_v10 = vld [vmem:[%s14861_s5 + $0x1588] sm:$0xff]  ;;  %v7254_v1 = vld [vmem:[%s14861_s5 + $0x15b8] sm:$0xff] }
 0x411   : > { %8800 = vmatpush1.bf16.msra.mxu1 %v8799_v11  ;;  %v13316_v11 = vld [vmem:[%s14862_s6] ss:$2 sm:$0x3f] }
 0x412   : > { %8802 = vmatprep.subr.bf16.mxu1 %v8801_v21  ;;  %v4257_v21 = vsub.s32 3, %v10166_v47  ;;  %v4254_v16 = vrot.slane %v13316_v11, %v11134_v25 }
 0x414   : > { %v4258_v22 = vrot.slane %v13316_v11, %v4257_v21 }
 0x415   : > { %8804 = vmatpush1.bf16.msra.mxu1 %v8803_v14  ;;  %v7218_v14 = vld [vmem:[%s14861_s5 + $0x1498] sm:$0xff] }
 0x416   : > { %8806 = vmatprep.subr.bf16.mxu1 %v8805_v15  ;;  %v13334_v15 = vld [vmem:[%s14862_s6 + $0x1] ss:$2 sm:$0x3f]  ;;  %v8933_v23 = vpack.c.bf16 %v7218_v14, %v7212_v13 }
 0x417   : > { %v4305_v33 = vrot.slane %v13334_v15, %v11134_v25  ;;  %v7223_v25 = vld [vmem:[%s14861_s5 + $0x14c0] sm:$0xff]  ;;  %v7260_v14 = vld [vmem:[%s14861_s5 + $0x15e8] sm:$0xff] }
 0x419   : > { %8808 = vmatpush1.bf16.msra.mxu1 %v8807_v26  ;;  %v7211_v26 = vld [vmem:[%s14861_s5 + $0x1460] sm:$0xff] }
 0x41a   : > { %8810 = vmatprep.subr.bf16.mxu1 %v8809_v29  ;;  %v7217_v29 = vld [vmem:[%s14861_s5 + $0x1490] sm:$0xff] }
 0x41b   : > { %v8935_v38 = vpack.c.bf16 %v7217_v29, %v7211_v26 }
 0x41d   : > { %8812 = vmatpush1.bf16.msra.mxu1 %v8811_v5  ;;  %v4309_v5 = vrot.slane %v13334_v15, %v4257_v21 }
 0x41e   : > { %8910 = vmatprep.subr.bf16.mxu1 %v8909_v42 }
 0x420   : > { %3873 = vmatmul.mubr.f32.vlgmr.msra.gmra.mrb[6].mxu1 %v12659_v8 }
 0x421   : > { %8912 = vmatpush1.bf16.msra.mxu1 %v8911_v44  ;;  %3878 = vmatprep.mubr.f32.mxu1 %v14878_v7  ;;  %v7229_v44 = vld [vmem:[%s14861_s5 + $0x14f0] sm:$0xff] }
 0x422   : > { %8914 = vmatprep.subr.bf16.mxu1 %v8913_v45  ;;  %v8939_v54 = vpack.c.bf16 %v7229_v44, %v7223_v25 }
 0x424   : > { %3879 = vmatmul.mubr.f32.gmra.mrb[8].mxu1 %v12687_v51 }
 0x425   : > { %8916 = vmatpush1.bf16.msra.mxu1 %v8915_v43  ;;  %3884 = vmatprep.mubr.f32.mxu1 %v14878_v7 }
 0x426   : > { %8918 = vmatprep.subr.bf16.mxu1 %v8917_v30 }
 0x428   : > { %3885 = vmatmul.mubr.f32.gmra.mrb[10].mxu1 %v12661_v35 }
 0x429   : > { %8920 = vmatpush1.bf16.msra.mxu1 %v8919_v61  ;;  %4121 = vmatprep.mubr.f32.mxu1 %v12129_v0  ;;  %v8927_v0 = vpack.c.bf16 %v7193_v4, %v7187_v3  ;;  %v8941_v61 = vpack.c.bf16 %v7242_v56, %v7236_v39  ;;  %v7283_v39 = vld [vmem:[%s14861_s5 + $0x16a0] sm:$0xff]  ;;  %v7289_v56 = vld [vmem:[%s14861_s5 + $0x16d0] sm:$0xff] }
 0x42a   : > { %8922 = vmatprep.subr.bf16.mxu1 %v8921_v27  ;;  %v7235_v27 = vld [vmem:[%s14861_s5 + $0x1520] sm:$0xff] }
 0x42b   : > { %v8943_v62 = vpack.c.bf16 %v7241_v55, %v7235_v27  ;;  %v7314_v27 = vld [vmem:[%s14861_s5 + $0x1798] sm:$0xff] }
 0x42d   : > { %8924 = vmatpush1.bf16.msra.mxu1 %v8923_v2 }
 0x42e   : > { %8926 = vmatprep.subr.bf16.mxu1 %v8925_v49 }
 0x431   : > { %8928 = vmatpush1.bf16.msra.mxu1 %v8927_v0 }
 0x432   : > { %8930 = vmatprep.subr.bf16.mxu1 %v8929_v57  ;;  %v8945_v57 = vpack.c.bf16 %v7254_v1, %v7248_v10  ;;  %v7307_v10 = vld [vmem:[%s14861_s5 + $0x1760] sm:$0xff]  ;;  %v7313_v1 = vld [vmem:[%s14861_s5 + $0x1790] sm:$0xff] }
 0x434   : > { %v4040_v37 = vpop.f32.mrb[14].mxu0 }
 0x435   : > { %v4275_v42 = vmul.f32 %v4254_v16, %v4040_v37  ;;  %v4042_v34 = vpop.f32.mrb[15].mxu0  ;;  %8932 = vmatpush1.bf16.msra.mxu1 %v8931_v18  ;;  %v7278_v37 = vld [vmem:[%s14861_s5 + $0x1678] sm:$0xff] }
 0x436   : > { %v4276_v24 = vmul.f32 %v4258_v22, %v4042_v34  ;;  %8934 = vmatprep.subr.bf16.mxu1 %v8933_v23  ;;  %v8947_v23 = vpack.c.bf16 %v7253_v12, %v7247_v9  ;;  %v7271_v34 = vld [vmem:[%s14861_s5 + $0x1640] sm:$0xff]  ;;  %v7338_v9 = vld [vmem:[%s14861_s5 + $0x1858] sm:$0xff] }
 0x437   : > { %v4326_v45 = vadd.f32 %v4305_v33, %v4275_v42  ;;  %v8953_v42 = vpack.c.bf16 %v7278_v37, %v7272_v36  ;;  %v7362_v36 = vld [vmem:[%s14861_s5 + $0x1918] sm:$0xff] }
 0x438   : > { %v4327_v58 = vadd.f32 %v4309_v5, %v4276_v24  ;;  %v4046_v53 = vpop.f32.mrb[16].mxu0  ;;  %v7284_v24 = vld [vmem:[%s14861_s5 + $0x16a8] sm:$0xff] }
 0x439   : > { %v13366_v43 = vmax.f32 %v4326_v45, 0.0  ;;  %v4281_v30 = vmul.f32 %v4254_v16, %v4046_v53  ;;  %v4048_v32 = vpop.f32.mrb[17].mxu0  ;;  %8936 = vmatpush1.bf16.msra.mxu1 %v8935_v38  ;;  %v7277_v38 = vld [vmem:[%s14861_s5 + $0x1670] sm:$0xff]  ;;  %v7302_v53 = vld [vmem:[%s14861_s5 + $0x1738] sm:$0xff] }
 0x43a   : > { %v13368_v59 = vmax.f32 %v4327_v58, 0.0  ;;  %v4282_v60 = vmul.f32 %v4258_v22, %v4048_v32  ;;  %8938 = vmatprep.subr.bf16.mxu1 %v8937_v17  ;;  %v7290_v17 = vld [vmem:[%s14861_s5 + $0x16d8] sm:$0xff]  ;;  %v8955_v25 = vpack.c.bf16 %v7277_v38, %v7271_v34  ;;  %v7296_v58 = vld [vmem:[%s14861_s5 + $0x1708] sm:$0xff]  ;;  %v7361_v34 = vld [vmem:[%s14861_s5 + $0x1910] sm:$0xff] }
 0x43b   : > { %4362 = vst [vmem:[#allocation4 + $0x10] sm:$0xff] %v13366_v43  ;;  %v4332_v19 = vadd.f32 %v4305_v33, %v4281_v30  ;;  %v8957_v45 = vpack.c.bf16 %v7290_v17, %v7284_v24  ;;  %v8959_v30 = vpack.c.bf16 %v7289_v56, %v7283_v39  ;;  %v8961_v32 = vpack.c.bf16 %v7302_v53, %v7296_v58  ;;  %v7368_v38 = vld [vmem:[%s14861_s5 + $0x1948] sm:$0xff]  ;;  %v7367_v17 = vld [vmem:[%s14861_s5 + $0x1940] sm:$0xff]  ;;  %v7385_v58 = vld [vmem:[%s14861_s5 + $0x19d0] sm:$0xff] }
 0x43c   : > { %4363 = vst [vmem:[#allocation4 + $0x18] sm:$0xff] %v13368_v59  ;;  %v4333_v2 = vadd.f32 %v4309_v5, %v4282_v60  ;;  %v4052_v49 = vpop.f32.mrb[18].mxu0  ;;  %v7301_v60 = vld [vmem:[%s14861_s5 + $0x1730] sm:$0xff]  ;;  %v7379_v56 = vld [vmem:[%s14861_s5 + $0x19a0] sm:$0xff]  ;;  %v7392_v53 = vld [vmem:[%s14861_s5 + $0x1a08] sm:$0xff] }
 0x43d   : > { %v13384_v3 = vmax.f32 %v4332_v19, 0.0  ;;  %v4287_v4 = vmul.f32 %v4254_v16, %v4052_v49  ;;  %v4054_v6 = vpop.f32.mrb[19].mxu0  ;;  %8940 = vmatpush1.bf16.msra.mxu1 %v8939_v54  ;;  %v7266_v16 = vld [vmem:[%s14861_s5 + $0x1618] sm:$0xff]  ;;  %v7295_v54 = vld [vmem:[%s14861_s5 + $0x1700] sm:$0xff] }
 0x43e   : > { %v13386_v0 = vmax.f32 %v4333_v2, 0.0  ;;  %v4288_v21 = vmul.f32 %v4258_v22, %v4054_v6  ;;  %8942 = vmatprep.subr.bf16.mxu1 %v8941_v61  ;;  %v8949_v29 = vpack.c.bf16 %v7266_v16, %v7260_v14  ;;  %v7308_v61 = vld [vmem:[%s14861_s5 + $0x1768] sm:$0xff]  ;;  %v8963_v55 = vpack.c.bf16 %v7301_v60, %v7295_v54  ;;  %v7326_v49 = vld [vmem:[%s14861_s5 + $0x17f8] sm:$0xff]  ;;  %v7331_v14 = vld [vmem:[%s14861_s5 + $0x1820] sm:$0xff] }
 0x43f   : > { %v4338_v13 = vadd.f32 %v4305_v33, %v4287_v4  ;;  %v7265_v33 = vld [vmem:[%s14861_s5 + $0x1610] sm:$0xff]  ;;  %v8965_v19 = vpack.c.bf16 %v7314_v27, %v7308_v61  ;;  %v7320_v2 = vld [vmem:[%s14861_s5 + $0x17c8] sm:$0xff]  ;;  %v8967_v4 = vpack.c.bf16 %v7313_v1, %v7307_v10  ;;  %v7391_v54 = vld [vmem:[%s14861_s5 + $0x1a00] sm:$0xff] }
 0x440   : > { %v4339_v18 = vadd.f32 %v4309_v5, %v4288_v21  ;;  %v8951_v5 = vpack.c.bf16 %v7265_v33, %v7259_v52  ;;  %v8969_v6 = vpack.c.bf16 %v7326_v49, %v7320_v2  ;;  %v7325_v21 = vld [vmem:[%s14861_s5 + $0x17f0] sm:$0xff]  ;;  %v7356_v33 = vld [vmem:[%s14861_s5 + $0x18e8] sm:$0xff]  ;;  %v7410_v27 = vld [vmem:[%s14861_s5 + $0x1a98] sm:$0xff] }
 0x441   : > { %v4356_v22 = vmax.f32 %v4338_v13, 0.0  ;;  %8944 = vmatpush1.bf16.msra.mxu1 %v8943_v62  ;;  %v7319_v62 = vld [vmem:[%s14861_s5 + $0x17c0] sm:$0xff]  ;;  %v7337_v16 = vld [vmem:[%s14861_s5 + $0x1850] sm:$0xff]  ;;  %v7404_v61 = vld [vmem:[%s14861_s5 + $0x1a68] sm:$0xff] }
 0x442   : > { %v4357_v26 = vmax.f32 %v4339_v18, 0.0  ;;  %8946 = vmatprep.subr.bf16.mxu1 %v8945_v57  ;;  %v7332_v57 = vld [vmem:[%s14861_s5 + $0x1828] sm:$0xff]  ;;  %v8971_v12 = vpack.c.bf16 %v7325_v21, %v7319_v62  ;;  %v7349_v52 = vld [vmem:[%s14861_s5 + $0x18b0] sm:$0xff]  ;;  %v7403_v10 = vld [vmem:[%s14861_s5 + $0x1a60] sm:$0xff] }
 0x443   : > { %4375 = vst [vmem:[#allocation4 + $0x70] sm:$0x3f] %v4356_v22  ;;  %v8973_v13 = vpack.c.bf16 %v7338_v9, %v7332_v57  ;;  %v7344_v18 = vld [vmem:[%s14861_s5 + $0x1888] sm:$0xff]  ;;  %v7350_v22 = vld [vmem:[%s14861_s5 + $0x18b8] sm:$0xff]  ;;  %v7397_v60 = vld [vmem:[%s14861_s5 + $0x1a30] sm:$0xff]  ;;  %v4246_v9 = vrot.slane %v13316_v11, %v10169_v48 }
 0x444   : > { %4376 = vst [vmem:[#allocation4 + $0x78] sm:$0x3f] %v4357_v26  ;;  %v8977_v26 = vpack.c.bf16 %v7350_v22, %v7344_v18  ;;  %v7409_v1 = vld [vmem:[%s14861_s5 + $0x1a90] sm:$0xff]  ;;  %v7416_v2 = vld [vmem:[%s14861_s5 + $0x1ac8] sm:$0xff]  ;;  %v7422_v49 = vld [vmem:[%s14861_s5 + $0x1af8] sm:$0xff] }
 0x445   : > { %8948 = vmatpush1.bf16.msra.mxu1 %v8947_v23  ;;  %v8975_v23 = vpack.c.bf16 %v7337_v16, %v7331_v14  ;;  %v7415_v62 = vld [vmem:[%s14861_s5 + $0x1ac0] sm:$0xff]  ;;  %v7421_v21 = vld [vmem:[%s14861_s5 + $0x1af0] sm:$0xff] }
 0x446   : > { %8950 = vmatprep.subr.bf16.mxu1 %v8949_v29  ;;  %v7343_v29 = vld [vmem:[%s14861_s5 + $0x1880] sm:$0xff]  ;;  %v9003_v57 = vpack.c.bf16 %v7421_v21, %v7415_v62 }
 0x447   : > { %v8979_v37 = vpack.c.bf16 %v7349_v52, %v7343_v29 }
 0x449   : > { %8952 = vmatpush1.bf16.msra.mxu1 %v8951_v5  ;;  %v8981_v5 = vpack.c.bf16 %v7362_v36, %v7356_v33 }
 0x44a   : > { %v13424_v44 = vld [vmem:[#allocation4 + $0x70] sm:$0x1f]  ;;  %8954 = vmatprep.subr.bf16.mxu1 %v8953_v42 }
 0x44b   : > { %4534 = vrot.lane.b32.xlu1 %v13424_v44, %s9654_s22  ;;  %v7355_v42 = vld [vmem:[%s14861_s5 + $0x18e0] sm:$0xff] }
 0x44d   : > { %8956 = vmatpush1.bf16.msra.mxu1 %v8955_v25  ;;  %v7373_v25 = vld [vmem:[%s14861_s5 + $0x1970] sm:$0xff] }
 0x44e   : > { %8958 = vmatprep.subr.bf16.mxu1 %v8957_v45  ;;  %v7380_v45 = vld [vmem:[%s14861_s5 + $0x19a8] sm:$0xff] }
 0x451   : > { %8960 = vmatpush1.bf16.msra.mxu1 %v8959_v30  ;;  %v8991_v30 = vpack.c.bf16 %v7385_v58, %v7379_v56 }
 0x452   : > { %8962 = vmatprep.subr.bf16.mxu1 %v8961_v32 }
 0x455   : > { %8964 = vmatpush1.bf16.msra.mxu1 %v8963_v55  ;;  %v8995_v55 = vpack.c.bf16 %v7397_v60, %v7391_v54 }
 0x456   : > { %8966 = vmatprep.subr.bf16.mxu1 %v8965_v19  ;;  %v8997_v19 = vpack.c.bf16 %v7410_v27, %v7404_v61  ;;  %v4435_v61 = vrot.slane %v13384_v3, 1 }
 0x459   : > { %8968 = vmatpush1.bf16.msra.mxu1 %v8967_v4  ;;  %v8999_v4 = vpack.c.bf16 %v7409_v1, %v7403_v10 }
 0x45a   : > { %8970 = vmatprep.subr.bf16.mxu1 %v8969_v6  ;;  %v9001_v6 = vpack.c.bf16 %v7422_v49, %v7416_v2 }
 0x45d   : > { %8972 = vmatpush1.bf16.msra.mxu1 %v8971_v12  ;;  %v4250_v12 = vrot.slane %v13316_v11, %v10175_v50 }
 0x45e   : > { %8974 = vmatprep.subr.bf16.mxu1 %v8973_v13  ;;  %v4297_v13 = vrot.slane %v13334_v15, %v10169_v48 }
 0x460   : > { %4122 = vmatmul.mubr.f32.vlgmr.msra.gmra.mrb[12].mxu1 %v12460_v40  ;;  %v7374_v40 = vld [vmem:[%s14861_s5 + $0x1978] sm:$0xff] }
 0x461   : > { %4127 = vmatprep.mubr.f32.mxu1 %v12479_v31  ;;  %8976 = vmatpush1.bf16.msra.mxu1 %v8975_v23  ;;  %v8983_v31 = vpack.c.bf16 %v7361_v34, %v7355_v42  ;;  %v8985_v24 = vpack.c.bf16 %v7374_v40, %v7368_v38 }
 0x462   : > { %8978 = vmatprep.subr.bf16.mxu1 %v8977_v26 }
 0x464   : > { %4128 = vmatmul.mubr.f32.gmra.mrb[14].mxu1 %v12500_v28  ;;  %v8987_v28 = vpack.c.bf16 %v7373_v25, %v7367_v17 }
 0x465   : > { %4133 = vmatprep.mubr.f32.mxu1 %v12438_v63  ;;  %8980 = vmatpush1.bf16.msra.mxu1 %v8979_v37  ;;  %v7386_v63 = vld [vmem:[%s14861_s5 + $0x19d8] sm:$0xff] }
 0x466   : > { %8982 = vmatprep.subr.bf16.mxu1 %v8981_v5  ;;  %v8989_v39 = vpack.c.bf16 %v7386_v63, %v7380_v45  ;;  %v4400_v45 = vld [vmem:[#allocation4 + $0x10] sm:$0xfe] }
 0x468   : > { %4134 = vmatmul.mubr.f32.gmra.mrb[16].mxu1 %v12462_v41  ;;  %v7398_v41 = vld [vmem:[%s14861_s5 + $0x1a38] sm:$0xff] }
 0x469   : > { %8984 = vmatpush1.bf16.msra.mxu1 %v8983_v31  ;;  %4204 = vmatprep.mubr.f32.mxu1 %v14878_v7  ;;  %v8993_v32 = vpack.c.bf16 %v7398_v41, %v7392_v53  ;;  %v4434_v53 = vrot.slane %v4400_v45, 1 }
 0x46a   : > { %8986 = vmatprep.subr.bf16.mxu1 %v8985_v24 }
 0x46b   : > { %v13612_v10 = vsel %vm1068_vm6, %v4434_v53, %v4435_v61 }
 0x46d   : > { %8988 = vmatpush1.bf16.msra.mxu1 %v8987_v28 }
 0x46e   : > { %8990 = vmatprep.subr.bf16.mxu1 %v8989_v39 }
 0x471   : > { %8992 = vmatpush1.bf16.msra.mxu1 %v8991_v30 }
 0x472   : > { %8994 = vmatprep.subr.bf16.mxu1 %v8993_v32 }
 0x475   : > { %8996 = vmatpush1.bf16.msra.mxu1 %v8995_v55 }
 0x476   : > { %8998 = vmatprep.subr.bf16.mxu1 %v8997_v19  ;;  %v4406_v19 = vld [vmem:[#allocation4 + $0x70] sm:$0x3f] }
 0x479   : > { %9000 = vmatpush1.bf16.msra.mxu1 %v8999_v4 }
 0x47a   : > { %9002 = vmatprep.subr.bf16.mxu1 %v9001_v6  ;;  %v13623_v6 = vrot.slane %v4406_v19, 1 }
 0x47d   : > { %9004 = vmatpush1.bf16.msra.mxu1 %v9003_v57 }
 0x47e   : > { %9261 = vmatprep.subr.bf16.mxu1 %v14876_v20 }
 0x480   : > { %4205 = vmatmul.mubr.f32.vlgmr.msra.gmra.mrb[12].mxu1 %v12659_v8  ;;  %v4301_v8 = vrot.slane %v13334_v15, %v10175_v50 }
 0x481   : > { %4210 = vmatprep.mubr.f32.mxu1 %v14878_v7 }
 0x484   : > { %4211 = vmatmul.mubr.f32.gmra.mrb[14].mxu1 %v12687_v51 }
 0x485   : > { %4216 = vmatprep.mubr.f32.mxu1 %v14878_v7 }
 0x488   : > { %4217 = vmatmul.mubr.f32.gmra.mrb[16].mxu1 %v12661_v35 }
 0x4f3   : > { %v3874_v14 = vpop.f32.mrb[6].mxu1 }
 0x4f4   : > { %v4273_v16 = vmul.f32 %v4246_v9, %v3874_v14  ;;  %v3876_v18 = vpop.f32.mrb[7].mxu1 }
 0x4f5   : > { %v4274_v51 = vmul.f32 %v4250_v12, %v3876_v18 }
 0x4f6   : > { %v4324_v22 = vadd.f32 %v4297_v13, %v4273_v16 }
 0x4f7   : > { %v4325_v23 = vadd.f32 %v4301_v8, %v4274_v51  ;;  %v3880_v26 = vpop.f32.mrb[8].mxu1 }
 0x4f8   : > { %v13586_v35 = vmax.f32 %v4324_v22, 0.0  ;;  %v4279_v29 = vmul.f32 %v4246_v9, %v3880_v26  ;;  %v3882_v52 = vpop.f32.mrb[9].mxu1  ;;  %v4685_v22 = vand.u32 127, %v836_v46 }
 0x4f9   : > { %v13588_v33 = vmax.f32 %v4325_v23, 0.0  ;;  %v4280_v36 = vmul.f32 %v4250_v12, %v3882_v52  ;;  %v4261_v52 = vsub.s32 4, %v10166_v47 }
 0x4fa   : > { %4360 = vst [vmem:[#allocation4] sm:$0xff] %v13586_v35  ;;  %v4330_v37 = vadd.f32 %v4297_v13, %v4279_v29 }
 0x4fb   : > { %4361 = vst [vmem:[#allocation4 + $0x8] sm:$0xff] %v13588_v33  ;;  %v4331_v5 = vadd.f32 %v4301_v8, %v4280_v36  ;;  %v3886_v42 = vpop.f32.mrb[10].mxu1  ;;  %v9512_v34 = vpack.i.bf16 %v13366_v43, %v13588_v33  ;;  %v4265_v36 = vsub.s32 5, %v10166_v47 }
 0x4fc   : > { %v13594_v38 = vmax.f32 %v4330_v37, 0.0  ;;  %v4285_v40 = vmul.f32 %v4246_v9, %v3886_v42  ;;  %v3888_v31 = vpop.f32.mrb[11].mxu1  ;;  %v4262_v37 = vrot.slane %v13316_v11, %v4261_v52  ;;  %v4313_v42 = vrot.slane %v13334_v15, %v4261_v52 }
 0x4fd   : > { %v13596_v24 = vmax.f32 %v4331_v5, 0.0  ;;  %v4286_v17 = vmul.f32 %v4250_v12, %v3888_v31  ;;  %9513 = vrot.lane.b32.xlu0 %v9512_v34, %s9654_s22  ;;  %v4266_v5 = vrot.slane %v13316_v11, %v4265_v36 }
 0x4fe   : > { %v4336_v25 = vadd.f32 %v4297_v13, %v4285_v40  ;;  %v9517_v63 = vpack.i.bf16 %v13594_v38, %v13586_v35  ;;  %v4429_v32 = vrot.slane %v13594_v38, 1  ;;  %v4317_v40 = vrot.slane %v13334_v15, %v4265_v36 }
 0x4ff   : > { %v4337_v28 = vadd.f32 %v4301_v8, %v4286_v17  ;;  %v9522_v39 = vpack.i.bf16 %v13384_v3, %v13596_v24  ;;  %v4432_v27 = vrot.slane %v13596_v24, 1  ;;  %v13642_v8 = vsel %vm1068_vm6, %v4435_v61, %v13623_v6 }
 0x500   : > { %v4354_v56 = vmax.f32 %v4336_v25, 0.0  ;;  %9518 = vrot.lane.b32.xlu1 %v9517_v63, %s9654_s22 }
 0x501   : > { %v4355_v58 = vmax.f32 %v4337_v28, 0.0  ;;  %9523 = vrot.lane.b32.xlu0 %v9522_v39, %s9654_s22  ;;  %v4398_v41 = vld [vmem:[#allocation4] sm:$0xfe] }
 0x502   : > { %4373 = vst [vmem:[#allocation4 + $0x60] sm:$0x3f] %v4354_v56  ;;  %v4399_v30 = vld [vmem:[#allocation4 + $0x8] sm:$0xfe]  ;;  %v4428_v54 = vrot.slane %v4398_v41, 1 }
 0x503   : > { %4374 = vst [vmem:[#allocation4 + $0x68] sm:$0x3f] %v4355_v58  ;;  %v4431_v60 = vrot.slane %v4399_v30, 1 }
 0x504   : > { %v13609_v55 = vsel %vm1068_vm6, %v4428_v54, %v4429_v32 }
 0x505   : > { %v13615_v1 = vsel %vm1068_vm6, %v4431_v60, %v4432_v27  ;;  %v4476_v2 = vmax.f32 %v13586_v35, %v13609_v55 }
 0x506   : > { %v4477_v49 = vmax.f32 %v13588_v33, %v13615_v1  ;;  %v9527_v4 = vpack.i.bf16 %v13612_v10, %v13615_v1  ;;  %v4686_v33 = vmul.u32 2, %v10166_v47 }
 0x508   : > { %9528 = vrot.lane.b32.xlu1 %v9527_v4, %s9654_s22  ;;  %v4401_v4 = vld [vmem:[#allocation4 + $0x18] sm:$0xfe]  ;;  %vm4688_vm11 = vcmp.eq.s32.totalorder %v4685_v22, %v4686_v33 }
 0x509   : > { %v4404_v62 = vld [vmem:[#allocation4 + $0x60] sm:$0x3f]  ;;  %v4437_v52 = vrot.slane %v4401_v4, 1 }
 0x50a   : > { %v13626_v21 = vld [vmem:[#allocation4 + $0x68] sm:$0x1f]  ;;  %v13628_v9 = vrot.slane %v4404_v62, 1  ;;  %v13634_v13 = vld [vmem:[#allocation4 + $0x60] sm:$0x1f] }
 0x50b   : > { %v4405_v57 = vld [vmem:[#allocation4 + $0x68] sm:$0x3f]  ;;  %4532 = vrot.lane.b32.xlu0 %v13626_v21, %s9654_s22 }
 0x50c   : > { %v13630_v12 = vrot.slane %v4405_v57, 1  ;;  %v13638_v14 = vsel %vm1068_vm6, %v4429_v32, %v13628_v9 }
 0x50d   : > { %v9532_v51 = vpack.i.bf16 %v13638_v14, %v13609_v55 }
 0x50e   : > { %v13654_v23 = vsel %vm1068_vm6, %v4432_v27, %v13630_v12 }
 0x50f   : > { %v9537_v26 = vpack.i.bf16 %v13642_v8, %v13654_v23  ;;  %9533 = vrot.lane.b32.xlu1 %v9532_v51, %s9654_s22  ;;  %v14896_v35 = vmax.f32 %v13596_v24, %v13654_v23 }
 0x511   : > { %9538 = vrot.lane.b32.xlu0 %v9537_v26, %s9654_s22 }
 0x513   : > { %4620 = vrot.lane.b32.xlu1 %v13630_v12, %s9654_s22 }
 0x515   : > { %4530 = vrot.lane.b32.xlu0 %v13634_v13, %s9654_s22 }
 0x517   : > { %4618 = vrot.lane.b32.xlu1 %v13628_v9, %s9654_s22 }
 0x519   : > { %4622 = vrot.lane.b32.xlu0 %v13623_v6, %s9654_s22 }
 0x553   : > { %v4206_v34 = vpop.f32.mrb[12].mxu1 }
 0x554   : > { %v4277_v31 = vmul.f32 %v4262_v37, %v4206_v34  ;;  %v4208_v17 = vpop.f32.mrb[13].mxu1  ;;  %v4438_v34 = vrot.slane %v13386_v0, 1 }
 0x555   : > { %v4278_v25 = vmul.f32 %v4266_v5, %v4208_v17 }
 0x556   : > { %v4328_v45 = vadd.f32 %v4313_v42, %v4277_v31 }
 0x557   : > { %v4329_v63 = vadd.f32 %v4317_v40, %v4278_v25  ;;  %v4212_v28 = vpop.f32.mrb[14].mxu1 }
 0x558   : > { %v13676_v39 = vmax.f32 %v4328_v45, 0.0  ;;  %v4283_v56 = vmul.f32 %v4262_v37, %v4212_v28  ;;  %v4214_v58 = vpop.f32.mrb[15].mxu1 }
 0x559   : > { %v4347_v53 = vmax.f32 %v4329_v63, 0.0  ;;  %v4284_v41 = vmul.f32 %v4266_v5, %v4214_v58  ;;  %v4407_v63 = vld [vmem:[#allocation4 + $0x78] sm:$0x3f] }
 0x55a   : > { %4364 = vst [vmem:[#allocation4 + $0x20] sm:$0xff] %v13676_v39  ;;  %v4334_v11 = vadd.f32 %v4313_v42, %v4283_v56  ;;  %v9542_v30 = vpack.i.bf16 %v13676_v39, %v13368_v59 }
 0x55b   : > { %4366 = vst.msk [vmem:[#allocation4 + $0x28] sm:$0xff] %vm4365_vm8, %v4347_v53  ;;  %v4335_v15 = vadd.f32 %v4317_v40, %v4284_v41  ;;  %v4218_v32 = vpop.f32.mrb[16].mxu1  ;;  %v13705_v53 = vrot.slane %v4407_v63, 1 }
 0x55c   : > { %v13682_v54 = vmax.f32 %v4334_v11, 0.0  ;;  %v4289_v60 = vmul.f32 %v4262_v37, %v4218_v32  ;;  %v4220_v61 = vpop.f32.mrb[17].mxu1  ;;  %9543 = vrot.lane.b32.xlu0 %v9542_v30, %s9654_s22 }
 0x55d   : > { %v4353_v27 = vmax.f32 %v4335_v15, 0.0  ;;  %v4290_v19 = vmul.f32 %v4266_v5, %v4220_v61  ;;  %v13712_v15 = vld [vmem:[#allocation4 + $0x78] sm:$0x1f]  ;;  %v13726_v4 = vsel %vm1068_vm6, %v4438_v34, %v13705_v53 }
 0x55e   : > { %v4340_v62 = vadd.f32 %v4313_v42, %v4289_v60  ;;  %v9547_v57 = vpack.i.bf16 %v13682_v54, %v13386_v0  ;;  %v4441_v5 = vrot.slane %v13682_v54, 1  ;;  %v13692_v42 = vsel %vm1068_vm6, %v4437_v52, %v4438_v34 }
 0x55f   : > { %4372 = vst.msk [vmem:[#allocation4 + $0x58] sm:$0xff] %vm4365_vm8, %v4353_v27  ;;  %v4341_v51 = vadd.f32 %v4317_v40, %v4290_v19 }
 0x560   : > { %v4358_v26 = vmax.f32 %v4340_v62, 0.0  ;;  %9548 = vrot.lane.b32.xlu1 %v9547_v57, %s9654_s22 }
 0x561   : > { %v4359_v36 = vmax.f32 %v4341_v51, 0.0  ;;  %v4402_v37 = vld [vmem:[#allocation4 + $0x20] sm:$0xfe] }
 0x562   : > { %4377 = vst [vmem:[#allocation4 + $0x80] sm:$0x3f] %v4358_v26  ;;  %v4440_v31 = vrot.slane %v4402_v37, 1  ;;  %v4403_v40 = vld [vmem:[#allocation4 + $0x28] sm:$0xfe] }
 0x563   : > { %4379 = vst.msk [vmem:[#allocation4 + $0x88] sm:$0x3f] %vm4378_vm9, %v4359_v36  ;;  %v4443_v58 = vrot.slane %v4403_v40, 1  ;;  %v13707_v11 = vld [vmem:[#allocation4 + $0x28] sm:$0xff]  ;;  %v13758_v40 = vpop.permute.xlu1 %4534 }
 0x564   : > { %v13695_v17 = vsel %vm1068_vm6, %v4440_v31, %v4441_v5 }
 0x565   : > { %v9552_v25 = vpack.i.bf16 %v13695_v17, %v13692_v42 }
 0x566   : > { %v13701_v28 = vld [vmem:[#allocation4 + $0x58] sm:$0xff] }
 0x567   : > { %9553 = vrot.lane.b32.xlu0 %v9552_v25, %s9654_s22  ;;  %v4444_v56 = vrot.slane %v13701_v28, 1 }
 0x569   : > { %v4408_v41 = vld [vmem:[#allocation4 + $0x80] sm:$0x3f]  ;;  %v13710_v30 = vsel %vm1068_vm6, %v4443_v58, %v4444_v56 }
 0x56a   : > { %v13714_v32 = vrot.slane %v4408_v41, 1  ;;  %v4409_v60 = vld [vmem:[#allocation4 + $0x88] sm:$0x3f]  ;;  %v13720_v27 = vld [vmem:[#allocation4 + $0x80] sm:$0x1f] }
 0x56b   : > { %4536 = vrot.lane.b32.xlu0 %v13712_v15, %s9654_s22  ;;  %v13722_v19 = vrot.slane %v4409_v60, 1  ;;  %v13734_v51 = vld [vmem:[#allocation4 + $0x88] sm:$0x1f] }
 0x56c   : > { %v13730_v62 = vsel %vm1068_vm6, %v4441_v5, %v13714_v32  ;;  %v9562_v5 = vpack.i.bf16 %v13701_v28, %v13707_v11 }
 0x56d   : > { %v9557_v26 = vpack.i.bf16 %v13730_v62, %v13726_v4  ;;  %v13742_v36 = vsel %vm1068_vm6, %v4444_v56, %v13722_v19  ;;  %vm5987_vm6 = vcmask 457728  }
 0x56e   : > { %v9567_v56 = vpack.i.bf16 %v13742_v36, %v13710_v30 }
 0x56f   : > { %9558 = vrot.lane.b32.xlu1 %v9557_v26, %s9654_s22  ;;  %4624 = vrot.lane.b32.xlu0 %v13705_v53, %s9654_s22  ;;  %v13755_v31 = vpop.permute.xlu0 %9513 }
 0x570   : > { %v14880_v58 = vunpack.i.h.bf16 %v13755_v31  ;;  %v9515_v26 = vunpack.i.l.bf16 %v13755_v31 }
 0x572   : > { %v9519_v25 = vpop.permute.xlu1 %9518  ;;  %v4544_v34 = vsel %vm4542_vm10, %v9515_v26, %v14880_v58 }
 0x573   : > { %4538 = vrot.lane.b32.xlu1 %v13720_v27, %s9654_s22  ;;  %9563 = vrot.lane.b32.xlu0 %v9562_v5, %s9654_s22  ;;  %v13764_v63 = vpop.permute.xlu0 %9523  ;;  %v9520_v41 = vunpack.i.l.bf16 %v9519_v25  ;;  %v9521_v5 = vunpack.i.h.bf16 %v9519_v25 }
 0x574   : > { %v14882_v20 = vunpack.i.h.bf16 %v13764_v63  ;;  %v9525_v57 = vunpack.i.l.bf16 %v13764_v63 }
 0x576   : > { %v4548_v25 = vsel %vm4542_vm10, %v9521_v5, %v9525_v57  ;;  %v4549_v61 = vsel %vm4542_vm10, %v9525_v57, %v14882_v20  ;;  %v14895_v57 = vmax.f32 %v13594_v38, %v13638_v14 }
 0x577   : > { %4626 = vrot.lane.b32.xlu1 %v13714_v32, %s9654_s22  ;;  %4540 = vrot.lane.b32.xlu0 %v13734_v51, %s9654_s22  ;;  %v4583_v55 = vmax.f32 %v14896_v35, %v4549_v61 }
 0x578   : > { %v4582_v46 = vmax.f32 %v14895_v57, %v4548_v25 }
 0x57a   : > { %v13770_v60 = vpop.permute.xlu1 %9528 }
 0x57b   : > { %9568 = vrot.lane.b32.xlu1 %v9567_v56, %s9654_s22  ;;  %v14881_v52 = vunpack.i.h.bf16 %v13770_v60  ;;  %v9530_v45 = vunpack.i.l.bf16 %v13770_v60  ;;  %v4543_v56 = vsel %vm4542_vm10, %v9520_v41, %v9515_v26 }
 0x57c   : > { %v4576_v41 = vmax.f32 %v4476_v2, %v4543_v56 }
 0x57d   : > { %v4533_v37 = vpop.permute.xlu0 %4532  ;;  %v4631_v26 = vsel %vm4542_vm10, %v9530_v45, %v14881_v52 }
 0x57e   : > { %v4554_v24 = vsel %vm4542_vm10, %v4533_v37, %v13758_v40 }
 0x57f   : > { %4628 = vrot.lane.b32.xlu1 %v13722_v19, %s9654_s22  ;;  %s9593_s22 = scalar_lea.vmem %s9592_s26, 32 }
 0x580   : > { %p9595_p1 = scmp.lt.s32.totalorder %s9593_s22, %s9587_s28 }
 0x581   : > { %v9534_v7 = vpop.permute.xlu1 %9533 }
 0x582   : > { %v9536_v18 = vunpack.i.h.bf16 %v9534_v7  ;;  %v9535_v16 = vunpack.i.l.bf16 %v9534_v7  ;;  %v4577_v7 = vmax.f32 %v4477_v49, %v4544_v34  ;;  %v4683_v34 = vadd.s32 8, %v10166_v47  ;;  %p9596_p2 = por %p9595_p1, %p9594_p0 }
 0x583   : > { %v13787_v29 = vpop.permute.xlu0 %9538 }
 0x584   : > { %v9541_v5 = vunpack.i.h.bf16 %v13787_v29  ;;  %v9540_v58 = vunpack.i.l.bf16 %v13787_v29  ;;  %v4630_v2 = vsel %vm4542_vm10, %v9535_v16, %v9530_v45  ;;  %v4664_v38 = vmax.f32 %v4577_v7, %v4631_v26  ;;  %p9597_p3 = pnand %p9596_p2, %p9590_p13 }
 0x585   : > { %v4663_v56 = vmax.f32 %v4576_v41, %v4630_v2  ;;  %v4621_v50 = vpop.permute.xlu1 %4620  ;;  %v14897_v45 = vmax.f32 %v13634_v13, %v13628_v9  ;;  %v4687_v47 = vmul.u32 2, %v4683_v34  ;;  %v14899_v13 = vmov 0.0  }
 0x586   : > { %v4635_v52 = vsel %vm4542_vm10, %v9536_v18, %v9540_v58  ;;  %v4636_v20 = vsel %vm4542_vm10, %v9540_v58, %v9541_v5  ;;  %v13829_v7 = vsel %vm4688_vm11, 1.0, %v14899_v13  ;;  %7750 = vmatprep.mubr.msk.f32.mxu1 %vm9655_vm4, %v14899_v13 }
 0x587   : > { %v4669_v1 = vmax.f32 %v4582_v46, %v4635_v52  ;;  %v4531_v49 = vpop.permute.xlu0 %4530  ;;  %v4670_v14 = vmax.f32 %v4583_v55, %v4636_v20  ;;  %v14898_v52 = vmax.f32 %v13626_v21, %v13630_v12  ;;  %vm4689_vm14 = vcmp.eq.s32.totalorder %v4685_v22, %v4687_v47 }
 0x588   : > { %v4553_v16 = vsel %vm4542_vm10, %v4531_v49, %v4533_v37 }
 0x589   : > { %v9005_v23 = vpack.c.bf16 %v4670_v14, %v4664_v38  ;;  %v9007_v18 = vpack.c.bf16 %v4669_v1, %v4663_v56  ;;  %v4588_v61 = vmax.f32 %v14897_v45, %v4553_v16  ;;  %v4619_v58 = vpop.permute.xlu1 %4618  ;;  %v4589_v25 = vmax.f32 %v14898_v52, %v4554_v24 }
 0x58a   : > { %v4640_v20 = vsel %vm4542_vm10, %v4619_v58, %v4621_v50  ;;  %v14900_v1 = vunpack.i.h.bf16 %v13755_v31  ;;  %v14901_v14 = vunpack.i.h.bf16 %v13764_v63  ;;  %v4478_v16 = vmax.f32 %v13366_v43, %v13612_v10 }
 0x58b   : > { %v13824_v41 = vpop.permute.xlu0 %4622  ;;  %9006 = vmatprep.subr.bf16.mxu0 %v9005_v23  ;;  %v4675_v9 = vmax.f32 %v4588_v61, %v4640_v20  ;;  %v4484_v23 = vmax.f32 %v13384_v3, %v13642_v8  ;;  %v4485_v31 = vmax.f32 %v13386_v0, %v13726_v4  ;;  %v14902_v63 = vunpack.i.h.bf16 %v13770_v60 }
 0x58c   : > { %v4641_v37 = vsel %vm4542_vm10, %v4621_v50, %v13824_v41  ;;  %9008 = vmatpush1.bf16.msra.mxu0 %v9007_v18  ;;  %v13837_v50 = vsel %vm4689_vm14, 1.0, %v14899_v13  ;;  %v4479_v18 = vmax.f32 %v13368_v59, %v13692_v42 }
 0x58d   : > { %v4676_v26 = vmax.f32 %v4589_v25, %v4641_v37 }
 0x58f   : > { %7426 = vmatprep.subr.msk.mxu0 %vm4701_vm12, %v4676_v26 }
 0x590   : > { %7427 = vmatpush1.msk.msra.mxu0 %vm4701_vm12, %v4675_v9 }
 0x591   : > { %7428 = vmatmul.mubr.msk.f32.vlgmr.msra.gmra.mrb[20].mxu0 %vm4694_vm13, %v13829_v7 }
 0x592   : > { %4790 = vmatprep.mubr.f32.mxu0 %v14899_v13 }
 0x595   : > { %7429 = vmatmul.mubr.msk.f32.gmra.mrb[22].mxu0 %vm4694_vm13, %v13837_v50 }
 0x596   : > { %4861 = vmatprep.mubr.f32.mxu0 %v14899_v13 }
 0x5ce   : > { %v9544_v21 = vpop.permute.xlu0 %9543 }
 0x5cf   : > { %v9546_v22 = vunpack.i.h.bf16 %v9544_v21  ;;  %v9545_v46 = vunpack.i.l.bf16 %v9544_v21  ;;  %v4491_v21 = vmax.f32 %v13712_v15, %v13705_v53 }
 0x5d1   : > { %v4545_v49 = vsel %vm4542_vm10, %v14900_v1, %v9545_v46  ;;  %v4546_v38 = vsel %vm4542_vm10, %v9545_v46, %v9546_v22 }
 0x5d2   : > { %v9549_v12 = vpop.permute.xlu1 %9548  ;;  %v4578_v43 = vmax.f32 %v4478_v16, %v4545_v49  ;;  %v4579_v10 = vmax.f32 %v4479_v18, %v4546_v38 }
 0x5d3   : > { %v9551_v35 = vunpack.i.h.bf16 %v9549_v12  ;;  %v9550_v55 = vunpack.i.l.bf16 %v9549_v12 }
 0x5d5   : > { %v4550_v34 = vsel %vm4542_vm10, %v14901_v14, %v9550_v55  ;;  %v4551_v24 = vsel %vm4542_vm10, %v9550_v55, %v9551_v35 }
 0x5d6   : > { %v4584_v47 = vmax.f32 %v4484_v23, %v4550_v34  ;;  %v4585_v3 = vmax.f32 %v4485_v31, %v4551_v24  ;;  %v14904_v34 = vmax.f32 %v13701_v28, %v13742_v36 }
 0x5d9   : > { %v13842_v57 = vpop.permute.xlu0 %9553 }
 0x5da   : > { %v9556_v56 = vunpack.i.h.bf16 %v13842_v57  ;;  %v9555_v33 = vunpack.i.l.bf16 %v13842_v57 }
 0x5dc   : > { %v4632_v58 = vsel %vm4542_vm10, %v14902_v63, %v9555_v33  ;;  %v4633_v52 = vsel %vm4542_vm10, %v9555_v33, %v9556_v56 }
 0x5dd   : > { %v4537_v2 = vpop.permute.xlu0 %4536  ;;  %v4665_v8 = vmax.f32 %v4578_v43, %v4632_v58  ;;  %v4666_v37 = vmax.f32 %v4579_v10, %v4633_v52  ;;  %v14908_v10 = vmax.f32 %v13720_v27, %v13714_v32  ;;  %v4953_v32 = vld [vmem:[%s14863_s7 + $0x10] sm:$0xff]  ;;  %v4954_v27 = vld [vmem:[%s14863_s7 + $0x18] sm:$0xff] }
 0x5de   : > { %v4555_v12 = vsel %vm4542_vm10, %v13758_v40, %v4537_v2 }
 0x5e1   : > { %v9559_v45 = vpop.permute.xlu1 %9558  ;;  %v4625_v61 = vpop.permute.xlu0 %4624 }
 0x5e2   : > { %v9561_v25 = vunpack.i.h.bf16 %v9559_v45  ;;  %v9560_v20 = vunpack.i.l.bf16 %v9559_v45  ;;  %v4642_v33 = vsel %vm4542_vm10, %v13824_v41, %v4625_v61 }
 0x5e4   : > { %v4637_v59 = vsel %vm4542_vm10, %v9541_v5, %v9560_v20  ;;  %v4638_v0 = vsel %vm4542_vm10, %v9560_v20, %v9561_v25  ;;  %v4490_v5 = vmax.f32 %v13424_v44, %v13623_v6  ;;  %v14903_v6 = vmax.f32 %v13707_v11, %v13710_v30 }
 0x5e5   : > { %v4671_v42 = vmax.f32 %v4584_v47, %v4637_v59  ;;  %v4539_v4 = vpop.permute.xlu1 %4538  ;;  %v9564_v60 = vpop.permute.xlu0 %9563  ;;  %v4672_v26 = vmax.f32 %v4585_v3, %v4638_v0  ;;  %v4969_v3 = vld [vmem:[%s14863_s7 + $0x90] sm:$0xff]  ;;  %v4970_v59 = vld [vmem:[%s14863_s7 + $0x98] sm:$0xff] }
 0x5e6   : > { %v4556_v9 = vsel %vm4542_vm10, %v4537_v2, %v4539_v4  ;;  %v9566_v46 = vunpack.i.h.bf16 %v9564_v60  ;;  %v9565_v55 = vunpack.i.l.bf16 %v9564_v60  ;;  %v4590_v38 = vmax.f32 %v4490_v5, %v4555_v12  ;;  %v4971_v60 = vld [vmem:[%s14863_s7 + $0xa0] sm:$0xff]  ;;  %v4956_v12 = vld [vmem:[%s14863_s7 + $0x28] sm:$0xff] }
 0x5e7   : > { %v9009_v57 = vpack.c.bf16 %v4672_v26, %v4666_v37  ;;  %v9011_v29 = vpack.c.bf16 %v4671_v42, %v4665_v8  ;;  %v4591_v1 = vmax.f32 %v4491_v21, %v4556_v9  ;;  %v4972_v37 = vld [vmem:[%s14863_s7 + $0xa8] sm:$0xff]  ;;  %v9023_v26 = vpack.c.bf16 %v4954_v27, %v4953_v32  ;;  %v4955_v21 = vld [vmem:[%s14863_s7 + $0x20] sm:$0xff] }
 0x5e8   : > { %v4677_v15 = vmax.f32 %v4590_v38, %v4642_v33  ;;  %v4552_v40 = vsel %vm4542_vm10, %v9551_v35, %v9566_v46  ;;  %v4547_v2 = vsel %vm4542_vm10, %v9546_v22, %v9565_v55  ;;  %v4581_v41 = vmax.f32 %v14903_v6, %v9565_v55  ;;  %v4958_v55 = vld [vmem:[%s14863_s7 + $0x38] sm:$0xff]  ;;  %v4975_v33 = vld [vmem:[%s14863_s7 + $0xc0] sm:$0xff] }
 0x5e9   : > { %9010 = vmatprep.subr.bf16.mxu0 %v9009_v57  ;;  %v4627_v49 = vpop.permute.xlu1 %4626  ;;  %v4587_v24 = vmax.f32 %v14904_v34, %v9566_v46  ;;  %v14905_v35 = vmax.f32 %v13676_v39, %v13695_v17  ;;  %v14906_v22 = vmax.f32 %v13682_v54, %v13730_v62  ;;  %v4541_v45 = vpop.permute.xlu0 %4540  ;;  %v14907_v54 = vmax.f32 %v13734_v51, %v13722_v19  ;;  %v4951_v19 = vld [vmem:[%s14863_s7] sm:$0xff]  ;;  %v4952_v51 = vld [vmem:[%s14863_s7 + $0x8] sm:$0xff]  ;;  %v4973_v57 = vld [vmem:[%s14863_s7 + $0xb0] sm:$0xff] }
 0x5ea   : > { %v4643_v14 = vsel %vm4542_vm10, %v4625_v61, %v4627_v49  ;;  %9012 = vmatpush1.bf16.msra.mxu0 %v9011_v29  ;;  %v4557_v17 = vsel %vm4542_vm10, %v4539_v4, %v4541_v45  ;;  %v9019_v42 = vpack.c.bf16 %v4952_v51, %v4951_v19  ;;  %v9021_v4 = vpack.c.bf16 %v4970_v59, %v4969_v3  ;;  %v4957_v46 = vld [vmem:[%s14863_s7 + $0x30] sm:$0xff]  ;;  %v4959_v38 = vld [vmem:[%s14863_s7 + $0x40] sm:$0xff]  ;;  %v4962_v6 = vld [vmem:[%s14863_s7 + $0x58] sm:$0xff] }
 0x5eb   : > { %v4678_v53 = vmax.f32 %v4591_v1, %v4643_v14  ;;  %v4580_v18 = vmax.f32 %v14905_v35, %v4547_v2  ;;  %v4586_v31 = vmax.f32 %v14906_v22, %v4552_v40  ;;  %v4593_v62 = vmax.f32 %v14907_v54, %v4541_v45  ;;  %v4960_v14 = vld [vmem:[%s14863_s7 + $0x48] sm:$0xff]  ;;  %v4982_v22 = vld [vmem:[%s14863_s7 + $0xf8] sm:$0xff]  ;;  %v5001_v54 = vld [vmem:[%s14863_s7 + $0x190] sm:$0xff] }
 0x5ec   : > { %v4592_v47 = vmax.f32 %v14908_v10, %v4557_v17  ;;  %v9025_v9 = vpack.c.bf16 %v4972_v37, %v4971_v60  ;;  %v9027_v29 = vpack.c.bf16 %v4956_v12, %v4955_v21  ;;  %v9031_v1 = vpack.c.bf16 %v4958_v55, %v4957_v46  ;;  %v4980_v34 = vld [vmem:[%s14863_s7 + $0xe8] sm:$0xff]  ;;  %v5003_v19 = vld [vmem:[%s14863_s7 + $0x1a0] sm:$0xff]  ;;  %v4989_v60 = vld [vmem:[%s14863_s7 + $0x130] sm:$0xff] }
 0x5ed   : > { %7430 = vmatprep.subr.msk.mxu0 %vm4701_vm12, %v4678_v53  ;;  %v9569_v44 = vpop.permute.xlu1 %9568  ;;  %v4977_v53 = vld [vmem:[%s14863_s7 + $0xd0] sm:$0xff]  ;;  %v9035_v40 = vpack.c.bf16 %v4960_v14, %v4959_v38  ;;  %v4964_v35 = vld [vmem:[%s14863_s7 + $0x68] sm:$0xff]  ;;  %v4987_v59 = vld [vmem:[%s14863_s7 + $0x120] sm:$0xff] }
 0x5ee   : > { %v9571_v16 = vunpack.i.h.bf16 %v9569_v44  ;;  %v9570_v23 = vunpack.i.l.bf16 %v9569_v44  ;;  %7431 = vmatpush1.msk.msra.mxu0 %vm4701_vm12, %v4677_v15  ;;  %v4978_v15 = vld [vmem:[%s14863_s7 + $0xd8] sm:$0xff]  ;;  %v4961_v44 = vld [vmem:[%s14863_s7 + $0x50] sm:$0xff]  ;;  %v4984_v17 = vld [vmem:[%s14863_s7 + $0x108] sm:$0xff] }
 0x5ef   : > { %7432 = vmatmul.mubr.msk.f32.vlgmr.msra.gmra.mrb[24].mxu0 %vm4694_vm13, %v13829_v7  ;;  %v9037_v2 = vpack.c.bf16 %v4978_v15, %v4977_v53  ;;  %v5004_v51 = vld [vmem:[%s14863_s7 + $0x1a8] sm:$0xff]  ;;  %v4990_v37 = vld [vmem:[%s14863_s7 + $0x138] sm:$0xff]  ;;  %v4995_v53 = vld [vmem:[%s14863_s7 + $0x160] sm:$0xff] }
 0x5f0   : > { %v4639_v11 = vsel %vm4542_vm10, %v9561_v25, %v9571_v16  ;;  %v4634_v28 = vsel %vm4542_vm10, %v9556_v56, %v9570_v23  ;;  %v4668_v30 = vmax.f32 %v4581_v41, %v9570_v23  ;;  %v4674_v36 = vmax.f32 %v4587_v24, %v9571_v16  ;;  %4867 = vmatprep.mubr.f32.mxu0 %v14899_v13  ;;  %v4967_v56 = vld [vmem:[%s14863_s7 + $0x80] sm:$0xff]  ;;  %v4968_v25 = vld [vmem:[%s14863_s7 + $0x88] sm:$0xff] }
 0x5f1   : > { %v4673_v61 = vmax.f32 %v4586_v31, %v4639_v11  ;;  %v4667_v63 = vmax.f32 %v4580_v18, %v4634_v28  ;;  %v4629_v39 = vpop.permute.xlu1 %4628  ;;  %v9017_v0 = vpack.c.bf16 %v4968_v25, %v4967_v56  ;;  %v4979_v41 = vld [vmem:[%s14863_s7 + $0xe0] sm:$0xff]  ;;  %v9039_v24 = vpack.c.bf16 %v4962_v6, %v4961_v44  ;;  %v4981_v18 = vld [vmem:[%s14863_s7 + $0xf0] sm:$0xff]  ;;  %v4966_v28 = vld [vmem:[%s14863_s7 + $0x78] sm:$0xff] }
 0x5f2   : > { %v9013_v58 = vpack.c.bf16 %v4674_v36, %v4668_v30  ;;  %v4644_v20 = vsel %vm4542_vm10, %v4627_v49, %v4629_v39  ;;  %v4680_v43 = vmax.f32 %v4593_v62, %v4629_v39  ;;  %v9041_v16 = vpack.c.bf16 %v4980_v34, %v4979_v41  ;;  %v4963_v23 = vld [vmem:[%s14863_s7 + $0x60] sm:$0xff]  ;;  %v4965_v11 = vld [vmem:[%s14863_s7 + $0x70] sm:$0xff]  ;;  %v5000_v36 = vld [vmem:[%s14863_s7 + $0x188] sm:$0xff] }
 0x5f3   : > { %7433 = vmatmul.mubr.msk.f32.gmra.mrb[26].mxu0 %vm4694_vm13, %v13837_v50  ;;  %v9015_v52 = vpack.c.bf16 %v4673_v61, %v4667_v63  ;;  %v4679_v8 = vmax.f32 %v4592_v47, %v4644_v20  ;;  %v9043_v31 = vpack.c.bf16 %v4964_v35, %v4963_v23  ;;  %v9045_v45 = vpack.c.bf16 %v4982_v22, %v4981_v18  ;;  %v4999_v30 = vld [vmem:[%s14863_s7 + $0x180] sm:$0xff]  ;;  %v5002_v62 = vld [vmem:[%s14863_s7 + $0x198] sm:$0xff]  ;;  %v4985_v20 = vld [vmem:[%s14863_s7 + $0x110] sm:$0xff] }
 0x5f4   : > { %9014 = vmatprep.subr.bf16.mxu0 %v9013_v58  ;;  %4938 = vmatprep.mubr.f32.mxu0 %v14899_v13  ;;  %v9047_v61 = vpack.c.bf16 %v4966_v28, %v4965_v11  ;;  %v9049_v63 = vpack.c.bf16 %v5000_v36, %v4999_v30  ;;  %v4983_v39 = vld [vmem:[%s14863_s7 + $0x100] sm:$0xff]  ;;  %v9053_v25 = vpack.c.bf16 %v5002_v62, %v5001_v54  ;;  %v4996_v15 = vld [vmem:[%s14863_s7 + $0x168] sm:$0xff]  ;;  %v4997_v41 = vld [vmem:[%s14863_s7 + $0x170] sm:$0xff] }
 0x5f5   : > { %9016 = vmatpush1.bf16.msra.mxu0 %v9015_v52  ;;  %v9051_v52 = vpack.c.bf16 %v4984_v17, %v4983_v39  ;;  %v9057_v3 = vpack.c.bf16 %v5004_v51, %v5003_v19  ;;  %v9063_v21 = vpack.c.bf16 %v4990_v37, %v4989_v60  ;;  %v9075_v44 = vpack.c.bf16 %v4996_v15, %v4995_v53  ;;  %v4998_v34 = vld [vmem:[%s14863_s7 + $0x178] sm:$0xff]  ;;  %v5015_v23 = vld [vmem:[%s14863_s7 + $0x200] sm:$0xff]  ;;  %v5016_v35 = vld [vmem:[%s14863_s7 + $0x208] sm:$0xff] }
 0x5f6   : > { %7434 = vmatprep.subr.msk.mxu0 %vm4701_vm12, %v4680_v43  ;;  %v4986_v43 = vld [vmem:[%s14863_s7 + $0x118] sm:$0xff]  ;;  %v9082_v22 = vpack.c.bf16 %v5016_v35, %v5015_v23  ;;  %v5021_v17 = vld [vmem:[%s14863_s7 + $0x230] sm:$0xff] }
 0x5f7   : > { %v9055_v10 = vpack.c.bf16 %v4986_v43, %v4985_v20  ;;  %v5018_v11 = vld [vmem:[%s14863_s7 + $0x218] sm:$0xff]  ;;  %v5025_v51 = vld [vmem:[%s14863_s7 + $0x250] sm:$0xff] }
 0x5f8   : > { %v5022_v54 = vld [vmem:[%s14863_s7 + $0x238] sm:$0xff]  ;;  %v5033_v37 = vld [vmem:[%s14863_s7 + $0x290] sm:$0xff] }
 0x5f9   : > { %7435 = vmatpush1.msk.msra.mxu0 %vm4701_vm12, %v4679_v8  ;;  %v7446_v15 = vld [vmem:[%s14865_s9 + $0xd0] sm:$0xff]  ;;  %v7455_v35 = vld [vmem:[%s14865_s9 + $0x118] sm:$0xff] }
 0x5fa   : > { %7436 = vmatmul.mubr.msk.f32.vlgmr.msra.gmra.mrb[28].mxu0 %vm4694_vm13, %v13829_v7  ;;  %9018 = vmatprep.subr.bf16.mxu0 %v9017_v0  ;;  %v4974_v7 = vld [vmem:[%s14863_s7 + $0xb8] sm:$0xff]  ;;  %v4988_v0 = vld [vmem:[%s14863_s7 + $0x128] sm:$0xff] }
 0x5fb   : > { %4944 = vmatprep.mubr.f32.mxu0 %v14899_v13  ;;  %9020 = vmatpush3.bf16.msra.mxu0 %v9019_v42  ;;  %v9029_v5 = vpack.c.bf16 %v4974_v7, %v4973_v57  ;;  %v5005_v42 = vld [vmem:[%s14863_s7 + $0x1b0] sm:$0xff]  ;;  %v9059_v32 = vpack.c.bf16 %v4988_v0, %v4987_v59  ;;  %v4991_v57 = vld [vmem:[%s14863_s7 + $0x140] sm:$0xff]  ;;  %v4992_v7 = vld [vmem:[%s14863_s7 + $0x148] sm:$0xff] }
 0x5fc   : > { %9022 = vmatprep.subr.bf16.mxu0 %v9021_v4  ;;  %v5006_v4 = vld [vmem:[%s14863_s7 + $0x1b8] sm:$0xff]  ;;  %v9067_v46 = vpack.c.bf16 %v4992_v7, %v4991_v57  ;;  %v5028_v59 = vld [vmem:[%s14863_s7 + $0x268] sm:$0xff]  ;;  %v7442_v57 = vld [vmem:[%s14865_s9 + $0xb0] sm:$0xff] }
 0x5fd   : > { %v9061_v27 = vpack.c.bf16 %v5006_v4, %v5005_v42  ;;  %v5030_v42 = vld [vmem:[%s14863_s7 + $0x278] sm:$0xff] }
 0x5fe   : > { %7437 = vmatmul.mubr.msk.f32.gmra.mrb[30].mxu0 %vm4694_vm13, %v13837_v50  ;;  %v4976_v50 = vld [vmem:[%s14863_s7 + $0xc8] sm:$0xff] }
 0x5ff   : > { %9024 = vmatpush3.bf16.msra.mxu0 %v9023_v26  ;;  %v9033_v49 = vpack.c.bf16 %v4976_v50, %v4975_v33  ;;  %v5007_v26 = vld [vmem:[%s14863_s7 + $0x1c0] sm:$0xff]  ;;  %v4993_v33 = vld [vmem:[%s14863_s7 + $0x150] sm:$0xff]  ;;  %v4994_v50 = vld [vmem:[%s14863_s7 + $0x158] sm:$0xff] }
 0x600   : > { %9026 = vmatprep.subr.bf16.mxu0 %v9025_v9  ;;  %v5008_v9 = vld [vmem:[%s14863_s7 + $0x1c8] sm:$0xff]  ;;  %v9071_v38 = vpack.c.bf16 %v4994_v50, %v4993_v33 }
 0x601   : > { %v9065_v12 = vpack.c.bf16 %v5008_v9, %v5007_v26  ;;  %v5034_v26 = vld [vmem:[%s14863_s7 + $0x298] sm:$0xff] }
 0x602   : > { %v9109_v9 = vpack.c.bf16 %v5034_v26, %v5033_v37 }
 0x603   : > { %9028 = vmatpush3.bf16.msra.mxu0 %v9027_v29  ;;  %v5009_v29 = vld [vmem:[%s14863_s7 + $0x1d0] sm:$0xff] }
 0x604   : > { %9030 = vmatprep.subr.bf16.mxu0 %v9029_v5  ;;  %v5010_v5 = vld [vmem:[%s14863_s7 + $0x1d8] sm:$0xff] }
 0x605   : > { %v9069_v55 = vpack.c.bf16 %v5010_v5, %v5009_v29  ;;  %v7444_v29 = vld [vmem:[%s14865_s9 + $0xc0] sm:$0xff] }
 0x606   : > { %v9113_v5 = vpack.c.bf16 %v7444_v29, %v7442_v57  ;;  %v5289_v57 = vld [vmem:[%s14865_s9] sm:$0xff]  ;;  %v5294_v29 = vld [vmem:[%s14865_s9 + $0x28] sm:$0xff] }
 0x607   : > { %9032 = vmatpush3.bf16.msra.mxu0 %v9031_v1  ;;  %v5011_v1 = vld [vmem:[%s14863_s7 + $0x1e0] sm:$0xff] }
 0x608   : > { %9034 = vmatprep.subr.bf16.mxu0 %v9033_v49  ;;  %v5012_v49 = vld [vmem:[%s14863_s7 + $0x1e8] sm:$0xff] }
 0x609   : > { %v9073_v14 = vpack.c.bf16 %v5012_v49, %v5011_v1 }
 0x60b   : > { %9036 = vmatpush3.bf16.msra.mxu0 %v9035_v40  ;;  %v5013_v40 = vld [vmem:[%s14863_s7 + $0x1f0] sm:$0xff] }
 0x60c   : > { %9038 = vmatprep.subr.bf16.mxu0 %v9037_v2  ;;  %v5014_v2 = vld [vmem:[%s14863_s7 + $0x1f8] sm:$0xff] }
 0x60d   : > { %v9077_v6 = vpack.c.bf16 %v5014_v2, %v5013_v40  ;;  %v7448_v40 = vld [vmem:[%s14865_s9 + $0xe0] sm:$0xff] }
 0x60e   : > { %v9117_v2 = vpack.c.bf16 %v7448_v40, %v7446_v15  ;;  %v5297_v15 = vld [vmem:[%s14865_s9 + $0x40] sm:$0xff]  ;;  %v5299_v40 = vld [vmem:[%s14865_s9 + $0x50] sm:$0xff] }
 0x60f   : > { %9040 = vmatpush3.bf16.msra.mxu0 %v9039_v24  ;;  %v9079_v24 = vpack.c.bf16 %v4998_v34, %v4997_v41  ;;  %v7450_v34 = vld [vmem:[%s14865_s9 + $0xf0] sm:$0xff] }
 0x610   : > { %9042 = vmatprep.subr.bf16.mxu0 %v9041_v16  ;;  %v14909_v16 = vmov 0.0|0.0  }
 0x613   : > { %9044 = vmatpush3.bf16.msra.mxu0 %v9043_v31 }
 0x614   : > { %9046 = vmatprep.subr.bf16.mxu0 %v9045_v45  ;;  %v5017_v45 = vld [vmem:[%s14863_s7 + $0x210] sm:$0xff] }
 0x615   : > { %v9085_v30 = vpack.c.bf16 %v5018_v11, %v5017_v45  ;;  %v7456_v45 = vld [vmem:[%s14865_s9 + $0x120] sm:$0xff] }
 0x617   : > { %9048 = vmatpush3.bf16.msra.mxu0 %v9047_v61  ;;  %v5019_v61 = vld [vmem:[%s14863_s7 + $0x220] sm:$0xff] }
 0x618   : > { %9050 = vmatprep.subr.bf16.mxu0 %v9049_v63  ;;  %v5020_v63 = vld [vmem:[%s14863_s7 + $0x228] sm:$0xff] }
 0x619   : > { %v9088_v39 = vpack.c.bf16 %v5020_v63, %v5019_v61  ;;  %v7460_v63 = vld [vmem:[%s14865_s9 + $0x140] sm:$0xff] }
 0x664   : > { %v4786_v58 = vpop.f32.mrb[20].mxu0 }
 0x665   : > { %v4788_v56 = vpop.f32.mrb[21].mxu0 }
 0x666   : > { %5106 = vmatprep.mubr.f32.mxu0 %v4788_v56  ;;  %v5023_v56 = vld [vmem:[%s14863_s7 + $0x240] sm:$0xff] }
 0x667   : > { %5107 = vmatmul.mubr.f32.vlgmr.msra.gmra.mrb[32].mxu0 %v4786_v58  ;;  %v9091_v58 = vpack.c.bf16 %v5022_v54, %v5021_v17  ;;  %v7463_v17 = vld [vmem:[%s14865_s9 + $0x158] sm:$0xff]  ;;  %v5290_v54 = vld [vmem:[%s14865_s9 + $0x8] sm:$0xff] }
 0x668   : > { %9052 = vmatpush3.bf16.msra.mxu0 %v9051_v52  ;;  %v4792_v47 = vpop.f32.mrb[22].mxu0 }
 0x669   : > { %9054 = vmatprep.subr.bf16.mxu0 %v9053_v25  ;;  %v4794_v8 = vpop.f32.mrb[23].mxu0  ;;  %v5024_v25 = vld [vmem:[%s14863_s7 + $0x248] sm:$0xff] }
 0x66a   : > { %5111 = vmatprep.mubr.f32.mxu0 %v4794_v8  ;;  %v9094_v43 = vpack.c.bf16 %v5024_v25, %v5023_v56  ;;  %v5029_v8 = vld [vmem:[%s14863_s7 + $0x270] sm:$0xff] }
 0x66b   : > { %5112 = vmatmul.mubr.f32.gmra.mrb[34].mxu0 %v4792_v47  ;;  %v9103_v4 = vpack.c.bf16 %v5030_v42, %v5029_v8  ;;  %v7441_v42 = vld [vmem:[%s14864_s8 + $0x1] ss:$0 sm:$0xff] }
 0x66c   : > { %9056 = vmatpush3.bf16.msra.mxu0 %v9055_v10  ;;  %v5026_v10 = vld [vmem:[%s14863_s7 + $0x258] sm:$0xff] }
 0x66d   : > { %9058 = vmatprep.subr.bf16.mxu0 %v9057_v3  ;;  %v9097_v47 = vpack.c.bf16 %v5026_v10, %v5025_v51  ;;  %v5027_v3 = vld [vmem:[%s14863_s7 + $0x260] sm:$0xff] }
 0x66e   : > { %v9100_v0 = vpack.c.bf16 %v5028_v59, %v5027_v3  ;;  %v7440_v59 = vld [vmem:[%s14864_s8] ss:$0 sm:$0xff] }
 0x670   : > { %9060 = vmatpush3.bf16.msra.mxu0 %v9059_v32  ;;  %v5031_v32 = vld [vmem:[%s14863_s7 + $0x280] sm:$0xff] }
 0x671   : > { %9062 = vmatprep.subr.bf16.mxu0 %v9061_v27  ;;  %v5032_v27 = vld [vmem:[%s14863_s7 + $0x288] sm:$0xff] }
 0x672   : > { %v9106_v60 = vpack.c.bf16 %v5032_v27, %v5031_v32 }
 0x674   : > { %9064 = vmatpush3.bf16.msra.mxu0 %v9063_v21  ;;  %v7443_v21 = vld [vmem:[%s14865_s9 + $0xb8] sm:$0xff] }
 0x675   : > { %9066 = vmatprep.subr.bf16.mxu0 %v9065_v12  ;;  %v7445_v12 = vld [vmem:[%s14865_s9 + $0xc8] sm:$0xff] }
 0x676   : > { %v9111_v7 = vpack.c.bf16 %v7445_v12, %v7443_v21 }
 0x678   : > { %9068 = vmatpush3.bf16.msra.mxu0 %v9067_v46 }
 0x679   : > { %9070 = vmatprep.subr.bf16.mxu0 %v9069_v55 }
 0x67c   : > { %9072 = vmatpush3.bf16.msra.mxu0 %v9071_v38  ;;  %v7447_v38 = vld [vmem:[%s14865_s9 + $0xd8] sm:$0xff] }
 0x67d   : > { %9074 = vmatprep.subr.bf16.mxu0 %v9073_v14  ;;  %v7449_v14 = vld [vmem:[%s14865_s9 + $0xe8] sm:$0xff] }
 0x67e   : > { %v9115_v53 = vpack.c.bf16 %v7449_v14, %v7447_v38  ;;  %v5300_v38 = vld [vmem:[%s14865_s9 + $0x58] sm:$0xff] }
 0x680   : > { %9076 = vmatpush3.bf16.msra.mxu0 %v9075_v44  ;;  %v7451_v44 = vld [vmem:[%s14865_s9 + $0xf8] sm:$0xff] }
 0x681   : > { %9078 = vmatprep.subr.bf16.mxu0 %v9077_v6  ;;  %v7453_v6 = vld [vmem:[%s14865_s9 + $0x108] sm:$0xff] }
 0x682   : > { %v9119_v41 = vpack.c.bf16 %v7453_v6, %v7451_v44  ;;  %v5302_v44 = vld [vmem:[%s14865_s9 + $0x68] sm:$0xff]  ;;  %v5304_v6 = vld [vmem:[%s14865_s9 + $0x78] sm:$0xff] }
 0x684   : > { %9080 = vmatpush3.bf16.msra.mxu0 %v9079_v24  ;;  %v7452_v24 = vld [vmem:[%s14865_s9 + $0x100] sm:$0xff] }
 0x685   : > { %9081 = vmatprep.subr.bf16.mxu0 %v14909_v16  ;;  %v9121_v23 = vpack.c.bf16 %v7452_v24, %v7450_v34  ;;  %v9143_v34 = vpack.c.bf16 %v5304_v6, %v5302_v44  ;;  %v5301_v24 = vld [vmem:[%s14865_s9 + $0x60] sm:$0xff]  ;;  %v7500_v44 = vld [vmem:[%s14867_s11 + $0xc8] sm:$0xff] }
 0x6c2   : > { %v4863_v18 = vpop.f32.mrb[24].mxu0 }
 0x6c3   : > { %v4865_v31 = vpop.f32.mrb[25].mxu0 }
 0x6c4   : > { %5181 = vmatprep.mubr.f32.mxu0 %v4865_v31  ;;  %v7454_v31 = vld [vmem:[%s14865_s9 + $0x110] sm:$0xff] }
 0x6c5   : > { %5182 = vmatmul.mubr.f32.vlgmr.msra.gmra.mrb[36].mxu0 %v4863_v18  ;;  %v7457_v18 = vld [vmem:[%s14865_s9 + $0x128] sm:$0xff]  ;;  %v9125_v11 = vpack.c.bf16 %v7456_v45, %v7454_v31  ;;  %v5305_v45 = vld [vmem:[%s14865_s9 + $0x80] sm:$0xff] }
 0x6c6   : > { %9083 = vmatpush1.bf16.msra.mxu0 %v9082_v22  ;;  %v4869_v28 = vpop.f32.mrb[26].mxu0  ;;  %v9123_v22 = vpack.c.bf16 %v7457_v18, %v7455_v35  ;;  %v5306_v35 = vld [vmem:[%s14865_s9 + $0x88] sm:$0xff]  ;;  %v5308_v18 = vld [vmem:[%s14865_s9 + $0x98] sm:$0xff] }
 0x6c7   : > { %v4871_v36 = vpop.f32.mrb[27].mxu0  ;;  %9084 = vmatprep.subr.bf16.mxu0 %v14909_v16  ;;  %v9147_v31 = vpack.c.bf16 %v5308_v18, %v5306_v35  ;;  %v7504_v35 = vld [vmem:[%s14867_s11 + $0xe8] sm:$0xff] }
 0x6c8   : > { %5186 = vmatprep.mubr.f32.mxu0 %v4871_v36  ;;  %v7458_v36 = vld [vmem:[%s14865_s9 + $0x130] sm:$0xff] }
 0x6c9   : > { %5187 = vmatmul.mubr.f32.gmra.mrb[38].mxu0 %v4869_v28  ;;  %v7459_v28 = vld [vmem:[%s14865_s9 + $0x138] sm:$0xff] }
 0x6ca   : > { %9086 = vmatpush1.bf16.msra.mxu0 %v9085_v30  ;;  %v7461_v30 = vld [vmem:[%s14865_s9 + $0x148] sm:$0xff] }
 0x6cb   : > { %9087 = vmatprep.subr.bf16.mxu0 %v14909_v16  ;;  %v9127_v61 = vpack.c.bf16 %v7461_v30, %v7459_v28  ;;  %v5310_v30 = vld [vmem:[%s14865_s9 + $0xa8] sm:$0xff] }
 0x6cd   : > { %v4940_v62 = vpop.f32.mrb[28].mxu0 }
 0x6ce   : > { %9089 = vmatpush1.bf16.msra.mxu0 %v9088_v39  ;;  %v4942_v52 = vpop.f32.mrb[29].mxu0  ;;  %v9129_v39 = vpack.c.bf16 %v7460_v63, %v7458_v36  ;;  %v7469_v36 = vld [vmem:[%s14865_s9 + $0x168] sm:$0xff]  ;;  %v7468_v63 = vld [vmem:[%s14865_s9 + $0x160] sm:$0xff] }
 0x6cf   : > { %9090 = vmatprep.subr.bf16.mxu0 %v14909_v16  ;;  %7438 = vmatprep.mubr.msk.f32.mxu0 %vm5035_vm15, %v4942_v52 }
 0x6d1   : > { %v4946_v20 = vpop.f32.mrb[30].mxu0 }
 0x6d2   : > { %9092 = vmatpush1.bf16.msra.mxu0 %v9091_v58  ;;  %v4948_v19 = vpop.f32.mrb[31].mxu0  ;;  %v7462_v58 = vld [vmem:[%s14865_s9 + $0x150] sm:$0xff] }
 0x6d3   : > { %9093 = vmatprep.subr.bf16.mxu0 %v14909_v16 }
 0x6d6   : > { %9095 = vmatpush1.bf16.msra.mxu0 %v9094_v43 }
 0x6d7   : > { %9096 = vmatprep.subr.bf16.mxu0 %v14909_v16 }
 0x6da   : > { %9098 = vmatpush1.bf16.msra.mxu0 %v9097_v47 }
 0x6db   : > { %9099 = vmatprep.subr.bf16.mxu0 %v14909_v16 }
 0x6de   : > { %9101 = vmatpush1.bf16.msra.mxu0 %v9100_v0 }
 0x6df   : > { %9102 = vmatprep.subr.bf16.mxu0 %v14909_v16 }
 0x6e2   : > { %9104 = vmatpush1.bf16.msra.mxu0 %v9103_v4 }
 0x6e3   : > { %9105 = vmatprep.subr.bf16.mxu0 %v14909_v16 }
 0x6e6   : > { %9107 = vmatpush1.bf16.msra.mxu0 %v9106_v60 }
 0x6e7   : > { %9108 = vmatprep.subr.bf16.mxu0 %v14909_v16 }
 0x6ea   : > { %9110 = vmatpush1.bf16.msra.mxu0 %v9109_v9 }
 0x6eb   : > { %9112 = vmatprep.subr.bf16.mxu0 %v9111_v7  ;;  %v5291_v7 = vld [vmem:[%s14865_s9 + $0x10] sm:$0xff] }
 0x6ed   : > { %5257 = vmatmul.mubr.f32.vlgmr.msra.gmra.mrb[40].mxu0 %v4940_v62  ;;  %v5292_v62 = vld [vmem:[%s14865_s9 + $0x18] sm:$0xff] }
 0x6ee   : > { %7439 = vmatprep.mubr.msk.f32.mxu0 %vm5035_vm15, %v4948_v19  ;;  %9114 = vmatpush1.bf16.msra.mxu0 %v9113_v5  ;;  %v9131_v52 = vpack.c.bf16 %v5292_v62, %v5290_v54  ;;  %v5296_v5 = vld [vmem:[%s14865_s9 + $0x38] sm:$0xff]  ;;  %v5309_v62 = vld [vmem:[%s14865_s9 + $0xa0] sm:$0xff] }
 0x6ef   : > { %9116 = vmatprep.subr.bf16.mxu0 %v9115_v53  ;;  %v7475_v54 = vld [vmem:[%s14865_s9 + $0x198] sm:$0xff] }
 0x6f1   : > { %5262 = vmatmul.mubr.f32.gmra.mrb[42].mxu0 %v4946_v20 }
 0x6f2   : > { %5406 = vmatprep.mubr.f32.mxu0 %v14899_v13  ;;  %9118 = vmatpush1.bf16.msra.mxu0 %v9117_v2 }
 0x6f3   : > { %9120 = vmatprep.subr.bf16.mxu0 %v9119_v41  ;;  %v9141_v41 = vpack.c.bf16 %v5299_v40, %v5297_v15 }
 0x6f6   : > { %9122 = vmatpush1.bf16.msra.mxu0 %v9121_v23  ;;  %v5303_v23 = vld [vmem:[%s14865_s9 + $0x70] sm:$0xff] }
 0x6f7   : > { %9124 = vmatprep.subr.bf16.mxu0 %v9123_v22  ;;  %v9145_v22 = vpack.c.bf16 %v5303_v23, %v5301_v24  ;;  %v7503_v23 = vld [vmem:[%s14867_s11 + $0xe0] sm:$0xff] }
 0x6f8   : > { %v9187_v18 = vpack.c.bf16 %v7504_v35, %v7503_v23  ;;  %v5674_v23 = vld [vmem:[%s14867_s11 + $0x78] sm:$0xff] }
 0x6fa   : > { %9126 = vmatpush1.bf16.msra.mxu0 %v9125_v11  ;;  %v5307_v11 = vld [vmem:[%s14865_s9 + $0x90] sm:$0xff] }
 0x6fb   : > { %9128 = vmatprep.subr.bf16.mxu0 %v9127_v61  ;;  %v9149_v28 = vpack.c.bf16 %v5307_v11, %v5305_v45  ;;  %v7471_v61 = vld [vmem:[%s14865_s9 + $0x178] sm:$0xff]  ;;  %v7507_v11 = vld [vmem:[%s14867_s11 + $0x100] sm:$0xff] }
 0x6fe   : > { %9130 = vmatpush1.bf16.msra.mxu0 %v9129_v39  ;;  %v7470_v39 = vld [vmem:[%s14865_s9 + $0x170] sm:$0xff] }
 0x6ff   : > { %5362 = vmatprep.subr.mxu0 %v7463_v17  ;;  %v7473_v17 = vld [vmem:[%s14865_s9 + $0x188] sm:$0xff] }
 0x702   : > { %5363 = vmatpush1.msra.mxu0 %v7462_v58  ;;  %v9151_v58 = vpack.c.bf16 %v7471_v61, %v7469_v36  ;;  %v7509_v36 = vld [vmem:[%s14867_s11 + $0x110] sm:$0xff]  ;;  %v7510_v61 = vld [vmem:[%s14867_s11 + $0x118] sm:$0xff] }
 0x703   : > { %9132 = vmatprep.subr.bf16.mxu0 %v9131_v52  ;;  %v9153_v52 = vpack.c.bf16 %v7470_v39, %v7468_v63  ;;  %v9196_v63 = vpack.c.bf16 %v7510_v61, %v7509_v36  ;;  %v5614_v39 = vld [vmem:[%s14866_s10] ss:$2 sm:$0x3] }
 0x73a   : > { %v7619_v46 = vpop.f32.mrb[32].mxu0 }
 0x73b   : > { %v7620_v55 = vpop.f32.mrb[33].mxu0 }
 0x73c   : > { %v7621_v33 = vadd.f32 %v7620_v55, %v7619_v46  ;;  %v9133_v46 = vpack.c.bf16 %v5291_v7, %v5289_v57  ;;  %v9135_v55 = vpack.c.bf16 %v5296_v5, %v5294_v29  ;;  %v7486_v57 = vld [vmem:[%s14865_s9 + $0x1f0] sm:$0xff]  ;;  %v7489_v29 = vld [vmem:[%s14865_s9 + $0x208] sm:$0xff] }
 0x73d   : > { %v7493_v5 = vld [vmem:[%s14867_s11 + $0x90] sm:$0xff] }
 0x73e   : > { %v7622_v50 = vpop.f32.mrb[34].mxu0 }
 0x73f   : > { %v7623_v1 = vpop.f32.mrb[35].mxu0 }
 0x740   : > { %v7624_v49 = vadd.f32 %v7623_v1, %v7622_v50  ;;  %v5295_v50 = vld [vmem:[%s14865_s9 + $0x30] sm:$0xff] }
 0x798   : > { %v7657_v56 = vpop.f32.mrb[36].mxu0 }
 0x799   : > { %v7658_v25 = vpop.f32.mrb[37].mxu0 }
 0x79a   : > { %v7659_v20 = vadd.f32 %v7658_v25, %v7657_v56  ;;  %v9155_v56 = vpack.c.bf16 %v7475_v54, %v7473_v17  ;;  %v7472_v25 = vld [vmem:[%s14865_s9 + $0x180] sm:$0xff]  ;;  %v5619_v54 = vrot.slane %v5614_v39, %v10169_v48 }
 0x79b   : > { %v7492_v17 = vld [vmem:[%s14866_s10 + $0x1] ss:$2 sm:$0x3] }
 0x79c   : > { %v7660_v43 = vpop.f32.mrb[38].mxu0  ;;  %v5184_v19 = vadd.f32 %v7659_v20, %v7621_v33  ;;  %v5293_v33 = vld [vmem:[%s14865_s9 + $0x20] sm:$0xff]  ;;  %v7474_v20 = vld [vmem:[%s14865_s9 + $0x190] sm:$0xff] }
 0x79d   : > { %v7661_v51 = vpop.f32.mrb[39].mxu0  ;;  %v9137_v14 = vpack.c.bf16 %v5295_v50, %v5293_v33  ;;  %v7495_v50 = vld [vmem:[%s14867_s11 + $0xa0] sm:$0xff] }
 0x79e   : > { %v7662_v10 = vadd.f32 %v7661_v51, %v7660_v43  ;;  %v7479_v51 = vld [vmem:[%s14865_s9 + $0x1b8] sm:$0xff] }
 0x7a0   : > { %v5189_v47 = vadd.f32 %v7662_v10, %v7624_v49  ;;  %v5298_v49 = vld [vmem:[%s14865_s9 + $0x48] sm:$0xff]  ;;  %v9157_v10 = vpack.c.bf16 %v7474_v20, %v7472_v25 }
 0x7a1   : > { %v9139_v53 = vpack.c.bf16 %v5300_v38, %v5298_v49 }
 0x7c0   : > { %v5258_v3 = vpop.f32.mrb[40].mxu0 }
 0x7c1   : > { %v5259_v0 = vadd.f32 %v5258_v3, %v5184_v19  ;;  %v5260_v8 = vpop.f32.mrb[41].mxu0  ;;  %v7477_v19 = vld [vmem:[%s14865_s9 + $0x1a8] sm:$0xff]  ;;  %v7476_v3 = vld [vmem:[%s14865_s9 + $0x1a0] sm:$0xff] }
 0x7c2   : > { %v7481_v8 = vld [vmem:[%s14865_s9 + $0x1c8] sm:$0xff] }
 0x7c3   : > { %v5272_v4 = vmul.f32 %v7440_v59, %v5259_v0 }
 0x7c4   : > { %v5263_v32 = vpop.f32.mrb[42].mxu0 }
 0x7c5   : > { %v5279_v27 = vadd.f32 %v7441_v42, %v5272_v4  ;;  %v5264_v60 = vadd.f32 %v5263_v32, %v5189_v47  ;;  %v5265_v37 = vpop.f32.mrb[43].mxu0  ;;  %v9159_v47 = vpack.c.bf16 %v7479_v51, %v7477_v19 }
 0x7c6   : > { %v7485_v37 = vld [vmem:[%s14865_s9 + $0x1e8] sm:$0xff] }
 0x7c7   : > { %v5281_v26 = vmax.f32 %v5279_v27, 0.0  ;;  %v5273_v9 = vmul.f32 %v7440_v59, %v5264_v60  ;;  %v7478_v59 = vld [vmem:[%s14865_s9 + $0x1b0] sm:$0xff]  ;;  %v7480_v27 = vld [vmem:[%s14865_s9 + $0x1c0] sm:$0xff] }
 0x7c8   : > { %v9161_v4 = vpack.c.bf16 %v7478_v59, %v7476_v3  ;;  %v7482_v60 = vld [vmem:[%s14865_s9 + $0x1d0] sm:$0xff] }
 0x7c9   : > { %5284 = vst.msk [vmem:[#allocation5] sm:$0xff] %vm5283_vm0, %v5281_v26  ;;  %v5280_v21 = vadd.f32 %v7441_v42, %v5273_v9  ;;  %v7483_v42 = vld [vmem:[%s14865_s9 + $0x1d8] sm:$0xff]  ;;  %v9165_v9 = vpack.c.bf16 %v7482_v60, %v7480_v27  ;;  %v5659_v60 = vld [vmem:[%s14867_s11] sm:$0xff] }
 0x7ca   : > { %v9163_v32 = vpack.c.bf16 %v7483_v42, %v7481_v8  ;;  %v7487_v26 = vld [vmem:[%s14865_s9 + $0x1f8] sm:$0xff] }
 0x7cb   : > { %v5282_v12 = vmax.f32 %v5280_v21, 0.0  ;;  %v9167_v21 = vpack.c.bf16 %v7487_v26, %v7485_v37  ;;  %v5660_v37 = vld [vmem:[%s14867_s11 + $0x8] sm:$0xff] }
 0x7cd   : > { %5286 = vst.msk [vmem:[#allocation5 + $0x8] sm:$0x7] %vm5285_vm1, %v5282_v12  ;;  %v7484_v12 = vld [vmem:[%s14865_s9 + $0x1e0] sm:$0xff] }
 0x7ce   : > { %v9169_v7 = vpack.c.bf16 %v7486_v57, %v7484_v12  ;;  %v9199_v12 = vpack.c.bf16 %v5660_v37, %v5659_v60  ;;  %v7529_v60 = vld [vmem:[%s14867_s11 + $0x1a0] sm:$0xff]  ;;  %v7530_v37 = vld [vmem:[%s14867_s11 + $0x1a8] sm:$0xff] }
 0x7d0   : > { %v5287_v43 = vld [vmem:[#allocation5] sm:$0xff] }
 0x7d4   : > { %v5311_v1 = vld [vmem:[#allocation5 + $0x1] sm:$0xff]  ;;  %v5312_v2 = vld [vmem:[#allocation5 + $0x9] sm:$0x1]  ;;  %v5503_v15 = vld [vmem:[#allocation5 + $0xa] sm:$0x1] }
 0x7d5   : > { %7464 = vmatmul.mubr.msk.f32.vlgmr.msra.gmra.mrb[44].mxu0 %vm5283_vm0, %v5311_v1  ;;  %v5288_v0 = vld [vmem:[#allocation5 + $0x8] sm:$0x1] }
 0x7d6   : > { %9134 = vmatpush1.bf16.msra.mxu0 %v9133_v46  ;;  %5412 = vmatprep.mubr.f32.mxu0 %v14899_v13  ;;  %v7494_v46 = vld [vmem:[%s14867_s11 + $0x98] sm:$0xff]  ;;  %v7496_v1 = vld [vmem:[%s14867_s11 + $0xa8] sm:$0xff] }
 0x7d7   : > { %9136 = vmatprep.subr.bf16.mxu0 %v9135_v55  ;;  %v7488_v55 = vld [vmem:[%s14865_s9 + $0x200] sm:$0xff]  ;;  %v9172_v33 = vpack.c.bf16 %v7494_v46, %v7493_v5  ;;  %v9175_v38 = vpack.c.bf16 %v7496_v1, %v7495_v50  ;;  %v5665_v1 = vld [vmem:[%s14867_s11 + $0x30] sm:$0xff] }
 0x7d8   : > { %v5502_v49 = vld [vmem:[#allocation5 + $0x2] sm:$0xff] }
 0x7d9   : > { %7465 = vmatmul.mubr.msk.f32.gmra.mrb[46].mxu0 %vm5283_vm0, %v5312_v2  ;;  %v7499_v2 = vld [vmem:[%s14867_s11 + $0xc0] sm:$0xff] }
 0x7da   : > { %9138 = vmatpush1.bf16.msra.mxu0 %v9137_v14  ;;  %5489 = vmatprep.mubr.f32.mxu0 %v14899_v13  ;;  %v7497_v14 = vld [vmem:[%s14867_s11 + $0xb0] sm:$0xff]  ;;  %v9181_v6 = vpack.c.bf16 %v7500_v44, %v7499_v2  ;;  %v5670_v2 = vld [vmem:[%s14867_s11 + $0x58] sm:$0xff] }
 0x7db   : > { %9140 = vmatprep.subr.bf16.mxu0 %v9139_v53  ;;  %v7498_v53 = vld [vmem:[%s14867_s11 + $0xb8] sm:$0xff] }
 0x7dc   : > { %v9178_v40 = vpack.c.bf16 %v7498_v53, %v7497_v14  ;;  %v5667_v14 = vld [vmem:[%s14867_s11 + $0x40] sm:$0xff]  ;;  %v5668_v53 = vld [vmem:[%s14867_s11 + $0x48] sm:$0xff] }
 0x7de   : > { %9142 = vmatpush1.bf16.msra.mxu0 %v9141_v41  ;;  %v7501_v41 = vld [vmem:[%s14867_s11 + $0xd0] sm:$0xff] }
 0x7df   : > { %9144 = vmatprep.subr.bf16.mxu0 %v9143_v34  ;;  %v7502_v34 = vld [vmem:[%s14867_s11 + $0xd8] sm:$0xff] }
 0x7e0   : > { %v9184_v24 = vpack.c.bf16 %v7502_v34, %v7501_v41  ;;  %v5672_v41 = vld [vmem:[%s14867_s11 + $0x68] sm:$0xff] }
 0x7e2   : > { %9146 = vmatpush1.bf16.msra.mxu0 %v9145_v22  ;;  %v7505_v22 = vld [vmem:[%s14867_s11 + $0xf0] sm:$0xff] }
 0x7e3   : > { %9148 = vmatprep.subr.bf16.mxu0 %v9147_v31  ;;  %v7506_v31 = vld [vmem:[%s14867_s11 + $0xf8] sm:$0xff] }
 0x7e4   : > { %v9190_v45 = vpack.c.bf16 %v7506_v31, %v7505_v22  ;;  %v5676_v22 = vld [vmem:[%s14867_s11 + $0x88] sm:$0xff] }
 0x7e6   : > { %9150 = vmatpush1.bf16.msra.mxu0 %v9149_v28  ;;  %v7508_v28 = vld [vmem:[%s14867_s11 + $0x108] sm:$0xff] }
 0x7e7   : > { %5445 = vmatprep.subr.mxu0 %v5310_v30  ;;  %v9193_v30 = vpack.c.bf16 %v7508_v28, %v7507_v11  ;;  %v7513_v11 = vld [vmem:[%s14867_s11 + $0x120] sm:$0xff]  ;;  %v7514_v28 = vld [vmem:[%s14867_s11 + $0x128] sm:$0xff] }
 0x7e8   : > { %v9226_v61 = vpack.c.bf16 %v7514_v28, %v7513_v11 }
 0x7ea   : > { %5446 = vmatpush1.msra.mxu0 %v5309_v62  ;;  %v14910_v62 = vld [vmem:[#allocation16_spill] sm:$0xff] }
 0x7eb   : > { %7466 = vmatmul.mubr.msk.f32.vlgmr.msra.gmra.mrb[44].mxu0 %vm5283_vm0, %v5287_v43  ;;  %9152 = vmatprep.subr.bf16.mxu0 %v9151_v58  ;;  %v5623_v58 = vrot.slane %v5614_v39, %v14910_v62  ;;  %v5640_v25 = vrot.slane %v7492_v17, %v14910_v62  ;;  %v7515_v39 = vld [vmem:[%s14867_s11 + $0x130] sm:$0xff] }
 0x7ec   : > { %9154 = vmatpush1.bf16.msra.mxu0 %v9153_v52  ;;  %5495 = vmatprep.mubr.f32.mxu0 %v14899_v13  ;;  %v5636_v52 = vrot.slane %v7492_v17, %v10169_v48  ;;  %v7516_v17 = vld [vmem:[%s14867_s11 + $0x138] sm:$0xff] }
 0x7ed   : > { %9156 = vmatprep.subr.bf16.mxu0 %v9155_v56 }
 0x7ef   : > { %7467 = vmatmul.mubr.msk.f32.gmra.mrb[46].mxu0 %vm5283_vm0, %v5288_v0 }
 0x7f0   : > { %9158 = vmatpush1.bf16.msra.mxu0 %v9157_v10  ;;  %5597 = vmatprep.mubr.f32.mxu0 %v14899_v13 }
 0x7f1   : > { %9160 = vmatprep.subr.bf16.mxu0 %v9159_v47 }
 0x7f4   : > { %9162 = vmatpush1.bf16.msra.mxu0 %v9161_v4 }
 0x7f5   : > { %9164 = vmatprep.subr.bf16.mxu0 %v9163_v32 }
 0x7f8   : > { %9166 = vmatpush1.bf16.msra.mxu0 %v9165_v9 }
 0x7f9   : > { %9168 = vmatprep.subr.bf16.mxu0 %v9167_v21 }
 0x7fc   : > { %9170 = vmatpush1.bf16.msra.mxu0 %v9169_v7  ;;  %v5661_v7 = vld [vmem:[%s14867_s11 + $0x10] sm:$0xff] }
 0x7fd   : > { %5553 = vmatprep.subr.mxu0 %v7489_v29  ;;  %v5662_v29 = vld [vmem:[%s14867_s11 + $0x18] sm:$0xff] }
 0x7fe   : > { %v9202_v46 = vpack.c.bf16 %v5662_v29, %v5661_v7  ;;  %v5971_v29 = vld [vmem:[%s14869_s13] sm:$0xff] }
 0x800   : > { %5554 = vmatpush1.msra.mxu0 %v7488_v55  ;;  %v5663_v55 = vld [vmem:[%s14867_s11 + $0x20] sm:$0xff] }
 0x801   : > { %7490 = vmatmul.mubr.msk.f32.vlgmr.msra.gmra.mrb[44].mxu0 %vm5283_vm0, %v5502_v49  ;;  %9171 = vmatprep.subr.bf16.mxu0 %v14909_v16  ;;  %v5666_v49 = vld [vmem:[%s14867_s11 + $0x38] sm:$0xff] }
 0x802   : > { %5603 = vmatprep.mubr.f32.mxu0 %v14899_v13  ;;  %9173 = vmatpush1.bf16.msra.mxu0 %v9172_v33  ;;  %v5664_v33 = vld [vmem:[%s14867_s11 + $0x28] sm:$0xff] }
 0x803   : > { %9174 = vmatprep.subr.bf16.mxu0 %v14909_v16  ;;  %v9205_v50 = vpack.c.bf16 %v5664_v33, %v5663_v55  ;;  %v7534_v55 = vld [vmem:[%s14869_s13 + $0x38] sm:$0xff]  ;;  %v7535_v33 = vld [vmem:[%s14869_s13 + $0x40] sm:$0xff] }
 0x805   : > { %7491 = vmatmul.mubr.msk.f32.gmra.mrb[46].mxu0 %vm5283_vm0, %v5503_v15  ;;  %v9211_v15 = vpack.c.bf16 %v5668_v53, %v5667_v14  ;;  %v7536_v14 = vld [vmem:[%s14869_s13 + $0x48] sm:$0xff]  ;;  %v7537_v53 = vld [vmem:[%s14869_s13 + $0x50] sm:$0xff] }
 0x806   : > { %9176 = vmatpush1.bf16.msra.mxu0 %v9175_v38  ;;  %v9208_v38 = vpack.c.bf16 %v5666_v49, %v5665_v1  ;;  %v5973_v1 = vld [vmem:[%s14869_s13 + $0x10] sm:$0xff]  ;;  %v5974_v49 = vld [vmem:[%s14869_s13 + $0x18] sm:$0xff] }
 0x807   : > { %9177 = vmatprep.subr.bf16.mxu0 %v14909_v16 }
 0x80a   : > { %9179 = vmatpush1.bf16.msra.mxu0 %v9178_v40  ;;  %v5669_v40 = vld [vmem:[%s14867_s11 + $0x50] sm:$0xff] }
 0x80b   : > { %9180 = vmatprep.subr.bf16.mxu0 %v14909_v16  ;;  %v9214_v44 = vpack.c.bf16 %v5670_v2, %v5669_v40  ;;  %v5975_v40 = vld [vmem:[%s14869_s13 + $0x20] sm:$0xff]  ;;  %v5976_v2 = vld [vmem:[%s14869_s13 + $0x28] sm:$0xff] }
 0x80e   : > { %9182 = vmatpush1.bf16.msra.mxu0 %v9181_v6  ;;  %v5671_v6 = vld [vmem:[%s14867_s11 + $0x60] sm:$0xff] }
 0x80f   : > { %9183 = vmatprep.subr.bf16.mxu0 %v14909_v16  ;;  %v9217_v34 = vpack.c.bf16 %v5672_v41, %v5671_v6  ;;  %v7538_v6 = vld [vmem:[%s14869_s13 + $0x58] sm:$0xff]  ;;  %v7539_v41 = vld [vmem:[%s14869_s13 + $0x60] sm:$0xff] }
 0x812   : > { %9185 = vmatpush1.bf16.msra.mxu0 %v9184_v24  ;;  %v5673_v24 = vld [vmem:[%s14867_s11 + $0x70] sm:$0xff] }
 0x813   : > { %9186 = vmatprep.subr.bf16.mxu0 %v14909_v16  ;;  %v9220_v35 = vpack.c.bf16 %v5674_v23, %v5673_v24  ;;  %v5977_v24 = vld [vmem:[%s14869_s13 + $0x30] sm:$0xff]  ;;  %v7540_v23 = vld [vmem:[%s14869_s13 + $0x68] sm:$0xff] }
 0x816   : > { %9188 = vmatpush1.bf16.msra.mxu0 %v9187_v18  ;;  %v5675_v18 = vld [vmem:[%s14867_s11 + $0x80] sm:$0xff] }
 0x817   : > { %9189 = vmatprep.subr.bf16.mxu0 %v14909_v16  ;;  %v9223_v31 = vpack.c.bf16 %v5676_v22, %v5675_v18  ;;  %v7533_v22 = vld [vmem:[%s14868_s12 + $0x1] ss:$0 sm:$0xff] }
 0x81a   : > { %9191 = vmatpush1.bf16.msra.mxu0 %v9190_v45 }
 0x81b   : > { %9192 = vmatprep.subr.bf16.mxu0 %v14909_v16 }
 0x81e   : > { %9194 = vmatpush1.bf16.msra.mxu0 %v9193_v30 }
 0x81f   : > { %9195 = vmatprep.subr.bf16.mxu0 %v14909_v16 }
 0x822   : > { %9197 = vmatpush1.bf16.msra.mxu0 %v9196_v63 }
 0x823   : > { %9198 = vmatprep.subr.bf16.mxu0 %v14909_v16 }
 0x8d4   : > { %v5599_v56 = vpop.f32.mrb[44].mxu0 }
 0x8d5   : > { %v5626_v20 = vmul.f32 %v5619_v54, %v5599_v56  ;;  %v5601_v43 = vpop.f32.mrb[45].mxu0  ;;  %v7518_v56 = vld [vmem:[%s14867_s11 + $0x148] sm:$0xff] }
 0x8d6   : > { %v5627_v19 = vmul.f32 %v5623_v58, %v5601_v43  ;;  %v7520_v43 = vld [vmem:[%s14867_s11 + $0x158] sm:$0xff] }
 0x8d7   : > { %v5643_v51 = vadd.f32 %v5636_v52, %v5626_v20  ;;  %v7519_v20 = vld [vmem:[%s14867_s11 + $0x150] sm:$0xff] }
 0x8d8   : > { %v5644_v10 = vadd.f32 %v5640_v25, %v5627_v19  ;;  %v5605_v47 = vpop.f32.mrb[46].mxu0  ;;  %v9235_v19 = vpack.c.bf16 %v7520_v43, %v7519_v20  ;;  %v7552_v20 = vld [vmem:[%s14869_s13 + $0xb0] sm:$0xff]  ;;  %v7549_v43 = vld [vmem:[%s14869_s13 + $0xa0] sm:$0xff] }
 0x8d9   : > { %v5647_v3 = vmax.f32 %v5643_v51, 0.0  ;;  %v5628_v59 = vmul.f32 %v5619_v54, %v5605_v47  ;;  %v5607_v0 = vpop.f32.mrb[47].mxu0  ;;  %v7521_v51 = vld [vmem:[%s14867_s11 + $0x160] sm:$0xff] }
 0x8da   : > { %v5648_v8 = vmax.f32 %v5644_v10, 0.0  ;;  %v5629_v42 = vmul.f32 %v5623_v58, %v5607_v0  ;;  %v9229_v58 = vpack.c.bf16 %v7516_v17, %v7515_v39  ;;  %v7522_v10 = vld [vmem:[%s14867_s11 + $0x168] sm:$0xff] }
 0x8db   : > { %5651 = vst [vmem:[#allocation6] sm:$0xff] %v5647_v3  ;;  %v5645_v4 = vadd.f32 %v5636_v52, %v5628_v59  ;;  %v7517_v52 = vld [vmem:[%s14867_s11 + $0x140] sm:$0xff]  ;;  %v9238_v47 = vpack.c.bf16 %v7522_v10, %v7521_v51  ;;  %v7523_v3 = vld [vmem:[%s14867_s11 + $0x170] sm:$0xff]  ;;  %v7524_v59 = vld [vmem:[%s14867_s11 + $0x178] sm:$0xff] }
 0x8dc   : > { %v5646_v32 = vadd.f32 %v5640_v25, %v5629_v42  ;;  %5653 = vst.msk [vmem:[#allocation6 + $0x8] sm:$0xff] %vm5652_vm2, %v5648_v8  ;;  %v9232_v25 = vpack.c.bf16 %v7518_v56, %v7517_v52  ;;  %v9241_v0 = vpack.c.bf16 %v7524_v59, %v7523_v3  ;;  %v7525_v8 = vld [vmem:[%s14867_s11 + $0x180] sm:$0xff]  ;;  %v7526_v42 = vld [vmem:[%s14867_s11 + $0x188] sm:$0xff]  ;;  %v7548_v52 = vld [vmem:[%s14869_s13 + $0x98] sm:$0xff] }
 0x8dd   : > { %v5649_v48 = vmax.f32 %v5645_v4, 0.0  ;;  %v9244_v4 = vpack.c.bf16 %v7526_v42, %v7525_v8  ;;  %v7546_v39 = vld [vmem:[%s14869_s13 + $0x88] sm:$0xff]  ;;  %v7553_v51 = vld [vmem:[%s14869_s13 + $0xb8] sm:$0xff]  ;;  %v7554_v10 = vld [vmem:[%s14869_s13 + $0xc0] sm:$0xff] }
 0x8de   : > { %v5650_v27 = vmax.f32 %v5646_v32, 0.0  ;;  %v7527_v32 = vld [vmem:[%s14867_s11 + $0x190] sm:$0xff]  ;;  %v9283_v3 = vpack.c.bf16 %v7554_v10, %v7553_v51  ;;  %v7555_v59 = vld [vmem:[%s14869_s13 + $0xc8] sm:$0xff]  ;;  %v7559_v42 = vld [vmem:[%s14869_s13 + $0xe0] sm:$0xff] }
 0x8df   : > { %5654 = vst [vmem:[#allocation6 + $0x10] sm:$0x1] %v5649_v48  ;;  %v7528_v48 = vld [vmem:[%s14867_s11 + $0x198] sm:$0xff] }
 0x8e0   : > { %5656 = vst.msk [vmem:[#allocation6 + $0x18] sm:$0x1] %vm5655_vm3, %v5650_v27  ;;  %v9247_v27 = vpack.c.bf16 %v7528_v48, %v7527_v32  ;;  %v7557_v32 = vld [vmem:[%s14869_s13 + $0xd8] sm:$0xff] }
 0x8e2   : > { %v5677_v26 = vld [vmem:[#allocation6] sm:$0xfe] }
 0x8e3   : > { %v5678_v9 = vld [vmem:[#allocation6 + $0x8] sm:$0xfe]  ;;  %v5700_v57 = vrot.slane %v5677_v26, 1  ;;  %v5657_v54 = vld [vmem:[#allocation6] sm:$0x7f] }
 0x8e4   : > { %v5701_v21 = vrot.slane %v5678_v9, 1  ;;  %v5658_v5 = vld [vmem:[#allocation6 + $0x8] sm:$0x7f]  ;;  %v9250_v9 = vpack.c.bf16 %v7530_v37, %v7529_v60 }
 0x8e5   : > { %v5849_v30 = vld [vmem:[#allocation6 + $0x8] sm:$0xfc] }
 0x8e6   : > { %7511 = vmatprep.mubr.msk.f32.mxu0 %vm5652_vm2, %v5701_v21  ;;  %v5878_v63 = vrot.slane %v5849_v30, 2  ;;  %v5850_v26 = vld [vmem:[#allocation6 + $0x10] sm:$0x1]  ;;  %v5848_v21 = vld [vmem:[#allocation6] sm:$0xfc]  ;;  %v7562_v60 = vld [vmem:[%s14869_s13 + $0xf8] sm:$0xff] }
 0x8e7   : > { %5770 = vmatmul.mubr.f32.vlgmr.msra.gmra.mrb[48].mxu0 %v5700_v57  ;;  %v5851_v45 = vld [vmem:[#allocation6 + $0x18] sm:$0x1]  ;;  %v5875_v57 = vrot.slane %v5848_v21, 2  ;;  %v7543_v30 = vld [vmem:[%s14869_s13 + $0x70] sm:$0xff] }
 0x8e8   : > { %9200 = vmatpush1.bf16.msra.mxu0 %v9199_v12  ;;  %7512 = vmatprep.mubr.msk.f32.mxu0 %vm5652_vm2, %v5658_v5  ;;  %v5879_v36 = vrot.slane %v5851_v45, 2  ;;  %v5876_v12 = vrot.slane %v5850_v26, 2  ;;  %v5972_v5 = vld [vmem:[%s14869_s13 + $0x8] sm:$0xff] }
 0x8e9   : > { %9201 = vmatprep.subr.bf16.mxu0 %v14909_v16  ;;  %v7564_v21 = vld [vmem:[%s14869_s13 + $0x108] sm:$0xff] }
 0x8ea   : > { %v5880_v62 = vsel %vm1512_vm7, %v5878_v63, %v5879_v36  ;;  %v5877_v7 = vsel %vm1512_vm7, %v5875_v57, %v5876_v12  ;;  %v7544_v36 = vld [vmem:[%s14869_s13 + $0x78] sm:$0xff]  ;;  %v7545_v63 = vld [vmem:[%s14869_s13 + $0x80] sm:$0xff]  ;;  %vm6549_vm7 = vcmask 73728  }
 0x8eb   : > { %v7567_v57 = vld [vmem:[%s14869_s13 + $0x118] sm:$0xff] }
 0x8ec   : > { %9203 = vmatpush1.bf16.msra.mxu0 %v9202_v46  ;;  %v9262_v46 = vpack.c.bf16 %v5972_v5, %v5971_v29  ;;  %v7565_v29 = vld [vmem:[%s14869_s13 + $0x110] sm:$0xff] }
 0x8ed   : > { %9204 = vmatprep.subr.bf16.mxu0 %v14909_v16 }
 0x8ee   : > { %9263 = vmatpush3.bf16.msra.mxu1 %v9262_v46  ;;  %v7569_v46 = vld [vmem:[%s14869_s13 + $0x128] sm:$0xff] }
 0x8ef   : > { %9264 = vmatprep.subr.bf16.mxu1 %v14909_v16 }
 0x8f0   : > { %9206 = vmatpush1.bf16.msra.mxu0 %v9205_v50  ;;  %v9253_v50 = vpack.c.bf16 %v7535_v33, %v7534_v55  ;;  %v7570_v55 = vld [vmem:[%s14869_s13 + $0x130] sm:$0xff] }
 0x8f1   : > { %9207 = vmatprep.subr.bf16.mxu0 %v14909_v16 }
 0x8f4   : > { %9209 = vmatpush1.bf16.msra.mxu0 %v9208_v38  ;;  %v9265_v38 = vpack.c.bf16 %v5974_v49, %v5973_v1  ;;  %v7571_v1 = vld [vmem:[%s14869_s13 + $0x138] sm:$0xff]  ;;  %v7572_v49 = vld [vmem:[%s14869_s13 + $0x140] sm:$0xff] }
 0x8f5   : > { %9210 = vmatprep.subr.bf16.mxu0 %v14909_v16 }
 0x8f6   : > { %9266 = vmatpush3.bf16.msra.mxu1 %v9265_v38  ;;  %v9304_v38 = vpack.c.bf16 %v7572_v49, %v7571_v1 }
 0x8f7   : > { %9267 = vmatprep.subr.bf16.mxu1 %v14909_v16 }
 0x8f8   : > { %9212 = vmatpush1.bf16.msra.mxu0 %v9211_v15  ;;  %v9256_v15 = vpack.c.bf16 %v7537_v53, %v7536_v14  ;;  %v7575_v14 = vld [vmem:[%s14869_s13 + $0x150] sm:$0xff]  ;;  %v7576_v53 = vld [vmem:[%s14869_s13 + $0x158] sm:$0xff] }
 0x8f9   : > { %9213 = vmatprep.subr.bf16.mxu0 %v14909_v16 }
 0x8fc   : > { %9215 = vmatpush1.bf16.msra.mxu0 %v9214_v44  ;;  %v9268_v44 = vpack.c.bf16 %v5976_v2, %v5975_v40  ;;  %v9307_v40 = vpack.c.bf16 %v7576_v53, %v7575_v14  ;;  %v7577_v2 = vld [vmem:[%s14869_s13 + $0x160] sm:$0xff] }
 0x8fd   : > { %9216 = vmatprep.subr.bf16.mxu0 %v14909_v16 }
 0x8fe   : > { %9269 = vmatpush3.bf16.msra.mxu1 %v9268_v44  ;;  %v7578_v44 = vld [vmem:[%s14869_s13 + $0x168] sm:$0xff] }
 0x8ff   : > { %7748 = vmatprep.subr.mxu1 %v14899_v13 }
 0x900   : > { %9218 = vmatpush1.bf16.msra.mxu0 %v9217_v34  ;;  %v9259_v34 = vpack.c.bf16 %v7539_v41, %v7538_v6  ;;  %v9310_v41 = vpack.c.bf16 %v7578_v44, %v7577_v2 }
 0x901   : > { %9219 = vmatprep.subr.bf16.mxu0 %v14909_v16 }
 0x902   : > { %7749 = vmatpush3.msra.mxu1 %v5977_v24  ;;  %v7580_v24 = vld [vmem:[%s14869_s13 + $0x178] sm:$0xff] }
 0x903   : > { %9270 = vmatprep.subr.bf16.mxu1 %v14909_v16 }
 0x904   : > { %9221 = vmatpush1.bf16.msra.mxu0 %v9220_v35  ;;  %v7532_v35 = vld [vmem:[%s14868_s12] ss:$0 sm:$0xff] }
 0x905   : > { %9222 = vmatprep.subr.bf16.mxu0 %v14909_v16 }
 0x908   : > { %9224 = vmatpush1.bf16.msra.mxu0 %v9223_v31 }
 0x909   : > { %9225 = vmatprep.subr.bf16.mxu0 %v14909_v16 }
 0x90b   : > { %5843 = vmatmul.mubr.f32.vlgmr.msra.gmra.mrb[48].mxu0 %v5657_v54 }
 0x90c   : > { %9227 = vmatpush1.bf16.msra.mxu0 %v9226_v61  ;;  %7531 = vmatprep.mubr.msk.f32.mxu0 %vm5652_vm2, %v5880_v62  ;;  %v9271_v61 = vpack.c.bf16 %v7544_v36, %v7543_v30  ;;  %v9274_v62 = vpack.c.bf16 %v7546_v39, %v7545_v63 }
 0x90d   : > { %9228 = vmatprep.subr.bf16.mxu0 %v14909_v16 }
 0x910   : > { %9230 = vmatpush1.bf16.msra.mxu0 %v9229_v58  ;;  %v7547_v58 = vld [vmem:[%s14869_s13 + $0x90] sm:$0xff] }
 0x911   : > { %9231 = vmatprep.subr.bf16.mxu0 %v14909_v16  ;;  %v9277_v56 = vpack.c.bf16 %v7548_v52, %v7547_v58 }
 0x914   : > { %9233 = vmatpush1.bf16.msra.mxu0 %v9232_v25  ;;  %v7551_v25 = vld [vmem:[%s14869_s13 + $0xa8] sm:$0xff] }
 0x915   : > { %9234 = vmatprep.subr.bf16.mxu0 %v14909_v16 }
 0x918   : > { %9236 = vmatpush1.bf16.msra.mxu0 %v9235_v19  ;;  %v9280_v19 = vpack.c.bf16 %v7552_v20, %v7551_v25 }
 0x919   : > { %9237 = vmatprep.subr.bf16.mxu0 %v14909_v16 }
 0x91c   : > { %9239 = vmatpush1.bf16.msra.mxu0 %v9238_v47 }
 0x91d   : > { %9240 = vmatprep.subr.bf16.mxu0 %v14909_v16 }
 0x920   : > { %9242 = vmatpush1.bf16.msra.mxu0 %v9241_v0  ;;  %v7556_v0 = vld [vmem:[%s14869_s13 + $0xd0] sm:$0xff] }
 0x921   : > { %9243 = vmatprep.subr.bf16.mxu0 %v14909_v16  ;;  %v9286_v8 = vpack.c.bf16 %v7556_v0, %v7555_v59 }
 0x924   : > { %9245 = vmatpush1.bf16.msra.mxu0 %v9244_v4  ;;  %v7560_v4 = vld [vmem:[%s14869_s13 + $0xe8] sm:$0xff] }
 0x925   : > { %9246 = vmatprep.subr.bf16.mxu0 %v14909_v16  ;;  %v9289_v48 = vpack.c.bf16 %v7560_v4, %v7559_v42 }
 0x928   : > { %9248 = vmatpush1.bf16.msra.mxu0 %v9247_v27  ;;  %v7561_v27 = vld [vmem:[%s14869_s13 + $0xf0] sm:$0xff] }
 0x929   : > { %9249 = vmatprep.subr.bf16.mxu0 %v14909_v16  ;;  %v9292_v26 = vpack.c.bf16 %v7562_v60, %v7561_v27 }
 0x92c   : > { %9251 = vmatpush1.bf16.msra.mxu0 %v9250_v9  ;;  %v7563_v9 = vld [vmem:[%s14869_s13 + $0x100] sm:$0xff] }
 0x92d   : > { %9252 = vmatprep.subr.bf16.mxu0 %v14909_v16  ;;  %v9295_v12 = vpack.c.bf16 %v7564_v21, %v7563_v9 }
 0x92f   : > { %5949 = vmatmul.mubr.f32.vlgmr.msra.gmra.mrb[48].mxu0 %v5877_v7  ;;  %v7568_v7 = vld [vmem:[%s14869_s13 + $0x120] sm:$0xff] }
 0x930   : > { %9254 = vmatpush3.bf16.msra.mxu0 %v9253_v50  ;;  %7733 = vmatprep.mubr.msk.f32.mxu0 %vm9655_vm4, %v14899_v13  ;;  %v9298_v5 = vpack.c.bf16 %v7568_v7, %v7567_v57  ;;  %v9301_v50 = vpack.c.bf16 %v7570_v55, %v7569_v46 }
 0x931   : > { %9255 = vmatprep.subr.bf16.mxu0 %v14909_v16 }
 0x934   : > { %9257 = vmatpush3.bf16.msra.mxu0 %v9256_v15  ;;  %v7573_v15 = vld [vmem:[%s14869_s13 + $0x148] sm:$0xff] }
 0x935   : > { %9258 = vmatprep.subr.bf16.mxu0 %v14909_v16 }
 0x938   : > { %9260 = vmatpush3.bf16.msra.mxu0 %v9259_v34  ;;  %v7579_v34 = vld [vmem:[%s14869_s13 + $0x170] sm:$0xff] }
 0x939   : > { %7731 = vmatprep.subr.mxu0 %v14899_v13 }
 0x93c   : > { %7732 = vmatpush3.msra.mxu0 %v7540_v23  ;;  %v9313_v23 = vpack.c.bf16 %v7580_v24, %v7579_v34 }
 0xa02   : > { %v5950_v18 = vpop.f32.mrb[48].mxu0 }
 0xa03   : > { %v5960_v31 = vmul.f32 %v7532_v35, %v5950_v18  ;;  %v5952_v45 = vpop.f32.mrb[49].mxu0  ;;  %v7581_v35 = vld [vmem:[%s14869_s13 + $0x180] sm:$0xff] }
 0xa05   : > { %v5966_v11 = vadd.f32 %v7533_v22, %v5960_v31 }
 0xa07   : > { %v5967_v28 = vmax.f32 %v5966_v11, 0.0 }
 0xa09   : > { %5969 = vst.msk [vmem:[#allocation7] sm:$0x7f] %vm5968_vm5, %v5967_v28 }
 0xa10   : > { %v5978_v17 = vld [vmem:[#allocation7 + $0x1] sm:$0x1]  ;;  %v5970_v54 = vld [vmem:[#allocation7] sm:$0x1]  ;;  %v6134_v47 = vld [vmem:[#allocation7 + $0x2] sm:$0x1] }
 0xa11   : > { %7734 = vmatmul.mubr.msk.f32.vlgmr.msra.gmra.mrb[50].mxu0 %vm5987_vm6, %v5978_v17  ;;  %7751 = vmatmul.mubr.msk.f32.vlgmr.msra.gmra.mrb[18].mxu1 %vm5987_vm6, %v5970_v54  ;;  %v6217_v37 = vld [vmem:[#allocation7 + $0x3] sm:$0x1]  ;;  %v6300_v33 = vld [vmem:[#allocation7 + $0x4] sm:$0x1]  ;;  %v6383_v6 = vld [vmem:[#allocation7 + $0x5] sm:$0x1] }
 0xa12   : > { %9272 = vmatpush3.bf16.msra.mxu1 %v9271_v61  ;;  %7767 = vmatprep.mubr.msk.f32.mxu1 %vm9655_vm4, %v14899_v13  ;;  %v6466_v18 = vld [vmem:[#allocation7 + $0x6] sm:$0x1] }
 0xa13   : > { %9273 = vmatprep.subr.bf16.mxu1 %v14909_v16 }
 0xa16   : > { %9275 = vmatpush3.bf16.msra.mxu1 %v9274_v62 }
 0xa17   : > { %9276 = vmatprep.subr.bf16.mxu1 %v14909_v16 }
 0xa1a   : > { %9278 = vmatpush3.bf16.msra.mxu1 %v9277_v56 }
 0xa1b   : > { %7765 = vmatprep.subr.mxu1 %v14899_v13 }
 0xa1e   : > { %7766 = vmatpush3.msra.mxu1 %v7549_v43 }
 0xa1f   : > { %7768 = vmatmul.mubr.msk.f32.vlgmr.msra.gmra.mrb[18].mxu1 %vm5987_vm6, %v6134_v47  ;;  %9279 = vmatprep.subr.bf16.mxu1 %v14909_v16 }
 0xa20   : > { %9281 = vmatpush3.bf16.msra.mxu1 %v9280_v19  ;;  %7784 = vmatprep.mubr.msk.f32.mxu1 %vm9655_vm4, %v14899_v13 }
 0xa21   : > { %9282 = vmatprep.subr.bf16.mxu1 %v14909_v16 }
 0xa24   : > { %9284 = vmatpush3.bf16.msra.mxu1 %v9283_v3 }
 0xa25   : > { %9285 = vmatprep.subr.bf16.mxu1 %v14909_v16 }
 0xa28   : > { %9287 = vmatpush3.bf16.msra.mxu1 %v9286_v8 }
 0xa29   : > { %7782 = vmatprep.subr.mxu1 %v14899_v13 }
 0xa2c   : > { %7783 = vmatpush3.msra.mxu1 %v7557_v32 }
 0xa2d   : > { %7785 = vmatmul.mubr.msk.f32.vlgmr.msra.gmra.mrb[18].mxu1 %vm5987_vm6, %v6217_v37  ;;  %9288 = vmatprep.subr.bf16.mxu1 %v14909_v16 }
 0xa2e   : > { %9290 = vmatpush3.bf16.msra.mxu1 %v9289_v48  ;;  %7801 = vmatprep.mubr.msk.f32.mxu1 %vm9655_vm4, %v14899_v13 }
 0xa2f   : > { %9291 = vmatprep.subr.bf16.mxu1 %v14909_v16 }
 0xa32   : > { %9293 = vmatpush3.bf16.msra.mxu1 %v9292_v26 }
 0xa33   : > { %9294 = vmatprep.subr.bf16.mxu1 %v14909_v16 }
 0xa36   : > { %9296 = vmatpush3.bf16.msra.mxu1 %v9295_v12 }
 0xa37   : > { %7799 = vmatprep.subr.mxu1 %v14899_v13 }
 0xa3a   : > { %7800 = vmatpush3.msra.mxu1 %v7565_v29 }
 0xa3b   : > { %7802 = vmatmul.mubr.msk.f32.vlgmr.msra.gmra.mrb[18].mxu1 %vm5987_vm6, %v6300_v33  ;;  %9297 = vmatprep.subr.bf16.mxu1 %v14909_v16 }
 0xa3c   : > { %9299 = vmatpush3.bf16.msra.mxu1 %v9298_v5  ;;  %7818 = vmatprep.mubr.msk.f32.mxu1 %vm9655_vm4, %v14899_v13 }
 0xa3d   : > { %9300 = vmatprep.subr.bf16.mxu1 %v14909_v16 }
 0xa40   : > { %9302 = vmatpush3.bf16.msra.mxu1 %v9301_v50 }
 0xa41   : > { %9303 = vmatprep.subr.bf16.mxu1 %v14909_v16 }
 0xa44   : > { %9305 = vmatpush3.bf16.msra.mxu1 %v9304_v38 }
 0xa45   : > { %7816 = vmatprep.subr.mxu1 %v14899_v13 }
 0xa48   : > { %7817 = vmatpush3.msra.mxu1 %v7573_v15 }
 0xa49   : > { %7819 = vmatmul.mubr.msk.f32.vlgmr.msra.gmra.mrb[18].mxu1 %vm5987_vm6, %v6383_v6  ;;  %9306 = vmatprep.subr.bf16.mxu1 %v14909_v16 }
 0xa4a   : > { %9308 = vmatpush3.bf16.msra.mxu1 %v9307_v40  ;;  %7835 = vmatprep.mubr.msk.f32.mxu1 %vm9655_vm4, %v14899_v13 }
 0xa4b   : > { %9309 = vmatprep.subr.bf16.mxu1 %v14909_v16 }
 0xa4e   : > { %9311 = vmatpush3.bf16.msra.mxu1 %v9310_v41 }
 0xa4f   : > { %9312 = vmatprep.subr.bf16.mxu1 %v14909_v16 }
 0xa52   : > { %9314 = vmatpush3.bf16.msra.mxu1 %v9313_v23 }
 0xa53   : > { %7833 = vmatprep.subr.mxu1 %v14899_v13 }
 0xa56   : > { %7834 = vmatpush3.msra.mxu1 %v7581_v35 }
 0xa57   : > { %7836 = vmatmul.mubr.msk.f32.vlgmr.msra.gmra.mrb[18].mxu1 %vm5987_vm6, %v6466_v18 }
 0xae4   : > { %v6057_v22 = vpop.f32.mrb[50].mxu0 }
 0xae5   : > { %v7735_v31 = vpop.f32.mrb[51].mxu0 }
 0xb2a   : > { %v6544_v45 = vpop.f32.mrb[18].mxu1 }
 0xb2b   : > { %v9315_v11 = vadd.f32 %v6544_v45, %v6057_v22  ;;  %v7837_v28 = vpop.f32.mrb[19].mxu1 }
 0xb2d   : > { %v6550_v16 = vsel %vm6549_vm7, %v9315_v11, -inf }
 0xb2e   : > { %6551 = vmax.xlane.f32.xlu0 %v6550_v16 }
 0xbbb   : > { %v6552_v13 = vpop.xlane.xlu0 %6551 }
 0xbbc   : > { %v6553_v30 = vsub.f32 %v9315_v11, %v6552_v13 }
 0xbbe   : > { %v6554_v36 = vmul.f32 1.442695, %v6553_v30 }
 0xbc0   : > { %9572 = vpow2.f32 %v6554_v36 }
 0xbca   : > { %v9573_v61 = vpop.eup %9572 }
 0xbcb   : > { %v6556_v63 = vsel %vm6549_vm7, %v9573_v61, 0.0 }
 0xbcc   : > { %6557 = vadd.xlane.f32.xlu1 %v6556_v63 }
 0xc59   : > { %v6558_v39 = vpop.xlane.xlu1 %6557 }
 0xc5a   : > { %9574 = vlog2.f32 %v6558_v39 }
 0xc64   : > { %v9575_v17 = vpop.eup %9574 }
 0xc65   : > { %v6560_v54 = vmul.f32 0.6931472, %v9575_v17 }
 0xc67   : > { %v6561_v62 = vsub.f32 %v6553_v30, %v6560_v54 }
 0xc69   : > { %6562 = vst.msk [vmem:[%s459_s15] sm:$0x1] %vm6549_vm7, %v6561_v62 }
 0xc6a   : > { %9600 = shalt.err (!%p9597_p3)
}
 0xc6b   : > { %s9601_s21 = scalar_lea.hbm %s14813_s20, 16  ;;  %s9605_s15 = scalar_lea.hbm %s14870_s14, 32 }
 0xc6c   : > { %p9602_p4 = scmp.ne.s32.totalorder %s14813_s20, %s9601_s21  ;;  %p9606_p9 = scmp.lt.u32.totalorder %s14813_s20, %s14870_s14 }
 0xc6d   : > { %p9607_p10 = scmp.lt.u32.totalorder %s9605_s15, %s9601_s21  ;;  %p9609_p12 = scmp.lt.u32.totalorder %s9601_s21, %s14813_s20 }
 0xc6e   : > { %p9603_p7 = pnand %p9602_p4, %p9770_p5 }
 0xc6f   : > { %p9608_p11 = por %p9607_p10, %p9606_p9 }
 0xc70   : > { %p9604_p8 = pneg %p9603_p7 }
 0xc71   : > { %p9610_p13 = por %p9609_p12, %p9608_p11 }
 0xc73   : > { %p9611_p0 = pnand %p9610_p13, %p9604_p8 }
 0xc75   : > { %9614 = shalt.err (!%p9611_p0)
}
 0xc76   : > { %9468 = dma.vmem_to_hbm [thread:$0]  (%p9770_p5), %s14815_s19, 16, %s14813_s20, %s6564_s25  }
 0xc77 PF: > { %s14911_s28 = sld [smem:[#allocation11_spill]]  ;;  %p9474_p1 = scmp.ge.s32.totalorder %s9649_s16, 2 }
 0xc79   : > { %p9471_p2 = pnand %p9474_p1, %p9774_p6 }
 0xc7d   : > { %s6588_s26 = sand.u32 1, %s14911_s28  }
 0xc7e   : > { %s6589_s22 = scalar_lea.sflag [#allocation9], %s6588_s26 }
 0xc7f   : > { %9632 = dma.done.wait (!%p9471_p2), %s6589_s22, 16  }
 0xc80   : > { %9634 = vsyncadd (!%p9471_p2), %s6589_s22, 4294967280  ;;  %s14913_s16 = sld [smem:[#allocation13_spill]]  ;;  %s14914_s21 = sld [smem:[#allocation12_spill]] }
 0xc81   : > { %s14915_s15 = sld [smem:[#allocation14_spill]]  ;;  %s14916_s29 = smov %s9641_s30 }
 0xc86   : > { %p24_p3 = scmp.ge.s32.totalorder %s14913_s16, 4   ;;  %s14917_s30 = smov %s14914_s21 }
 0xc88   :  { %26 = sbr.rel (!%p24_p3) target bundleno = 3 (0x3), region = 131 }
 0xc8f   :  { %6593 = vsyncpa [#allocation9], 1 }
 0xc90   :  { %6595 = vsyncpa [#allocation9 + $0x1], 1 }

</bundles_post_ra>
